<compile_context>
chip_gen: v5e
topology: v5e:2x2
jax: 0.10.0
libtpu: 0.0.40
codegen_flags: <defaults>
</compile_context>

<pallas_src>
import functools

import jax
import jax.numpy as jnp
from jax import lax
from jax.experimental import pallas as pl
from jax.experimental.pallas import tpu as pltpu

KH, KW = 3, 3  # 3x3 conv, stride=1, padding=1


def _relu_conv3x3_kernel(x_ref, w_ref, o_ref, slab_ref, *, TH, CROWS, Wpa):
    """One (batch n, H-tile t) grid step.

    x_ref:    (1, Hp*Wpa, Cin) bf16  zero-padded NHWC image, (H, W) flattened to rows
                                      (resident across t: its block index only uses n)
    w_ref:    (KH*KW, Cin, Coutp) bf16 weights, Cout zero-padded to lane-dense 128
    o_ref:    (1, TH, W, Coutp)  output tile (padded channels sliced off in wrapper)
    slab_ref: ((TH+3)*Wpa, Cin) bf16 scratch: ReLU'd flat slab for this tile
    """
    Wout = o_ref.shape[2]
    Coutp = o_ref.shape[3]
    slabR = slab_ref.shape[0]

    CM = CROWS * Wpa          # flat output rows per chunk (e.g. 4*64 = 256)
    CMP = CM + 16             # partial-accumulator rows (needs CM+2; 16 keeps bf16
                              # slice sizes packing-friendly)
    n_chunks = TH // CROWS

    t = pl.program_id(1)
    start = pl.multiple_of(t * TH * Wpa, Wpa)   # first padded flat row of this tile

    # Fused ReLU while staging this tile's padded rows into a flat, re-sliceable
    # bf16 slab (zero padding is ReLU-invariant).
    slab_ref[...] = jnp.maximum(x_ref[0, pl.ds(start, slabR), :], 0)

    def chunk_body(c, carry):
        m0 = pl.multiple_of(c * CM, CM)          # flat output row of this chunk
        acc = jnp.zeros((CM, Coutp), jnp.float32)
        for j in range(KW):                      # kw taps
            a = jnp.zeros((CMP, Coutp), jnp.float32)
            for kh in range(KH):                 # kh taps: tile-aligned slab slices
                patch = slab_ref[pl.ds(m0 + kh * Wpa, CMP), :]
                # (CMP, Cin) x (Cin, 128) bf16 MXU matmul, f32 accumulation.
                a = a + jnp.dot(patch, w_ref[kh * KW + j],
                                preferred_element_type=jnp.float32)
            if j:
                # out[m] needs a_j[m + j]; shift the 32-bit partial accumulator
                # (cheap XLU roll) instead of the packed-bf16 activations.
                a = pltpu.roll(a, shift=CMP - j, axis=0)
            acc = acc + a[:CM]
        # Store this chunk (trim alignment columns Wpa -> Wout; 56 % 8 == 0).
        out_c = acc.reshape(CROWS, Wpa, Coutp)[:, :Wout, :]
        o_ref[0, pl.ds(c * CROWS, CROWS), :, :] = out_c.astype(o_ref.dtype)
        return carry

    lax.fori_loop(0, n_chunks, chunk_body, 0)


@jax.jit
def relu_conv2d_3x3(x_nchw, weight_oihw):
    """y = Conv2d(Cin, Cout, 3, stride=1, padding=1, bias=False)(ReLU(x)).

    Accepts/returns PyTorch layouts (NCHW / OIHW) to match nn.Conv2d; the kernel
    works in NHWC (channels on the 128-lane axis) with bf16 MXU operands.
    """
    N, Cin, H, W = x_nchw.shape
    Cout = weight_oihw.shape[0]
    assert weight_oihw.shape == (Cout, Cin, KH, KW)

    # H-tile: fewest grid steps that still divide H (H=56 -> TH=28 -> grid (N, 2),
    # balancing v7x's two TensorCores).  CROWS = output rows per accumulator chunk.
    TH = next(th for th in (32, 28, 16, 14, 8, 7, 4, 2, 1) if H % th == 0)
    CROWS = next(cr for cr in (4, 2, 1) if TH % cr == 0)
    assert H % TH == 0 and TH % CROWS == 0

    Hp = H + 3                              # 1 top + 2 bottom zero pad (halo + chunk slack)
    Wpa = ((W + 2 + 15) // 16) * 16         # padded width, 16-aligned (bf16 sublane packing)
    Coutp = ((Cout + 127) // 128) * 128     # lane-dense output channels
    assert Wpa >= W + 2                     # every tap stays inside the padded row

    # NCHW -> NHWC, zero pad, cast to bf16 (MXU-native), flatten (H, W) -> rows.
    # Boundary transposes are required by the PyTorch NCHW interface; XLA fuses them.
    x_nhwc = jnp.transpose(x_nchw, (0, 2, 3, 1))
    x_pad = jnp.pad(x_nhwc, ((0, 0), (1, 2), (1, Wpa - W - 1), (0, 0)))
    x_flat = x_pad.astype(jnp.bfloat16).reshape(N, Hp * Wpa, Cin)

    # OIHW -> (KH*KW, Cin, Coutp) bf16, Cout zero-padded so the MXU N-dim and every
    # output store are lane-dense (128); padded channels are sliced off below.
    w = jnp.transpose(weight_oihw, (2, 3, 1, 0)).reshape(KH * KW, Cin, Cout)
    w = jnp.pad(w, ((0, 0), (0, 0), (0, Coutp - Cout))).astype(jnp.bfloat16)

    slabR = (TH + 3) * Wpa
    kernel = functools.partial(_relu_conv3x3_kernel, TH=TH, CROWS=CROWS, Wpa=Wpa)

    out_wide = pl.pallas_call(
        kernel,
        out_shape=jax.ShapeDtypeStruct((N, H, W, Coutp), x_nchw.dtype),
        grid_spec=pltpu.PrefetchScalarGridSpec(
            num_scalar_prefetch=0,
            grid=(N, H // TH),
            in_specs=[
                pl.BlockSpec((1, Hp * Wpa, Cin), lambda n, t: (n, 0, 0)),
                pl.BlockSpec((KH * KW, Cin, Coutp), lambda n, t: (0, 0, 0)),
            ],
            out_specs=pl.BlockSpec((1, TH, W, Coutp), lambda n, t: (n, t, 0, 0)),
            scratch_shapes=[pltpu.VMEM((slabR, Cin), jnp.bfloat16)],
        ),
        compiler_params=pltpu.CompilerParams(
            dimension_semantics=("parallel", "parallel"),
            vmem_limit_bytes=32 * 1024 * 1024,
        ),
    )(x_flat, w)

    # Drop padded channels, back to NCHW (fused with the output transpose under jit).
    return jnp.transpose(out_wide[:, :, :, :Cout], (0, 3, 1, 2))


def reference(x_nchw, weight_oihw, *, bf16_operands):
    x = jnp.maximum(x_nchw, 0.0)
    w = weight_oihw
    kwargs = {}
    if bf16_operands:
        x = x.astype(jnp.bfloat16)
        w = w.astype(jnp.bfloat16)
        kwargs = dict(preferred_element_type=jnp.float32)
    return jax.lax.conv_general_dilated(
        x, w,
        window_strides=(1, 1),
        padding=((1, 1), (1, 1)),
        dimension_numbers=("NCHW", "OIHW", "NCHW"),
        **kwargs,
    )


if __name__ == "__main__":
    # The module's own shapes: Conv2d(192 -> 48, 3x3, pad=1) on (1, 192, 56, 56).
    N, Cin, Cout, H, W = 1, 192, 48, 56, 56

    key = jax.random.PRNGKey(0)
    kx, kw_key = jax.random.split(key)
    x = jax.random.normal(kx, (N, Cin, H, W), dtype=jnp.float32)
    fan_in = Cin * KH * KW
    bound = 1.0 / (fan_in ** 0.5)  # PyTorch Conv2d default kaiming-uniform bound
    weight = jax.random.uniform(
        kw_key, (Cout, Cin, KH, KW), dtype=jnp.float32, minval=-bound, maxval=bound
    )

    y = jax.block_until_ready(relu_conv2d_3x3(x, weight))
    assert y.shape == (N, Cout, H, W), y.shape

    # Matched-precision reference (bf16 operands, f32 accumulation — same as the MXU path).
    y_ref_bf16 = jax.block_until_ready(reference(x, weight, bf16_operands=True))
    err_matched = float(jnp.max(jnp.abs(y - y_ref_bf16)))
    assert jnp.allclose(y, y_ref_bf16, atol=5e-3, rtol=5e-3), err_matched

    # Full-f32 module semantics; bf16 MXU operands cost ~0.4% relative error on K=1728.
    y_ref_f32 = jax.block_until_ready(reference(x, weight, bf16_operands=False))
    err_f32 = float(jnp.max(jnp.abs(y - y_ref_f32)))
    assert jnp.allclose(y, y_ref_f32, atol=3e-2, rtol=3e-2), err_f32

    print("KERNEL_OK")
</pallas_src>

<mosaic_0001>
module attributes {stable_mosaic.version = 11 : i64} {
  func.func @_relu_conv3x3_kernel(%arg0: i32, %arg1: i32, %arg2: memref<1x3776x192xbf16, #tpu.memory_space<vmem>>, %arg3: memref<9x192x128xbf16, #tpu.memory_space<vmem>>, %arg4: memref<1x28x56x128xf32, #tpu.memory_space<vmem>>, %arg5: memref<1984x192xbf16, #tpu.memory_space<vmem>>) attributes {dimension_semantics = [#tpu.dimension_semantics<parallel>, #tpu.dimension_semantics<parallel>], iteration_bounds = array<i64: 1, 2>, scalar_prefetch = 0 : i64, scratch_operands = 1 : i64, tpu.core_type = #tpu.core_type<tc>, window_params = [{transform_indices = @transform_0, window_bounds = array<i64: 1, 3776, 192>}, {pipeline_mode = #tpu.pipeline_mode<synchronous>, transform_indices = @transform_1, window_bounds = array<i64: 9, 192, 128>}, {transform_indices = @transform_2, window_bounds = array<i64: 1, 28, 56, 128>}]} {
    %c28_i32 = arith.constant 28 : i32
    %0 = arith.muli %arg1, %c28_i32 : i32
    %c64_i32 = arith.constant 64 : i32
    %1 = arith.muli %0, %c64_i32 : i32
    %2 = tpu.assume_multiple %1, 64 : i32
    %c0 = arith.constant 0 : index
    %3 = arith.index_cast %2 : i32 to index
    %c0_0 = arith.constant 0 : index
    %4 = vector.load %arg2[%c0, %3, %c0_0] : memref<1x3776x192xbf16, #tpu.memory_space<vmem>>, vector<1x1984x192xbf16>
    %5 = vector.shape_cast %4 : vector<1x1984x192xbf16> to vector<1984x192xbf16>
    %cst = arith.constant 0.000000e+00 : bf16
    %6 = vector.broadcast %cst : bf16 to vector<1984x192xbf16>
    %7 = arith.maximumf %5, %6 : vector<1984x192xbf16>
    %c0_1 = arith.constant 0 : index
    %c0_2 = arith.constant 0 : index
    %8 = vector.load %arg5[%c0_1, %c0_2] : memref<1984x192xbf16, #tpu.memory_space<vmem>>, vector<1984x192xbf16>
    tpu.vector_store %arg5[%c0_1, %c0_2], %7 {strides = array<i32>} : memref<1984x192xbf16, #tpu.memory_space<vmem>>, vector<1984x192xbf16>,
    %c0_i32 = arith.constant 0 : i32
    %c7_i32 = arith.constant 7 : i32
    %9 = arith.addi %c0_i32, %c7_i32 : i32
    %c1_i32 = arith.constant 1 : i32
    scf.for %arg6 = %c0_i32 to %9 step %c1_i32  : i32 {
      %c256_i32 = arith.constant 256 : i32
      %10 = arith.muli %arg6, %c256_i32 : i32
      %11 = tpu.assume_multiple %10, 256 : i32
      %cst_4 = arith.constant 0.000000e+00 : f32
      %12 = vector.broadcast %cst_4 : f32 to vector<256x128xf32>
      %cst_5 = arith.constant 0.000000e+00 : f32
      %13 = vector.broadcast %cst_5 : f32 to vector<272x128xf32>
      %c0_i32_6 = arith.constant 0 : i32
      %14 = arith.addi %11, %c0_i32_6 : i32
      %15 = arith.index_cast %14 : i32 to index
      %c0_7 = arith.constant 0 : index
      %16 = vector.load %arg5[%15, %c0_7] : memref<1984x192xbf16, #tpu.memory_space<vmem>>, vector<272x192xbf16>
      %c0_8 = arith.constant 0 : index
      %c0_9 = arith.constant 0 : index
      %c0_10 = arith.constant 0 : index
      %17 = vector.load %arg3[%c0_8, %c0_9, %c0_10] : memref<9x192x128xbf16, #tpu.memory_space<vmem>>, vector<1x192x128xbf16>
      %18 = vector.shape_cast %17 : vector<1x192x128xbf16> to vector<192x128xbf16>
      %cst_11 = arith.constant dense<0.000000e+00> : vector<272x128xf32>
      %19 = tpu.matmul %16, %18, %cst_11 {dimension_numbers = #tpu.dot_dimension_numbers<[1], [0], [0], [1], [0, 0, 1, 1], [], []>} : vector<272x192xbf16>, vector<192x128xbf16>, vector<272x128xf32> -> vector<272x128xf32>
      %20 = arith.addf %13, %19 : vector<272x128xf32>
      %c64_i32_12 = arith.constant 64 : i32
      %21 = arith.addi %11, %c64_i32_12 : i32
      %22 = arith.index_cast %21 : i32 to index
      %c0_13 = arith.constant 0 : index
      %23 = vector.load %arg5[%22, %c0_13] : memref<1984x192xbf16, #tpu.memory_space<vmem>>, vector<272x192xbf16>
      %c3 = arith.constant 3 : index
      %c0_14 = arith.constant 0 : index
      %c0_15 = arith.constant 0 : index
      %24 = vector.load %arg3[%c3, %c0_14, %c0_15] : memref<9x192x128xbf16, #tpu.memory_space<vmem>>, vector<1x192x128xbf16>
      %25 = vector.shape_cast %24 : vector<1x192x128xbf16> to vector<192x128xbf16>
      %cst_16 = arith.constant dense<0.000000e+00> : vector<272x128xf32>
      %26 = tpu.matmul %23, %25, %cst_16 {dimension_numbers = #tpu.dot_dimension_numbers<[1], [0], [0], [1], [0, 0, 1, 1], [], []>} : vector<272x192xbf16>, vector<192x128xbf16>, vector<272x128xf32> -> vector<272x128xf32>
      %27 = arith.addf %20, %26 : vector<272x128xf32>
      %c128_i32 = arith.constant 128 : i32
      %28 = arith.addi %11, %c128_i32 : i32
      %29 = arith.index_cast %28 : i32 to index
      %c0_17 = arith.constant 0 : index
      %30 = vector.load %arg5[%29, %c0_17] : memref<1984x192xbf16, #tpu.memory_space<vmem>>, vector<272x192xbf16>
      %c6 = arith.constant 6 : index
      %c0_18 = arith.constant 0 : index
      %c0_19 = arith.constant 0 : index
      %31 = vector.load %arg3[%c6, %c0_18, %c0_19] : memref<9x192x128xbf16, #tpu.memory_space<vmem>>, vector<1x192x128xbf16>
      %32 = vector.shape_cast %31 : vector<1x192x128xbf16> to vector<192x128xbf16>
      %cst_20 = arith.constant dense<0.000000e+00> : vector<272x128xf32>
      %33 = tpu.matmul %30, %32, %cst_20 {dimension_numbers = #tpu.dot_dimension_numbers<[1], [0], [0], [1], [0, 0, 1, 1], [], []>} : vector<272x192xbf16>, vector<192x128xbf16>, vector<272x128xf32> -> vector<272x128xf32>
      %34 = arith.addf %27, %33 : vector<272x128xf32>
      %35 = vector.extract_strided_slice %34 {offsets = [0, 0], sizes = [256, 128], strides = [1, 1]} : vector<272x128xf32> to vector<256x128xf32>
      %36 = arith.addf %12, %35 : vector<256x128xf32>
      %cst_21 = arith.constant 0.000000e+00 : f32
      %37 = vector.broadcast %cst_21 : f32 to vector<272x128xf32>
      %c0_i32_22 = arith.constant 0 : i32
      %38 = arith.addi %11, %c0_i32_22 : i32
      %39 = arith.index_cast %38 : i32 to index
      %c0_23 = arith.constant 0 : index
      %40 = vector.load %arg5[%39, %c0_23] : memref<1984x192xbf16, #tpu.memory_space<vmem>>, vector<272x192xbf16>
      %c1 = arith.constant 1 : index
      %c0_24 = arith.constant 0 : index
      %c0_25 = arith.constant 0 : index
      %41 = vector.load %arg3[%c1, %c0_24, %c0_25] : memref<9x192x128xbf16, #tpu.memory_space<vmem>>, vector<1x192x128xbf16>
      %42 = vector.shape_cast %41 : vector<1x192x128xbf16> to vector<192x128xbf16>
      %cst_26 = arith.constant dense<0.000000e+00> : vector<272x128xf32>
      %43 = tpu.matmul %40, %42, %cst_26 {dimension_numbers = #tpu.dot_dimension_numbers<[1], [0], [0], [1], [0, 0, 1, 1], [], []>} : vector<272x192xbf16>, vector<192x128xbf16>, vector<272x128xf32> -> vector<272x128xf32>
      %44 = arith.addf %37, %43 : vector<272x128xf32>
      %c64_i32_27 = arith.constant 64 : i32
      %45 = arith.addi %11, %c64_i32_27 : i32
      %46 = arith.index_cast %45 : i32 to index
      %c0_28 = arith.constant 0 : index
      %47 = vector.load %arg5[%46, %c0_28] : memref<1984x192xbf16, #tpu.memory_space<vmem>>, vector<272x192xbf16>
      %c4 = arith.constant 4 : index
      %c0_29 = arith.constant 0 : index
      %c0_30 = arith.constant 0 : index
      %48 = vector.load %arg3[%c4, %c0_29, %c0_30] : memref<9x192x128xbf16, #tpu.memory_space<vmem>>, vector<1x192x128xbf16>
      %49 = vector.shape_cast %48 : vector<1x192x128xbf16> to vector<192x128xbf16>
      %cst_31 = arith.constant dense<0.000000e+00> : vector<272x128xf32>
      %50 = tpu.matmul %47, %49, %cst_31 {dimension_numbers = #tpu.dot_dimension_numbers<[1], [0], [0], [1], [0, 0, 1, 1], [], []>} : vector<272x192xbf16>, vector<192x128xbf16>, vector<272x128xf32> -> vector<272x128xf32>
      %51 = arith.addf %44, %50 : vector<272x128xf32>
      %c128_i32_32 = arith.constant 128 : i32
      %52 = arith.addi %11, %c128_i32_32 : i32
      %53 = arith.index_cast %52 : i32 to index
      %c0_33 = arith.constant 0 : index
      %54 = vector.load %arg5[%53, %c0_33] : memref<1984x192xbf16, #tpu.memory_space<vmem>>, vector<272x192xbf16>
      %c7 = arith.constant 7 : index
      %c0_34 = arith.constant 0 : index
      %c0_35 = arith.constant 0 : index
      %55 = vector.load %arg3[%c7, %c0_34, %c0_35] : memref<9x192x128xbf16, #tpu.memory_space<vmem>>, vector<1x192x128xbf16>
      %56 = vector.shape_cast %55 : vector<1x192x128xbf16> to vector<192x128xbf16>
      %cst_36 = arith.constant dense<0.000000e+00> : vector<272x128xf32>
      %57 = tpu.matmul %54, %56, %cst_36 {dimension_numbers = #tpu.dot_dimension_numbers<[1], [0], [0], [1], [0, 0, 1, 1], [], []>} : vector<272x192xbf16>, vector<192x128xbf16>, vector<272x128xf32> -> vector<272x128xf32>
      %58 = arith.addf %51, %57 : vector<272x128xf32>
      %c271_i32 = arith.constant 271 : i32
      %59 = tpu.dynamic_rotate %58 by %c271_i32 dim 0 : vector<272x128xf32>, i32 -> vector<272x128xf32>
      %60 = vector.extract_strided_slice %59 {offsets = [0, 0], sizes = [256, 128], strides = [1, 1]} : vector<272x128xf32> to vector<256x128xf32>
      %61 = arith.addf %36, %60 : vector<256x128xf32>
      %cst_37 = arith.constant 0.000000e+00 : f32
      %62 = vector.broadcast %cst_37 : f32 to vector<272x128xf32>
      %c0_i32_38 = arith.constant 0 : i32
      %63 = arith.addi %11, %c0_i32_38 : i32
      %64 = arith.index_cast %63 : i32 to index
      %c0_39 = arith.constant 0 : index
      %65 = vector.load %arg5[%64, %c0_39] : memref<1984x192xbf16, #tpu.memory_space<vmem>>, vector<272x192xbf16>
      %c2 = arith.constant 2 : index
      %c0_40 = arith.constant 0 : index
      %c0_41 = arith.constant 0 : index
      %66 = vector.load %arg3[%c2, %c0_40, %c0_41] : memref<9x192x128xbf16, #tpu.memory_space<vmem>>, vector<1x192x128xbf16>
      %67 = vector.shape_cast %66 : vector<1x192x128xbf16> to vector<192x128xbf16>
      %cst_42 = arith.constant dense<0.000000e+00> : vector<272x128xf32>
      %68 = tpu.matmul %65, %67, %cst_42 {dimension_numbers = #tpu.dot_dimension_numbers<[1], [0], [0], [1], [0, 0, 1, 1], [], []>} : vector<272x192xbf16>, vector<192x128xbf16>, vector<272x128xf32> -> vector<272x128xf32>
      %69 = arith.addf %62, %68 : vector<272x128xf32>
      %c64_i32_43 = arith.constant 64 : i32
      %70 = arith.addi %11, %c64_i32_43 : i32
      %71 = arith.index_cast %70 : i32 to index
      %c0_44 = arith.constant 0 : index
      %72 = vector.load %arg5[%71, %c0_44] : memref<1984x192xbf16, #tpu.memory_space<vmem>>, vector<272x192xbf16>
      %c5 = arith.constant 5 : index
      %c0_45 = arith.constant 0 : index
      %c0_46 = arith.constant 0 : index
      %73 = vector.load %arg3[%c5, %c0_45, %c0_46] : memref<9x192x128xbf16, #tpu.memory_space<vmem>>, vector<1x192x128xbf16>
      %74 = vector.shape_cast %73 : vector<1x192x128xbf16> to vector<192x128xbf16>
      %cst_47 = arith.constant dense<0.000000e+00> : vector<272x128xf32>
      %75 = tpu.matmul %72, %74, %cst_47 {dimension_numbers = #tpu.dot_dimension_numbers<[1], [0], [0], [1], [0, 0, 1, 1], [], []>} : vector<272x192xbf16>, vector<192x128xbf16>, vector<272x128xf32> -> vector<272x128xf32>
      %76 = arith.addf %69, %75 : vector<272x128xf32>
      %c128_i32_48 = arith.constant 128 : i32
      %77 = arith.addi %11, %c128_i32_48 : i32
      %78 = arith.index_cast %77 : i32 to index
      %c0_49 = arith.constant 0 : index
      %79 = vector.load %arg5[%78, %c0_49] : memref<1984x192xbf16, #tpu.memory_space<vmem>>, vector<272x192xbf16>
      %c8 = arith.constant 8 : index
      %c0_50 = arith.constant 0 : index
      %c0_51 = arith.constant 0 : index
      %80 = vector.load %arg3[%c8, %c0_50, %c0_51] : memref<9x192x128xbf16, #tpu.memory_space<vmem>>, vector<1x192x128xbf16>
      %81 = vector.shape_cast %80 : vector<1x192x128xbf16> to vector<192x128xbf16>
      %cst_52 = arith.constant dense<0.000000e+00> : vector<272x128xf32>
      %82 = tpu.matmul %79, %81, %cst_52 {dimension_numbers = #tpu.dot_dimension_numbers<[1], [0], [0], [1], [0, 0, 1, 1], [], []>} : vector<272x192xbf16>, vector<192x128xbf16>, vector<272x128xf32> -> vector<272x128xf32>
      %83 = arith.addf %76, %82 : vector<272x128xf32>
      %c270_i32 = arith.constant 270 : i32
      %84 = tpu.dynamic_rotate %83 by %c270_i32 dim 0 : vector<272x128xf32>, i32 -> vector<272x128xf32>
      %85 = vector.extract_strided_slice %84 {offsets = [0, 0], sizes = [256, 128], strides = [1, 1]} : vector<272x128xf32> to vector<256x128xf32>
      %86 = arith.addf %61, %85 : vector<256x128xf32>
      %87 = vector.shape_cast %86 : vector<256x128xf32> to vector<4x64x128xf32>
      %88 = vector.extract_strided_slice %87 {offsets = [0, 0, 0], sizes = [4, 56, 128], strides = [1, 1, 1]} : vector<4x64x128xf32> to vector<4x56x128xf32>
      %c4_i32 = arith.constant 4 : i32
      %89 = arith.muli %arg6, %c4_i32 : i32
      %c0_53 = arith.constant 0 : index
      %90 = arith.index_cast %89 : i32 to index
      %c0_54 = arith.constant 0 : index
      %c0_55 = arith.constant 0 : index
      %91 = vector.load %arg4[%c0_53, %90, %c0_54, %c0_55] : memref<1x28x56x128xf32, #tpu.memory_space<vmem>>, vector<1x4x56x128xf32>
      %92 = vector.shape_cast %91 : vector<1x4x56x128xf32> to vector<4x56x128xf32>
      %93 = vector.shape_cast %88 : vector<4x56x128xf32> to vector<1x4x56x128xf32>
      tpu.vector_store %arg4[%c0_53, %90, %c0_54, %c0_55], %93 {strides = array<i32>} : memref<1x28x56x128xf32, #tpu.memory_space<vmem>>, vector<1x4x56x128xf32>,
    }
    %c7_i32_3 = arith.constant 7 : i32
    return
  }
  func.func @transform_0(%arg0: i32, %arg1: i32) -> (i32, i32, i32) {
    %c0_i32 = arith.constant 0 : i32
    %c0_i32_0 = arith.constant 0 : i32
    %c0_i32_1 = arith.constant 0 : i32
    return %arg0, %c0_i32, %c0_i32_0 : i32, i32, i32
  }
  func.func @transform_1(%arg0: i32, %arg1: i32) -> (i32, i32, i32) {
    %c0_i32 = arith.constant 0 : i32
    %c0_i32_0 = arith.constant 0 : i32
    %c0_i32_1 = arith.constant 0 : i32
    %c0_i32_2 = arith.constant 0 : i32
    return %c0_i32, %c0_i32_0, %c0_i32_1 : i32, i32, i32
  }
  func.func @transform_2(%arg0: i32, %arg1: i32) -> (i32, i32, i32, i32) {
    %c0_i32 = arith.constant 0 : i32
    %c0_i32_0 = arith.constant 0 : i32
    %c0_i32_1 = arith.constant 0 : i32
    return %arg0, %arg1, %c0_i32, %c0_i32_0 : i32, i32, i32, i32
  }
}

</mosaic_0001>

<bundles_post_ra>
// kernel: relu_conv2d_3x3.1
= control target key start
LH: loop header
LB: loop body
LE: loop exit
PB: predicated region body
PF: predicated region fallthrough
CT: control target
= control target key end

     0   :  { %s7100_s9 = smov 0   ;;  %s7102_s10 = smov 0   ;;  %s9890_s0 = inlined_call_operand.vmem [shape: bf16[1,3776,192], index: 0, kind: input, shape index: {}]   ;;  %s9891_s1 = inlined_call_operand.vmem [shape: bf16[9,192,128], index: 1, kind: input, shape index: {}]   ;;  %s9892_s2 = inlined_call_operand.vmem [shape: f32[1,56,56,128], index: 2, kind: output, shape index: {}]  }
   0x1   :  { %s7104_s11 = smov 0  }
   0x2 LB: > { %s21_s12 = sadd.s32 1, %s7075_s10  ;;  %p5598_p0 = scmp.ge.s32.totalorder %s7079_s11, 1  ;;  %s7079_s11 = sphi %s7104_s11, %s12_s11   ;;  %s7075_s10 = sphi %s7102_s10, %s10496_s10   ;;  %s7071_s9 = sphi %s7100_s9, %s10495_s9  }
   0x3   : > { %p22_p1 = scmp.ge.s32.totalorder %s21_s12, 2  ;;  %p126_p2 = scmp.lt.s32.totalorder %s7079_s11, 3 }
   0x5   : > { %s10498_s12 = smov (%p22_p1, %s21_s12), 0  ;;  %p127_p3 = pnand %p5598_p0, %p126_p2 }
   0x6   : > { %s158_s13 = smul.u32 (!%p127_p3), 28, %s7071_s9  ;;  %s7878_s24 = smov (!%p127_p3), 0  }
   0x7   : > { %130 = sbr.rel (%p127_p3) target bundleno = 1703 (0x6a7), region = 28 }
   0x8   : > { %s170_s14 = smul.u32 (!%p127_p3), 1792, %s7071_s9  ;;  %p161_p4 = scmp.lt.s32.totalorder (!%p127_p3), %s158_s13, 55 }
   0xa   : > { %s171_s15 = sshra.s32 (!%p127_p3), %s170_s14, 3 }
   0xb   : > { %s6798_s16 = sshll.u32 (!%p127_p3), %s171_s15, 3 }
   0xc   : > { %s10500_s13 = smov (!%p161_p4, %s158_s13), 55  ;;  %s7121_s20 = scalar_lea.vmem %s9890_s0, %s6798_s16  ;;  %vm1664_vm0 = vcmask 1043456   ;;  %vm1665_vm1 = vcmask 523268  }
   0xd   : > { %s7020_s17 = smul.u32 56, %s10500_s13  ;;  %v176_v0 = vld [vmem:[%s7121_s20] sm:$0xff]  ;;  %v177_v1 = vld [vmem:[%s7121_s20 + $0x8] sm:$0xff]  ;;  %v178_v2 = vld [vmem:[%s7121_s20 + $0x10] sm:$0xff] }
   0xe   : > { %v424_v3 = vunpack.c.l.bf16 %v176_v0  ;;  %v425_v4 = vunpack.c.h.bf16 %v176_v0  ;;  %v426_v5 = vunpack.c.l.bf16 %v177_v1  ;;  %v427_v6 = vunpack.c.h.bf16 %v177_v1  ;;  %v179_v7 = vld [vmem:[%s7121_s20 + $0x18] sm:$0xff]  ;;  %v180_v12 = vld [vmem:[%s7121_s20 + $0x20] sm:$0xff]  ;;  %v181_v17 = vld [vmem:[%s7121_s20 + $0x28] sm:$0xff] }
   0xf   : > { %s7129_s23 = scalar_lea.vmem %s9892_s2, %s7020_s17  ;;  %v428_v8 = vunpack.c.l.bf16 %v178_v2  ;;  %v429_v9 = vunpack.c.h.bf16 %v178_v2  ;;  %v430_v10 = vunpack.c.l.bf16 %v179_v7  ;;  %v431_v11 = vunpack.c.h.bf16 %v179_v7  ;;  %vm7136_vm2 = vmor %vm1665_vm1, %vm1664_vm0  ;;  %v182_v23 = vld [vmem:[%s7121_s20 + $0x30] sm:$0xff]  ;;  %v183_v28 = vld [vmem:[%s7121_s20 + $0x38] sm:$0xff] }
  0x10   : > { %v920_v13 = vmax.f32 %v424_v3, 0.0  ;;  %v921_v14 = vmax.f32 %v425_v4, 0.0  ;;  %v922_v15 = vmax.f32 %v426_v5, 0.0  ;;  %v923_v16 = vmax.f32 %v427_v6, 0.0  ;;  %v184_v33 = vld [vmem:[%s7121_s20 + $0x40] sm:$0xff]  ;;  %v185_v42 = vld [vmem:[%s7121_s20 + $0x48] sm:$0xff] }
  0x11   : > { %v924_v19 = vmax.f32 %v428_v8, 0.0  ;;  %v925_v20 = vmax.f32 %v429_v9, 0.0  ;;  %v926_v21 = vmax.f32 %v430_v10, 0.0  ;;  %v927_v22 = vmax.f32 %v431_v11, 0.0  ;;  %v186_v47 = vld [vmem:[%s7121_s20 + $0x50] sm:$0xff]  ;;  %v187_v52 = vld [vmem:[%s7121_s20 + $0x58] sm:$0xff] }
  0x12   : > { %v1416_v24 = vpack.c.bf16 %v921_v14, %v920_v13  ;;  %v1417_v25 = vpack.c.bf16 %v923_v16, %v922_v15  ;;  %v432_v26 = vunpack.c.l.bf16 %v180_v12  ;;  %v433_v27 = vunpack.c.h.bf16 %v180_v12  ;;  %v188_v57 = vld [vmem:[%s7121_s20 + $0x60] sm:$0xff]  ;;  %v189_v2 = vld [vmem:[%s7121_s20 + $0x68] sm:$0xff]  ;;  %v190_v7 = vld [vmem:[%s7121_s20 + $0x70] sm:$0xff] }
  0x13   : > { %v1418_v29 = vpack.c.bf16 %v925_v20, %v924_v19  ;;  %v1419_v30 = vpack.c.bf16 %v927_v22, %v926_v21  ;;  %v434_v31 = vunpack.c.l.bf16 %v181_v17  ;;  %v435_v32 = vunpack.c.h.bf16 %v181_v17  ;;  %v191_v12 = vld [vmem:[%s7121_s20 + $0x78] sm:$0xff]  ;;  %v192_v17 = vld [vmem:[%s7121_s20 + $0x80] sm:$0xff] }
  0x14   : > { %1667 = vst.msk [vmem:[#allocation2] sm:$0xff] %vm7136_vm2, %v1416_v24  ;;  %v928_v34 = vmax.f32 %v432_v26, 0.0  ;;  %v929_v35 = vmax.f32 %v433_v27, 0.0  ;;  %v436_v36 = vunpack.c.l.bf16 %v182_v23  ;;  %v437_v37 = vunpack.c.h.bf16 %v182_v23  ;;  %v193_v27 = vld [vmem:[%s7121_s20 + $0x88] sm:$0xff] }
  0x15   : > { %1668 = vst.msk [vmem:[#allocation2 + $0x8] sm:$0xff] %vm7136_vm2, %v1417_v25  ;;  %v930_v38 = vmax.f32 %v434_v31, 0.0  ;;  %v931_v39 = vmax.f32 %v435_v32, 0.0  ;;  %v438_v40 = vunpack.c.l.bf16 %v183_v28  ;;  %v439_v41 = vunpack.c.h.bf16 %v183_v28  ;;  %v194_v32 = vld [vmem:[%s7121_s20 + $0x90] sm:$0xff] }
  0x16   : > { %1669 = vst.msk [vmem:[#allocation2 + $0x10] sm:$0xff] %vm7136_vm2, %v1418_v29  ;;  %v1420_v43 = vpack.c.bf16 %v929_v35, %v928_v34  ;;  %v932_v44 = vmax.f32 %v436_v36, 0.0  ;;  %v933_v45 = vmax.f32 %v437_v37, 0.0  ;;  %v440_v46 = vunpack.c.l.bf16 %v184_v33  ;;  %v195_v37 = vld [vmem:[%s7121_s20 + $0x98] sm:$0xff] }
  0x17   : > { %1670 = vst.msk [vmem:[#allocation2 + $0x18] sm:$0xff] %vm7136_vm2, %v1419_v30  ;;  %v1421_v48 = vpack.c.bf16 %v931_v39, %v930_v38  ;;  %v934_v49 = vmax.f32 %v438_v40, 0.0  ;;  %v935_v50 = vmax.f32 %v439_v41, 0.0  ;;  %v441_v51 = vunpack.c.h.bf16 %v184_v33 }
  0x18   : > { %1671 = vst.msk [vmem:[#allocation2 + $0x20] sm:$0xff] %vm7136_vm2, %v1420_v43  ;;  %v1422_v53 = vpack.c.bf16 %v933_v45, %v932_v44  ;;  %v936_v54 = vmax.f32 %v440_v46, 0.0  ;;  %v442_v55 = vunpack.c.l.bf16 %v185_v42  ;;  %v443_v56 = vunpack.c.h.bf16 %v185_v42  ;;  %v196_v42 = vld [vmem:[%s7121_s20 + $0xa0] sm:$0xff] }
  0x19   : > { %1672 = vst.msk [vmem:[#allocation2 + $0x28] sm:$0xff] %vm7136_vm2, %v1421_v48  ;;  %v1423_v58 = vpack.c.bf16 %v935_v50, %v934_v49  ;;  %v937_v59 = vmax.f32 %v441_v51, 0.0  ;;  %v444_v60 = vunpack.c.l.bf16 %v186_v47  ;;  %v445_v61 = vunpack.c.h.bf16 %v186_v47  ;;  %v197_v51 = vld [vmem:[%s7121_s20 + $0xa8] sm:$0xff] }
  0x1a   : > { %1673 = vst.msk [vmem:[#allocation2 + $0x30] sm:$0xff] %vm7136_vm2, %v1422_v53  ;;  %v938_v62 = vmax.f32 %v442_v55, 0.0  ;;  %v939_v63 = vmax.f32 %v443_v56, 0.0  ;;  %v446_v0 = vunpack.c.l.bf16 %v187_v52  ;;  %v447_v1 = vunpack.c.h.bf16 %v187_v52  ;;  %v198_v56 = vld [vmem:[%s7121_s20 + $0xb0] sm:$0xff] }
  0x1b   : > { %1674 = vst.msk [vmem:[#allocation2 + $0x38] sm:$0xff] %vm7136_vm2, %v1423_v58  ;;  %v1424_v3 = vpack.c.bf16 %v937_v59, %v936_v54  ;;  %v940_v4 = vmax.f32 %v444_v60, 0.0  ;;  %v941_v5 = vmax.f32 %v445_v61, 0.0  ;;  %v448_v6 = vunpack.c.l.bf16 %v188_v57  ;;  %v199_v61 = vld [vmem:[%s7121_s20 + $0xb8] sm:$0xff] }
  0x1c   : > { %v1425_v8 = vpack.c.bf16 %v939_v63, %v938_v62  ;;  %v942_v9 = vmax.f32 %v446_v0, 0.0  ;;  %v943_v10 = vmax.f32 %v447_v1, 0.0  ;;  %v449_v11 = vunpack.c.h.bf16 %v188_v57 }
  0x1d   : > { %1675 = vst.msk [vmem:[#allocation2 + $0x40] sm:$0xff] %vm7136_vm2, %v1424_v3  ;;  %v1426_v13 = vpack.c.bf16 %v941_v5, %v940_v4  ;;  %v944_v14 = vmax.f32 %v448_v6, 0.0  ;;  %v450_v15 = vunpack.c.l.bf16 %v189_v2  ;;  %v451_v16 = vunpack.c.h.bf16 %v189_v2  ;;  %v200_v2 = vld [vmem:[%s7121_s20 + $0xc0] sm:$0xff] }
  0x1e   : > { %1676 = vst.msk [vmem:[#allocation2 + $0x48] sm:$0xff] %vm7136_vm2, %v1425_v8  ;;  %v1427_v19 = vpack.c.bf16 %v943_v10, %v942_v9  ;;  %v945_v20 = vmax.f32 %v449_v11, 0.0  ;;  %v452_v21 = vunpack.c.l.bf16 %v190_v7  ;;  %v453_v22 = vunpack.c.h.bf16 %v190_v7  ;;  %v201_v11 = vld [vmem:[%s7121_s20 + $0xc8] sm:$0xff] }
  0x1f   : > { %1677 = vst.msk [vmem:[#allocation2 + $0x50] sm:$0xff] %vm7136_vm2, %v1426_v13  ;;  %v946_v23 = vmax.f32 %v450_v15, 0.0  ;;  %v947_v24 = vmax.f32 %v451_v16, 0.0  ;;  %v454_v25 = vunpack.c.l.bf16 %v191_v12  ;;  %v455_v26 = vunpack.c.h.bf16 %v191_v12  ;;  %v202_v16 = vld [vmem:[%s7121_s20 + $0xd0] sm:$0xff] }
  0x20   : > { %1678 = vst.msk [vmem:[#allocation2 + $0x58] sm:$0xff] %vm7136_vm2, %v1427_v19  ;;  %v1428_v28 = vpack.c.bf16 %v945_v20, %v944_v14  ;;  %v948_v29 = vmax.f32 %v452_v21, 0.0  ;;  %v949_v30 = vmax.f32 %v453_v22, 0.0  ;;  %v456_v31 = vunpack.c.l.bf16 %v192_v17  ;;  %v203_v22 = vld [vmem:[%s7121_s20 + $0xd8] sm:$0xff] }
  0x21   : > { %v1429_v33 = vpack.c.bf16 %v947_v24, %v946_v23  ;;  %v950_v34 = vmax.f32 %v454_v25, 0.0  ;;  %v951_v35 = vmax.f32 %v455_v26, 0.0  ;;  %v457_v36 = vunpack.c.h.bf16 %v192_v17 }
  0x22   : > { %1679 = vst.msk [vmem:[#allocation2 + $0x60] sm:$0xff] %vm7136_vm2, %v1428_v28  ;;  %v1430_v38 = vpack.c.bf16 %v949_v30, %v948_v29  ;;  %v952_v39 = vmax.f32 %v456_v31, 0.0  ;;  %v458_v40 = vunpack.c.l.bf16 %v193_v27  ;;  %v459_v41 = vunpack.c.h.bf16 %v193_v27  ;;  %v204_v27 = vld [vmem:[%s7121_s20 + $0xe0] sm:$0xff] }
  0x23   : > { %1680 = vst.msk [vmem:[#allocation2 + $0x68] sm:$0xff] %vm7136_vm2, %v1429_v33  ;;  %v1431_v43 = vpack.c.bf16 %v951_v35, %v950_v34  ;;  %v953_v44 = vmax.f32 %v457_v36, 0.0  ;;  %v460_v45 = vunpack.c.l.bf16 %v194_v32  ;;  %v461_v46 = vunpack.c.h.bf16 %v194_v32  ;;  %v205_v36 = vld [vmem:[%s7121_s20 + $0xe8] sm:$0xff] }
  0x24   : > { %1681 = vst.msk [vmem:[#allocation2 + $0x70] sm:$0xff] %vm7136_vm2, %v1430_v38  ;;  %v954_v47 = vmax.f32 %v458_v40, 0.0  ;;  %v955_v48 = vmax.f32 %v459_v41, 0.0  ;;  %v462_v49 = vunpack.c.l.bf16 %v195_v37  ;;  %v463_v50 = vunpack.c.h.bf16 %v195_v37  ;;  %v206_v41 = vld [vmem:[%s7121_s20 + $0xf0] sm:$0xff] }
  0x25   : > { %1682 = vst.msk [vmem:[#allocation2 + $0x78] sm:$0xff] %vm7136_vm2, %v1431_v43  ;;  %v1432_v52 = vpack.c.bf16 %v953_v44, %v952_v39  ;;  %v956_v53 = vmax.f32 %v460_v45, 0.0  ;;  %v957_v54 = vmax.f32 %v461_v46, 0.0  ;;  %v464_v55 = vunpack.c.l.bf16 %v196_v42  ;;  %v207_v46 = vld [vmem:[%s7121_s20 + $0xf8] sm:$0xff] }
  0x26   : > { %v1433_v57 = vpack.c.bf16 %v955_v48, %v954_v47  ;;  %v958_v58 = vmax.f32 %v462_v49, 0.0  ;;  %v959_v59 = vmax.f32 %v463_v50, 0.0  ;;  %v465_v60 = vunpack.c.h.bf16 %v196_v42 }
  0x27   : > { %1683 = vst.msk [vmem:[#allocation2 + $0x80] sm:$0xff] %vm7136_vm2, %v1432_v52  ;;  %v1434_v62 = vpack.c.bf16 %v957_v54, %v956_v53  ;;  %v960_v63 = vmax.f32 %v464_v55, 0.0  ;;  %v466_v0 = vunpack.c.l.bf16 %v197_v51  ;;  %v467_v1 = vunpack.c.h.bf16 %v197_v51  ;;  %v208_v51 = vld [vmem:[%s7121_s20 + $0x100] sm:$0xff] }
  0x28   : > { %1684 = vst.msk [vmem:[#allocation2 + $0x88] sm:$0xff] %vm7136_vm2, %v1433_v57  ;;  %v1435_v3 = vpack.c.bf16 %v959_v59, %v958_v58  ;;  %v961_v4 = vmax.f32 %v465_v60, 0.0  ;;  %v468_v5 = vunpack.c.l.bf16 %v198_v56  ;;  %v469_v6 = vunpack.c.h.bf16 %v198_v56  ;;  %v209_v60 = vld [vmem:[%s7121_s20 + $0x108] sm:$0xff] }
  0x29   : > { %1685 = vst.msk [vmem:[#allocation2 + $0x90] sm:$0xff] %vm7136_vm2, %v1434_v62  ;;  %v962_v7 = vmax.f32 %v466_v0, 0.0  ;;  %v963_v8 = vmax.f32 %v467_v1, 0.0  ;;  %v470_v9 = vunpack.c.l.bf16 %v199_v61  ;;  %v471_v10 = vunpack.c.h.bf16 %v199_v61  ;;  %v210_v1 = vld [vmem:[%s7121_s20 + $0x110] sm:$0xff] }
  0x2a   : > { %1686 = vst.msk [vmem:[#allocation2 + $0x98] sm:$0xff] %vm7136_vm2, %v1435_v3  ;;  %v1436_v12 = vpack.c.bf16 %v961_v4, %v960_v63  ;;  %v964_v13 = vmax.f32 %v468_v5, 0.0  ;;  %v965_v14 = vmax.f32 %v469_v6, 0.0  ;;  %v472_v15 = vunpack.c.l.bf16 %v200_v2  ;;  %v211_v6 = vld [vmem:[%s7121_s20 + $0x118] sm:$0xff] }
  0x2b   : > { %v1437_v17 = vpack.c.bf16 %v963_v8, %v962_v7  ;;  %v966_v19 = vmax.f32 %v470_v9, 0.0  ;;  %v967_v20 = vmax.f32 %v471_v10, 0.0  ;;  %v473_v21 = vunpack.c.h.bf16 %v200_v2 }
  0x2c   : > { %1687 = vst.msk [vmem:[#allocation2 + $0xa0] sm:$0xff] %vm7136_vm2, %v1436_v12  ;;  %v1438_v23 = vpack.c.bf16 %v965_v14, %v964_v13  ;;  %v968_v24 = vmax.f32 %v472_v15, 0.0  ;;  %v474_v25 = vunpack.c.l.bf16 %v201_v11  ;;  %v475_v26 = vunpack.c.h.bf16 %v201_v11  ;;  %v212_v11 = vld [vmem:[%s7121_s20 + $0x120] sm:$0xff] }
  0x2d   : > { %1688 = vst.msk [vmem:[#allocation2 + $0xa8] sm:$0xff] %vm7136_vm2, %v1437_v17  ;;  %v1439_v28 = vpack.c.bf16 %v967_v20, %v966_v19  ;;  %v969_v29 = vmax.f32 %v473_v21, 0.0  ;;  %v476_v30 = vunpack.c.l.bf16 %v202_v16  ;;  %v477_v31 = vunpack.c.h.bf16 %v202_v16  ;;  %v213_v21 = vld [vmem:[%s7121_s20 + $0x128] sm:$0xff] }
  0x2e   : > { %1689 = vst.msk [vmem:[#allocation2 + $0xb0] sm:$0xff] %vm7136_vm2, %v1438_v23  ;;  %v970_v32 = vmax.f32 %v474_v25, 0.0  ;;  %v971_v33 = vmax.f32 %v475_v26, 0.0  ;;  %v478_v34 = vunpack.c.l.bf16 %v203_v22  ;;  %v479_v35 = vunpack.c.h.bf16 %v203_v22  ;;  %v214_v26 = vld [vmem:[%s7121_s20 + $0x130] sm:$0xff] }
  0x2f   : > { %1690 = vst.msk [vmem:[#allocation2 + $0xb8] sm:$0xff] %vm7136_vm2, %v1439_v28  ;;  %v1440_v37 = vpack.c.bf16 %v969_v29, %v968_v24  ;;  %v972_v38 = vmax.f32 %v476_v30, 0.0  ;;  %v973_v39 = vmax.f32 %v477_v31, 0.0  ;;  %v480_v40 = vunpack.c.l.bf16 %v204_v27  ;;  %v215_v31 = vld [vmem:[%s7121_s20 + $0x138] sm:$0xff] }
  0x30   : > { %v1441_v42 = vpack.c.bf16 %v971_v33, %v970_v32  ;;  %v974_v43 = vmax.f32 %v478_v34, 0.0  ;;  %v975_v44 = vmax.f32 %v479_v35, 0.0  ;;  %v481_v45 = vunpack.c.h.bf16 %v204_v27 }
  0x31   : > { %1691 = vst.msk [vmem:[#allocation2 + $0xc0] sm:$0xff] %vm7136_vm2, %v1440_v37  ;;  %v1442_v47 = vpack.c.bf16 %v973_v39, %v972_v38  ;;  %v976_v48 = vmax.f32 %v480_v40, 0.0  ;;  %v482_v49 = vunpack.c.l.bf16 %v205_v36  ;;  %v483_v50 = vunpack.c.h.bf16 %v205_v36  ;;  %v216_v36 = vld [vmem:[%s7121_s20 + $0x140] sm:$0xff] }
  0x32   : > { %1692 = vst.msk [vmem:[#allocation2 + $0xc8] sm:$0xff] %vm7136_vm2, %v1441_v42  ;;  %v1443_v52 = vpack.c.bf16 %v975_v44, %v974_v43  ;;  %v977_v53 = vmax.f32 %v481_v45, 0.0  ;;  %v484_v54 = vunpack.c.l.bf16 %v206_v41  ;;  %v485_v55 = vunpack.c.h.bf16 %v206_v41  ;;  %v217_v45 = vld [vmem:[%s7121_s20 + $0x148] sm:$0xff] }
  0x33   : > { %1693 = vst.msk [vmem:[#allocation2 + $0xd0] sm:$0xff] %vm7136_vm2, %v1442_v47  ;;  %v978_v56 = vmax.f32 %v482_v49, 0.0  ;;  %v979_v57 = vmax.f32 %v483_v50, 0.0  ;;  %v486_v58 = vunpack.c.l.bf16 %v207_v46  ;;  %v487_v59 = vunpack.c.h.bf16 %v207_v46  ;;  %v218_v50 = vld [vmem:[%s7121_s20 + $0x150] sm:$0xff] }
  0x34   : > { %1694 = vst.msk [vmem:[#allocation2 + $0xd8] sm:$0xff] %vm7136_vm2, %v1443_v52  ;;  %v1444_v61 = vpack.c.bf16 %v977_v53, %v976_v48  ;;  %v980_v62 = vmax.f32 %v484_v54, 0.0  ;;  %v981_v63 = vmax.f32 %v485_v55, 0.0  ;;  %v488_v0 = vunpack.c.l.bf16 %v208_v51  ;;  %v219_v55 = vld [vmem:[%s7121_s20 + $0x158] sm:$0xff] }
  0x35   : > { %v1445_v2 = vpack.c.bf16 %v979_v57, %v978_v56  ;;  %v982_v3 = vmax.f32 %v486_v58, 0.0  ;;  %v983_v4 = vmax.f32 %v487_v59, 0.0  ;;  %v489_v5 = vunpack.c.h.bf16 %v208_v51 }
  0x36   : > { %1695 = vst.msk [vmem:[#allocation2 + $0xe0] sm:$0xff] %vm7136_vm2, %v1444_v61  ;;  %v1446_v7 = vpack.c.bf16 %v981_v63, %v980_v62  ;;  %v984_v8 = vmax.f32 %v488_v0, 0.0  ;;  %v490_v9 = vunpack.c.l.bf16 %v209_v60  ;;  %v491_v10 = vunpack.c.h.bf16 %v209_v60  ;;  %v220_v60 = vld [vmem:[%s7121_s20 + $0x160] sm:$0xff] }
  0x37   : > { %1696 = vst.msk [vmem:[#allocation2 + $0xe8] sm:$0xff] %vm7136_vm2, %v1445_v2  ;;  %v1447_v12 = vpack.c.bf16 %v983_v4, %v982_v3  ;;  %v985_v13 = vmax.f32 %v489_v5, 0.0  ;;  %v492_v14 = vunpack.c.l.bf16 %v210_v1  ;;  %v493_v15 = vunpack.c.h.bf16 %v210_v1  ;;  %v221_v5 = vld [vmem:[%s7121_s20 + $0x168] sm:$0xff] }
  0x38   : > { %1697 = vst.msk [vmem:[#allocation2 + $0xf0] sm:$0xff] %vm7136_vm2, %v1446_v7  ;;  %v986_v16 = vmax.f32 %v490_v9, 0.0  ;;  %v987_v17 = vmax.f32 %v491_v10, 0.0  ;;  %v494_v19 = vunpack.c.l.bf16 %v211_v6  ;;  %v495_v20 = vunpack.c.h.bf16 %v211_v6  ;;  %v222_v10 = vld [vmem:[%s7121_s20 + $0x170] sm:$0xff] }
  0x39   : > { %1698 = vst.msk [vmem:[#allocation2 + $0xf8] sm:$0xff] %vm7136_vm2, %v1447_v12  ;;  %v1448_v22 = vpack.c.bf16 %v985_v13, %v984_v8  ;;  %v988_v23 = vmax.f32 %v492_v14, 0.0  ;;  %v989_v24 = vmax.f32 %v493_v15, 0.0  ;;  %v496_v25 = vunpack.c.l.bf16 %v212_v11  ;;  %v223_v15 = vld [vmem:[%s7121_s20 + $0x178] sm:$0xff] }
  0x3a   : > { %v1449_v27 = vpack.c.bf16 %v987_v17, %v986_v16  ;;  %v990_v28 = vmax.f32 %v494_v19, 0.0  ;;  %v991_v29 = vmax.f32 %v495_v20, 0.0  ;;  %v497_v30 = vunpack.c.h.bf16 %v212_v11 }
  0x3b   : > { %1699 = vst.msk [vmem:[#allocation2 + $0x100] sm:$0xff] %vm7136_vm2, %v1448_v22  ;;  %v1450_v32 = vpack.c.bf16 %v989_v24, %v988_v23  ;;  %v992_v33 = vmax.f32 %v496_v25, 0.0  ;;  %v498_v34 = vunpack.c.l.bf16 %v213_v21  ;;  %v499_v35 = vunpack.c.h.bf16 %v213_v21  ;;  %v224_v21 = vld [vmem:[%s7121_s20 + $0x180] sm:$0xff] }
  0x3c   : > { %1700 = vst.msk [vmem:[#allocation2 + $0x108] sm:$0xff] %vm7136_vm2, %v1449_v27  ;;  %v1451_v37 = vpack.c.bf16 %v991_v29, %v990_v28  ;;  %v993_v38 = vmax.f32 %v497_v30, 0.0  ;;  %v500_v39 = vunpack.c.l.bf16 %v214_v26  ;;  %v501_v40 = vunpack.c.h.bf16 %v214_v26  ;;  %v225_v30 = vld [vmem:[%s7121_s20 + $0x188] sm:$0xff] }
  0x3d   : > { %1701 = vst.msk [vmem:[#allocation2 + $0x110] sm:$0xff] %vm7136_vm2, %v1450_v32  ;;  %v994_v41 = vmax.f32 %v498_v34, 0.0  ;;  %v995_v42 = vmax.f32 %v499_v35, 0.0  ;;  %v502_v43 = vunpack.c.l.bf16 %v215_v31  ;;  %v503_v44 = vunpack.c.h.bf16 %v215_v31  ;;  %v226_v35 = vld [vmem:[%s7121_s20 + $0x190] sm:$0xff] }
  0x3e   : > { %1702 = vst.msk [vmem:[#allocation2 + $0x118] sm:$0xff] %vm7136_vm2, %v1451_v37  ;;  %v1452_v46 = vpack.c.bf16 %v993_v38, %v992_v33  ;;  %v996_v47 = vmax.f32 %v500_v39, 0.0  ;;  %v997_v48 = vmax.f32 %v501_v40, 0.0  ;;  %v504_v49 = vunpack.c.l.bf16 %v216_v36  ;;  %v227_v40 = vld [vmem:[%s7121_s20 + $0x198] sm:$0xff] }
  0x3f   : > { %v1453_v51 = vpack.c.bf16 %v995_v42, %v994_v41  ;;  %v998_v52 = vmax.f32 %v502_v43, 0.0  ;;  %v999_v53 = vmax.f32 %v503_v44, 0.0  ;;  %v505_v54 = vunpack.c.h.bf16 %v216_v36 }
  0x40   : > { %1703 = vst.msk [vmem:[#allocation2 + $0x120] sm:$0xff] %vm7136_vm2, %v1452_v46  ;;  %v1454_v56 = vpack.c.bf16 %v997_v48, %v996_v47  ;;  %v1000_v57 = vmax.f32 %v504_v49, 0.0  ;;  %v506_v58 = vunpack.c.l.bf16 %v217_v45  ;;  %v507_v59 = vunpack.c.h.bf16 %v217_v45  ;;  %v228_v45 = vld [vmem:[%s7121_s20 + $0x1a0] sm:$0xff] }
  0x41   : > { %1704 = vst.msk [vmem:[#allocation2 + $0x128] sm:$0xff] %vm7136_vm2, %v1453_v51  ;;  %v1455_v61 = vpack.c.bf16 %v999_v53, %v998_v52  ;;  %v1001_v62 = vmax.f32 %v505_v54, 0.0  ;;  %v508_v63 = vunpack.c.l.bf16 %v218_v50  ;;  %v509_v0 = vunpack.c.h.bf16 %v218_v50  ;;  %v229_v54 = vld [vmem:[%s7121_s20 + $0x1a8] sm:$0xff] }
  0x42   : > { %1705 = vst.msk [vmem:[#allocation2 + $0x130] sm:$0xff] %vm7136_vm2, %v1454_v56  ;;  %v1002_v1 = vmax.f32 %v506_v58, 0.0  ;;  %v1003_v2 = vmax.f32 %v507_v59, 0.0  ;;  %v510_v3 = vunpack.c.l.bf16 %v219_v55  ;;  %v511_v4 = vunpack.c.h.bf16 %v219_v55  ;;  %v230_v59 = vld [vmem:[%s7121_s20 + $0x1b0] sm:$0xff] }
  0x43   : > { %1706 = vst.msk [vmem:[#allocation2 + $0x138] sm:$0xff] %vm7136_vm2, %v1455_v61  ;;  %v1456_v6 = vpack.c.bf16 %v1001_v62, %v1000_v57  ;;  %v1004_v7 = vmax.f32 %v508_v63, 0.0  ;;  %v1005_v8 = vmax.f32 %v509_v0, 0.0  ;;  %v512_v9 = vunpack.c.l.bf16 %v220_v60  ;;  %v231_v0 = vld [vmem:[%s7121_s20 + $0x1b8] sm:$0xff] }
  0x44   : > { %v1457_v11 = vpack.c.bf16 %v1003_v2, %v1002_v1  ;;  %v1006_v12 = vmax.f32 %v510_v3, 0.0  ;;  %v1007_v13 = vmax.f32 %v511_v4, 0.0  ;;  %v513_v14 = vunpack.c.h.bf16 %v220_v60 }
  0x45   : > { %1707 = vst.msk [vmem:[#allocation2 + $0x140] sm:$0xff] %vm7136_vm2, %v1456_v6  ;;  %v1458_v16 = vpack.c.bf16 %v1005_v8, %v1004_v7  ;;  %v1008_v17 = vmax.f32 %v512_v9, 0.0  ;;  %v514_v19 = vunpack.c.l.bf16 %v221_v5  ;;  %v515_v20 = vunpack.c.h.bf16 %v221_v5  ;;  %v232_v5 = vld [vmem:[%s7121_s20 + $0x1c0] sm:$0xff] }
  0x46   : > { %1708 = vst.msk [vmem:[#allocation2 + $0x148] sm:$0xff] %vm7136_vm2, %v1457_v11  ;;  %v1459_v22 = vpack.c.bf16 %v1007_v13, %v1006_v12  ;;  %v1009_v23 = vmax.f32 %v513_v14, 0.0  ;;  %v516_v24 = vunpack.c.l.bf16 %v222_v10  ;;  %v517_v25 = vunpack.c.h.bf16 %v222_v10  ;;  %v233_v14 = vld [vmem:[%s7121_s20 + $0x1c8] sm:$0xff] }
  0x47   : > { %1709 = vst.msk [vmem:[#allocation2 + $0x150] sm:$0xff] %vm7136_vm2, %v1458_v16  ;;  %v1010_v26 = vmax.f32 %v514_v19, 0.0  ;;  %v1011_v27 = vmax.f32 %v515_v20, 0.0  ;;  %v518_v28 = vunpack.c.l.bf16 %v223_v15  ;;  %v519_v29 = vunpack.c.h.bf16 %v223_v15  ;;  %v234_v20 = vld [vmem:[%s7121_s20 + $0x1d0] sm:$0xff] }
  0x48   : > { %1710 = vst.msk [vmem:[#allocation2 + $0x158] sm:$0xff] %vm7136_vm2, %v1459_v22  ;;  %v1460_v31 = vpack.c.bf16 %v1009_v23, %v1008_v17  ;;  %v1012_v32 = vmax.f32 %v516_v24, 0.0  ;;  %v1013_v33 = vmax.f32 %v517_v25, 0.0  ;;  %v520_v34 = vunpack.c.l.bf16 %v224_v21  ;;  %v235_v25 = vld [vmem:[%s7121_s20 + $0x1d8] sm:$0xff] }
  0x49   : > { %v1461_v36 = vpack.c.bf16 %v1011_v27, %v1010_v26  ;;  %v1014_v37 = vmax.f32 %v518_v28, 0.0  ;;  %v1015_v38 = vmax.f32 %v519_v29, 0.0  ;;  %v521_v39 = vunpack.c.h.bf16 %v224_v21 }
  0x4a   : > { %1711 = vst.msk [vmem:[#allocation2 + $0x160] sm:$0xff] %vm7136_vm2, %v1460_v31  ;;  %v1462_v41 = vpack.c.bf16 %v1013_v33, %v1012_v32  ;;  %v1016_v42 = vmax.f32 %v520_v34, 0.0  ;;  %v522_v43 = vunpack.c.l.bf16 %v225_v30  ;;  %v523_v44 = vunpack.c.h.bf16 %v225_v30  ;;  %v236_v30 = vld [vmem:[%s7121_s20 + $0x1e0] sm:$0xff] }
  0x4b   : > { %1712 = vst.msk [vmem:[#allocation2 + $0x168] sm:$0xff] %vm7136_vm2, %v1461_v36  ;;  %v1463_v46 = vpack.c.bf16 %v1015_v38, %v1014_v37  ;;  %v1017_v47 = vmax.f32 %v521_v39, 0.0  ;;  %v524_v48 = vunpack.c.l.bf16 %v226_v35  ;;  %v525_v49 = vunpack.c.h.bf16 %v226_v35  ;;  %v237_v39 = vld [vmem:[%s7121_s20 + $0x1e8] sm:$0xff] }
  0x4c   : > { %1713 = vst.msk [vmem:[#allocation2 + $0x170] sm:$0xff] %vm7136_vm2, %v1462_v41  ;;  %v1018_v50 = vmax.f32 %v522_v43, 0.0  ;;  %v1019_v51 = vmax.f32 %v523_v44, 0.0  ;;  %v526_v52 = vunpack.c.l.bf16 %v227_v40  ;;  %v527_v53 = vunpack.c.h.bf16 %v227_v40  ;;  %v238_v44 = vld [vmem:[%s7121_s20 + $0x1f0] sm:$0xff] }
  0x4d   : > { %1714 = vst.msk [vmem:[#allocation2 + $0x178] sm:$0xff] %vm7136_vm2, %v1463_v46  ;;  %v1464_v55 = vpack.c.bf16 %v1017_v47, %v1016_v42  ;;  %v1020_v56 = vmax.f32 %v524_v48, 0.0  ;;  %v1021_v57 = vmax.f32 %v525_v49, 0.0  ;;  %v528_v58 = vunpack.c.l.bf16 %v228_v45  ;;  %v239_v49 = vld [vmem:[%s7121_s20 + $0x1f8] sm:$0xff] }
  0x4e   : > { %v1465_v60 = vpack.c.bf16 %v1019_v51, %v1018_v50  ;;  %v1022_v61 = vmax.f32 %v526_v52, 0.0  ;;  %v1023_v62 = vmax.f32 %v527_v53, 0.0  ;;  %v529_v63 = vunpack.c.h.bf16 %v228_v45 }
  0x4f   : > { %1715 = vst.msk [vmem:[#allocation2 + $0x180] sm:$0xff] %vm7136_vm2, %v1464_v55  ;;  %v1466_v1 = vpack.c.bf16 %v1021_v57, %v1020_v56  ;;  %v1024_v2 = vmax.f32 %v528_v58, 0.0  ;;  %v530_v3 = vunpack.c.l.bf16 %v229_v54  ;;  %v531_v4 = vunpack.c.h.bf16 %v229_v54  ;;  %v240_v54 = vld [vmem:[%s7121_s20 + $0x200] sm:$0xff] }
  0x50   : > { %1716 = vst.msk [vmem:[#allocation2 + $0x188] sm:$0xff] %vm7136_vm2, %v1465_v60  ;;  %v1467_v6 = vpack.c.bf16 %v1023_v62, %v1022_v61  ;;  %v1025_v7 = vmax.f32 %v529_v63, 0.0  ;;  %v532_v8 = vunpack.c.l.bf16 %v230_v59  ;;  %v533_v9 = vunpack.c.h.bf16 %v230_v59  ;;  %v241_v63 = vld [vmem:[%s7121_s20 + $0x208] sm:$0xff] }
  0x51   : > { %1717 = vst.msk [vmem:[#allocation2 + $0x190] sm:$0xff] %vm7136_vm2, %v1466_v1  ;;  %v1026_v10 = vmax.f32 %v530_v3, 0.0  ;;  %v1027_v11 = vmax.f32 %v531_v4, 0.0  ;;  %v534_v12 = vunpack.c.l.bf16 %v231_v0  ;;  %v535_v13 = vunpack.c.h.bf16 %v231_v0  ;;  %v242_v4 = vld [vmem:[%s7121_s20 + $0x210] sm:$0xff] }
  0x52   : > { %1718 = vst.msk [vmem:[#allocation2 + $0x198] sm:$0xff] %vm7136_vm2, %v1467_v6  ;;  %v1468_v15 = vpack.c.bf16 %v1025_v7, %v1024_v2  ;;  %v1028_v16 = vmax.f32 %v532_v8, 0.0  ;;  %v1029_v17 = vmax.f32 %v533_v9, 0.0  ;;  %v536_v19 = vunpack.c.l.bf16 %v232_v5  ;;  %v243_v9 = vld [vmem:[%s7121_s20 + $0x218] sm:$0xff] }
  0x53   : > { %v1469_v21 = vpack.c.bf16 %v1027_v11, %v1026_v10  ;;  %v1030_v22 = vmax.f32 %v534_v12, 0.0  ;;  %v1031_v23 = vmax.f32 %v535_v13, 0.0  ;;  %v537_v24 = vunpack.c.h.bf16 %v232_v5 }
  0x54   : > { %1719 = vst.msk [vmem:[#allocation2 + $0x1a0] sm:$0xff] %vm7136_vm2, %v1468_v15  ;;  %v1470_v26 = vpack.c.bf16 %v1029_v17, %v1028_v16  ;;  %v1032_v27 = vmax.f32 %v536_v19, 0.0  ;;  %v538_v28 = vunpack.c.l.bf16 %v233_v14  ;;  %v539_v29 = vunpack.c.h.bf16 %v233_v14  ;;  %v244_v14 = vld [vmem:[%s7121_s20 + $0x220] sm:$0xff] }
  0x55   : > { %1720 = vst.msk [vmem:[#allocation2 + $0x1a8] sm:$0xff] %vm7136_vm2, %v1469_v21  ;;  %v1471_v31 = vpack.c.bf16 %v1031_v23, %v1030_v22  ;;  %v1033_v32 = vmax.f32 %v537_v24, 0.0  ;;  %v540_v33 = vunpack.c.l.bf16 %v234_v20  ;;  %v541_v34 = vunpack.c.h.bf16 %v234_v20  ;;  %v245_v24 = vld [vmem:[%s7121_s20 + $0x228] sm:$0xff] }
  0x56   : > { %1721 = vst.msk [vmem:[#allocation2 + $0x1b0] sm:$0xff] %vm7136_vm2, %v1470_v26  ;;  %v1034_v35 = vmax.f32 %v538_v28, 0.0  ;;  %v1035_v36 = vmax.f32 %v539_v29, 0.0  ;;  %v542_v37 = vunpack.c.l.bf16 %v235_v25  ;;  %v543_v38 = vunpack.c.h.bf16 %v235_v25  ;;  %v246_v29 = vld [vmem:[%s7121_s20 + $0x230] sm:$0xff] }
  0x57   : > { %1722 = vst.msk [vmem:[#allocation2 + $0x1b8] sm:$0xff] %vm7136_vm2, %v1471_v31  ;;  %v1472_v40 = vpack.c.bf16 %v1033_v32, %v1032_v27  ;;  %v1036_v41 = vmax.f32 %v540_v33, 0.0  ;;  %v1037_v42 = vmax.f32 %v541_v34, 0.0  ;;  %v544_v43 = vunpack.c.l.bf16 %v236_v30  ;;  %v247_v34 = vld [vmem:[%s7121_s20 + $0x238] sm:$0xff] }
  0x58   : > { %v1473_v45 = vpack.c.bf16 %v1035_v36, %v1034_v35  ;;  %v1038_v46 = vmax.f32 %v542_v37, 0.0  ;;  %v1039_v47 = vmax.f32 %v543_v38, 0.0  ;;  %v545_v48 = vunpack.c.h.bf16 %v236_v30 }
  0x59   : > { %1723 = vst.msk [vmem:[#allocation2 + $0x1c0] sm:$0xff] %vm7136_vm2, %v1472_v40  ;;  %v1474_v50 = vpack.c.bf16 %v1037_v42, %v1036_v41  ;;  %v1040_v51 = vmax.f32 %v544_v43, 0.0  ;;  %v546_v52 = vunpack.c.l.bf16 %v237_v39  ;;  %v547_v53 = vunpack.c.h.bf16 %v237_v39  ;;  %v248_v39 = vld [vmem:[%s7121_s20 + $0x240] sm:$0xff] }
  0x5a   : > { %1724 = vst.msk [vmem:[#allocation2 + $0x1c8] sm:$0xff] %vm7136_vm2, %v1473_v45  ;;  %v1475_v55 = vpack.c.bf16 %v1039_v47, %v1038_v46  ;;  %v1041_v56 = vmax.f32 %v545_v48, 0.0  ;;  %v548_v57 = vunpack.c.l.bf16 %v238_v44  ;;  %v549_v58 = vunpack.c.h.bf16 %v238_v44  ;;  %v249_v48 = vld [vmem:[%s7121_s20 + $0x248] sm:$0xff] }
  0x5b   : > { %1725 = vst.msk [vmem:[#allocation2 + $0x1d0] sm:$0xff] %vm7136_vm2, %v1474_v50  ;;  %v1042_v59 = vmax.f32 %v546_v52, 0.0  ;;  %v1043_v60 = vmax.f32 %v547_v53, 0.0  ;;  %v550_v61 = vunpack.c.l.bf16 %v239_v49  ;;  %v551_v62 = vunpack.c.h.bf16 %v239_v49  ;;  %v250_v53 = vld [vmem:[%s7121_s20 + $0x250] sm:$0xff] }
  0x5c   : > { %1726 = vst.msk [vmem:[#allocation2 + $0x1d8] sm:$0xff] %vm7136_vm2, %v1475_v55  ;;  %v1476_v0 = vpack.c.bf16 %v1041_v56, %v1040_v51  ;;  %v1044_v1 = vmax.f32 %v548_v57, 0.0  ;;  %v1045_v2 = vmax.f32 %v549_v58, 0.0  ;;  %v552_v3 = vunpack.c.l.bf16 %v240_v54  ;;  %v251_v58 = vld [vmem:[%s7121_s20 + $0x258] sm:$0xff] }
  0x5d   : > { %v1477_v5 = vpack.c.bf16 %v1043_v60, %v1042_v59  ;;  %v1046_v6 = vmax.f32 %v550_v61, 0.0  ;;  %v1047_v7 = vmax.f32 %v551_v62, 0.0  ;;  %v553_v8 = vunpack.c.h.bf16 %v240_v54 }
  0x5e   : > { %1727 = vst.msk [vmem:[#allocation2 + $0x1e0] sm:$0xff] %vm7136_vm2, %v1476_v0  ;;  %v1478_v10 = vpack.c.bf16 %v1045_v2, %v1044_v1  ;;  %v1048_v11 = vmax.f32 %v552_v3, 0.0  ;;  %v554_v12 = vunpack.c.l.bf16 %v241_v63  ;;  %v555_v13 = vunpack.c.h.bf16 %v241_v63  ;;  %v252_v63 = vld [vmem:[%s7121_s20 + $0x260] sm:$0xff] }
  0x5f   : > { %1728 = vst.msk [vmem:[#allocation2 + $0x1e8] sm:$0xff] %vm7136_vm2, %v1477_v5  ;;  %v1479_v15 = vpack.c.bf16 %v1047_v7, %v1046_v6  ;;  %v1049_v16 = vmax.f32 %v553_v8, 0.0  ;;  %v556_v17 = vunpack.c.l.bf16 %v242_v4  ;;  %v557_v19 = vunpack.c.h.bf16 %v242_v4  ;;  %v253_v8 = vld [vmem:[%s7121_s20 + $0x268] sm:$0xff] }
  0x60   : > { %1729 = vst.msk [vmem:[#allocation2 + $0x1f0] sm:$0xff] %vm7136_vm2, %v1478_v10  ;;  %v1050_v20 = vmax.f32 %v554_v12, 0.0  ;;  %v1051_v21 = vmax.f32 %v555_v13, 0.0  ;;  %v558_v22 = vunpack.c.l.bf16 %v243_v9  ;;  %v559_v23 = vunpack.c.h.bf16 %v243_v9  ;;  %v254_v13 = vld [vmem:[%s7121_s20 + $0x270] sm:$0xff] }
  0x61   : > { %1730 = vst.msk [vmem:[#allocation2 + $0x1f8] sm:$0xff] %vm7136_vm2, %v1479_v15  ;;  %v1480_v25 = vpack.c.bf16 %v1049_v16, %v1048_v11  ;;  %v1052_v26 = vmax.f32 %v556_v17, 0.0  ;;  %v1053_v27 = vmax.f32 %v557_v19, 0.0  ;;  %v560_v28 = vunpack.c.l.bf16 %v244_v14  ;;  %v255_v19 = vld [vmem:[%s7121_s20 + $0x278] sm:$0xff] }
  0x62   : > { %v1481_v30 = vpack.c.bf16 %v1051_v21, %v1050_v20  ;;  %v1054_v31 = vmax.f32 %v558_v22, 0.0  ;;  %v1055_v32 = vmax.f32 %v559_v23, 0.0  ;;  %v561_v33 = vunpack.c.h.bf16 %v244_v14 }
  0x63   : > { %1731 = vst.msk [vmem:[#allocation2 + $0x200] sm:$0xff] %vm7136_vm2, %v1480_v25  ;;  %v1482_v35 = vpack.c.bf16 %v1053_v27, %v1052_v26  ;;  %v1056_v36 = vmax.f32 %v560_v28, 0.0  ;;  %v562_v37 = vunpack.c.l.bf16 %v245_v24  ;;  %v563_v38 = vunpack.c.h.bf16 %v245_v24  ;;  %v256_v24 = vld [vmem:[%s7121_s20 + $0x280] sm:$0xff] }
  0x64   : > { %1732 = vst.msk [vmem:[#allocation2 + $0x208] sm:$0xff] %vm7136_vm2, %v1481_v30  ;;  %v1483_v40 = vpack.c.bf16 %v1055_v32, %v1054_v31  ;;  %v1057_v41 = vmax.f32 %v561_v33, 0.0  ;;  %v564_v42 = vunpack.c.l.bf16 %v246_v29  ;;  %v565_v43 = vunpack.c.h.bf16 %v246_v29  ;;  %v257_v33 = vld [vmem:[%s7121_s20 + $0x288] sm:$0xff] }
  0x65   : > { %1733 = vst.msk [vmem:[#allocation2 + $0x210] sm:$0xff] %vm7136_vm2, %v1482_v35  ;;  %v1058_v44 = vmax.f32 %v562_v37, 0.0  ;;  %v1059_v45 = vmax.f32 %v563_v38, 0.0  ;;  %v566_v46 = vunpack.c.l.bf16 %v247_v34  ;;  %v567_v47 = vunpack.c.h.bf16 %v247_v34  ;;  %v258_v38 = vld [vmem:[%s7121_s20 + $0x290] sm:$0xff] }
  0x66   : > { %1734 = vst.msk [vmem:[#allocation2 + $0x218] sm:$0xff] %vm7136_vm2, %v1483_v40  ;;  %v1484_v49 = vpack.c.bf16 %v1057_v41, %v1056_v36  ;;  %v1060_v50 = vmax.f32 %v564_v42, 0.0  ;;  %v1061_v51 = vmax.f32 %v565_v43, 0.0  ;;  %v568_v52 = vunpack.c.l.bf16 %v248_v39  ;;  %v259_v43 = vld [vmem:[%s7121_s20 + $0x298] sm:$0xff] }
  0x67   : > { %v1485_v54 = vpack.c.bf16 %v1059_v45, %v1058_v44  ;;  %v1062_v55 = vmax.f32 %v566_v46, 0.0  ;;  %v1063_v56 = vmax.f32 %v567_v47, 0.0  ;;  %v569_v57 = vunpack.c.h.bf16 %v248_v39 }
  0x68   : > { %1735 = vst.msk [vmem:[#allocation2 + $0x220] sm:$0xff] %vm7136_vm2, %v1484_v49  ;;  %v1486_v59 = vpack.c.bf16 %v1061_v51, %v1060_v50  ;;  %v1064_v60 = vmax.f32 %v568_v52, 0.0  ;;  %v570_v61 = vunpack.c.l.bf16 %v249_v48  ;;  %v571_v62 = vunpack.c.h.bf16 %v249_v48  ;;  %v260_v48 = vld [vmem:[%s7121_s20 + $0x2a0] sm:$0xff] }
  0x69   : > { %1736 = vst.msk [vmem:[#allocation2 + $0x228] sm:$0xff] %vm7136_vm2, %v1485_v54  ;;  %v1487_v0 = vpack.c.bf16 %v1063_v56, %v1062_v55  ;;  %v1065_v1 = vmax.f32 %v569_v57, 0.0  ;;  %v572_v2 = vunpack.c.l.bf16 %v250_v53  ;;  %v573_v3 = vunpack.c.h.bf16 %v250_v53  ;;  %v261_v57 = vld [vmem:[%s7121_s20 + $0x2a8] sm:$0xff] }
  0x6a   : > { %1737 = vst.msk [vmem:[#allocation2 + $0x230] sm:$0xff] %vm7136_vm2, %v1486_v59  ;;  %v1066_v4 = vmax.f32 %v570_v61, 0.0  ;;  %v1067_v5 = vmax.f32 %v571_v62, 0.0  ;;  %v574_v6 = vunpack.c.l.bf16 %v251_v58  ;;  %v575_v7 = vunpack.c.h.bf16 %v251_v58  ;;  %v262_v62 = vld [vmem:[%s7121_s20 + $0x2b0] sm:$0xff] }
  0x6b   : > { %1738 = vst.msk [vmem:[#allocation2 + $0x238] sm:$0xff] %vm7136_vm2, %v1487_v0  ;;  %v1488_v9 = vpack.c.bf16 %v1065_v1, %v1064_v60  ;;  %v1068_v10 = vmax.f32 %v572_v2, 0.0  ;;  %v1069_v11 = vmax.f32 %v573_v3, 0.0  ;;  %v576_v12 = vunpack.c.l.bf16 %v252_v63  ;;  %v263_v3 = vld [vmem:[%s7121_s20 + $0x2b8] sm:$0xff] }
  0x6c   : > { %v1489_v14 = vpack.c.bf16 %v1067_v5, %v1066_v4  ;;  %v1070_v15 = vmax.f32 %v574_v6, 0.0  ;;  %v1071_v16 = vmax.f32 %v575_v7, 0.0  ;;  %v577_v17 = vunpack.c.h.bf16 %v252_v63 }
  0x6d   : > { %1739 = vst.msk [vmem:[#allocation2 + $0x240] sm:$0xff] %vm7136_vm2, %v1488_v9  ;;  %v1490_v20 = vpack.c.bf16 %v1069_v11, %v1068_v10  ;;  %v1072_v21 = vmax.f32 %v576_v12, 0.0  ;;  %v578_v22 = vunpack.c.l.bf16 %v253_v8  ;;  %v579_v23 = vunpack.c.h.bf16 %v253_v8  ;;  %v264_v8 = vld [vmem:[%s7121_s20 + $0x2c0] sm:$0xff] }
  0x6e   : > { %1740 = vst.msk [vmem:[#allocation2 + $0x248] sm:$0xff] %vm7136_vm2, %v1489_v14  ;;  %v1491_v25 = vpack.c.bf16 %v1071_v16, %v1070_v15  ;;  %v1073_v26 = vmax.f32 %v577_v17, 0.0  ;;  %v580_v27 = vunpack.c.l.bf16 %v254_v13  ;;  %v581_v28 = vunpack.c.h.bf16 %v254_v13  ;;  %v265_v17 = vld [vmem:[%s7121_s20 + $0x2c8] sm:$0xff] }
  0x6f   : > { %1741 = vst.msk [vmem:[#allocation2 + $0x250] sm:$0xff] %vm7136_vm2, %v1490_v20  ;;  %v1074_v29 = vmax.f32 %v578_v22, 0.0  ;;  %v1075_v30 = vmax.f32 %v579_v23, 0.0  ;;  %v582_v31 = vunpack.c.l.bf16 %v255_v19  ;;  %v583_v32 = vunpack.c.h.bf16 %v255_v19  ;;  %v266_v23 = vld [vmem:[%s7121_s20 + $0x2d0] sm:$0xff] }
  0x70   : > { %1742 = vst.msk [vmem:[#allocation2 + $0x258] sm:$0xff] %vm7136_vm2, %v1491_v25  ;;  %v1492_v34 = vpack.c.bf16 %v1073_v26, %v1072_v21  ;;  %v1076_v35 = vmax.f32 %v580_v27, 0.0  ;;  %v1077_v36 = vmax.f32 %v581_v28, 0.0  ;;  %v584_v37 = vunpack.c.l.bf16 %v256_v24  ;;  %v267_v28 = vld [vmem:[%s7121_s20 + $0x2d8] sm:$0xff] }
  0x71   : > { %v1493_v39 = vpack.c.bf16 %v1075_v30, %v1074_v29  ;;  %v1078_v40 = vmax.f32 %v582_v31, 0.0  ;;  %v1079_v41 = vmax.f32 %v583_v32, 0.0  ;;  %v585_v42 = vunpack.c.h.bf16 %v256_v24 }
  0x72   : > { %1743 = vst.msk [vmem:[#allocation2 + $0x260] sm:$0xff] %vm7136_vm2, %v1492_v34  ;;  %v1494_v44 = vpack.c.bf16 %v1077_v36, %v1076_v35  ;;  %v1080_v45 = vmax.f32 %v584_v37, 0.0  ;;  %v586_v46 = vunpack.c.l.bf16 %v257_v33  ;;  %v587_v47 = vunpack.c.h.bf16 %v257_v33  ;;  %v268_v33 = vld [vmem:[%s7121_s20 + $0x2e0] sm:$0xff] }
  0x73   : > { %1744 = vst.msk [vmem:[#allocation2 + $0x268] sm:$0xff] %vm7136_vm2, %v1493_v39  ;;  %v1495_v49 = vpack.c.bf16 %v1079_v41, %v1078_v40  ;;  %v1081_v50 = vmax.f32 %v585_v42, 0.0  ;;  %v588_v51 = vunpack.c.l.bf16 %v258_v38  ;;  %v589_v52 = vunpack.c.h.bf16 %v258_v38  ;;  %v269_v42 = vld [vmem:[%s7121_s20 + $0x2e8] sm:$0xff] }
  0x74   : > { %1745 = vst.msk [vmem:[#allocation2 + $0x270] sm:$0xff] %vm7136_vm2, %v1494_v44  ;;  %v1082_v53 = vmax.f32 %v586_v46, 0.0  ;;  %v1083_v54 = vmax.f32 %v587_v47, 0.0  ;;  %v590_v55 = vunpack.c.l.bf16 %v259_v43  ;;  %v591_v56 = vunpack.c.h.bf16 %v259_v43  ;;  %v270_v47 = vld [vmem:[%s7121_s20 + $0x2f0] sm:$0xff] }
  0x75   : > { %1746 = vst.msk [vmem:[#allocation2 + $0x278] sm:$0xff] %vm7136_vm2, %v1495_v49  ;;  %v1496_v58 = vpack.c.bf16 %v1081_v50, %v1080_v45  ;;  %v1084_v59 = vmax.f32 %v588_v51, 0.0  ;;  %v1085_v60 = vmax.f32 %v589_v52, 0.0  ;;  %v592_v61 = vunpack.c.l.bf16 %v260_v48  ;;  %v271_v52 = vld [vmem:[%s7121_s20 + $0x2f8] sm:$0xff] }
  0x76   : > { %v1497_v63 = vpack.c.bf16 %v1083_v54, %v1082_v53  ;;  %v1086_v0 = vmax.f32 %v590_v55, 0.0  ;;  %v1087_v1 = vmax.f32 %v591_v56, 0.0  ;;  %v593_v2 = vunpack.c.h.bf16 %v260_v48 }
  0x77   : > { %1747 = vst.msk [vmem:[#allocation2 + $0x280] sm:$0xff] %vm7136_vm2, %v1496_v58  ;;  %v1498_v4 = vpack.c.bf16 %v1085_v60, %v1084_v59  ;;  %v1088_v5 = vmax.f32 %v592_v61, 0.0  ;;  %v594_v6 = vunpack.c.l.bf16 %v261_v57  ;;  %v595_v7 = vunpack.c.h.bf16 %v261_v57  ;;  %v272_v57 = vld [vmem:[%s7121_s20 + $0x300] sm:$0xff] }
  0x78   : > { %1748 = vst.msk [vmem:[#allocation2 + $0x288] sm:$0xff] %vm7136_vm2, %v1497_v63  ;;  %v1499_v9 = vpack.c.bf16 %v1087_v1, %v1086_v0  ;;  %v1089_v10 = vmax.f32 %v593_v2, 0.0  ;;  %v596_v11 = vunpack.c.l.bf16 %v262_v62  ;;  %v597_v12 = vunpack.c.h.bf16 %v262_v62  ;;  %v273_v2 = vld [vmem:[%s7121_s20 + $0x308] sm:$0xff] }
  0x79   : > { %1749 = vst.msk [vmem:[#allocation2 + $0x290] sm:$0xff] %vm7136_vm2, %v1498_v4  ;;  %v1090_v13 = vmax.f32 %v594_v6, 0.0  ;;  %v1091_v14 = vmax.f32 %v595_v7, 0.0  ;;  %v598_v15 = vunpack.c.l.bf16 %v263_v3  ;;  %v599_v16 = vunpack.c.h.bf16 %v263_v3  ;;  %v274_v7 = vld [vmem:[%s7121_s20 + $0x310] sm:$0xff] }
  0x7a   : > { %1750 = vst.msk [vmem:[#allocation2 + $0x298] sm:$0xff] %vm7136_vm2, %v1499_v9  ;;  %v1500_v19 = vpack.c.bf16 %v1089_v10, %v1088_v5  ;;  %v1092_v20 = vmax.f32 %v596_v11, 0.0  ;;  %v1093_v21 = vmax.f32 %v597_v12, 0.0  ;;  %v600_v22 = vunpack.c.l.bf16 %v264_v8  ;;  %v275_v12 = vld [vmem:[%s7121_s20 + $0x318] sm:$0xff] }
  0x7b   : > { %v1501_v24 = vpack.c.bf16 %v1091_v14, %v1090_v13  ;;  %v1094_v25 = vmax.f32 %v598_v15, 0.0  ;;  %v1095_v26 = vmax.f32 %v599_v16, 0.0  ;;  %v601_v27 = vunpack.c.h.bf16 %v264_v8 }
  0x7c   : > { %1751 = vst.msk [vmem:[#allocation2 + $0x2a0] sm:$0xff] %vm7136_vm2, %v1500_v19  ;;  %v1502_v29 = vpack.c.bf16 %v1093_v21, %v1092_v20  ;;  %v1096_v30 = vmax.f32 %v600_v22, 0.0  ;;  %v602_v31 = vunpack.c.l.bf16 %v265_v17  ;;  %v603_v32 = vunpack.c.h.bf16 %v265_v17  ;;  %v276_v17 = vld [vmem:[%s7121_s20 + $0x320] sm:$0xff] }
  0x7d   : > { %1752 = vst.msk [vmem:[#allocation2 + $0x2a8] sm:$0xff] %vm7136_vm2, %v1501_v24  ;;  %v1503_v34 = vpack.c.bf16 %v1095_v26, %v1094_v25  ;;  %v1097_v35 = vmax.f32 %v601_v27, 0.0  ;;  %v604_v36 = vunpack.c.l.bf16 %v266_v23  ;;  %v605_v37 = vunpack.c.h.bf16 %v266_v23  ;;  %v277_v27 = vld [vmem:[%s7121_s20 + $0x328] sm:$0xff] }
  0x7e   : > { %1753 = vst.msk [vmem:[#allocation2 + $0x2b0] sm:$0xff] %vm7136_vm2, %v1502_v29  ;;  %v1098_v38 = vmax.f32 %v602_v31, 0.0  ;;  %v1099_v39 = vmax.f32 %v603_v32, 0.0  ;;  %v606_v40 = vunpack.c.l.bf16 %v267_v28  ;;  %v607_v41 = vunpack.c.h.bf16 %v267_v28  ;;  %v278_v32 = vld [vmem:[%s7121_s20 + $0x330] sm:$0xff] }
  0x7f   : > { %1754 = vst.msk [vmem:[#allocation2 + $0x2b8] sm:$0xff] %vm7136_vm2, %v1503_v34  ;;  %v1504_v43 = vpack.c.bf16 %v1097_v35, %v1096_v30  ;;  %v1100_v44 = vmax.f32 %v604_v36, 0.0  ;;  %v1101_v45 = vmax.f32 %v605_v37, 0.0  ;;  %v608_v46 = vunpack.c.l.bf16 %v268_v33  ;;  %v279_v37 = vld [vmem:[%s7121_s20 + $0x338] sm:$0xff] }
  0x80   : > { %v1505_v48 = vpack.c.bf16 %v1099_v39, %v1098_v38  ;;  %v1102_v49 = vmax.f32 %v606_v40, 0.0  ;;  %v1103_v50 = vmax.f32 %v607_v41, 0.0  ;;  %v609_v51 = vunpack.c.h.bf16 %v268_v33 }
  0x81   : > { %1755 = vst.msk [vmem:[#allocation2 + $0x2c0] sm:$0xff] %vm7136_vm2, %v1504_v43  ;;  %v1506_v53 = vpack.c.bf16 %v1101_v45, %v1100_v44  ;;  %v1104_v54 = vmax.f32 %v608_v46, 0.0  ;;  %v610_v55 = vunpack.c.l.bf16 %v269_v42  ;;  %v611_v56 = vunpack.c.h.bf16 %v269_v42  ;;  %v280_v42 = vld [vmem:[%s7121_s20 + $0x340] sm:$0xff] }
  0x82   : > { %1756 = vst.msk [vmem:[#allocation2 + $0x2c8] sm:$0xff] %vm7136_vm2, %v1505_v48  ;;  %v1507_v58 = vpack.c.bf16 %v1103_v50, %v1102_v49  ;;  %v1105_v59 = vmax.f32 %v609_v51, 0.0  ;;  %v612_v60 = vunpack.c.l.bf16 %v270_v47  ;;  %v613_v61 = vunpack.c.h.bf16 %v270_v47  ;;  %v281_v51 = vld [vmem:[%s7121_s20 + $0x348] sm:$0xff] }
  0x83   : > { %1757 = vst.msk [vmem:[#allocation2 + $0x2d0] sm:$0xff] %vm7136_vm2, %v1506_v53  ;;  %v1106_v62 = vmax.f32 %v610_v55, 0.0  ;;  %v1107_v63 = vmax.f32 %v611_v56, 0.0  ;;  %v614_v0 = vunpack.c.l.bf16 %v271_v52  ;;  %v615_v1 = vunpack.c.h.bf16 %v271_v52  ;;  %v282_v56 = vld [vmem:[%s7121_s20 + $0x350] sm:$0xff] }
  0x84   : > { %1758 = vst.msk [vmem:[#allocation2 + $0x2d8] sm:$0xff] %vm7136_vm2, %v1507_v58  ;;  %v1508_v3 = vpack.c.bf16 %v1105_v59, %v1104_v54  ;;  %v1108_v4 = vmax.f32 %v612_v60, 0.0  ;;  %v1109_v5 = vmax.f32 %v613_v61, 0.0  ;;  %v616_v6 = vunpack.c.l.bf16 %v272_v57  ;;  %v283_v61 = vld [vmem:[%s7121_s20 + $0x358] sm:$0xff] }
  0x85   : > { %v1509_v8 = vpack.c.bf16 %v1107_v63, %v1106_v62  ;;  %v1110_v9 = vmax.f32 %v614_v0, 0.0  ;;  %v1111_v10 = vmax.f32 %v615_v1, 0.0  ;;  %v617_v11 = vunpack.c.h.bf16 %v272_v57 }
  0x86   : > { %1759 = vst.msk [vmem:[#allocation2 + $0x2e0] sm:$0xff] %vm7136_vm2, %v1508_v3  ;;  %v1510_v13 = vpack.c.bf16 %v1109_v5, %v1108_v4  ;;  %v1112_v14 = vmax.f32 %v616_v6, 0.0  ;;  %v618_v15 = vunpack.c.l.bf16 %v273_v2  ;;  %v619_v16 = vunpack.c.h.bf16 %v273_v2  ;;  %v284_v2 = vld [vmem:[%s7121_s20 + $0x360] sm:$0xff] }
  0x87   : > { %1760 = vst.msk [vmem:[#allocation2 + $0x2e8] sm:$0xff] %vm7136_vm2, %v1509_v8  ;;  %v1511_v19 = vpack.c.bf16 %v1111_v10, %v1110_v9  ;;  %v1113_v20 = vmax.f32 %v617_v11, 0.0  ;;  %v620_v21 = vunpack.c.l.bf16 %v274_v7  ;;  %v621_v22 = vunpack.c.h.bf16 %v274_v7  ;;  %v285_v11 = vld [vmem:[%s7121_s20 + $0x368] sm:$0xff] }
  0x88   : > { %1761 = vst.msk [vmem:[#allocation2 + $0x2f0] sm:$0xff] %vm7136_vm2, %v1510_v13  ;;  %v1114_v23 = vmax.f32 %v618_v15, 0.0  ;;  %v1115_v24 = vmax.f32 %v619_v16, 0.0  ;;  %v622_v25 = vunpack.c.l.bf16 %v275_v12  ;;  %v623_v26 = vunpack.c.h.bf16 %v275_v12  ;;  %v286_v16 = vld [vmem:[%s7121_s20 + $0x370] sm:$0xff] }
  0x89   : > { %1762 = vst.msk [vmem:[#allocation2 + $0x2f8] sm:$0xff] %vm7136_vm2, %v1511_v19  ;;  %v1512_v28 = vpack.c.bf16 %v1113_v20, %v1112_v14  ;;  %v1116_v29 = vmax.f32 %v620_v21, 0.0  ;;  %v1117_v30 = vmax.f32 %v621_v22, 0.0  ;;  %v624_v31 = vunpack.c.l.bf16 %v276_v17  ;;  %v287_v22 = vld [vmem:[%s7121_s20 + $0x378] sm:$0xff] }
  0x8a   : > { %v1513_v33 = vpack.c.bf16 %v1115_v24, %v1114_v23  ;;  %v1118_v34 = vmax.f32 %v622_v25, 0.0  ;;  %v1119_v35 = vmax.f32 %v623_v26, 0.0  ;;  %v625_v36 = vunpack.c.h.bf16 %v276_v17 }
  0x8b   : > { %1763 = vst.msk [vmem:[#allocation2 + $0x300] sm:$0xff] %vm7136_vm2, %v1512_v28  ;;  %v1514_v38 = vpack.c.bf16 %v1117_v30, %v1116_v29  ;;  %v1120_v39 = vmax.f32 %v624_v31, 0.0  ;;  %v626_v40 = vunpack.c.l.bf16 %v277_v27  ;;  %v627_v41 = vunpack.c.h.bf16 %v277_v27  ;;  %v288_v27 = vld [vmem:[%s7121_s20 + $0x380] sm:$0xff] }
  0x8c   : > { %1764 = vst.msk [vmem:[#allocation2 + $0x308] sm:$0xff] %vm7136_vm2, %v1513_v33  ;;  %v1515_v43 = vpack.c.bf16 %v1119_v35, %v1118_v34  ;;  %v1121_v44 = vmax.f32 %v625_v36, 0.0  ;;  %v628_v45 = vunpack.c.l.bf16 %v278_v32  ;;  %v629_v46 = vunpack.c.h.bf16 %v278_v32  ;;  %v289_v36 = vld [vmem:[%s7121_s20 + $0x388] sm:$0xff] }
  0x8d   : > { %1765 = vst.msk [vmem:[#allocation2 + $0x310] sm:$0xff] %vm7136_vm2, %v1514_v38  ;;  %v1122_v47 = vmax.f32 %v626_v40, 0.0  ;;  %v1123_v48 = vmax.f32 %v627_v41, 0.0  ;;  %v630_v49 = vunpack.c.l.bf16 %v279_v37  ;;  %v631_v50 = vunpack.c.h.bf16 %v279_v37  ;;  %v290_v41 = vld [vmem:[%s7121_s20 + $0x390] sm:$0xff] }
  0x8e   : > { %1766 = vst.msk [vmem:[#allocation2 + $0x318] sm:$0xff] %vm7136_vm2, %v1515_v43  ;;  %v1516_v52 = vpack.c.bf16 %v1121_v44, %v1120_v39  ;;  %v1124_v53 = vmax.f32 %v628_v45, 0.0  ;;  %v1125_v54 = vmax.f32 %v629_v46, 0.0  ;;  %v632_v55 = vunpack.c.l.bf16 %v280_v42  ;;  %v291_v46 = vld [vmem:[%s7121_s20 + $0x398] sm:$0xff] }
  0x8f   : > { %v1517_v57 = vpack.c.bf16 %v1123_v48, %v1122_v47  ;;  %v1126_v58 = vmax.f32 %v630_v49, 0.0  ;;  %v1127_v59 = vmax.f32 %v631_v50, 0.0  ;;  %v633_v60 = vunpack.c.h.bf16 %v280_v42 }
  0x90   : > { %1767 = vst.msk [vmem:[#allocation2 + $0x320] sm:$0xff] %vm7136_vm2, %v1516_v52  ;;  %v1518_v62 = vpack.c.bf16 %v1125_v54, %v1124_v53  ;;  %v1128_v63 = vmax.f32 %v632_v55, 0.0  ;;  %v634_v0 = vunpack.c.l.bf16 %v281_v51  ;;  %v635_v1 = vunpack.c.h.bf16 %v281_v51  ;;  %v292_v51 = vld [vmem:[%s7121_s20 + $0x3a0] sm:$0xff] }
  0x91   : > { %1768 = vst.msk [vmem:[#allocation2 + $0x328] sm:$0xff] %vm7136_vm2, %v1517_v57  ;;  %v1519_v3 = vpack.c.bf16 %v1127_v59, %v1126_v58  ;;  %v1129_v4 = vmax.f32 %v633_v60, 0.0  ;;  %v636_v5 = vunpack.c.l.bf16 %v282_v56  ;;  %v637_v6 = vunpack.c.h.bf16 %v282_v56  ;;  %v293_v60 = vld [vmem:[%s7121_s20 + $0x3a8] sm:$0xff] }
  0x92   : > { %1769 = vst.msk [vmem:[#allocation2 + $0x330] sm:$0xff] %vm7136_vm2, %v1518_v62  ;;  %v1130_v7 = vmax.f32 %v634_v0, 0.0  ;;  %v1131_v8 = vmax.f32 %v635_v1, 0.0  ;;  %v638_v9 = vunpack.c.l.bf16 %v283_v61  ;;  %v639_v10 = vunpack.c.h.bf16 %v283_v61  ;;  %v294_v1 = vld [vmem:[%s7121_s20 + $0x3b0] sm:$0xff] }
  0x93   : > { %1770 = vst.msk [vmem:[#allocation2 + $0x338] sm:$0xff] %vm7136_vm2, %v1519_v3  ;;  %v1520_v12 = vpack.c.bf16 %v1129_v4, %v1128_v63  ;;  %v1132_v13 = vmax.f32 %v636_v5, 0.0  ;;  %v1133_v14 = vmax.f32 %v637_v6, 0.0  ;;  %v640_v15 = vunpack.c.l.bf16 %v284_v2  ;;  %v295_v6 = vld [vmem:[%s7121_s20 + $0x3b8] sm:$0xff] }
  0x94   : > { %v1521_v17 = vpack.c.bf16 %v1131_v8, %v1130_v7  ;;  %v1134_v19 = vmax.f32 %v638_v9, 0.0  ;;  %v1135_v20 = vmax.f32 %v639_v10, 0.0  ;;  %v641_v21 = vunpack.c.h.bf16 %v284_v2 }
  0x95   : > { %1771 = vst.msk [vmem:[#allocation2 + $0x340] sm:$0xff] %vm7136_vm2, %v1520_v12  ;;  %v1522_v23 = vpack.c.bf16 %v1133_v14, %v1132_v13  ;;  %v1136_v24 = vmax.f32 %v640_v15, 0.0  ;;  %v642_v25 = vunpack.c.l.bf16 %v285_v11  ;;  %v643_v26 = vunpack.c.h.bf16 %v285_v11  ;;  %v296_v11 = vld [vmem:[%s7121_s20 + $0x3c0] sm:$0xff] }
  0x96   : > { %1772 = vst.msk [vmem:[#allocation2 + $0x348] sm:$0xff] %vm7136_vm2, %v1521_v17  ;;  %v1523_v28 = vpack.c.bf16 %v1135_v20, %v1134_v19  ;;  %v1137_v29 = vmax.f32 %v641_v21, 0.0  ;;  %v644_v30 = vunpack.c.l.bf16 %v286_v16  ;;  %v645_v31 = vunpack.c.h.bf16 %v286_v16  ;;  %v297_v21 = vld [vmem:[%s7121_s20 + $0x3c8] sm:$0xff] }
  0x97   : > { %1773 = vst.msk [vmem:[#allocation2 + $0x350] sm:$0xff] %vm7136_vm2, %v1522_v23  ;;  %v1138_v32 = vmax.f32 %v642_v25, 0.0  ;;  %v1139_v33 = vmax.f32 %v643_v26, 0.0  ;;  %v646_v34 = vunpack.c.l.bf16 %v287_v22  ;;  %v647_v35 = vunpack.c.h.bf16 %v287_v22  ;;  %v298_v26 = vld [vmem:[%s7121_s20 + $0x3d0] sm:$0xff] }
  0x98   : > { %1774 = vst.msk [vmem:[#allocation2 + $0x358] sm:$0xff] %vm7136_vm2, %v1523_v28  ;;  %v1524_v37 = vpack.c.bf16 %v1137_v29, %v1136_v24  ;;  %v1140_v38 = vmax.f32 %v644_v30, 0.0  ;;  %v1141_v39 = vmax.f32 %v645_v31, 0.0  ;;  %v648_v40 = vunpack.c.l.bf16 %v288_v27  ;;  %v299_v31 = vld [vmem:[%s7121_s20 + $0x3d8] sm:$0xff] }
  0x99   : > { %v1525_v42 = vpack.c.bf16 %v1139_v33, %v1138_v32  ;;  %v1142_v43 = vmax.f32 %v646_v34, 0.0  ;;  %v1143_v44 = vmax.f32 %v647_v35, 0.0  ;;  %v649_v45 = vunpack.c.h.bf16 %v288_v27 }
  0x9a   : > { %1775 = vst.msk [vmem:[#allocation2 + $0x360] sm:$0xff] %vm7136_vm2, %v1524_v37  ;;  %v1526_v47 = vpack.c.bf16 %v1141_v39, %v1140_v38  ;;  %v1144_v48 = vmax.f32 %v648_v40, 0.0  ;;  %v650_v49 = vunpack.c.l.bf16 %v289_v36  ;;  %v651_v50 = vunpack.c.h.bf16 %v289_v36  ;;  %v300_v36 = vld [vmem:[%s7121_s20 + $0x3e0] sm:$0xff] }
  0x9b   : > { %1776 = vst.msk [vmem:[#allocation2 + $0x368] sm:$0xff] %vm7136_vm2, %v1525_v42  ;;  %v1527_v52 = vpack.c.bf16 %v1143_v44, %v1142_v43  ;;  %v1145_v53 = vmax.f32 %v649_v45, 0.0  ;;  %v652_v54 = vunpack.c.l.bf16 %v290_v41  ;;  %v653_v55 = vunpack.c.h.bf16 %v290_v41  ;;  %v301_v45 = vld [vmem:[%s7121_s20 + $0x3e8] sm:$0xff] }
  0x9c   : > { %1777 = vst.msk [vmem:[#allocation2 + $0x370] sm:$0xff] %vm7136_vm2, %v1526_v47  ;;  %v1146_v56 = vmax.f32 %v650_v49, 0.0  ;;  %v1147_v57 = vmax.f32 %v651_v50, 0.0  ;;  %v654_v58 = vunpack.c.l.bf16 %v291_v46  ;;  %v655_v59 = vunpack.c.h.bf16 %v291_v46  ;;  %v302_v50 = vld [vmem:[%s7121_s20 + $0x3f0] sm:$0xff] }
  0x9d   : > { %1778 = vst.msk [vmem:[#allocation2 + $0x378] sm:$0xff] %vm7136_vm2, %v1527_v52  ;;  %v1528_v61 = vpack.c.bf16 %v1145_v53, %v1144_v48  ;;  %v1148_v62 = vmax.f32 %v652_v54, 0.0  ;;  %v1149_v63 = vmax.f32 %v653_v55, 0.0  ;;  %v656_v0 = vunpack.c.l.bf16 %v292_v51  ;;  %v303_v55 = vld [vmem:[%s7121_s20 + $0x3f8] sm:$0xff] }
  0x9e   : > { %v1529_v2 = vpack.c.bf16 %v1147_v57, %v1146_v56  ;;  %v1150_v3 = vmax.f32 %v654_v58, 0.0  ;;  %v1151_v4 = vmax.f32 %v655_v59, 0.0  ;;  %v657_v5 = vunpack.c.h.bf16 %v292_v51 }
  0x9f   : > { %1779 = vst.msk [vmem:[#allocation2 + $0x380] sm:$0xff] %vm7136_vm2, %v1528_v61  ;;  %v1530_v7 = vpack.c.bf16 %v1149_v63, %v1148_v62  ;;  %v1152_v8 = vmax.f32 %v656_v0, 0.0  ;;  %v658_v9 = vunpack.c.l.bf16 %v293_v60  ;;  %v659_v10 = vunpack.c.h.bf16 %v293_v60  ;;  %v304_v60 = vld [vmem:[%s7121_s20 + $0x400] sm:$0xff] }
  0xa0   : > { %1780 = vst.msk [vmem:[#allocation2 + $0x388] sm:$0xff] %vm7136_vm2, %v1529_v2  ;;  %v1531_v12 = vpack.c.bf16 %v1151_v4, %v1150_v3  ;;  %v1153_v13 = vmax.f32 %v657_v5, 0.0  ;;  %v660_v14 = vunpack.c.l.bf16 %v294_v1  ;;  %v661_v15 = vunpack.c.h.bf16 %v294_v1  ;;  %v305_v5 = vld [vmem:[%s7121_s20 + $0x408] sm:$0xff] }
  0xa1   : > { %1781 = vst.msk [vmem:[#allocation2 + $0x390] sm:$0xff] %vm7136_vm2, %v1530_v7  ;;  %v1154_v16 = vmax.f32 %v658_v9, 0.0  ;;  %v1155_v17 = vmax.f32 %v659_v10, 0.0  ;;  %v662_v19 = vunpack.c.l.bf16 %v295_v6  ;;  %v663_v20 = vunpack.c.h.bf16 %v295_v6  ;;  %v306_v10 = vld [vmem:[%s7121_s20 + $0x410] sm:$0xff] }
  0xa2   : > { %1782 = vst.msk [vmem:[#allocation2 + $0x398] sm:$0xff] %vm7136_vm2, %v1531_v12  ;;  %v1532_v22 = vpack.c.bf16 %v1153_v13, %v1152_v8  ;;  %v1156_v23 = vmax.f32 %v660_v14, 0.0  ;;  %v1157_v24 = vmax.f32 %v661_v15, 0.0  ;;  %v664_v25 = vunpack.c.l.bf16 %v296_v11  ;;  %v307_v15 = vld [vmem:[%s7121_s20 + $0x418] sm:$0xff] }
  0xa3   : > { %v1533_v27 = vpack.c.bf16 %v1155_v17, %v1154_v16  ;;  %v1158_v28 = vmax.f32 %v662_v19, 0.0  ;;  %v1159_v29 = vmax.f32 %v663_v20, 0.0  ;;  %v665_v30 = vunpack.c.h.bf16 %v296_v11 }
  0xa4   : > { %1783 = vst.msk [vmem:[#allocation2 + $0x3a0] sm:$0xff] %vm7136_vm2, %v1532_v22  ;;  %v1534_v32 = vpack.c.bf16 %v1157_v24, %v1156_v23  ;;  %v1160_v33 = vmax.f32 %v664_v25, 0.0  ;;  %v666_v34 = vunpack.c.l.bf16 %v297_v21  ;;  %v667_v35 = vunpack.c.h.bf16 %v297_v21  ;;  %v308_v21 = vld [vmem:[%s7121_s20 + $0x420] sm:$0xff] }
  0xa5   : > { %1784 = vst.msk [vmem:[#allocation2 + $0x3a8] sm:$0xff] %vm7136_vm2, %v1533_v27  ;;  %v1535_v37 = vpack.c.bf16 %v1159_v29, %v1158_v28  ;;  %v1161_v38 = vmax.f32 %v665_v30, 0.0  ;;  %v668_v39 = vunpack.c.l.bf16 %v298_v26  ;;  %v669_v40 = vunpack.c.h.bf16 %v298_v26  ;;  %v309_v30 = vld [vmem:[%s7121_s20 + $0x428] sm:$0xff] }
  0xa6   : > { %1785 = vst.msk [vmem:[#allocation2 + $0x3b0] sm:$0xff] %vm7136_vm2, %v1534_v32  ;;  %v1162_v41 = vmax.f32 %v666_v34, 0.0  ;;  %v1163_v42 = vmax.f32 %v667_v35, 0.0  ;;  %v670_v43 = vunpack.c.l.bf16 %v299_v31  ;;  %v671_v44 = vunpack.c.h.bf16 %v299_v31  ;;  %v310_v35 = vld [vmem:[%s7121_s20 + $0x430] sm:$0xff] }
  0xa7   : > { %1786 = vst.msk [vmem:[#allocation2 + $0x3b8] sm:$0xff] %vm7136_vm2, %v1535_v37  ;;  %v1536_v46 = vpack.c.bf16 %v1161_v38, %v1160_v33  ;;  %v1164_v47 = vmax.f32 %v668_v39, 0.0  ;;  %v1165_v48 = vmax.f32 %v669_v40, 0.0  ;;  %v672_v49 = vunpack.c.l.bf16 %v300_v36  ;;  %v311_v40 = vld [vmem:[%s7121_s20 + $0x438] sm:$0xff] }
  0xa8   : > { %v1537_v51 = vpack.c.bf16 %v1163_v42, %v1162_v41  ;;  %v1166_v52 = vmax.f32 %v670_v43, 0.0  ;;  %v1167_v53 = vmax.f32 %v671_v44, 0.0  ;;  %v673_v54 = vunpack.c.h.bf16 %v300_v36 }
  0xa9   : > { %1787 = vst.msk [vmem:[#allocation2 + $0x3c0] sm:$0xff] %vm7136_vm2, %v1536_v46  ;;  %v1538_v56 = vpack.c.bf16 %v1165_v48, %v1164_v47  ;;  %v1168_v57 = vmax.f32 %v672_v49, 0.0  ;;  %v674_v58 = vunpack.c.l.bf16 %v301_v45  ;;  %v675_v59 = vunpack.c.h.bf16 %v301_v45  ;;  %v312_v45 = vld [vmem:[%s7121_s20 + $0x440] sm:$0xff] }
  0xaa   : > { %1788 = vst.msk [vmem:[#allocation2 + $0x3c8] sm:$0xff] %vm7136_vm2, %v1537_v51  ;;  %v1539_v61 = vpack.c.bf16 %v1167_v53, %v1166_v52  ;;  %v1169_v62 = vmax.f32 %v673_v54, 0.0  ;;  %v676_v63 = vunpack.c.l.bf16 %v302_v50  ;;  %v677_v0 = vunpack.c.h.bf16 %v302_v50  ;;  %v313_v54 = vld [vmem:[%s7121_s20 + $0x448] sm:$0xff] }
  0xab   : > { %1789 = vst.msk [vmem:[#allocation2 + $0x3d0] sm:$0xff] %vm7136_vm2, %v1538_v56  ;;  %v1170_v1 = vmax.f32 %v674_v58, 0.0  ;;  %v1171_v2 = vmax.f32 %v675_v59, 0.0  ;;  %v678_v3 = vunpack.c.l.bf16 %v303_v55  ;;  %v679_v4 = vunpack.c.h.bf16 %v303_v55  ;;  %v314_v59 = vld [vmem:[%s7121_s20 + $0x450] sm:$0xff] }
  0xac   : > { %1790 = vst.msk [vmem:[#allocation2 + $0x3d8] sm:$0xff] %vm7136_vm2, %v1539_v61  ;;  %v1540_v6 = vpack.c.bf16 %v1169_v62, %v1168_v57  ;;  %v1172_v7 = vmax.f32 %v676_v63, 0.0  ;;  %v1173_v8 = vmax.f32 %v677_v0, 0.0  ;;  %v680_v9 = vunpack.c.l.bf16 %v304_v60  ;;  %v315_v0 = vld [vmem:[%s7121_s20 + $0x458] sm:$0xff] }
  0xad   : > { %v1541_v11 = vpack.c.bf16 %v1171_v2, %v1170_v1  ;;  %v1174_v12 = vmax.f32 %v678_v3, 0.0  ;;  %v1175_v13 = vmax.f32 %v679_v4, 0.0  ;;  %v681_v14 = vunpack.c.h.bf16 %v304_v60 }
  0xae   : > { %1791 = vst.msk [vmem:[#allocation2 + $0x3e0] sm:$0xff] %vm7136_vm2, %v1540_v6  ;;  %v1542_v16 = vpack.c.bf16 %v1173_v8, %v1172_v7  ;;  %v1176_v17 = vmax.f32 %v680_v9, 0.0  ;;  %v682_v19 = vunpack.c.l.bf16 %v305_v5  ;;  %v683_v20 = vunpack.c.h.bf16 %v305_v5  ;;  %v316_v5 = vld [vmem:[%s7121_s20 + $0x460] sm:$0xff] }
  0xaf   : > { %1792 = vst.msk [vmem:[#allocation2 + $0x3e8] sm:$0xff] %vm7136_vm2, %v1541_v11  ;;  %v1543_v22 = vpack.c.bf16 %v1175_v13, %v1174_v12  ;;  %v1177_v23 = vmax.f32 %v681_v14, 0.0  ;;  %v684_v24 = vunpack.c.l.bf16 %v306_v10  ;;  %v685_v25 = vunpack.c.h.bf16 %v306_v10  ;;  %v317_v14 = vld [vmem:[%s7121_s20 + $0x468] sm:$0xff] }
  0xb0   : > { %1793 = vst.msk [vmem:[#allocation2 + $0x3f0] sm:$0xff] %vm7136_vm2, %v1542_v16  ;;  %v1178_v26 = vmax.f32 %v682_v19, 0.0  ;;  %v1179_v27 = vmax.f32 %v683_v20, 0.0  ;;  %v686_v28 = vunpack.c.l.bf16 %v307_v15  ;;  %v687_v29 = vunpack.c.h.bf16 %v307_v15  ;;  %v318_v20 = vld [vmem:[%s7121_s20 + $0x470] sm:$0xff] }
  0xb1   : > { %1794 = vst.msk [vmem:[#allocation2 + $0x3f8] sm:$0xff] %vm7136_vm2, %v1543_v22  ;;  %v1544_v31 = vpack.c.bf16 %v1177_v23, %v1176_v17  ;;  %v1180_v32 = vmax.f32 %v684_v24, 0.0  ;;  %v1181_v33 = vmax.f32 %v685_v25, 0.0  ;;  %v688_v34 = vunpack.c.l.bf16 %v308_v21  ;;  %v319_v25 = vld [vmem:[%s7121_s20 + $0x478] sm:$0xff] }
  0xb2   : > { %v1545_v36 = vpack.c.bf16 %v1179_v27, %v1178_v26  ;;  %v1182_v37 = vmax.f32 %v686_v28, 0.0  ;;  %v1183_v38 = vmax.f32 %v687_v29, 0.0  ;;  %v689_v39 = vunpack.c.h.bf16 %v308_v21 }
  0xb3   : > { %1795 = vst.msk [vmem:[#allocation2 + $0x400] sm:$0xff] %vm7136_vm2, %v1544_v31  ;;  %v1546_v41 = vpack.c.bf16 %v1181_v33, %v1180_v32  ;;  %v1184_v42 = vmax.f32 %v688_v34, 0.0  ;;  %v690_v43 = vunpack.c.l.bf16 %v309_v30  ;;  %v691_v44 = vunpack.c.h.bf16 %v309_v30  ;;  %v320_v30 = vld [vmem:[%s7121_s20 + $0x480] sm:$0xff] }
  0xb4   : > { %1796 = vst.msk [vmem:[#allocation2 + $0x408] sm:$0xff] %vm7136_vm2, %v1545_v36  ;;  %v1547_v46 = vpack.c.bf16 %v1183_v38, %v1182_v37  ;;  %v1185_v47 = vmax.f32 %v689_v39, 0.0  ;;  %v692_v48 = vunpack.c.l.bf16 %v310_v35  ;;  %v693_v49 = vunpack.c.h.bf16 %v310_v35  ;;  %v321_v39 = vld [vmem:[%s7121_s20 + $0x488] sm:$0xff] }
  0xb5   : > { %1797 = vst.msk [vmem:[#allocation2 + $0x410] sm:$0xff] %vm7136_vm2, %v1546_v41  ;;  %v1186_v50 = vmax.f32 %v690_v43, 0.0  ;;  %v1187_v51 = vmax.f32 %v691_v44, 0.0  ;;  %v694_v52 = vunpack.c.l.bf16 %v311_v40  ;;  %v695_v53 = vunpack.c.h.bf16 %v311_v40  ;;  %v322_v44 = vld [vmem:[%s7121_s20 + $0x490] sm:$0xff] }
  0xb6   : > { %1798 = vst.msk [vmem:[#allocation2 + $0x418] sm:$0xff] %vm7136_vm2, %v1547_v46  ;;  %v1548_v55 = vpack.c.bf16 %v1185_v47, %v1184_v42  ;;  %v1188_v56 = vmax.f32 %v692_v48, 0.0  ;;  %v1189_v57 = vmax.f32 %v693_v49, 0.0  ;;  %v696_v58 = vunpack.c.l.bf16 %v312_v45  ;;  %v323_v49 = vld [vmem:[%s7121_s20 + $0x498] sm:$0xff] }
  0xb7   : > { %v1549_v60 = vpack.c.bf16 %v1187_v51, %v1186_v50  ;;  %v1190_v61 = vmax.f32 %v694_v52, 0.0  ;;  %v1191_v62 = vmax.f32 %v695_v53, 0.0  ;;  %v697_v63 = vunpack.c.h.bf16 %v312_v45 }
  0xb8   : > { %1799 = vst.msk [vmem:[#allocation2 + $0x420] sm:$0xff] %vm7136_vm2, %v1548_v55  ;;  %v1550_v1 = vpack.c.bf16 %v1189_v57, %v1188_v56  ;;  %v1192_v2 = vmax.f32 %v696_v58, 0.0  ;;  %v698_v3 = vunpack.c.l.bf16 %v313_v54  ;;  %v699_v4 = vunpack.c.h.bf16 %v313_v54  ;;  %v324_v54 = vld [vmem:[%s7121_s20 + $0x4a0] sm:$0xff] }
  0xb9   : > { %1800 = vst.msk [vmem:[#allocation2 + $0x428] sm:$0xff] %vm7136_vm2, %v1549_v60  ;;  %v1551_v6 = vpack.c.bf16 %v1191_v62, %v1190_v61  ;;  %v1193_v7 = vmax.f32 %v697_v63, 0.0  ;;  %v700_v8 = vunpack.c.l.bf16 %v314_v59  ;;  %v701_v9 = vunpack.c.h.bf16 %v314_v59  ;;  %v325_v63 = vld [vmem:[%s7121_s20 + $0x4a8] sm:$0xff] }
  0xba   : > { %1801 = vst.msk [vmem:[#allocation2 + $0x430] sm:$0xff] %vm7136_vm2, %v1550_v1  ;;  %v1194_v10 = vmax.f32 %v698_v3, 0.0  ;;  %v1195_v11 = vmax.f32 %v699_v4, 0.0  ;;  %v702_v12 = vunpack.c.l.bf16 %v315_v0  ;;  %v703_v13 = vunpack.c.h.bf16 %v315_v0  ;;  %v326_v4 = vld [vmem:[%s7121_s20 + $0x4b0] sm:$0xff] }
  0xbb   : > { %1802 = vst.msk [vmem:[#allocation2 + $0x438] sm:$0xff] %vm7136_vm2, %v1551_v6  ;;  %v1552_v15 = vpack.c.bf16 %v1193_v7, %v1192_v2  ;;  %v1196_v16 = vmax.f32 %v700_v8, 0.0  ;;  %v1197_v17 = vmax.f32 %v701_v9, 0.0  ;;  %v704_v19 = vunpack.c.l.bf16 %v316_v5  ;;  %v327_v9 = vld [vmem:[%s7121_s20 + $0x4b8] sm:$0xff] }
  0xbc   : > { %v1553_v21 = vpack.c.bf16 %v1195_v11, %v1194_v10  ;;  %v1198_v22 = vmax.f32 %v702_v12, 0.0  ;;  %v1199_v23 = vmax.f32 %v703_v13, 0.0  ;;  %v705_v24 = vunpack.c.h.bf16 %v316_v5 }
  0xbd   : > { %1803 = vst.msk [vmem:[#allocation2 + $0x440] sm:$0xff] %vm7136_vm2, %v1552_v15  ;;  %v1554_v26 = vpack.c.bf16 %v1197_v17, %v1196_v16  ;;  %v1200_v27 = vmax.f32 %v704_v19, 0.0  ;;  %v706_v28 = vunpack.c.l.bf16 %v317_v14  ;;  %v707_v29 = vunpack.c.h.bf16 %v317_v14  ;;  %v328_v14 = vld [vmem:[%s7121_s20 + $0x4c0] sm:$0xff] }
  0xbe   : > { %1804 = vst.msk [vmem:[#allocation2 + $0x448] sm:$0xff] %vm7136_vm2, %v1553_v21  ;;  %v1555_v31 = vpack.c.bf16 %v1199_v23, %v1198_v22  ;;  %v1201_v32 = vmax.f32 %v705_v24, 0.0  ;;  %v708_v33 = vunpack.c.l.bf16 %v318_v20  ;;  %v709_v34 = vunpack.c.h.bf16 %v318_v20  ;;  %v329_v24 = vld [vmem:[%s7121_s20 + $0x4c8] sm:$0xff] }
  0xbf   : > { %1805 = vst.msk [vmem:[#allocation2 + $0x450] sm:$0xff] %vm7136_vm2, %v1554_v26  ;;  %v1202_v35 = vmax.f32 %v706_v28, 0.0  ;;  %v1203_v36 = vmax.f32 %v707_v29, 0.0  ;;  %v710_v37 = vunpack.c.l.bf16 %v319_v25  ;;  %v711_v38 = vunpack.c.h.bf16 %v319_v25  ;;  %v330_v29 = vld [vmem:[%s7121_s20 + $0x4d0] sm:$0xff] }
  0xc0   : > { %1806 = vst.msk [vmem:[#allocation2 + $0x458] sm:$0xff] %vm7136_vm2, %v1555_v31  ;;  %v1556_v40 = vpack.c.bf16 %v1201_v32, %v1200_v27  ;;  %v1204_v41 = vmax.f32 %v708_v33, 0.0  ;;  %v1205_v42 = vmax.f32 %v709_v34, 0.0  ;;  %v712_v43 = vunpack.c.l.bf16 %v320_v30  ;;  %v331_v34 = vld [vmem:[%s7121_s20 + $0x4d8] sm:$0xff] }
  0xc1   : > { %v1557_v45 = vpack.c.bf16 %v1203_v36, %v1202_v35  ;;  %v1206_v46 = vmax.f32 %v710_v37, 0.0  ;;  %v1207_v47 = vmax.f32 %v711_v38, 0.0  ;;  %v713_v48 = vunpack.c.h.bf16 %v320_v30 }
  0xc2   : > { %1807 = vst.msk [vmem:[#allocation2 + $0x460] sm:$0xff] %vm7136_vm2, %v1556_v40  ;;  %v1558_v50 = vpack.c.bf16 %v1205_v42, %v1204_v41  ;;  %v1208_v51 = vmax.f32 %v712_v43, 0.0  ;;  %v714_v52 = vunpack.c.l.bf16 %v321_v39  ;;  %v715_v53 = vunpack.c.h.bf16 %v321_v39  ;;  %v332_v39 = vld [vmem:[%s7121_s20 + $0x4e0] sm:$0xff] }
  0xc3   : > { %1808 = vst.msk [vmem:[#allocation2 + $0x468] sm:$0xff] %vm7136_vm2, %v1557_v45  ;;  %v1559_v55 = vpack.c.bf16 %v1207_v47, %v1206_v46  ;;  %v1209_v56 = vmax.f32 %v713_v48, 0.0  ;;  %v716_v57 = vunpack.c.l.bf16 %v322_v44  ;;  %v717_v58 = vunpack.c.h.bf16 %v322_v44  ;;  %v333_v48 = vld [vmem:[%s7121_s20 + $0x4e8] sm:$0xff] }
  0xc4   : > { %1809 = vst.msk [vmem:[#allocation2 + $0x470] sm:$0xff] %vm7136_vm2, %v1558_v50  ;;  %v1210_v59 = vmax.f32 %v714_v52, 0.0  ;;  %v1211_v60 = vmax.f32 %v715_v53, 0.0  ;;  %v718_v61 = vunpack.c.l.bf16 %v323_v49  ;;  %v719_v62 = vunpack.c.h.bf16 %v323_v49  ;;  %v334_v53 = vld [vmem:[%s7121_s20 + $0x4f0] sm:$0xff] }
  0xc5   : > { %1810 = vst.msk [vmem:[#allocation2 + $0x478] sm:$0xff] %vm7136_vm2, %v1559_v55  ;;  %v1560_v0 = vpack.c.bf16 %v1209_v56, %v1208_v51  ;;  %v1212_v1 = vmax.f32 %v716_v57, 0.0  ;;  %v1213_v2 = vmax.f32 %v717_v58, 0.0  ;;  %v720_v3 = vunpack.c.l.bf16 %v324_v54  ;;  %v335_v58 = vld [vmem:[%s7121_s20 + $0x4f8] sm:$0xff] }
  0xc6   : > { %v1561_v5 = vpack.c.bf16 %v1211_v60, %v1210_v59  ;;  %v1214_v6 = vmax.f32 %v718_v61, 0.0  ;;  %v1215_v7 = vmax.f32 %v719_v62, 0.0  ;;  %v721_v8 = vunpack.c.h.bf16 %v324_v54 }
  0xc7   : > { %1811 = vst.msk [vmem:[#allocation2 + $0x480] sm:$0xff] %vm7136_vm2, %v1560_v0  ;;  %v1562_v10 = vpack.c.bf16 %v1213_v2, %v1212_v1  ;;  %v1216_v11 = vmax.f32 %v720_v3, 0.0  ;;  %v722_v12 = vunpack.c.l.bf16 %v325_v63  ;;  %v723_v13 = vunpack.c.h.bf16 %v325_v63  ;;  %v336_v63 = vld [vmem:[%s7121_s20 + $0x500] sm:$0xff] }
  0xc8   : > { %1812 = vst.msk [vmem:[#allocation2 + $0x488] sm:$0xff] %vm7136_vm2, %v1561_v5  ;;  %v1563_v15 = vpack.c.bf16 %v1215_v7, %v1214_v6  ;;  %v1217_v16 = vmax.f32 %v721_v8, 0.0  ;;  %v724_v17 = vunpack.c.l.bf16 %v326_v4  ;;  %v725_v19 = vunpack.c.h.bf16 %v326_v4  ;;  %v337_v8 = vld [vmem:[%s7121_s20 + $0x508] sm:$0xff] }
  0xc9   : > { %1813 = vst.msk [vmem:[#allocation2 + $0x490] sm:$0xff] %vm7136_vm2, %v1562_v10  ;;  %v1218_v20 = vmax.f32 %v722_v12, 0.0  ;;  %v1219_v21 = vmax.f32 %v723_v13, 0.0  ;;  %v726_v22 = vunpack.c.l.bf16 %v327_v9  ;;  %v727_v23 = vunpack.c.h.bf16 %v327_v9  ;;  %v338_v13 = vld [vmem:[%s7121_s20 + $0x510] sm:$0xff] }
  0xca   : > { %1814 = vst.msk [vmem:[#allocation2 + $0x498] sm:$0xff] %vm7136_vm2, %v1563_v15  ;;  %v1564_v25 = vpack.c.bf16 %v1217_v16, %v1216_v11  ;;  %v1220_v26 = vmax.f32 %v724_v17, 0.0  ;;  %v1221_v27 = vmax.f32 %v725_v19, 0.0  ;;  %v728_v28 = vunpack.c.l.bf16 %v328_v14  ;;  %v339_v19 = vld [vmem:[%s7121_s20 + $0x518] sm:$0xff] }
  0xcb   : > { %v1565_v30 = vpack.c.bf16 %v1219_v21, %v1218_v20  ;;  %v1222_v31 = vmax.f32 %v726_v22, 0.0  ;;  %v1223_v32 = vmax.f32 %v727_v23, 0.0  ;;  %v729_v33 = vunpack.c.h.bf16 %v328_v14 }
  0xcc   : > { %1815 = vst.msk [vmem:[#allocation2 + $0x4a0] sm:$0xff] %vm7136_vm2, %v1564_v25  ;;  %v1566_v35 = vpack.c.bf16 %v1221_v27, %v1220_v26  ;;  %v1224_v36 = vmax.f32 %v728_v28, 0.0  ;;  %v730_v37 = vunpack.c.l.bf16 %v329_v24  ;;  %v731_v38 = vunpack.c.h.bf16 %v329_v24  ;;  %v340_v24 = vld [vmem:[%s7121_s20 + $0x520] sm:$0xff] }
  0xcd   : > { %1816 = vst.msk [vmem:[#allocation2 + $0x4a8] sm:$0xff] %vm7136_vm2, %v1565_v30  ;;  %v1567_v40 = vpack.c.bf16 %v1223_v32, %v1222_v31  ;;  %v1225_v41 = vmax.f32 %v729_v33, 0.0  ;;  %v732_v42 = vunpack.c.l.bf16 %v330_v29  ;;  %v733_v43 = vunpack.c.h.bf16 %v330_v29  ;;  %v341_v33 = vld [vmem:[%s7121_s20 + $0x528] sm:$0xff] }
  0xce   : > { %1817 = vst.msk [vmem:[#allocation2 + $0x4b0] sm:$0xff] %vm7136_vm2, %v1566_v35  ;;  %v1226_v44 = vmax.f32 %v730_v37, 0.0  ;;  %v1227_v45 = vmax.f32 %v731_v38, 0.0  ;;  %v734_v46 = vunpack.c.l.bf16 %v331_v34  ;;  %v735_v47 = vunpack.c.h.bf16 %v331_v34  ;;  %v342_v38 = vld [vmem:[%s7121_s20 + $0x530] sm:$0xff] }
  0xcf   : > { %1818 = vst.msk [vmem:[#allocation2 + $0x4b8] sm:$0xff] %vm7136_vm2, %v1567_v40  ;;  %v1568_v49 = vpack.c.bf16 %v1225_v41, %v1224_v36  ;;  %v1228_v50 = vmax.f32 %v732_v42, 0.0  ;;  %v1229_v51 = vmax.f32 %v733_v43, 0.0  ;;  %v736_v52 = vunpack.c.l.bf16 %v332_v39  ;;  %v343_v43 = vld [vmem:[%s7121_s20 + $0x538] sm:$0xff] }
  0xd0   : > { %v1569_v54 = vpack.c.bf16 %v1227_v45, %v1226_v44  ;;  %v1230_v55 = vmax.f32 %v734_v46, 0.0  ;;  %v1231_v56 = vmax.f32 %v735_v47, 0.0  ;;  %v737_v57 = vunpack.c.h.bf16 %v332_v39 }
  0xd1   : > { %1819 = vst.msk [vmem:[#allocation2 + $0x4c0] sm:$0xff] %vm7136_vm2, %v1568_v49  ;;  %v1570_v59 = vpack.c.bf16 %v1229_v51, %v1228_v50  ;;  %v1232_v60 = vmax.f32 %v736_v52, 0.0  ;;  %v738_v61 = vunpack.c.l.bf16 %v333_v48  ;;  %v739_v62 = vunpack.c.h.bf16 %v333_v48  ;;  %v344_v48 = vld [vmem:[%s7121_s20 + $0x540] sm:$0xff] }
  0xd2   : > { %1820 = vst.msk [vmem:[#allocation2 + $0x4c8] sm:$0xff] %vm7136_vm2, %v1569_v54  ;;  %v1571_v0 = vpack.c.bf16 %v1231_v56, %v1230_v55  ;;  %v1233_v1 = vmax.f32 %v737_v57, 0.0  ;;  %v740_v2 = vunpack.c.l.bf16 %v334_v53  ;;  %v741_v3 = vunpack.c.h.bf16 %v334_v53  ;;  %v345_v57 = vld [vmem:[%s7121_s20 + $0x548] sm:$0xff] }
  0xd3   : > { %1821 = vst.msk [vmem:[#allocation2 + $0x4d0] sm:$0xff] %vm7136_vm2, %v1570_v59  ;;  %v1234_v4 = vmax.f32 %v738_v61, 0.0  ;;  %v1235_v5 = vmax.f32 %v739_v62, 0.0  ;;  %v742_v6 = vunpack.c.l.bf16 %v335_v58  ;;  %v743_v7 = vunpack.c.h.bf16 %v335_v58  ;;  %v346_v62 = vld [vmem:[%s7121_s20 + $0x550] sm:$0xff] }
  0xd4   : > { %1822 = vst.msk [vmem:[#allocation2 + $0x4d8] sm:$0xff] %vm7136_vm2, %v1571_v0  ;;  %v1572_v9 = vpack.c.bf16 %v1233_v1, %v1232_v60  ;;  %v1236_v10 = vmax.f32 %v740_v2, 0.0  ;;  %v1237_v11 = vmax.f32 %v741_v3, 0.0  ;;  %v744_v12 = vunpack.c.l.bf16 %v336_v63  ;;  %v347_v3 = vld [vmem:[%s7121_s20 + $0x558] sm:$0xff] }
  0xd5   : > { %v1573_v14 = vpack.c.bf16 %v1235_v5, %v1234_v4  ;;  %v1238_v15 = vmax.f32 %v742_v6, 0.0  ;;  %v1239_v16 = vmax.f32 %v743_v7, 0.0  ;;  %v745_v17 = vunpack.c.h.bf16 %v336_v63 }
  0xd6   : > { %1823 = vst.msk [vmem:[#allocation2 + $0x4e0] sm:$0xff] %vm7136_vm2, %v1572_v9  ;;  %v1574_v20 = vpack.c.bf16 %v1237_v11, %v1236_v10  ;;  %v1240_v21 = vmax.f32 %v744_v12, 0.0  ;;  %v746_v22 = vunpack.c.l.bf16 %v337_v8  ;;  %v747_v23 = vunpack.c.h.bf16 %v337_v8  ;;  %v348_v8 = vld [vmem:[%s7121_s20 + $0x560] sm:$0xff] }
  0xd7   : > { %1824 = vst.msk [vmem:[#allocation2 + $0x4e8] sm:$0xff] %vm7136_vm2, %v1573_v14  ;;  %v1575_v25 = vpack.c.bf16 %v1239_v16, %v1238_v15  ;;  %v1241_v26 = vmax.f32 %v745_v17, 0.0  ;;  %v748_v27 = vunpack.c.l.bf16 %v338_v13  ;;  %v749_v28 = vunpack.c.h.bf16 %v338_v13  ;;  %v349_v17 = vld [vmem:[%s7121_s20 + $0x568] sm:$0xff] }
  0xd8   : > { %1825 = vst.msk [vmem:[#allocation2 + $0x4f0] sm:$0xff] %vm7136_vm2, %v1574_v20  ;;  %v1242_v29 = vmax.f32 %v746_v22, 0.0  ;;  %v1243_v30 = vmax.f32 %v747_v23, 0.0  ;;  %v750_v31 = vunpack.c.l.bf16 %v339_v19  ;;  %v751_v32 = vunpack.c.h.bf16 %v339_v19  ;;  %v350_v23 = vld [vmem:[%s7121_s20 + $0x570] sm:$0xff] }
  0xd9   : > { %1826 = vst.msk [vmem:[#allocation2 + $0x4f8] sm:$0xff] %vm7136_vm2, %v1575_v25  ;;  %v1576_v34 = vpack.c.bf16 %v1241_v26, %v1240_v21  ;;  %v1244_v35 = vmax.f32 %v748_v27, 0.0  ;;  %v1245_v36 = vmax.f32 %v749_v28, 0.0  ;;  %v752_v37 = vunpack.c.l.bf16 %v340_v24  ;;  %v351_v28 = vld [vmem:[%s7121_s20 + $0x578] sm:$0xff] }
  0xda   : > { %v1577_v39 = vpack.c.bf16 %v1243_v30, %v1242_v29  ;;  %v1246_v40 = vmax.f32 %v750_v31, 0.0  ;;  %v1247_v41 = vmax.f32 %v751_v32, 0.0  ;;  %v753_v42 = vunpack.c.h.bf16 %v340_v24 }
  0xdb   : > { %1827 = vst.msk [vmem:[#allocation2 + $0x500] sm:$0xff] %vm7136_vm2, %v1576_v34  ;;  %v1578_v44 = vpack.c.bf16 %v1245_v36, %v1244_v35  ;;  %v1248_v45 = vmax.f32 %v752_v37, 0.0  ;;  %v754_v46 = vunpack.c.l.bf16 %v341_v33  ;;  %v755_v47 = vunpack.c.h.bf16 %v341_v33  ;;  %v352_v33 = vld [vmem:[%s7121_s20 + $0x580] sm:$0xff] }
  0xdc   : > { %1828 = vst.msk [vmem:[#allocation2 + $0x508] sm:$0xff] %vm7136_vm2, %v1577_v39  ;;  %v1579_v49 = vpack.c.bf16 %v1247_v41, %v1246_v40  ;;  %v1249_v50 = vmax.f32 %v753_v42, 0.0  ;;  %v756_v51 = vunpack.c.l.bf16 %v342_v38  ;;  %v757_v52 = vunpack.c.h.bf16 %v342_v38  ;;  %v353_v42 = vld [vmem:[%s7121_s20 + $0x588] sm:$0xff] }
  0xdd   : > { %1829 = vst.msk [vmem:[#allocation2 + $0x510] sm:$0xff] %vm7136_vm2, %v1578_v44  ;;  %v1250_v53 = vmax.f32 %v754_v46, 0.0  ;;  %v1251_v54 = vmax.f32 %v755_v47, 0.0  ;;  %v758_v55 = vunpack.c.l.bf16 %v343_v43  ;;  %v759_v56 = vunpack.c.h.bf16 %v343_v43  ;;  %v354_v47 = vld [vmem:[%s7121_s20 + $0x590] sm:$0xff] }
  0xde   : > { %1830 = vst.msk [vmem:[#allocation2 + $0x518] sm:$0xff] %vm7136_vm2, %v1579_v49  ;;  %v1580_v58 = vpack.c.bf16 %v1249_v50, %v1248_v45  ;;  %v1252_v59 = vmax.f32 %v756_v51, 0.0  ;;  %v1253_v60 = vmax.f32 %v757_v52, 0.0  ;;  %v760_v61 = vunpack.c.l.bf16 %v344_v48  ;;  %v355_v52 = vld [vmem:[%s7121_s20 + $0x598] sm:$0xff] }
  0xdf   : > { %v1581_v63 = vpack.c.bf16 %v1251_v54, %v1250_v53  ;;  %v1254_v0 = vmax.f32 %v758_v55, 0.0  ;;  %v1255_v1 = vmax.f32 %v759_v56, 0.0  ;;  %v761_v2 = vunpack.c.h.bf16 %v344_v48 }
  0xe0   : > { %1831 = vst.msk [vmem:[#allocation2 + $0x520] sm:$0xff] %vm7136_vm2, %v1580_v58  ;;  %v1582_v4 = vpack.c.bf16 %v1253_v60, %v1252_v59  ;;  %v1256_v5 = vmax.f32 %v760_v61, 0.0  ;;  %v762_v6 = vunpack.c.l.bf16 %v345_v57  ;;  %v763_v7 = vunpack.c.h.bf16 %v345_v57  ;;  %v356_v57 = vld [vmem:[%s7121_s20 + $0x5a0] sm:$0xff] }
  0xe1   : > { %1832 = vst.msk [vmem:[#allocation2 + $0x528] sm:$0xff] %vm7136_vm2, %v1581_v63  ;;  %v1583_v9 = vpack.c.bf16 %v1255_v1, %v1254_v0  ;;  %v1257_v10 = vmax.f32 %v761_v2, 0.0  ;;  %v764_v11 = vunpack.c.l.bf16 %v346_v62  ;;  %v765_v12 = vunpack.c.h.bf16 %v346_v62  ;;  %v357_v2 = vld [vmem:[%s7121_s20 + $0x5a8] sm:$0xff] }
  0xe2   : > { %1833 = vst.msk [vmem:[#allocation2 + $0x530] sm:$0xff] %vm7136_vm2, %v1582_v4  ;;  %v1258_v13 = vmax.f32 %v762_v6, 0.0  ;;  %v1259_v14 = vmax.f32 %v763_v7, 0.0  ;;  %v766_v15 = vunpack.c.l.bf16 %v347_v3  ;;  %v767_v16 = vunpack.c.h.bf16 %v347_v3  ;;  %v358_v7 = vld [vmem:[%s7121_s20 + $0x5b0] sm:$0xff] }
  0xe3   : > { %1834 = vst.msk [vmem:[#allocation2 + $0x538] sm:$0xff] %vm7136_vm2, %v1583_v9  ;;  %v1584_v19 = vpack.c.bf16 %v1257_v10, %v1256_v5  ;;  %v1260_v20 = vmax.f32 %v764_v11, 0.0  ;;  %v1261_v21 = vmax.f32 %v765_v12, 0.0  ;;  %v768_v22 = vunpack.c.l.bf16 %v348_v8  ;;  %v359_v12 = vld [vmem:[%s7121_s20 + $0x5b8] sm:$0xff] }
  0xe4   : > { %v1585_v24 = vpack.c.bf16 %v1259_v14, %v1258_v13  ;;  %v1262_v25 = vmax.f32 %v766_v15, 0.0  ;;  %v1263_v26 = vmax.f32 %v767_v16, 0.0  ;;  %v769_v27 = vunpack.c.h.bf16 %v348_v8 }
  0xe5   : > { %1835 = vst.msk [vmem:[#allocation2 + $0x540] sm:$0xff] %vm7136_vm2, %v1584_v19  ;;  %v1586_v29 = vpack.c.bf16 %v1261_v21, %v1260_v20  ;;  %v1264_v30 = vmax.f32 %v768_v22, 0.0  ;;  %v770_v31 = vunpack.c.l.bf16 %v349_v17  ;;  %v771_v32 = vunpack.c.h.bf16 %v349_v17  ;;  %v360_v17 = vld [vmem:[%s7121_s20 + $0x5c0] sm:$0xff] }
  0xe6   : > { %1836 = vst.msk [vmem:[#allocation2 + $0x548] sm:$0xff] %vm7136_vm2, %v1585_v24  ;;  %v1587_v34 = vpack.c.bf16 %v1263_v26, %v1262_v25  ;;  %v1265_v35 = vmax.f32 %v769_v27, 0.0  ;;  %v772_v36 = vunpack.c.l.bf16 %v350_v23  ;;  %v773_v37 = vunpack.c.h.bf16 %v350_v23  ;;  %v361_v27 = vld [vmem:[%s7121_s20 + $0x5c8] sm:$0xff] }
  0xe7   : > { %1837 = vst.msk [vmem:[#allocation2 + $0x550] sm:$0xff] %vm7136_vm2, %v1586_v29  ;;  %v1266_v38 = vmax.f32 %v770_v31, 0.0  ;;  %v1267_v39 = vmax.f32 %v771_v32, 0.0  ;;  %v774_v40 = vunpack.c.l.bf16 %v351_v28  ;;  %v775_v41 = vunpack.c.h.bf16 %v351_v28  ;;  %v362_v32 = vld [vmem:[%s7121_s20 + $0x5d0] sm:$0xff] }
  0xe8   : > { %1838 = vst.msk [vmem:[#allocation2 + $0x558] sm:$0xff] %vm7136_vm2, %v1587_v34  ;;  %v1588_v43 = vpack.c.bf16 %v1265_v35, %v1264_v30  ;;  %v1268_v44 = vmax.f32 %v772_v36, 0.0  ;;  %v1269_v45 = vmax.f32 %v773_v37, 0.0  ;;  %v776_v46 = vunpack.c.l.bf16 %v352_v33  ;;  %v363_v37 = vld [vmem:[%s7121_s20 + $0x5d8] sm:$0xff] }
  0xe9   : > { %v1589_v48 = vpack.c.bf16 %v1267_v39, %v1266_v38  ;;  %v1270_v49 = vmax.f32 %v774_v40, 0.0  ;;  %v1271_v50 = vmax.f32 %v775_v41, 0.0  ;;  %v777_v51 = vunpack.c.h.bf16 %v352_v33 }
  0xea   : > { %1839 = vst.msk [vmem:[#allocation2 + $0x560] sm:$0xff] %vm7136_vm2, %v1588_v43  ;;  %v1590_v53 = vpack.c.bf16 %v1269_v45, %v1268_v44  ;;  %v1272_v54 = vmax.f32 %v776_v46, 0.0  ;;  %v778_v55 = vunpack.c.l.bf16 %v353_v42  ;;  %v779_v56 = vunpack.c.h.bf16 %v353_v42  ;;  %v364_v42 = vld [vmem:[%s7121_s20 + $0x5e0] sm:$0xff] }
  0xeb   : > { %1840 = vst.msk [vmem:[#allocation2 + $0x568] sm:$0xff] %vm7136_vm2, %v1589_v48  ;;  %v1591_v58 = vpack.c.bf16 %v1271_v50, %v1270_v49  ;;  %v1273_v59 = vmax.f32 %v777_v51, 0.0  ;;  %v780_v60 = vunpack.c.l.bf16 %v354_v47  ;;  %v781_v61 = vunpack.c.h.bf16 %v354_v47  ;;  %v365_v51 = vld [vmem:[%s7121_s20 + $0x5e8] sm:$0xff] }
  0xec   : > { %1841 = vst.msk [vmem:[#allocation2 + $0x570] sm:$0xff] %vm7136_vm2, %v1590_v53  ;;  %v1274_v62 = vmax.f32 %v778_v55, 0.0  ;;  %v1275_v63 = vmax.f32 %v779_v56, 0.0  ;;  %v782_v0 = vunpack.c.l.bf16 %v355_v52  ;;  %v783_v1 = vunpack.c.h.bf16 %v355_v52  ;;  %v366_v56 = vld [vmem:[%s7121_s20 + $0x5f0] sm:$0xff] }
  0xed   : > { %1842 = vst.msk [vmem:[#allocation2 + $0x578] sm:$0xff] %vm7136_vm2, %v1591_v58  ;;  %v1592_v3 = vpack.c.bf16 %v1273_v59, %v1272_v54  ;;  %v1276_v4 = vmax.f32 %v780_v60, 0.0  ;;  %v1277_v5 = vmax.f32 %v781_v61, 0.0  ;;  %v784_v6 = vunpack.c.l.bf16 %v356_v57  ;;  %v367_v61 = vld [vmem:[%s7121_s20 + $0x5f8] sm:$0xff] }
  0xee   : > { %v1593_v8 = vpack.c.bf16 %v1275_v63, %v1274_v62  ;;  %v1278_v9 = vmax.f32 %v782_v0, 0.0  ;;  %v1279_v10 = vmax.f32 %v783_v1, 0.0  ;;  %v785_v11 = vunpack.c.h.bf16 %v356_v57 }
  0xef   : > { %1843 = vst.msk [vmem:[#allocation2 + $0x580] sm:$0xff] %vm7136_vm2, %v1592_v3  ;;  %v1594_v13 = vpack.c.bf16 %v1277_v5, %v1276_v4  ;;  %v1280_v14 = vmax.f32 %v784_v6, 0.0  ;;  %v786_v15 = vunpack.c.l.bf16 %v357_v2  ;;  %v787_v16 = vunpack.c.h.bf16 %v357_v2  ;;  %v368_v2 = vld [vmem:[%s7121_s20 + $0x600] sm:$0xff] }
  0xf0   : > { %1844 = vst.msk [vmem:[#allocation2 + $0x588] sm:$0xff] %vm7136_vm2, %v1593_v8  ;;  %v1595_v19 = vpack.c.bf16 %v1279_v10, %v1278_v9  ;;  %v1281_v20 = vmax.f32 %v785_v11, 0.0  ;;  %v788_v21 = vunpack.c.l.bf16 %v358_v7  ;;  %v789_v22 = vunpack.c.h.bf16 %v358_v7  ;;  %v369_v11 = vld [vmem:[%s7121_s20 + $0x608] sm:$0xff] }
  0xf1   : > { %1845 = vst.msk [vmem:[#allocation2 + $0x590] sm:$0xff] %vm7136_vm2, %v1594_v13  ;;  %v1282_v23 = vmax.f32 %v786_v15, 0.0  ;;  %v1283_v24 = vmax.f32 %v787_v16, 0.0  ;;  %v790_v25 = vunpack.c.l.bf16 %v359_v12  ;;  %v791_v26 = vunpack.c.h.bf16 %v359_v12  ;;  %v370_v16 = vld [vmem:[%s7121_s20 + $0x610] sm:$0xff] }
  0xf2   : > { %1846 = vst.msk [vmem:[#allocation2 + $0x598] sm:$0xff] %vm7136_vm2, %v1595_v19  ;;  %v1596_v28 = vpack.c.bf16 %v1281_v20, %v1280_v14  ;;  %v1284_v29 = vmax.f32 %v788_v21, 0.0  ;;  %v1285_v30 = vmax.f32 %v789_v22, 0.0  ;;  %v792_v31 = vunpack.c.l.bf16 %v360_v17  ;;  %v371_v22 = vld [vmem:[%s7121_s20 + $0x618] sm:$0xff] }
  0xf3   : > { %v1597_v33 = vpack.c.bf16 %v1283_v24, %v1282_v23  ;;  %v1286_v34 = vmax.f32 %v790_v25, 0.0  ;;  %v1287_v35 = vmax.f32 %v791_v26, 0.0  ;;  %v793_v36 = vunpack.c.h.bf16 %v360_v17 }
  0xf4   : > { %1847 = vst.msk [vmem:[#allocation2 + $0x5a0] sm:$0xff] %vm7136_vm2, %v1596_v28  ;;  %v1598_v38 = vpack.c.bf16 %v1285_v30, %v1284_v29  ;;  %v1288_v39 = vmax.f32 %v792_v31, 0.0  ;;  %v794_v40 = vunpack.c.l.bf16 %v361_v27  ;;  %v795_v41 = vunpack.c.h.bf16 %v361_v27  ;;  %v372_v27 = vld [vmem:[%s7121_s20 + $0x620] sm:$0xff] }
  0xf5   : > { %1848 = vst.msk [vmem:[#allocation2 + $0x5a8] sm:$0xff] %vm7136_vm2, %v1597_v33  ;;  %v1599_v43 = vpack.c.bf16 %v1287_v35, %v1286_v34  ;;  %v1289_v44 = vmax.f32 %v793_v36, 0.0  ;;  %v796_v45 = vunpack.c.l.bf16 %v362_v32  ;;  %v797_v46 = vunpack.c.h.bf16 %v362_v32  ;;  %v373_v36 = vld [vmem:[%s7121_s20 + $0x628] sm:$0xff] }
  0xf6   : > { %1849 = vst.msk [vmem:[#allocation2 + $0x5b0] sm:$0xff] %vm7136_vm2, %v1598_v38  ;;  %v1290_v47 = vmax.f32 %v794_v40, 0.0  ;;  %v1291_v48 = vmax.f32 %v795_v41, 0.0  ;;  %v798_v49 = vunpack.c.l.bf16 %v363_v37  ;;  %v799_v50 = vunpack.c.h.bf16 %v363_v37  ;;  %v374_v41 = vld [vmem:[%s7121_s20 + $0x630] sm:$0xff] }
  0xf7   : > { %1850 = vst.msk [vmem:[#allocation2 + $0x5b8] sm:$0xff] %vm7136_vm2, %v1599_v43  ;;  %v1600_v52 = vpack.c.bf16 %v1289_v44, %v1288_v39  ;;  %v1292_v53 = vmax.f32 %v796_v45, 0.0  ;;  %v1293_v54 = vmax.f32 %v797_v46, 0.0  ;;  %v800_v55 = vunpack.c.l.bf16 %v364_v42  ;;  %v375_v46 = vld [vmem:[%s7121_s20 + $0x638] sm:$0xff] }
  0xf8   : > { %v1601_v57 = vpack.c.bf16 %v1291_v48, %v1290_v47  ;;  %v1294_v58 = vmax.f32 %v798_v49, 0.0  ;;  %v1295_v59 = vmax.f32 %v799_v50, 0.0  ;;  %v801_v60 = vunpack.c.h.bf16 %v364_v42 }
  0xf9   : > { %1851 = vst.msk [vmem:[#allocation2 + $0x5c0] sm:$0xff] %vm7136_vm2, %v1600_v52  ;;  %v1602_v62 = vpack.c.bf16 %v1293_v54, %v1292_v53  ;;  %v1296_v63 = vmax.f32 %v800_v55, 0.0  ;;  %v802_v0 = vunpack.c.l.bf16 %v365_v51  ;;  %v803_v1 = vunpack.c.h.bf16 %v365_v51  ;;  %v376_v51 = vld [vmem:[%s7121_s20 + $0x640] sm:$0xff] }
  0xfa   : > { %1852 = vst.msk [vmem:[#allocation2 + $0x5c8] sm:$0xff] %vm7136_vm2, %v1601_v57  ;;  %v1603_v3 = vpack.c.bf16 %v1295_v59, %v1294_v58  ;;  %v1297_v4 = vmax.f32 %v801_v60, 0.0  ;;  %v804_v5 = vunpack.c.l.bf16 %v366_v56  ;;  %v805_v6 = vunpack.c.h.bf16 %v366_v56  ;;  %v377_v60 = vld [vmem:[%s7121_s20 + $0x648] sm:$0xff] }
  0xfb   : > { %1853 = vst.msk [vmem:[#allocation2 + $0x5d0] sm:$0xff] %vm7136_vm2, %v1602_v62  ;;  %v1298_v7 = vmax.f32 %v802_v0, 0.0  ;;  %v1299_v8 = vmax.f32 %v803_v1, 0.0  ;;  %v806_v9 = vunpack.c.l.bf16 %v367_v61  ;;  %v807_v10 = vunpack.c.h.bf16 %v367_v61  ;;  %v378_v1 = vld [vmem:[%s7121_s20 + $0x650] sm:$0xff] }
  0xfc   : > { %1854 = vst.msk [vmem:[#allocation2 + $0x5d8] sm:$0xff] %vm7136_vm2, %v1603_v3  ;;  %v1604_v12 = vpack.c.bf16 %v1297_v4, %v1296_v63  ;;  %v1300_v13 = vmax.f32 %v804_v5, 0.0  ;;  %v1301_v14 = vmax.f32 %v805_v6, 0.0  ;;  %v808_v15 = vunpack.c.l.bf16 %v368_v2  ;;  %v379_v6 = vld [vmem:[%s7121_s20 + $0x658] sm:$0xff] }
  0xfd   : > { %v1605_v17 = vpack.c.bf16 %v1299_v8, %v1298_v7  ;;  %v1302_v19 = vmax.f32 %v806_v9, 0.0  ;;  %v1303_v20 = vmax.f32 %v807_v10, 0.0  ;;  %v809_v21 = vunpack.c.h.bf16 %v368_v2 }
  0xfe   : > { %1855 = vst.msk [vmem:[#allocation2 + $0x5e0] sm:$0xff] %vm7136_vm2, %v1604_v12  ;;  %v1606_v23 = vpack.c.bf16 %v1301_v14, %v1300_v13  ;;  %v1304_v24 = vmax.f32 %v808_v15, 0.0  ;;  %v810_v25 = vunpack.c.l.bf16 %v369_v11  ;;  %v811_v26 = vunpack.c.h.bf16 %v369_v11  ;;  %v380_v11 = vld [vmem:[%s7121_s20 + $0x660] sm:$0xff] }
  0xff   : > { %1856 = vst.msk [vmem:[#allocation2 + $0x5e8] sm:$0xff] %vm7136_vm2, %v1605_v17  ;;  %v1607_v28 = vpack.c.bf16 %v1303_v20, %v1302_v19  ;;  %v1305_v29 = vmax.f32 %v809_v21, 0.0  ;;  %v812_v30 = vunpack.c.l.bf16 %v370_v16  ;;  %v813_v31 = vunpack.c.h.bf16 %v370_v16  ;;  %v381_v21 = vld [vmem:[%s7121_s20 + $0x668] sm:$0xff] }
 0x100   : > { %1857 = vst.msk [vmem:[#allocation2 + $0x5f0] sm:$0xff] %vm7136_vm2, %v1606_v23  ;;  %v1306_v32 = vmax.f32 %v810_v25, 0.0  ;;  %v1307_v33 = vmax.f32 %v811_v26, 0.0  ;;  %v814_v34 = vunpack.c.l.bf16 %v371_v22  ;;  %v815_v35 = vunpack.c.h.bf16 %v371_v22  ;;  %v382_v26 = vld [vmem:[%s7121_s20 + $0x670] sm:$0xff] }
 0x101   : > { %1858 = vst.msk [vmem:[#allocation2 + $0x5f8] sm:$0xff] %vm7136_vm2, %v1607_v28  ;;  %v1608_v37 = vpack.c.bf16 %v1305_v29, %v1304_v24  ;;  %v1308_v38 = vmax.f32 %v812_v30, 0.0  ;;  %v1309_v39 = vmax.f32 %v813_v31, 0.0  ;;  %v816_v40 = vunpack.c.l.bf16 %v372_v27  ;;  %v383_v31 = vld [vmem:[%s7121_s20 + $0x678] sm:$0xff] }
 0x102   : > { %v1609_v42 = vpack.c.bf16 %v1307_v33, %v1306_v32  ;;  %v1310_v43 = vmax.f32 %v814_v34, 0.0  ;;  %v1311_v44 = vmax.f32 %v815_v35, 0.0  ;;  %v817_v45 = vunpack.c.h.bf16 %v372_v27 }
 0x103   : > { %1859 = vst.msk [vmem:[#allocation2 + $0x600] sm:$0xff] %vm7136_vm2, %v1608_v37  ;;  %v1610_v47 = vpack.c.bf16 %v1309_v39, %v1308_v38  ;;  %v1312_v48 = vmax.f32 %v816_v40, 0.0  ;;  %v818_v49 = vunpack.c.l.bf16 %v373_v36  ;;  %v819_v50 = vunpack.c.h.bf16 %v373_v36  ;;  %v384_v36 = vld [vmem:[%s7121_s20 + $0x680] sm:$0xff] }
 0x104   : > { %1860 = vst.msk [vmem:[#allocation2 + $0x608] sm:$0xff] %vm7136_vm2, %v1609_v42  ;;  %v1611_v52 = vpack.c.bf16 %v1311_v44, %v1310_v43  ;;  %v1313_v53 = vmax.f32 %v817_v45, 0.0  ;;  %v820_v54 = vunpack.c.l.bf16 %v374_v41  ;;  %v821_v55 = vunpack.c.h.bf16 %v374_v41  ;;  %v385_v45 = vld [vmem:[%s7121_s20 + $0x688] sm:$0xff] }
 0x105   : > { %1861 = vst.msk [vmem:[#allocation2 + $0x610] sm:$0xff] %vm7136_vm2, %v1610_v47  ;;  %v1314_v56 = vmax.f32 %v818_v49, 0.0  ;;  %v1315_v57 = vmax.f32 %v819_v50, 0.0  ;;  %v822_v58 = vunpack.c.l.bf16 %v375_v46  ;;  %v823_v59 = vunpack.c.h.bf16 %v375_v46  ;;  %v386_v50 = vld [vmem:[%s7121_s20 + $0x690] sm:$0xff] }
 0x106   : > { %1862 = vst.msk [vmem:[#allocation2 + $0x618] sm:$0xff] %vm7136_vm2, %v1611_v52  ;;  %v1612_v61 = vpack.c.bf16 %v1313_v53, %v1312_v48  ;;  %v1316_v62 = vmax.f32 %v820_v54, 0.0  ;;  %v1317_v63 = vmax.f32 %v821_v55, 0.0  ;;  %v824_v0 = vunpack.c.l.bf16 %v376_v51  ;;  %v387_v55 = vld [vmem:[%s7121_s20 + $0x698] sm:$0xff] }
 0x107   : > { %v1613_v2 = vpack.c.bf16 %v1315_v57, %v1314_v56  ;;  %v1318_v3 = vmax.f32 %v822_v58, 0.0  ;;  %v1319_v4 = vmax.f32 %v823_v59, 0.0  ;;  %v825_v5 = vunpack.c.h.bf16 %v376_v51 }
 0x108   : > { %1863 = vst.msk [vmem:[#allocation2 + $0x620] sm:$0xff] %vm7136_vm2, %v1612_v61  ;;  %v1614_v7 = vpack.c.bf16 %v1317_v63, %v1316_v62  ;;  %v1320_v8 = vmax.f32 %v824_v0, 0.0  ;;  %v826_v9 = vunpack.c.l.bf16 %v377_v60  ;;  %v827_v10 = vunpack.c.h.bf16 %v377_v60  ;;  %v388_v60 = vld [vmem:[%s7121_s20 + $0x6a0] sm:$0xff] }
 0x109   : > { %1864 = vst.msk [vmem:[#allocation2 + $0x628] sm:$0xff] %vm7136_vm2, %v1613_v2  ;;  %v1615_v12 = vpack.c.bf16 %v1319_v4, %v1318_v3  ;;  %v1321_v13 = vmax.f32 %v825_v5, 0.0  ;;  %v828_v14 = vunpack.c.l.bf16 %v378_v1  ;;  %v829_v15 = vunpack.c.h.bf16 %v378_v1  ;;  %v389_v5 = vld [vmem:[%s7121_s20 + $0x6a8] sm:$0xff] }
 0x10a   : > { %1865 = vst.msk [vmem:[#allocation2 + $0x630] sm:$0xff] %vm7136_vm2, %v1614_v7  ;;  %v1322_v16 = vmax.f32 %v826_v9, 0.0  ;;  %v1323_v17 = vmax.f32 %v827_v10, 0.0  ;;  %v830_v19 = vunpack.c.l.bf16 %v379_v6  ;;  %v831_v20 = vunpack.c.h.bf16 %v379_v6  ;;  %v390_v10 = vld [vmem:[%s7121_s20 + $0x6b0] sm:$0xff] }
 0x10b   : > { %1866 = vst.msk [vmem:[#allocation2 + $0x638] sm:$0xff] %vm7136_vm2, %v1615_v12  ;;  %v1616_v22 = vpack.c.bf16 %v1321_v13, %v1320_v8  ;;  %v1324_v23 = vmax.f32 %v828_v14, 0.0  ;;  %v1325_v24 = vmax.f32 %v829_v15, 0.0  ;;  %v832_v25 = vunpack.c.l.bf16 %v380_v11  ;;  %v391_v15 = vld [vmem:[%s7121_s20 + $0x6b8] sm:$0xff] }
 0x10c   : > { %v1617_v27 = vpack.c.bf16 %v1323_v17, %v1322_v16  ;;  %v1326_v28 = vmax.f32 %v830_v19, 0.0  ;;  %v1327_v29 = vmax.f32 %v831_v20, 0.0  ;;  %v833_v30 = vunpack.c.h.bf16 %v380_v11 }
 0x10d   : > { %1867 = vst.msk [vmem:[#allocation2 + $0x640] sm:$0xff] %vm7136_vm2, %v1616_v22  ;;  %v1618_v32 = vpack.c.bf16 %v1325_v24, %v1324_v23  ;;  %v1328_v33 = vmax.f32 %v832_v25, 0.0  ;;  %v834_v34 = vunpack.c.l.bf16 %v381_v21  ;;  %v835_v35 = vunpack.c.h.bf16 %v381_v21  ;;  %v392_v21 = vld [vmem:[%s7121_s20 + $0x6c0] sm:$0xff] }
 0x10e   : > { %1868 = vst.msk [vmem:[#allocation2 + $0x648] sm:$0xff] %vm7136_vm2, %v1617_v27  ;;  %v1619_v37 = vpack.c.bf16 %v1327_v29, %v1326_v28  ;;  %v1329_v38 = vmax.f32 %v833_v30, 0.0  ;;  %v836_v39 = vunpack.c.l.bf16 %v382_v26  ;;  %v837_v40 = vunpack.c.h.bf16 %v382_v26  ;;  %v393_v30 = vld [vmem:[%s7121_s20 + $0x6c8] sm:$0xff] }
 0x10f   : > { %1869 = vst.msk [vmem:[#allocation2 + $0x650] sm:$0xff] %vm7136_vm2, %v1618_v32  ;;  %v1330_v41 = vmax.f32 %v834_v34, 0.0  ;;  %v1331_v42 = vmax.f32 %v835_v35, 0.0  ;;  %v838_v43 = vunpack.c.l.bf16 %v383_v31  ;;  %v839_v44 = vunpack.c.h.bf16 %v383_v31  ;;  %v394_v35 = vld [vmem:[%s7121_s20 + $0x6d0] sm:$0xff] }
 0x110   : > { %1870 = vst.msk [vmem:[#allocation2 + $0x658] sm:$0xff] %vm7136_vm2, %v1619_v37  ;;  %v1620_v46 = vpack.c.bf16 %v1329_v38, %v1328_v33  ;;  %v1332_v47 = vmax.f32 %v836_v39, 0.0  ;;  %v1333_v48 = vmax.f32 %v837_v40, 0.0  ;;  %v840_v49 = vunpack.c.l.bf16 %v384_v36  ;;  %v395_v40 = vld [vmem:[%s7121_s20 + $0x6d8] sm:$0xff] }
 0x111   : > { %v1621_v51 = vpack.c.bf16 %v1331_v42, %v1330_v41  ;;  %v1334_v52 = vmax.f32 %v838_v43, 0.0  ;;  %v1335_v53 = vmax.f32 %v839_v44, 0.0  ;;  %v841_v54 = vunpack.c.h.bf16 %v384_v36 }
 0x112   : > { %1871 = vst.msk [vmem:[#allocation2 + $0x660] sm:$0xff] %vm7136_vm2, %v1620_v46  ;;  %v1622_v56 = vpack.c.bf16 %v1333_v48, %v1332_v47  ;;  %v1336_v57 = vmax.f32 %v840_v49, 0.0  ;;  %v842_v58 = vunpack.c.l.bf16 %v385_v45  ;;  %v843_v59 = vunpack.c.h.bf16 %v385_v45  ;;  %v396_v45 = vld [vmem:[%s7121_s20 + $0x6e0] sm:$0xff] }
 0x113   : > { %1872 = vst.msk [vmem:[#allocation2 + $0x668] sm:$0xff] %vm7136_vm2, %v1621_v51  ;;  %v1623_v61 = vpack.c.bf16 %v1335_v53, %v1334_v52  ;;  %v1337_v62 = vmax.f32 %v841_v54, 0.0  ;;  %v844_v63 = vunpack.c.l.bf16 %v386_v50  ;;  %v845_v0 = vunpack.c.h.bf16 %v386_v50  ;;  %v397_v54 = vld [vmem:[%s7121_s20 + $0x6e8] sm:$0xff] }
 0x114   : > { %1873 = vst.msk [vmem:[#allocation2 + $0x670] sm:$0xff] %vm7136_vm2, %v1622_v56  ;;  %v1338_v1 = vmax.f32 %v842_v58, 0.0  ;;  %v1339_v2 = vmax.f32 %v843_v59, 0.0  ;;  %v846_v3 = vunpack.c.l.bf16 %v387_v55  ;;  %v847_v4 = vunpack.c.h.bf16 %v387_v55  ;;  %v398_v59 = vld [vmem:[%s7121_s20 + $0x6f0] sm:$0xff] }
 0x115   : > { %1874 = vst.msk [vmem:[#allocation2 + $0x678] sm:$0xff] %vm7136_vm2, %v1623_v61  ;;  %v1624_v6 = vpack.c.bf16 %v1337_v62, %v1336_v57  ;;  %v1340_v7 = vmax.f32 %v844_v63, 0.0  ;;  %v1341_v8 = vmax.f32 %v845_v0, 0.0  ;;  %v848_v9 = vunpack.c.l.bf16 %v388_v60  ;;  %v399_v0 = vld [vmem:[%s7121_s20 + $0x6f8] sm:$0xff] }
 0x116   : > { %v1625_v11 = vpack.c.bf16 %v1339_v2, %v1338_v1  ;;  %v1342_v12 = vmax.f32 %v846_v3, 0.0  ;;  %v1343_v13 = vmax.f32 %v847_v4, 0.0  ;;  %v849_v14 = vunpack.c.h.bf16 %v388_v60 }
 0x117   : > { %1875 = vst.msk [vmem:[#allocation2 + $0x680] sm:$0xff] %vm7136_vm2, %v1624_v6  ;;  %v1626_v16 = vpack.c.bf16 %v1341_v8, %v1340_v7  ;;  %v1344_v17 = vmax.f32 %v848_v9, 0.0  ;;  %v850_v19 = vunpack.c.l.bf16 %v389_v5  ;;  %v851_v20 = vunpack.c.h.bf16 %v389_v5  ;;  %v400_v5 = vld [vmem:[%s7121_s20 + $0x700] sm:$0xff] }
 0x118   : > { %1876 = vst.msk [vmem:[#allocation2 + $0x688] sm:$0xff] %vm7136_vm2, %v1625_v11  ;;  %v1627_v22 = vpack.c.bf16 %v1343_v13, %v1342_v12  ;;  %v1345_v23 = vmax.f32 %v849_v14, 0.0  ;;  %v852_v24 = vunpack.c.l.bf16 %v390_v10  ;;  %v853_v25 = vunpack.c.h.bf16 %v390_v10  ;;  %v401_v14 = vld [vmem:[%s7121_s20 + $0x708] sm:$0xff] }
 0x119   : > { %1877 = vst.msk [vmem:[#allocation2 + $0x690] sm:$0xff] %vm7136_vm2, %v1626_v16  ;;  %v1346_v26 = vmax.f32 %v850_v19, 0.0  ;;  %v1347_v27 = vmax.f32 %v851_v20, 0.0  ;;  %v854_v28 = vunpack.c.l.bf16 %v391_v15  ;;  %v855_v29 = vunpack.c.h.bf16 %v391_v15  ;;  %v402_v20 = vld [vmem:[%s7121_s20 + $0x710] sm:$0xff] }
 0x11a   : > { %1878 = vst.msk [vmem:[#allocation2 + $0x698] sm:$0xff] %vm7136_vm2, %v1627_v22  ;;  %v1628_v31 = vpack.c.bf16 %v1345_v23, %v1344_v17  ;;  %v1348_v32 = vmax.f32 %v852_v24, 0.0  ;;  %v1349_v33 = vmax.f32 %v853_v25, 0.0  ;;  %v856_v34 = vunpack.c.l.bf16 %v392_v21  ;;  %v403_v25 = vld [vmem:[%s7121_s20 + $0x718] sm:$0xff] }
 0x11b   : > { %v1629_v36 = vpack.c.bf16 %v1347_v27, %v1346_v26  ;;  %v1350_v37 = vmax.f32 %v854_v28, 0.0  ;;  %v1351_v38 = vmax.f32 %v855_v29, 0.0  ;;  %v857_v39 = vunpack.c.h.bf16 %v392_v21 }
 0x11c   : > { %1879 = vst.msk [vmem:[#allocation2 + $0x6a0] sm:$0xff] %vm7136_vm2, %v1628_v31  ;;  %v1630_v41 = vpack.c.bf16 %v1349_v33, %v1348_v32  ;;  %v1352_v42 = vmax.f32 %v856_v34, 0.0  ;;  %v858_v43 = vunpack.c.l.bf16 %v393_v30  ;;  %v859_v44 = vunpack.c.h.bf16 %v393_v30  ;;  %v404_v30 = vld [vmem:[%s7121_s20 + $0x720] sm:$0xff] }
 0x11d   : > { %1880 = vst.msk [vmem:[#allocation2 + $0x6a8] sm:$0xff] %vm7136_vm2, %v1629_v36  ;;  %v1631_v46 = vpack.c.bf16 %v1351_v38, %v1350_v37  ;;  %v1353_v47 = vmax.f32 %v857_v39, 0.0  ;;  %v860_v48 = vunpack.c.l.bf16 %v394_v35  ;;  %v861_v49 = vunpack.c.h.bf16 %v394_v35  ;;  %v405_v39 = vld [vmem:[%s7121_s20 + $0x728] sm:$0xff] }
 0x11e   : > { %1881 = vst.msk [vmem:[#allocation2 + $0x6b0] sm:$0xff] %vm7136_vm2, %v1630_v41  ;;  %v1354_v50 = vmax.f32 %v858_v43, 0.0  ;;  %v1355_v51 = vmax.f32 %v859_v44, 0.0  ;;  %v862_v52 = vunpack.c.l.bf16 %v395_v40  ;;  %v863_v53 = vunpack.c.h.bf16 %v395_v40  ;;  %v406_v44 = vld [vmem:[%s7121_s20 + $0x730] sm:$0xff] }
 0x11f   : > { %1882 = vst.msk [vmem:[#allocation2 + $0x6b8] sm:$0xff] %vm7136_vm2, %v1631_v46  ;;  %v1632_v55 = vpack.c.bf16 %v1353_v47, %v1352_v42  ;;  %v1356_v56 = vmax.f32 %v860_v48, 0.0  ;;  %v1357_v57 = vmax.f32 %v861_v49, 0.0  ;;  %v864_v58 = vunpack.c.l.bf16 %v396_v45  ;;  %v407_v49 = vld [vmem:[%s7121_s20 + $0x738] sm:$0xff] }
 0x120   : > { %v1633_v60 = vpack.c.bf16 %v1355_v51, %v1354_v50  ;;  %v1358_v61 = vmax.f32 %v862_v52, 0.0  ;;  %v1359_v62 = vmax.f32 %v863_v53, 0.0  ;;  %v865_v63 = vunpack.c.h.bf16 %v396_v45 }
 0x121   : > { %1883 = vst.msk [vmem:[#allocation2 + $0x6c0] sm:$0xff] %vm7136_vm2, %v1632_v55  ;;  %v1634_v1 = vpack.c.bf16 %v1357_v57, %v1356_v56  ;;  %v1360_v2 = vmax.f32 %v864_v58, 0.0  ;;  %v866_v3 = vunpack.c.l.bf16 %v397_v54  ;;  %v867_v4 = vunpack.c.h.bf16 %v397_v54  ;;  %v408_v54 = vld [vmem:[%s7121_s20 + $0x740] sm:$0xff] }
 0x122   : > { %1884 = vst.msk [vmem:[#allocation2 + $0x6c8] sm:$0xff] %vm7136_vm2, %v1633_v60  ;;  %v1635_v6 = vpack.c.bf16 %v1359_v62, %v1358_v61  ;;  %v1361_v7 = vmax.f32 %v865_v63, 0.0  ;;  %v868_v8 = vunpack.c.l.bf16 %v398_v59  ;;  %v869_v9 = vunpack.c.h.bf16 %v398_v59  ;;  %v409_v63 = vld [vmem:[%s7121_s20 + $0x748] sm:$0xff] }
 0x123   : > { %1885 = vst.msk [vmem:[#allocation2 + $0x6d0] sm:$0xff] %vm7136_vm2, %v1634_v1  ;;  %v1362_v10 = vmax.f32 %v866_v3, 0.0  ;;  %v1363_v11 = vmax.f32 %v867_v4, 0.0  ;;  %v870_v12 = vunpack.c.l.bf16 %v399_v0  ;;  %v871_v13 = vunpack.c.h.bf16 %v399_v0  ;;  %v410_v4 = vld [vmem:[%s7121_s20 + $0x750] sm:$0xff] }
 0x124   : > { %1886 = vst.msk [vmem:[#allocation2 + $0x6d8] sm:$0xff] %vm7136_vm2, %v1635_v6  ;;  %v1636_v15 = vpack.c.bf16 %v1361_v7, %v1360_v2  ;;  %v1364_v16 = vmax.f32 %v868_v8, 0.0  ;;  %v1365_v17 = vmax.f32 %v869_v9, 0.0  ;;  %v872_v19 = vunpack.c.l.bf16 %v400_v5  ;;  %v411_v9 = vld [vmem:[%s7121_s20 + $0x758] sm:$0xff] }
 0x125   : > { %v1637_v21 = vpack.c.bf16 %v1363_v11, %v1362_v10  ;;  %v1366_v22 = vmax.f32 %v870_v12, 0.0  ;;  %v1367_v23 = vmax.f32 %v871_v13, 0.0  ;;  %v873_v24 = vunpack.c.h.bf16 %v400_v5 }
 0x126   : > { %1887 = vst.msk [vmem:[#allocation2 + $0x6e0] sm:$0xff] %vm7136_vm2, %v1636_v15  ;;  %v1638_v26 = vpack.c.bf16 %v1365_v17, %v1364_v16  ;;  %v1368_v27 = vmax.f32 %v872_v19, 0.0  ;;  %v874_v28 = vunpack.c.l.bf16 %v401_v14  ;;  %v875_v29 = vunpack.c.h.bf16 %v401_v14  ;;  %v412_v14 = vld [vmem:[%s7121_s20 + $0x760] sm:$0xff] }
 0x127   : > { %1888 = vst.msk [vmem:[#allocation2 + $0x6e8] sm:$0xff] %vm7136_vm2, %v1637_v21  ;;  %v1639_v31 = vpack.c.bf16 %v1367_v23, %v1366_v22  ;;  %v1369_v32 = vmax.f32 %v873_v24, 0.0  ;;  %v876_v33 = vunpack.c.l.bf16 %v402_v20  ;;  %v877_v34 = vunpack.c.h.bf16 %v402_v20  ;;  %v413_v24 = vld [vmem:[%s7121_s20 + $0x768] sm:$0xff] }
 0x128   : > { %1889 = vst.msk [vmem:[#allocation2 + $0x6f0] sm:$0xff] %vm7136_vm2, %v1638_v26  ;;  %v1370_v35 = vmax.f32 %v874_v28, 0.0  ;;  %v1371_v36 = vmax.f32 %v875_v29, 0.0  ;;  %v878_v37 = vunpack.c.l.bf16 %v403_v25  ;;  %v879_v38 = vunpack.c.h.bf16 %v403_v25  ;;  %v414_v29 = vld [vmem:[%s7121_s20 + $0x770] sm:$0xff] }
 0x129   : > { %1890 = vst.msk [vmem:[#allocation2 + $0x6f8] sm:$0xff] %vm7136_vm2, %v1639_v31  ;;  %v1640_v40 = vpack.c.bf16 %v1369_v32, %v1368_v27  ;;  %v1372_v41 = vmax.f32 %v876_v33, 0.0  ;;  %v1373_v42 = vmax.f32 %v877_v34, 0.0  ;;  %v880_v43 = vunpack.c.l.bf16 %v404_v30  ;;  %v415_v34 = vld [vmem:[%s7121_s20 + $0x778] sm:$0xff] }
 0x12a   : > { %v1641_v45 = vpack.c.bf16 %v1371_v36, %v1370_v35  ;;  %v1374_v46 = vmax.f32 %v878_v37, 0.0  ;;  %v1375_v47 = vmax.f32 %v879_v38, 0.0  ;;  %v881_v48 = vunpack.c.h.bf16 %v404_v30 }
 0x12b   : > { %1891 = vst.msk [vmem:[#allocation2 + $0x700] sm:$0xff] %vm7136_vm2, %v1640_v40  ;;  %v1642_v50 = vpack.c.bf16 %v1373_v42, %v1372_v41  ;;  %v1376_v51 = vmax.f32 %v880_v43, 0.0  ;;  %v882_v52 = vunpack.c.l.bf16 %v405_v39  ;;  %v883_v53 = vunpack.c.h.bf16 %v405_v39  ;;  %v416_v39 = vld [vmem:[%s7121_s20 + $0x780] sm:$0xff] }
 0x12c   : > { %1892 = vst.msk [vmem:[#allocation2 + $0x708] sm:$0xff] %vm7136_vm2, %v1641_v45  ;;  %v1643_v55 = vpack.c.bf16 %v1375_v47, %v1374_v46  ;;  %v1377_v56 = vmax.f32 %v881_v48, 0.0  ;;  %v884_v57 = vunpack.c.l.bf16 %v406_v44  ;;  %v885_v58 = vunpack.c.h.bf16 %v406_v44  ;;  %v417_v48 = vld [vmem:[%s7121_s20 + $0x788] sm:$0xff] }
 0x12d   : > { %1893 = vst.msk [vmem:[#allocation2 + $0x710] sm:$0xff] %vm7136_vm2, %v1642_v50  ;;  %v1378_v59 = vmax.f32 %v882_v52, 0.0  ;;  %v1379_v60 = vmax.f32 %v883_v53, 0.0  ;;  %v886_v61 = vunpack.c.l.bf16 %v407_v49  ;;  %v887_v62 = vunpack.c.h.bf16 %v407_v49  ;;  %v418_v53 = vld [vmem:[%s7121_s20 + $0x790] sm:$0xff] }
 0x12e   : > { %1894 = vst.msk [vmem:[#allocation2 + $0x718] sm:$0xff] %vm7136_vm2, %v1643_v55  ;;  %v1644_v0 = vpack.c.bf16 %v1377_v56, %v1376_v51  ;;  %v1380_v1 = vmax.f32 %v884_v57, 0.0  ;;  %v1381_v2 = vmax.f32 %v885_v58, 0.0  ;;  %v888_v3 = vunpack.c.l.bf16 %v408_v54  ;;  %v419_v58 = vld [vmem:[%s7121_s20 + $0x798] sm:$0xff] }
 0x12f   : > { %v1645_v5 = vpack.c.bf16 %v1379_v60, %v1378_v59  ;;  %v1382_v6 = vmax.f32 %v886_v61, 0.0  ;;  %v1383_v7 = vmax.f32 %v887_v62, 0.0  ;;  %v889_v8 = vunpack.c.h.bf16 %v408_v54 }
 0x130   : > { %1895 = vst.msk [vmem:[#allocation2 + $0x720] sm:$0xff] %vm7136_vm2, %v1644_v0  ;;  %v1646_v10 = vpack.c.bf16 %v1381_v2, %v1380_v1  ;;  %v1384_v11 = vmax.f32 %v888_v3, 0.0  ;;  %v890_v12 = vunpack.c.l.bf16 %v409_v63  ;;  %v891_v13 = vunpack.c.h.bf16 %v409_v63  ;;  %v420_v63 = vld [vmem:[%s7121_s20 + $0x7a0] sm:$0xff] }
 0x131   : > { %1896 = vst.msk [vmem:[#allocation2 + $0x728] sm:$0xff] %vm7136_vm2, %v1645_v5  ;;  %v1647_v15 = vpack.c.bf16 %v1383_v7, %v1382_v6  ;;  %v1385_v16 = vmax.f32 %v889_v8, 0.0  ;;  %v892_v17 = vunpack.c.l.bf16 %v410_v4  ;;  %v893_v19 = vunpack.c.h.bf16 %v410_v4  ;;  %v421_v8 = vld [vmem:[%s7121_s20 + $0x7a8] sm:$0xff] }
 0x132   : > { %1897 = vst.msk [vmem:[#allocation2 + $0x730] sm:$0xff] %vm7136_vm2, %v1646_v10  ;;  %v1386_v20 = vmax.f32 %v890_v12, 0.0  ;;  %v1387_v21 = vmax.f32 %v891_v13, 0.0  ;;  %v894_v22 = vunpack.c.l.bf16 %v411_v9  ;;  %v895_v23 = vunpack.c.h.bf16 %v411_v9  ;;  %v422_v13 = vld [vmem:[%s7121_s20 + $0x7b0] sm:$0xff] }
 0x133   : > { %1898 = vst.msk [vmem:[#allocation2 + $0x738] sm:$0xff] %vm7136_vm2, %v1647_v15  ;;  %v1648_v25 = vpack.c.bf16 %v1385_v16, %v1384_v11  ;;  %v1388_v26 = vmax.f32 %v892_v17, 0.0  ;;  %v1389_v27 = vmax.f32 %v893_v19, 0.0  ;;  %v896_v28 = vunpack.c.l.bf16 %v412_v14  ;;  %v423_v19 = vld [vmem:[%s7121_s20 + $0x7b8] sm:$0xff] }
 0x134   : > { %v1649_v30 = vpack.c.bf16 %v1387_v21, %v1386_v20  ;;  %v1390_v31 = vmax.f32 %v894_v22, 0.0  ;;  %v1391_v32 = vmax.f32 %v895_v23, 0.0  ;;  %v897_v33 = vunpack.c.h.bf16 %v412_v14 }
 0x135   : > { %1899 = vst.msk [vmem:[#allocation2 + $0x740] sm:$0xff] %vm7136_vm2, %v1648_v25  ;;  %v1650_v35 = vpack.c.bf16 %v1389_v27, %v1388_v26  ;;  %v1392_v36 = vmax.f32 %v896_v28, 0.0  ;;  %v898_v37 = vunpack.c.l.bf16 %v413_v24  ;;  %v899_v38 = vunpack.c.h.bf16 %v413_v24 }
 0x136   : > { %1900 = vst.msk [vmem:[#allocation2 + $0x748] sm:$0xff] %vm7136_vm2, %v1649_v30  ;;  %v1651_v40 = vpack.c.bf16 %v1391_v32, %v1390_v31  ;;  %v1393_v41 = vmax.f32 %v897_v33, 0.0  ;;  %v900_v42 = vunpack.c.l.bf16 %v414_v29  ;;  %v901_v43 = vunpack.c.h.bf16 %v414_v29 }
 0x137   : > { %1901 = vst.msk [vmem:[#allocation2 + $0x750] sm:$0xff] %vm7136_vm2, %v1650_v35  ;;  %v1394_v44 = vmax.f32 %v898_v37, 0.0  ;;  %v1395_v45 = vmax.f32 %v899_v38, 0.0  ;;  %v902_v46 = vunpack.c.l.bf16 %v415_v34  ;;  %v903_v47 = vunpack.c.h.bf16 %v415_v34 }
 0x138   : > { %1902 = vst.msk [vmem:[#allocation2 + $0x758] sm:$0xff] %vm7136_vm2, %v1651_v40  ;;  %v1652_v49 = vpack.c.bf16 %v1393_v41, %v1392_v36  ;;  %v1396_v50 = vmax.f32 %v900_v42, 0.0  ;;  %v1397_v51 = vmax.f32 %v901_v43, 0.0  ;;  %v904_v52 = vunpack.c.l.bf16 %v416_v39 }
 0x139   : > { %v1653_v54 = vpack.c.bf16 %v1395_v45, %v1394_v44  ;;  %v1398_v55 = vmax.f32 %v902_v46, 0.0  ;;  %v1399_v56 = vmax.f32 %v903_v47, 0.0  ;;  %v905_v57 = vunpack.c.h.bf16 %v416_v39 }
 0x13a   : > { %1903 = vst.msk [vmem:[#allocation2 + $0x760] sm:$0xff] %vm7136_vm2, %v1652_v49  ;;  %v1654_v59 = vpack.c.bf16 %v1397_v51, %v1396_v50  ;;  %v1400_v60 = vmax.f32 %v904_v52, 0.0  ;;  %v906_v61 = vunpack.c.l.bf16 %v417_v48  ;;  %v907_v62 = vunpack.c.h.bf16 %v417_v48 }
 0x13b   : > { %1904 = vst.msk [vmem:[#allocation2 + $0x768] sm:$0xff] %vm7136_vm2, %v1653_v54  ;;  %v1655_v0 = vpack.c.bf16 %v1399_v56, %v1398_v55  ;;  %v1401_v1 = vmax.f32 %v905_v57, 0.0  ;;  %v908_v2 = vunpack.c.l.bf16 %v418_v53  ;;  %v909_v3 = vunpack.c.h.bf16 %v418_v53 }
 0x13c   : > { %1905 = vst.msk [vmem:[#allocation2 + $0x770] sm:$0xff] %vm7136_vm2, %v1654_v59  ;;  %v1402_v4 = vmax.f32 %v906_v61, 0.0  ;;  %v1403_v5 = vmax.f32 %v907_v62, 0.0  ;;  %v910_v6 = vunpack.c.l.bf16 %v419_v58  ;;  %v911_v7 = vunpack.c.h.bf16 %v419_v58 }
 0x13d   : > { %1906 = vst.msk [vmem:[#allocation2 + $0x778] sm:$0xff] %vm7136_vm2, %v1655_v0  ;;  %v1656_v9 = vpack.c.bf16 %v1401_v1, %v1400_v60  ;;  %v1404_v10 = vmax.f32 %v908_v2, 0.0  ;;  %v1405_v11 = vmax.f32 %v909_v3, 0.0  ;;  %v912_v12 = vunpack.c.l.bf16 %v420_v63 }
 0x13e   : > { %v1657_v14 = vpack.c.bf16 %v1403_v5, %v1402_v4  ;;  %v1406_v15 = vmax.f32 %v910_v6, 0.0  ;;  %v1407_v16 = vmax.f32 %v911_v7, 0.0  ;;  %v913_v17 = vunpack.c.h.bf16 %v420_v63 }
 0x13f   : > { %1907 = vst.msk [vmem:[#allocation2 + $0x780] sm:$0xff] %vm7136_vm2, %v1656_v9  ;;  %v1658_v20 = vpack.c.bf16 %v1405_v11, %v1404_v10  ;;  %v1408_v21 = vmax.f32 %v912_v12, 0.0  ;;  %v914_v22 = vunpack.c.l.bf16 %v421_v8  ;;  %v915_v23 = vunpack.c.h.bf16 %v421_v8 }
 0x140   : > { %1908 = vst.msk [vmem:[#allocation2 + $0x788] sm:$0xff] %vm7136_vm2, %v1657_v14  ;;  %v1659_v24 = vpack.c.bf16 %v1407_v16, %v1406_v15  ;;  %v1409_v25 = vmax.f32 %v913_v17, 0.0  ;;  %v916_v26 = vunpack.c.l.bf16 %v422_v13  ;;  %v917_v27 = vunpack.c.h.bf16 %v422_v13 }
 0x141   : > { %1909 = vst.msk [vmem:[#allocation2 + $0x790] sm:$0xff] %vm7136_vm2, %v1658_v20  ;;  %v1410_v28 = vmax.f32 %v914_v22, 0.0  ;;  %v1411_v29 = vmax.f32 %v915_v23, 0.0  ;;  %v918_v30 = vunpack.c.l.bf16 %v423_v19  ;;  %v919_v31 = vunpack.c.h.bf16 %v423_v19 }
 0x142   : > { %1910 = vst.msk [vmem:[#allocation2 + $0x798] sm:$0xff] %vm7136_vm2, %v1659_v24  ;;  %v1660_v32 = vpack.c.bf16 %v1409_v25, %v1408_v21  ;;  %v1412_v33 = vmax.f32 %v916_v26, 0.0  ;;  %v1413_v34 = vmax.f32 %v917_v27, 0.0 }
 0x143   : > { %v1661_v35 = vpack.c.bf16 %v1411_v29, %v1410_v28  ;;  %v1414_v36 = vmax.f32 %v918_v30, 0.0  ;;  %v1415_v37 = vmax.f32 %v919_v31, 0.0 }
 0x144   : > { %1911 = vst.msk [vmem:[#allocation2 + $0x7a0] sm:$0xff] %vm7136_vm2, %v1660_v32  ;;  %v1662_v38 = vpack.c.bf16 %v1413_v34, %v1412_v33 }
 0x145   : > { %1912 = vst.msk [vmem:[#allocation2 + $0x7a8] sm:$0xff] %vm7136_vm2, %v1661_v35  ;;  %v1663_v39 = vpack.c.bf16 %v1415_v37, %v1414_v36 }
 0x146   : > { %1913 = vst.msk [vmem:[#allocation2 + $0x7b0] sm:$0xff] %vm7136_vm2, %v1662_v38 }
 0x147   : > { %1914 = vst.msk [vmem:[#allocation2 + $0x7b8] sm:$0xff] %vm7136_vm2, %v1663_v39 }
 0x148 LB: >> { %v6888_v40 = vld [vmem:[%s9891_s1 + $0x158] sm:$0xff]  ;;  %v6887_v43 = vld [vmem:[%s9891_s1 + $0x150] sm:$0xff]  ;;  %s7909_s9 = sshll.u32 %s7083_s24, 8  ;;  %v6886_v47 = vld [vmem:[%s9891_s1 + $0x148] sm:$0xff]  ;;  %vm2275_vm3 = vcmask 523264   ;;  %s6795_s5 = smul.u32 224, %s7083_s24  ;;  %s7083_s24 = sphi %s7878_s24, %s1920_s24  }
 0x149   : >> { %v7889_v41 = vld [vmem:[%s9891_s1 + $0x178] sm:$0xff]  ;;  %2327 = vmatpush.bf16.msra.mxu0 %v6888_v40  ;;  %v7906_v44 = vld [vmem:[%s9891_s1 + $0x170] sm:$0xff]  ;;  %s1985_s17 = sadd.s32 64, %s7909_s9  ;;  %v7928_v48 = vld [vmem:[%s9891_s1 + $0x168] sm:$0xff]  ;;  %s7962_s15 = scalar_lea.vmem [#allocation2], %s7909_s9 }
 0x14a   : >> { %v6841_v18 = vld [vmem:[%s9891_s1 + $0x38] sm:$0xff]  ;;  %7012 = vmatpush.bf16.msra.mxu1 %v7889_v41  ;;  %v6840_v45 = vld [vmem:[%s9891_s1 + $0x30] sm:$0xff]  ;;  %s1986_s18 = sshra.s32 %s1985_s17, 3  ;;  %v6839_v49 = vld [vmem:[%s9891_s1 + $0x28] sm:$0xff]  ;;  %s2955_s20 = sadd.s32 128, %s7909_s9 }
 0x14b   : >> { %v7897_v42 = vld [vmem:[%s9891_s1 + $0x58] sm:$0xff]  ;;  %2779 = vmatpush.bf16.msra.mxu2 %v6841_v18  ;;  %v7918_v46 = vld [vmem:[%s9891_s1 + $0x50] sm:$0xff]  ;;  %s6846_s19 = sshll.u32 %s1986_s18, 3  ;;  %v7937_v50 = vld [vmem:[%s9891_s1 + $0x48] sm:$0xff]  ;;  %s2956_s21 = sshra.s32 %s2955_s20, 3 }
 0x14c   : >> { %7016 = vmatpush.bf16.msra.mxu3 %v7897_v42  ;;  %v6885_v51 = vld [vmem:[%s9891_s1 + $0x140] sm:$0xff]  ;;  %s7951_s8 = scalar_lea.vmem [#allocation2], %s6846_s19  ;;  %v6939_v59 = vld [vmem:[%s9891_s1 + $0x298] sm:$0xff]  ;;  %v6934_v1 = vld [vmem:[%s9891_s1 + $0x270] sm:$0xff]  ;;  %s6893_s22 = sshll.u32 %s2956_s21, 3 }
 0x14d   : >> { %2328 = vmatpush.bf16.msra.mxu0 %v6887_v43  ;;  %v7945_v52 = vld [vmem:[%s9891_s1 + $0x160] sm:$0xff]  ;;  %v6935_v60 = vld [vmem:[%s9891_s1 + $0x278] sm:$0xff]  ;;  %v6883_v2 = vld [vmem:[%s9891_s1 + $0x130] sm:$0xff]  ;;  %s8236_s9 = scalar_lea.vmem [#allocation2], %s6893_s22  ;;  %s9694_s6 = scalar_lea.vmem %s7129_s23, %s6795_s5 }
 0x14e   : >> { %7013 = vmatpush.bf16.msra.mxu1 %v7906_v44  ;;  %v6838_v53 = vld [vmem:[%s9891_s1 + $0x20] sm:$0xff]  ;;  %v5699_v55 = vld [vmem:[%s7951_s8 + $0x88] sm:$0xf0]  ;;  %v6884_v63 = vld [vmem:[%s9891_s1 + $0x138] sm:$0xff]  ;;  %s1920_s24 = sadd.s32 1, %s7083_s24  }
 0x14f   : >> { %2780 = vmatpush.bf16.msra.mxu2 %v6840_v45  ;;  %v6863_v54 = vld [vmem:[%s7951_s8 + $0x84] sm:$0xf]  ;;  %v5900_v58 = vld [vmem:[%s7962_s15 + $0x88] sm:$0xf0]  ;;  %v6837_v0 = vld [vmem:[%s9891_s1 + $0x18] sm:$0xff]  ;;  %p1917_p5 = scmp.ge.s32.totalorder %s1920_s24, 7  }
 0x150   : >> { %7017 = vmatpush.bf16.msra.mxu3 %v7918_v46  ;;  %v7959_v56 = vld [vmem:[%s9891_s1 + $0x40] sm:$0xff]  ;;  %v7972_v61 = vor.u32 %v6863_v54, %v5699_v55  ;;  %v6938_v3 = vld [vmem:[%s9891_s1 + $0x290] sm:$0xff]  ;;  %v6933_v5 = vld [vmem:[%s9891_s1 + $0x268] sm:$0xff] }
 0x151   : >> { %2329 = vmatpush.bf16.msra.mxu0 %v6886_v47  ;;  %v6816_v57 = vld [vmem:[%s7962_s15 + $0x84] sm:$0xf]  ;;  %v6836_v4 = vld [vmem:[%s9891_s1 + $0x10] sm:$0xff]  ;;  %v6882_v6 = vld [vmem:[%s9891_s1 + $0x128] sm:$0xff] }
 0x152   : >> { %7014 = vmatpush.bf16.msra.mxu1 %v7928_v48  ;;  %10071 = vst [vmem:[#allocation3_spill] sm:$0xff] %v7972_v61  ;;  %v7975_v62 = vor.u32 %v6816_v57, %v5900_v58  ;;  %v6835_v7 = vld [vmem:[%s9891_s1 + $0x8] sm:$0xff]  ;;  %v6881_v8 = vld [vmem:[%s9891_s1 + $0x120] sm:$0xff]  ;;  %v6865_v12 = vld [vmem:[%s7951_s8 + $0x94] sm:$0xf] }
 0x153   : >> { %2781 = vmatpush.bf16.msra.mxu2 %v6839_v49  ;;  %v6834_v9 = vld [vmem:[%s9891_s1] sm:$0xff]  ;;  %v6848_v11 = vld [vmem:[%s7951_s8 + $0x4] sm:$0xf0]  ;;  %v5707_v13 = vld [vmem:[%s7951_s8 + $0x98] sm:$0xf0] }
 0x154   : >> { %7018 = vmatpush.bf16.msra.mxu3 %v7937_v50  ;;  %10072 = vst [vmem:[#allocation4_spill] sm:$0xff] %v7975_v62  ;;  %v5633_v10 = vld [vmem:[%s7951_s8] sm:$0xf]  ;;  %v6801_v15 = vld [vmem:[%s7962_s15 + $0x4] sm:$0xf0]  ;;  %v8025_v20 = vor.u32 %v6865_v12, %v5707_v13  ;;  %v6931_v37 = vld [vmem:[%s9891_s1 + $0x258] sm:$0xff] }
 0x155   : >> { %2330 = vmatpush.bf16.msra.mxu0 %v6885_v51  ;;  %v5834_v14 = vld [vmem:[%s7962_s15] sm:$0xf]  ;;  %v6818_v16 = vld [vmem:[%s7962_s15 + $0x94] sm:$0xf]  ;;  %v5908_v17 = vld [vmem:[%s7962_s15 + $0x98] sm:$0xf0]  ;;  %v8023_v19 = vor.u32 %v6848_v11, %v5633_v10 }
 0x156   : >> { %7015 = vmatpush.bf16.msra.mxu1 %v7945_v52  ;;  %10073 = vst [vmem:[#allocation5_spill] sm:$0xff] %v8025_v20  ;;  %v8027_v21 = vor.u32 %v6801_v15, %v5834_v14  ;;  %v8029_v22 = vor.u32 %v6818_v16, %v5908_v17  ;;  %v6932_v23 = vld [vmem:[%s9891_s1 + $0x260] sm:$0xff]  ;;  %v5641_v24 = vld [vmem:[%s7951_s8 + $0x10] sm:$0xf]  ;;  %v6850_v25 = vld [vmem:[%s7951_s8 + $0x14] sm:$0xf0] }
 0x157   : >> { %2782 = vmatpush.bf16.msra.mxu2 %v6838_v53  ;;  %v6867_v26 = vld [vmem:[%s7951_s8 + $0xa4] sm:$0xf]  ;;  %v5715_v27 = vld [vmem:[%s7951_s8 + $0xa8] sm:$0xf0]  ;;  %v5842_v28 = vld [vmem:[%s7962_s15 + $0x10] sm:$0xf]  ;;  %v8056_v32 = vor.u32 %v6850_v25, %v5641_v24 }
 0x158   : >> { %7019 = vmatpush.bf16.msra.mxu3 %v7959_v56  ;;  %10074 = vst [vmem:[#allocation6_spill] sm:$0xff] %v8027_v21  ;;  %v6803_v29 = vld [vmem:[%s7962_s15 + $0x14] sm:$0xf0]  ;;  %v6820_v30 = vld [vmem:[%s7962_s15 + $0xa4] sm:$0xf]  ;;  %v8058_v33 = vor.u32 %v6867_v26, %v5715_v27  ;;  %v6937_v36 = vld [vmem:[%s9891_s1 + $0x288] sm:$0xff] }
 0x159   : >> { %5823 = vmatmul.msk.bf16.vlgmr.msra.gmra.mxu1 %vm2275_vm3, %v7972_v61  ;;  %2331 = vmatpush.bf16.msra.mxu0 %v6884_v63  ;;  %10075 = vst [vmem:[#allocation7_spill] sm:$0xff] %v8029_v22  ;;  %v5916_v31 = vld [vmem:[%s7962_s15 + $0xa8] sm:$0xf0]  ;;  %v8060_v34 = vor.u32 %v6803_v29, %v5842_v28  ;;  %v5649_v38 = vld [vmem:[%s7951_s8 + $0x20] sm:$0xf]  ;;  %v6930_v63 = vld [vmem:[%s9891_s1 + $0x250] sm:$0xff] }
 0x15a   : >> { %3296 = vmatpush.bf16.msrb.mxu1 %v6935_v60  ;;  %10076 = vst [vmem:[#allocation8_spill] sm:$0xff] %v8058_v33  ;;  %v8062_v35 = vor.u32 %v6820_v30, %v5916_v31  ;;  %v6852_v39 = vld [vmem:[%s7951_s8 + $0x24] sm:$0xf0]  ;;  %v6869_v40 = vld [vmem:[%s7951_s8 + $0xb4] sm:$0xf]  ;;  %v6928_v31 = vld [vmem:[%s9891_s1 + $0x240] sm:$0xff] }
 0x15b   : >> { %6024 = vmatmul.msk.bf16.vlgmr.msra.gmra.mxu3 %vm2275_vm3, %v7975_v62  ;;  %2783 = vmatpush.bf16.msra.mxu2 %v6837_v0  ;;  %10077 = vst [vmem:[#allocation9_spill] sm:$0xff] %v8060_v34  ;;  %v5850_v18 = vld [vmem:[%s7962_s15 + $0x20] sm:$0xf]  ;;  %v6822_v43 = vld [vmem:[%s7962_s15 + $0xb4] sm:$0xf]  ;;  %v8084_v45 = vor.u32 %v6852_v39, %v5649_v38  ;;  %v6929_v13 = vld [vmem:[%s9891_s1 + $0x248] sm:$0xff] }
 0x15c   : >> { %3388 = vmatpush.bf16.msrb.mxu3 %v6939_v59  ;;  %10078 = vst [vmem:[#allocation10_spill] sm:$0xff] %v8062_v35  ;;  %v5657_v49 = vld [vmem:[%s7951_s8 + $0x30] sm:$0xf]  ;;  %v6871_v51 = vld [vmem:[%s7951_s8 + $0xc4] sm:$0xf] }
 0x15d   : >> { %2332 = vmatpush.bf16.msra.mxu0 %v6883_v2  ;;  %v5858_v53 = vld [vmem:[%s7962_s15 + $0x30] sm:$0xf]  ;;  %v6807_v54 = vld [vmem:[%s7962_s15 + $0x34] sm:$0xf0]  ;;  %v6824_v55 = vld [vmem:[%s7962_s15 + $0xc4] sm:$0xf] }
 0x15e   : >> { %3297 = vmatpush.bf16.msrb.mxu1 %v6934_v1  ;;  %v8110_v59 = vor.u32 %v6807_v54, %v5858_v53  ;;  %v6936_v0 = vld [vmem:[%s9891_s1 + $0x280] sm:$0xff]  ;;  %v6856_v2 = vld [vmem:[%s7951_s8 + $0x44] sm:$0xf0]  ;;  %v5673_v14 = vld [vmem:[%s7951_s8 + $0x50] sm:$0xf] }
 0x15f   : >> { %2784 = vmatpush.bf16.msra.mxu2 %v6836_v4  ;;  %v5665_v1 = vld [vmem:[%s7951_s8 + $0x40] sm:$0xf]  ;;  %v5739_v4 = vld [vmem:[%s7951_s8 + $0xd8] sm:$0xf0]  ;;  %v6858_v15 = vld [vmem:[%s7951_s8 + $0x54] sm:$0xf0] }
 0x160   : >> { %3389 = vmatpush.bf16.msrb.mxu3 %v6938_v3  ;;  %10084 = vst [vmem:[#allocation16_spill] sm:$0xff] %v8110_v59  ;;  %v6873_v3 = vld [vmem:[%s7951_s8 + $0xd4] sm:$0xf]  ;;  %v6875_v16 = vld [vmem:[%s7951_s8 + $0xe4] sm:$0xf]  ;;  %v8159_v27 = vor.u32 %v6858_v15, %v5673_v14 }
 0x161   : >> { %2333 = vmatpush.bf16.msra.mxu0 %v6882_v6  ;;  %v6809_v6 = vld [vmem:[%s7962_s15 + $0x44] sm:$0xf0]  ;;  %v8136_v10 = vor.u32 %v6873_v3, %v5739_v4  ;;  %v5747_v17 = vld [vmem:[%s7951_s8 + $0xe8] sm:$0xf0]  ;;  %v6811_v24 = vld [vmem:[%s7962_s15 + $0x54] sm:$0xf0] }
 0x162   : >> { %3298 = vmatpush.bf16.msrb.mxu1 %v6933_v5  ;;  %v5866_v5 = vld [vmem:[%s7962_s15 + $0x40] sm:$0xf]  ;;  %v6828_v25 = vld [vmem:[%s7962_s15 + $0xe4] sm:$0xf]  ;;  %v5948_v26 = vld [vmem:[%s7962_s15 + $0xe8] sm:$0xf0]  ;;  %v8161_v28 = vor.u32 %v6875_v16, %v5747_v17 }
 0x163   : >> { %2785 = vmatpush.bf16.msra.mxu2 %v6835_v7  ;;  %v6826_v7 = vld [vmem:[%s7962_s15 + $0xd4] sm:$0xf]  ;;  %10087 = vst [vmem:[#allocation19_spill] sm:$0xff] %v8136_v10  ;;  %v8138_v11 = vor.u32 %v6809_v6, %v5866_v5  ;;  %v8165_v30 = vor.u32 %v6828_v25, %v5948_v26  ;;  %v5755_v39 = vld [vmem:[%s7951_s8 + $0xf8] sm:$0xf0] }
 0x164   : >> { %3390 = vmatpush.bf16.msrb.mxu3 %v6937_v36  ;;  %10090 = vst [vmem:[#allocation22_spill] sm:$0xff] %v8159_v27  ;;  %v5681_v36 = vld [vmem:[%s7951_s8 + $0x60] sm:$0xf]  ;;  %v6877_v38 = vld [vmem:[%s7951_s8 + $0xf4] sm:$0xf] }
 0x165   : >> { %2334 = vmatpush.bf16.msra.mxu0 %v6881_v8  ;;  %v5940_v8 = vld [vmem:[%s7962_s15 + $0xd8] sm:$0xf0]  ;;  %10088 = vst [vmem:[#allocation20_spill] sm:$0xff] %v8138_v11  ;;  %v5689_v53 = vld [vmem:[%s7951_s8 + $0x70] sm:$0xf] }
 0x166   : >> { %3299 = vmatpush.bf16.msrb.mxu1 %v6932_v23  ;;  %v8140_v12 = vor.u32 %v6826_v7, %v5940_v8  ;;  %v5874_v23 = vld [vmem:[%s7962_s15 + $0x50] sm:$0xf]  ;;  %10091 = vst [vmem:[#allocation23_spill] sm:$0xff] %v8161_v28  ;;  %v6862_v54 = vld [vmem:[%s7951_s8 + $0x74] sm:$0xf0] }
 0x167   : >> { %2786 = vmatpush.bf16.msra.mxu2 %v6834_v9  ;;  %v8134_v9 = vor.u32 %v6856_v2, %v5665_v1  ;;  %v8163_v29 = vor.u32 %v6811_v24, %v5874_v23  ;;  %10093 = vst [vmem:[#allocation25_spill] sm:$0xff] %v8165_v30  ;;  %v6832_v1 = vld [vmem:[%s7962_s15 + $0x104] sm:$0xf]  ;;  %v5964_v2 = vld [vmem:[%s7962_s15 + $0x108] sm:$0xf0]  ;;  %v8212_v3 = vor.u32 %v6862_v54, %v5689_v53  ;;  %v6946_v53 = vld [vmem:[%s9891_s1 + $0x90] sm:$0xff] }
 0x168   : >> { %2335 = vmatmul.bf16.vlgmr.msra.gmra.mxu0 %v8023_v19  ;;  %3391 = vmatpush.bf16.msrb.mxu3 %v6936_v0  ;;  %10089 = vst [vmem:[#allocation21_spill] sm:$0xff] %v8140_v12  ;;  %v6815_v0 = vld [vmem:[%s7962_s15 + $0x74] sm:$0xf0]  ;;  %v8220_v7 = vor.u32 %v6832_v1, %v5964_v2  ;;  %v5697_v14 = vld [vmem:[%s7951_s8 + $0x80] sm:$0xf] }
 0x169   : >> { %2419 = vmatpush.bf16.msrb.mxu0 %v7889_v41  ;;  %5824 = vmatmul.msk.bf16.gmra.mxu1 %vm2275_vm3, %v8025_v20  ;;  %v5723_v41 = vld [vmem:[%s7951_s8 + $0xb8] sm:$0xf0]  ;;  %10086 = vst [vmem:[#allocation18_spill] sm:$0xff] %v8134_v9  ;;  %v6864_v15 = vld [vmem:[%s7951_s8 + $0x84] sm:$0xf0] }
 0x16a   : >> { %2787 = vmatmul.bf16.vlgmr.msra.gmra.mxu2 %v8027_v21  ;;  %3300 = vmatpush.bf16.msrb.mxu1 %v6931_v37  ;;  %10092 = vst [vmem:[#allocation24_spill] sm:$0xff] %v8163_v29  ;;  %v6860_v37 = vld [vmem:[%s7951_s8 + $0x64] sm:$0xf0]  ;;  %v5898_v16 = vld [vmem:[%s7962_s15 + $0x80] sm:$0xf] }
 0x16b   : >> { %2871 = vmatpush.bf16.msrb.mxu2 %v7897_v42  ;;  %6025 = vmatmul.msk.bf16.gmra.mxu3 %vm2275_vm3, %v8029_v22  ;;  %v6805_v42 = vld [vmem:[%s7962_s15 + $0x24] sm:$0xf0]  ;;  %10098 = vst [vmem:[#allocation30_spill] sm:$0xff] %v8212_v3  ;;  %v6061_v17 = vld [vmem:[%s8236_s9] sm:$0xf] }
 0x16c   : >> { %v8088_v47 = vor.u32 %v6805_v42, %v5850_v18  ;;  %v6830_v18 = vld [vmem:[%s7962_s15 + $0xf4] sm:$0xf]  ;;  %v5956_v42 = vld [vmem:[%s7962_s15 + $0xf8] sm:$0xf0]  ;;  %10101 = vst [vmem:[#allocation33_spill] sm:$0xff] %v8220_v7 }
 0x16d   : >> { %2420 = vmatpush.bf16.msrb.mxu0 %v7906_v44  ;;  %v5924_v44 = vld [vmem:[%s7962_s15 + $0xb8] sm:$0xf0]  ;;  %v6895_v23 = vld [vmem:[%s8236_s9 + $0x4] sm:$0xf0]  ;;  %v6894_v25 = vld [vmem:[%s8236_s9 + $0x4] sm:$0xf] }
 0x16e   : >> { %10080 = vst [vmem:[#allocation12_spill] sm:$0xff] %v8088_v47  ;;  %3301 = vmatpush.bf16.msrb.mxu1 %v6930_v63  ;;  %v5890_v63 = vld [vmem:[%s7962_s15 + $0x70] sm:$0xf]  ;;  %v6817_v24 = vld [vmem:[%s7962_s15 + $0x84] sm:$0xf0] }
 0x16f   : >> { %2872 = vmatpush.bf16.msrb.mxu2 %v7918_v46  ;;  %v8086_v46 = vor.u32 %v6869_v40, %v5723_v41  ;;  %v5882_v40 = vld [vmem:[%s7962_s15 + $0x60] sm:$0xf]  ;;  %v6813_v41 = vld [vmem:[%s7962_s15 + $0x64] sm:$0xf0]  ;;  %v8218_v6 = vor.u32 %v6815_v0, %v5890_v63  ;;  %v6063_v26 = vld [vmem:[%s8236_s9 + $0x8] sm:$0xf0] }
 0x170   : >> { %v5705_v54 = vld [vmem:[%s7951_s8 + $0x90] sm:$0xf]  ;;  %v6897_v0 = vld [vmem:[%s8236_s9 + $0x14] sm:$0xf0]  ;;  %v6896_v2 = vld [vmem:[%s8236_s9 + $0x14] sm:$0xf] }
 0x171   : >> { %2421 = vmatpush.bf16.msrb.mxu0 %v7928_v48  ;;  %10079 = vst [vmem:[#allocation11_spill] sm:$0xff] %v8086_v46  ;;  %v8090_v48 = vor.u32 %v6822_v43, %v5924_v44  ;;  %v8184_v43 = vor.u32 %v6860_v37, %v5681_v36  ;;  %v8186_v44 = vor.u32 %v6877_v38, %v5755_v39  ;;  %v6069_v63 = vld [vmem:[%s8236_s9 + $0x10] sm:$0xf]  ;;  %v6819_v1 = vld [vmem:[%s7962_s15 + $0x94] sm:$0xf0] }
 0x172   : >> { %3302 = vmatpush.bf16.msrb.mxu1 %v6929_v13  ;;  %10100 = vst [vmem:[#allocation32_spill] sm:$0xff] %v8218_v6  ;;  %v8245_v36 = vor.u32 %v6864_v15, %v5697_v14  ;;  %v8247_v37 = vor.u32 %v6895_v23, %v6061_v17  ;;  %v6071_v14 = vld [vmem:[%s8236_s9 + $0x18] sm:$0xf0]  ;;  %v8287_v23 = vor.u32 %v6897_v0, %v6069_v63  ;;  %v5713_v0 = vld [vmem:[%s7951_s8 + $0xa0] sm:$0xf] }
 0x173   : >> { %2873 = vmatpush.bf16.msrb.mxu2 %v7937_v50  ;;  %10081 = vst [vmem:[#allocation13_spill] sm:$0xff] %v8090_v48  ;;  %v6854_v50 = vld [vmem:[%s7951_s8 + $0x34] sm:$0xf0]  ;;  %v6902_v20 = vld [vmem:[%s8236_s9 + $0x44] sm:$0xf] }
 0x174   : >> { %v8106_v57 = vor.u32 %v6854_v50, %v5657_v49  ;;  %10094 = vst [vmem:[#allocation26_spill] sm:$0xff] %v8184_v43  ;;  %v8188_v49 = vor.u32 %v6813_v41, %v5882_v40  ;;  %v8190_v50 = vor.u32 %v6830_v18, %v5956_v42  ;;  %v8253_v40 = vor.u32 %v6817_v24, %v5898_v16 }
 0x175   : >> { %2422 = vmatpush.bf16.msrb.mxu0 %v7945_v52  ;;  %v5731_v52 = vld [vmem:[%s7951_s8 + $0xc8] sm:$0xf0]  ;;  %10095 = vst [vmem:[#allocation27_spill] sm:$0xff] %v8186_v44  ;;  %v8255_v41 = vor.u32 %v6894_v25, %v6063_v26 }
 0x176   : >> { %10082 = vst [vmem:[#allocation14_spill] sm:$0xff] %v8106_v57  ;;  %v8108_v58 = vor.u32 %v6871_v51, %v5731_v52  ;;  %3303 = vmatpush.bf16.msrb.mxu1 %v6928_v31  ;;  %v6951_v51 = vld [vmem:[%s9891_s1 + $0xb8] sm:$0xff] }
 0x177   : >> { %2874 = vmatpush.bf16.msrb.mxu2 %v7959_v56  ;;  %v5932_v56 = vld [vmem:[%s7962_s15 + $0xc8] sm:$0xf0]  ;;  %10096 = vst [vmem:[#allocation28_spill] sm:$0xff] %v8188_v49  ;;  %4002 = vmatpush.bf16.msra.mxu3 %v6951_v51  ;;  %v6947_v52 = vld [vmem:[%s9891_s1 + $0x98] sm:$0xff] }
 0x178   : >> { %2340 = vmatmul.bf16.gmra.mxu0 %v8056_v32  ;;  %10083 = vst [vmem:[#allocation15_spill] sm:$0xff] %v8108_v58  ;;  %v8112_v60 = vor.u32 %v6824_v55, %v5932_v56  ;;  %v6879_v55 = vld [vmem:[%s7951_s8 + $0x104] sm:$0xf]  ;;  %v5763_v56 = vld [vmem:[%s7951_s8 + $0x108] sm:$0xf0] }
 0x179   : >> { %5825 = vmatmul.msk.bf16.gmra.mxu1 %vm2275_vm3, %v8058_v33  ;;  %10097 = vst [vmem:[#allocation29_spill] sm:$0xff] %v8190_v50  ;;  %v8214_v4 = vor.u32 %v6879_v55, %v5763_v56  ;;  %v6866_v55 = vld [vmem:[%s7951_s8 + $0x94] sm:$0xf0]  ;;  %v5906_v56 = vld [vmem:[%s7962_s15 + $0x90] sm:$0xf] }
 0x17a   : >> { %2792 = vmatmul.bf16.gmra.mxu2 %v8060_v34  ;;  %10085 = vst [vmem:[#allocation17_spill] sm:$0xff] %v8112_v60  ;;  %3906 = vmatpush.bf16.msra.mxu1 %v6947_v52  ;;  %v8285_v17 = vor.u32 %v6866_v55, %v5705_v54  ;;  %v8293_v26 = vor.u32 %v6819_v1, %v5906_v56  ;;  %v6868_v1 = vld [vmem:[%s7951_s8 + $0xa4] sm:$0xf0] }
 0x17b   : >> { %6026 = vmatmul.msk.bf16.gmra.mxu3 %vm2275_vm3, %v8062_v35  ;;  %10099 = vst [vmem:[#allocation31_spill] sm:$0xff] %v8214_v4 }
 0x17c   : >> { %10102 = vst [vmem:[#allocation34_spill] sm:$0xff] %v8245_v36 }
 0x17d   : >> { %10103 = vst [vmem:[#allocation35_spill] sm:$0xff] %v8247_v37 }
 0x17e   : >> { %10104 = vst [vmem:[#allocation36_spill] sm:$0xff] %v8253_v40  ;;  %3907 = vmatpush.bf16.msra.mxu1 %v6946_v53  ;;  %v8295_v53 = vor.u32 %v6896_v2, %v6071_v14  ;;  %v5914_v2 = vld [vmem:[%s7962_s15 + $0xa0] sm:$0xf] }
 0x17f   : >> { %10105 = vst [vmem:[#allocation37_spill] sm:$0xff] %v8255_v41  ;;  %v6077_v14 = vld [vmem:[%s8236_s9 + $0x20] sm:$0xf] }
 0x180   : >> { %10106 = vst [vmem:[#allocation38_spill] sm:$0xff] %v8285_v17 }
 0x181   : >> { %10107 = vst [vmem:[#allocation39_spill] sm:$0xff] %v8287_v23 }
 0x182   : >> { %10108 = vst [vmem:[#allocation40_spill] sm:$0xff] %v8293_v26 }
 0x183   : >> { %10109 = vst [vmem:[#allocation41_spill] sm:$0xff] %v8295_v53 }
 0x188   : >> { %2345 = vmatmul.bf16.gmra.mxu0 %v8084_v45 }
 0x189   : >> { %5826 = vmatmul.msk.bf16.gmra.mxu1 %vm2275_vm3, %v8086_v46  ;;  %v6087_v46 = vld [vmem:[%s8236_s9 + $0x38] sm:$0xf0] }
 0x18a   : >> { %2797 = vmatmul.bf16.gmra.mxu2 %v8088_v47 }
 0x18b   : >> { %6027 = vmatmul.msk.bf16.gmra.mxu3 %vm2275_vm3, %v8090_v48  ;;  %v6900_v48 = vld [vmem:[%s8236_s9 + $0x34] sm:$0xf] }
 0x18c   : >> { %v8371_v22 = vor.u32 %v6900_v48, %v6087_v46  ;;  %v6872_v46 = vld [vmem:[%s7951_s8 + $0xc4] sm:$0xf0]  ;;  %v5930_v48 = vld [vmem:[%s7962_s15 + $0xc0] sm:$0xf] }
 0x18e   : >> { %10122 = vst [vmem:[#allocation54_spill] sm:$0xff] %v8371_v22 }
 0x198   : >> { %2350 = vmatmul.bf16.gmra.mxu0 %v8106_v57 }
 0x199   : >> { %5827 = vmatmul.msk.bf16.gmra.mxu1 %vm2275_vm3, %v8108_v58  ;;  %v6823_v58 = vld [vmem:[%s7962_s15 + $0xb4] sm:$0xf0] }
 0x19a   : >> { %2802 = vmatmul.bf16.gmra.mxu2 %v8110_v59 }
 0x19b   : >> { %6028 = vmatmul.msk.bf16.gmra.mxu3 %vm2275_vm3, %v8112_v60  ;;  %v6901_v60 = vld [vmem:[%s8236_s9 + $0x34] sm:$0xf0] }
 0x1a8   : >> { %2354 = vmatmul.bf16.gmra.mxu0 %v8134_v9 }
 0x1a9   : >> { %5828 = vmatmul.msk.bf16.gmra.mxu1 %vm2275_vm3, %v8136_v10 }
 0x1aa   : >> { %2806 = vmatmul.bf16.gmra.mxu2 %v8138_v11 }
 0x1ab   : >> { %6029 = vmatmul.msk.bf16.gmra.mxu3 %vm2275_vm3, %v8140_v12 }
 0x1b8   : >> { %2359 = vmatmul.bf16.gmra.mxu0 %v8159_v27 }
 0x1b9   : >> { %5829 = vmatmul.msk.bf16.gmra.mxu1 %vm2275_vm3, %v8161_v28 }
 0x1ba   : >> { %2811 = vmatmul.bf16.gmra.mxu2 %v8163_v29 }
 0x1bb   : >> { %6030 = vmatmul.msk.bf16.gmra.mxu3 %vm2275_vm3, %v8165_v30 }
 0x1c8   : >> { %2364 = vmatmul.bf16.gmra.mxu0 %v8184_v43 }
 0x1c9   : >> { %5830 = vmatmul.msk.bf16.gmra.mxu1 %vm2275_vm3, %v8186_v44 }
 0x1ca   : >> { %2816 = vmatmul.bf16.gmra.mxu2 %v8188_v49  ;;  %v6944_v49 = vld [vmem:[%s9891_s1 + $0x80] sm:$0xff] }
 0x1cb   : >> { %6031 = vmatmul.msk.bf16.gmra.mxu3 %vm2275_vm3, %v8190_v50 }
 0x1d6   : >> { %v8216_v5 = vpop.f32.mrf.mxu1 }
 0x1d8   : >> { %2369 = vmatmul.bf16.gmra.mxu0 %v8212_v3 }
 0x1d9   : >> { %5831 = vmatmul.msk.bf16.gmra.mxu1 %vm2275_vm3, %v8214_v4 }
 0x1da   : >> { %2821 = vmatmul.bf16.gmra.mxu2 %v8218_v6 }
 0x1db   : >> { %6032 = vmatmul.msk.bf16.gmra.mxu3 %vm2275_vm3, %v8220_v7  ;;  %v6079_v7 = vld [vmem:[%s8236_s9 + $0x28] sm:$0xf0] }
 0x1de   : >> { %v8229_v8 = vpop.f32.mrf.mxu3  ;;  %v8231_v13 = vpop.f32.mrf.mxu1 }
 0x1e5   : >> { %v8249_v38 = vpop.f32.mrf.mxu0 }
 0x1e6   : >> { %v8243_v31 = vpop.f32.mrf.mxu3  ;;  %v8251_v39 = vpop.f32.mrf.mxu1 }
 0x1e8   : >> { %2373 = vmatmul.bf16.gmra.mxu0 %v8245_v36  ;;  %v6103_v36 = vld [vmem:[%s8236_s9 + $0x58] sm:$0xf0] }
 0x1e9   : >> { %3304 = vmatmul.bf16.vlgmr.msrb.gmra.mxu1 %v8247_v37  ;;  %v6821_v37 = vld [vmem:[%s7962_s15 + $0xa4] sm:$0xf0] }
 0x1ea   : >> { %2825 = vmatmul.bf16.gmra.mxu2 %v8253_v40  ;;  %v8330_v12 = vor.u32 %v6821_v37, %v5914_v2  ;;  %v5721_v2 = vld [vmem:[%s7951_s8 + $0xb0] sm:$0xf]  ;;  %v6827_v40 = vld [vmem:[%s7962_s15 + $0xd4] sm:$0xf0] }
 0x1eb   : >> { %6243 = vmatmul.msk.bf16.vlgmr.msrb.gmra.mxu3 %vm2275_vm3, %v8255_v41  ;;  %v6899_v41 = vld [vmem:[%s8236_s9 + $0x24] sm:$0xf0] }
 0x1ec   : >> { %v8324_v44 = vor.u32 %v6899_v41, %v6077_v14  ;;  %10112 = vst [vmem:[#allocation44_spill] sm:$0xff] %v8330_v12  ;;  %v6870_v14 = vld [vmem:[%s7951_s8 + $0xb4] sm:$0xf0] }
 0x1ed   : >> { %v8262_v18 = vpop.f32.mrf.mxu2  ;;  %v8266_v51 = vpop.f32.mrf.mxu0 }
 0x1ee   : >> { %v8264_v42 = vpop.f32.mrf.mxu3  ;;  %v8268_v52 = vpop.f32.mrf.mxu1  ;;  %10111 = vst [vmem:[#allocation43_spill] sm:$0xff] %v8324_v44 }
 0x1f5   : >> { %v8281_v15 = vpop.f32.mrf.mxu2  ;;  %v8289_v24 = vpop.f32.mrf.mxu0 }
 0x1f6   : >> { %v8283_v16 = vpop.f32.mrf.mxu3  ;;  %v8291_v25 = vpop.f32.mrf.mxu1 }
 0x1f8   : >> { %2378 = vmatmul.bf16.gmra.mxu0 %v8285_v17 }
 0x1f9   : >> { %3309 = vmatmul.bf16.gmra.mxu1 %v8287_v23  ;;  %v6898_v23 = vld [vmem:[%s8236_s9 + $0x24] sm:$0xf] }
 0x1fa   : >> { %2830 = vmatmul.bf16.gmra.mxu2 %v8293_v26  ;;  %v8332_v10 = vor.u32 %v6898_v23, %v6079_v7  ;;  %v6950_v7 = vld [vmem:[%s9891_s1 + $0xb0] sm:$0xff] }
 0x1fb   : >> { %6244 = vmatmul.msk.bf16.gmra.mxu3 %vm2275_vm3, %v8295_v53  ;;  %v8322_v53 = vor.u32 %v6868_v1, %v5713_v0  ;;  %v6945_v1 = vld [vmem:[%s9891_s1 + $0x88] sm:$0xff] }
 0x1fc   : >> { %10113 = vst [vmem:[#allocation45_spill] sm:$0xff] %v8332_v10  ;;  %4003 = vmatpush.bf16.msra.mxu3 %v6950_v7  ;;  %3908 = vmatpush.bf16.msra.mxu1 %v6945_v1 }
 0x1fd   : >> { %v8302_v54 = vpop.f32.mrf.mxu2  ;;  %v8306_v63 = vpop.f32.mrf.mxu0  ;;  %10110 = vst [vmem:[#allocation42_spill] sm:$0xff] %v8322_v53 }
 0x1fe   : >> { %v8304_v55 = vpop.f32.mrf.mxu3  ;;  %v8308_v56 = vpop.f32.mrf.mxu1 }
 0x200   : >> { %3909 = vmatpush.bf16.msra.mxu1 %v6944_v49  ;;  %v6876_v49 = vld [vmem:[%s7951_s8 + $0xe4] sm:$0xf0] }
 0x205   : >> { %v8318_v4 = vpop.f32.mrf.mxu2  ;;  %v8326_v30 = vpop.f32.mrf.mxu0 }
 0x206   : >> { %v8320_v50 = vpop.f32.mrf.mxu3  ;;  %v8328_v28 = vpop.f32.mrf.mxu1 }
 0x208   : >> { %2383 = vmatmul.bf16.gmra.mxu0 %v8322_v53 }
 0x209   : >> { %3314 = vmatmul.bf16.gmra.mxu1 %v8324_v44  ;;  %v6085_v44 = vld [vmem:[%s8236_s9 + $0x30] sm:$0xf] }
 0x20a   : >> { %2835 = vmatmul.bf16.gmra.mxu2 %v8330_v12  ;;  %v8363_v12 = vor.u32 %v6901_v60, %v6085_v44 }
 0x20b   : >> { %6245 = vmatmul.msk.bf16.gmra.mxu3 %vm2275_vm3, %v8332_v10  ;;  %v5922_v10 = vld [vmem:[%s7962_s15 + $0xb0] sm:$0xf] }
 0x20c   : >> { %10119 = vst [vmem:[#allocation51_spill] sm:$0xff] %v8363_v12  ;;  %v8369_v53 = vor.u32 %v6823_v58, %v5922_v10  ;;  %v5729_v10 = vld [vmem:[%s7951_s8 + $0xc0] sm:$0xf] }
 0x20d   : >> { %v8339_v41 = vpop.f32.mrf.mxu2  ;;  %v8346_v23 = vpop.f32.mrf.mxu0 }
 0x20e   : >> { %10114 = vst [vmem:[#allocation46_spill] sm:$0xff] %v8339_v41  ;;  %v8341_v37 = vpop.f32.mrf.mxu3  ;;  %v2479_v0 = vpop.f32.mrf.mxu1 }
 0x20f   : >> { %10115 = vst [vmem:[#allocation47_spill] sm:$0xff] %v8341_v37  ;;  %v8361_v0 = vor.u32 %v6870_v14, %v5721_v2  ;;  %v6093_v2 = vld [vmem:[%s8236_s9 + $0x40] sm:$0xf]  ;;  %v6903_v14 = vld [vmem:[%s8236_s9 + $0x44] sm:$0xf0] }
 0x210   : >> { %10116 = vst [vmem:[#allocation48_spill] sm:$0xff] %v8346_v23  ;;  %v8396_v17 = vor.u32 %v6903_v14, %v6093_v2  ;;  %v6101_v14 = vld [vmem:[%s8236_s9 + $0x50] sm:$0xf] }
 0x211   : >> { %10118 = vst [vmem:[#allocation50_spill] sm:$0xff] %v8361_v0 }
 0x212   : >> { %10121 = vst [vmem:[#allocation53_spill] sm:$0xff] %v8369_v53 }
 0x213   : >> { %10127 = vst [vmem:[#allocation59_spill] sm:$0xff] %v8396_v17 }
 0x215   : >> { %v8359_v35 = vpop.f32.mrf.mxu2  ;;  %v8365_v7 = vpop.f32.mrf.mxu0 }
 0x216   : >> { %10117 = vst [vmem:[#allocation49_spill] sm:$0xff] %v8359_v35  ;;  %v2931_v33 = vpop.f32.mrf.mxu3  ;;  %v8367_v1 = vpop.f32.mrf.mxu1 }
 0x217   : >> { %10120 = vst [vmem:[#allocation52_spill] sm:$0xff] %v8365_v7 }
 0x218   : >> { %2388 = vmatmul.bf16.gmra.mxu0 %v8361_v0  ;;  %v6825_v0 = vld [vmem:[%s7962_s15 + $0xc4] sm:$0xf0] }
 0x219   : >> { %3319 = vmatmul.bf16.gmra.mxu1 %v8363_v12  ;;  %v6095_v12 = vld [vmem:[%s8236_s9 + $0x48] sm:$0xf0]  ;;  %v8402_v61 = vor.u32 %v6825_v0, %v5930_v48  ;;  %v5938_v48 = vld [vmem:[%s7962_s15 + $0xd0] sm:$0xf] }
 0x21a   : >> { %2840 = vmatmul.bf16.gmra.mxu2 %v8369_v53  ;;  %v8442_v27 = vor.u32 %v6827_v40, %v5938_v48  ;;  %v5946_v48 = vld [vmem:[%s7962_s15 + $0xe0] sm:$0xf] }
 0x21b   : >> { %6246 = vmatmul.msk.bf16.gmra.mxu3 %vm2275_vm3, %v8371_v22  ;;  %v8394_v22 = vor.u32 %v6872_v46, %v5729_v10  ;;  %10129 = vst [vmem:[#allocation61_spill] sm:$0xff] %v8402_v61 }
 0x21c   : >> { %10139 = vst [vmem:[#allocation71_spill] sm:$0xff] %v8442_v27 }
 0x21d   : >> { %v8378_v33 = vpop.f32.mrf.mxu2  ;;  %v2353_v44 = vpop.f32.mrf.mxu0  ;;  %10126 = vst [vmem:[#allocation58_spill] sm:$0xff] %v8394_v22 }
 0x21e   : >> { %10123 = vst [vmem:[#allocation55_spill] sm:$0xff] %v8378_v33  ;;  %v8380_v60 = vpop.f32.mrf.mxu3  ;;  %v8382_v58 = vpop.f32.mrf.mxu1 }
 0x21f   : >> { %10124 = vst [vmem:[#allocation56_spill] sm:$0xff] %v8380_v60 }
 0x225   : >> { %v2805_v26 = vpop.f32.mrf.mxu2  ;;  %v8398_v44 = vpop.f32.mrf.mxu0 }
 0x226   : >> { %v8392_v53 = vpop.f32.mrf.mxu3  ;;  %10128 = vst [vmem:[#allocation60_spill] sm:$0xff] %v8398_v44  ;;  %v8400_v62 = vpop.f32.mrf.mxu1  ;;  %v8404_v26 = vor.u32 %v6902_v20, %v6095_v12  ;;  %v5737_v20 = vld [vmem:[%s7951_s8 + $0xd0] sm:$0xf]  ;;  %v6874_v12 = vld [vmem:[%s7951_s8 + $0xd4] sm:$0xf0] }
 0x227   : >> { %10125 = vst [vmem:[#allocation57_spill] sm:$0xff] %v8392_v53 }
 0x228   : >> { %10130 = vst [vmem:[#allocation62_spill] sm:$0xff] %v8404_v26  ;;  %2392 = vmatmul.bf16.gmra.mxu0 %v8394_v22  ;;  %v6905_v22 = vld [vmem:[%s8236_s9 + $0x54] sm:$0xf0] }
 0x229   : >> { %3323 = vmatmul.bf16.gmra.mxu1 %v8396_v17  ;;  %v6904_v17 = vld [vmem:[%s8236_s9 + $0x54] sm:$0xf]  ;;  %v8433_v3 = vor.u32 %v6905_v22, %v6101_v14  ;;  %v6109_v14 = vld [vmem:[%s8236_s9 + $0x60] sm:$0xf] }
 0x22a   : >> { %2844 = vmatmul.bf16.gmra.mxu2 %v8402_v61 }
 0x22b   : >> { %6247 = vmatmul.msk.bf16.gmra.mxu3 %vm2275_vm3, %v8404_v26  ;;  %v8431_v26 = vor.u32 %v6874_v12, %v5737_v20  ;;  %10137 = vst [vmem:[#allocation69_spill] sm:$0xff] %v8433_v3  ;;  %v8444_v20 = vor.u32 %v6904_v17, %v6103_v36  ;;  %v5745_v17 = vld [vmem:[%s7951_s8 + $0xe0] sm:$0xf] }
 0x22d   : >> { %v8411_v10 = vpop.f32.mrf.mxu2  ;;  %v8415_v2 = vpop.f32.mrf.mxu0  ;;  %10136 = vst [vmem:[#allocation68_spill] sm:$0xff] %v8431_v26 }
 0x22e   : >> { %10131 = vst [vmem:[#allocation63_spill] sm:$0xff] %v8411_v10  ;;  %v8413_v46 = vpop.f32.mrf.mxu3  ;;  %v8417_v0 = vpop.f32.mrf.mxu1 }
 0x22f   : >> { %10132 = vst [vmem:[#allocation64_spill] sm:$0xff] %v8413_v46 }
 0x230   : >> { %10133 = vst [vmem:[#allocation65_spill] sm:$0xff] %v8415_v2 }
 0x231   : >> { %10140 = vst [vmem:[#allocation72_spill] sm:$0xff] %v8444_v20 }
 0x235   : >> { %v8427_v61 = vpop.f32.mrf.mxu2  ;;  %v8438_v43 = vpop.f32.mrf.mxu0 }
 0x236   : >> { %10134 = vst [vmem:[#allocation66_spill] sm:$0xff] %v8427_v61  ;;  %v8429_v6 = vpop.f32.mrf.mxu3  ;;  %v8440_v29 = vpop.f32.mrf.mxu1 }
 0x237   : >> { %10135 = vst [vmem:[#allocation67_spill] sm:$0xff] %v8429_v6  ;;  %v6111_v6 = vld [vmem:[%s8236_s9 + $0x68] sm:$0xf0] }
 0x238   : >> { %10138 = vst [vmem:[#allocation70_spill] sm:$0xff] %v8438_v43  ;;  %2397 = vmatmul.bf16.gmra.mxu0 %v8431_v26  ;;  %v6907_v26 = vld [vmem:[%s8236_s9 + $0x64] sm:$0xf0] }
 0x239   : >> { %3328 = vmatmul.bf16.gmra.mxu1 %v8433_v3  ;;  %v6829_v43 = vld [vmem:[%s7962_s15 + $0xe4] sm:$0xf0]  ;;  %v6906_v3 = vld [vmem:[%s8236_s9 + $0x64] sm:$0xf] }
 0x23a   : >> { %2849 = vmatmul.bf16.gmra.mxu2 %v8442_v27  ;;  %v8479_v2 = vor.u32 %v6829_v43, %v5946_v48  ;;  %v8481_v46 = vor.u32 %v6906_v3, %v6111_v6  ;;  %v6949_v6 = vld [vmem:[%s9891_s1 + $0xa8] sm:$0xff]  ;;  %v6878_v48 = vld [vmem:[%s7951_s8 + $0xf4] sm:$0xf0] }
 0x23b   : >> { %6248 = vmatmul.msk.bf16.gmra.mxu3 %vm2275_vm3, %v8444_v20  ;;  %v8471_v20 = vor.u32 %v6876_v49, %v5745_v17  ;;  %v5753_v49 = vld [vmem:[%s7951_s8 + $0xf0] sm:$0xf] }
 0x23c   : >> { %10149 = vst [vmem:[#allocation81_spill] sm:$0xff] %v8479_v2  ;;  %4004 = vmatpush.bf16.msra.mxu3 %v6949_v6  ;;  %v6943_v6 = vld [vmem:[%s9891_s1 + $0x78] sm:$0xff] }
 0x23d   : >> { %v8451_v22 = vpop.f32.mrf.mxu2  ;;  %v8455_v40 = vpop.f32.mrf.mxu0  ;;  %10146 = vst [vmem:[#allocation78_spill] sm:$0xff] %v8471_v20  ;;  %3910 = vmatpush.bf16.msra.mxu1 %v6943_v6 }
 0x23e   : >> { %10141 = vst [vmem:[#allocation73_spill] sm:$0xff] %v8451_v22  ;;  %v8453_v12 = vpop.f32.mrf.mxu3  ;;  %v8457_v36 = vpop.f32.mrf.mxu1 }
 0x23f   : >> { %10142 = vst [vmem:[#allocation74_spill] sm:$0xff] %v8453_v12  ;;  %v8473_v12 = vor.u32 %v6907_v26, %v6109_v14  ;;  %v5954_v14 = vld [vmem:[%s7962_s15 + $0xf0] sm:$0xf] }
 0x240   : >> { %10143 = vst [vmem:[#allocation75_spill] sm:$0xff] %v8455_v40 }
 0x241   : >> { %10147 = vst [vmem:[#allocation79_spill] sm:$0xff] %v8473_v12 }
 0x242   : >> { %10150 = vst [vmem:[#allocation82_spill] sm:$0xff] %v8481_v46 }
 0x245   : >> { %v8467_v27 = vpop.f32.mrf.mxu2  ;;  %v8475_v40 = vpop.f32.mrf.mxu0 }
 0x246   : >> { %10144 = vst [vmem:[#allocation76_spill] sm:$0xff] %v8467_v27  ;;  %v8469_v61 = vpop.f32.mrf.mxu3  ;;  %v8477_v22 = vpop.f32.mrf.mxu1 }
 0x247   : >> { %10145 = vst [vmem:[#allocation77_spill] sm:$0xff] %v8469_v61 }
 0x248   : >> { %10148 = vst [vmem:[#allocation80_spill] sm:$0xff] %v8475_v40  ;;  %2402 = vmatmul.bf16.gmra.mxu0 %v8471_v20  ;;  %v6909_v20 = vld [vmem:[%s8236_s9 + $0x74] sm:$0xf0]  ;;  %v6908_v40 = vld [vmem:[%s8236_s9 + $0x74] sm:$0xf] }
 0x249   : >> { %3333 = vmatmul.bf16.gmra.mxu1 %v8473_v12  ;;  %v6117_v12 = vld [vmem:[%s8236_s9 + $0x70] sm:$0xf] }
 0x24a   : >> { %2854 = vmatmul.bf16.gmra.mxu2 %v8479_v2  ;;  %v6831_v2 = vld [vmem:[%s7962_s15 + $0xf4] sm:$0xf0] }
 0x24b   : >> { %6249 = vmatmul.msk.bf16.gmra.mxu3 %vm2275_vm3, %v8481_v46  ;;  %v6119_v46 = vld [vmem:[%s8236_s9 + $0x78] sm:$0xf0]  ;;  %v8513_v10 = vor.u32 %v6831_v2, %v5954_v14  ;;  %v6125_v14 = vld [vmem:[%s8236_s9 + $0x80] sm:$0xf] }
 0x24c   : >> { %v8515_v11 = vor.u32 %v6908_v40, %v6119_v46  ;;  %v6959_v40 = vld [vmem:[%s9891_s1 + $0x1b8] sm:$0xff] }
 0x24d   : >> { %v8488_v26 = vpop.f32.mrf.mxu2  ;;  %v8492_v43 = vpop.f32.mrf.mxu0  ;;  %10158 = vst [vmem:[#allocation90_spill] sm:$0xff] %v8513_v10  ;;  %3650 = vmatpush.bf16.msra.mxu0 %v6959_v40 }
 0x24e   : >> { %10151 = vst [vmem:[#allocation83_spill] sm:$0xff] %v8488_v26  ;;  %v8490_v17 = vpop.f32.mrf.mxu3  ;;  %v2498_v3 = vpop.f32.mrf.mxu1 }
 0x24f   : >> { %10152 = vst [vmem:[#allocation84_spill] sm:$0xff] %v8490_v17  ;;  %v8507_v17 = vor.u32 %v6878_v48, %v5753_v49  ;;  %v6880_v49 = vld [vmem:[%s7951_s8 + $0x104] sm:$0xf0]  ;;  %v5962_v48 = vld [vmem:[%s7962_s15 + $0x100] sm:$0xf] }
 0x250   : >> { %10153 = vst [vmem:[#allocation85_spill] sm:$0xff] %v8492_v43  ;;  %v8509_v43 = vor.u32 %v6909_v20, %v6117_v12 }
 0x251   : >> { %10155 = vst [vmem:[#allocation87_spill] sm:$0xff] %v8507_v17 }
 0x252   : >> { %10156 = vst [vmem:[#allocation88_spill] sm:$0xff] %v8509_v43 }
 0x253   : >> { %10159 = vst [vmem:[#allocation91_spill] sm:$0xff] %v8515_v11 }
 0x255   : >> { %v8505_v61 = vpop.f32.mrf.mxu2  ;;  %v8511_v3 = vpop.f32.mrf.mxu0 }
 0x256   : >> { %10154 = vst [vmem:[#allocation86_spill] sm:$0xff] %v8505_v61  ;;  %v2950_v26 = vpop.f32.mrf.mxu3  ;;  %v2500_v27 = vpop.f32.mrf.mxu1 }
 0x257   : >> { %10157 = vst [vmem:[#allocation89_spill] sm:$0xff] %v8511_v3  ;;  %v6963_v27 = vld [vmem:[%s9891_s1 + $0x1d8] sm:$0xff]  ;;  %v5761_v26 = vld [vmem:[%s7951_s8 + $0x100] sm:$0xf] }
 0x258   : >> { %2407 = vmatmul.bf16.gmra.mxu0 %v8507_v17  ;;  %3746 = vmatpush.bf16.msra.mxu2 %v6963_v27  ;;  %v6127_v17 = vld [vmem:[%s8236_s9 + $0x88] sm:$0xf0]  ;;  %v8541_v3 = vor.u32 %v6880_v49, %v5761_v26 }
 0x259   : >> { %3338 = vmatmul.bf16.gmra.mxu1 %v8509_v43  ;;  %v6833_v43 = vld [vmem:[%s7962_s15 + $0x104] sm:$0xf0] }
 0x25a   : >> { %2859 = vmatmul.bf16.gmra.mxu2 %v8513_v10  ;;  %v6910_v10 = vld [vmem:[%s8236_s9 + $0x84] sm:$0xf]  ;;  %10161 = vst [vmem:[#allocation93_spill] sm:$0xff] %v8541_v3 }
 0x25b   : >> { %6250 = vmatmul.msk.bf16.gmra.mxu3 %vm2275_vm3, %v8515_v11  ;;  %v6911_v11 = vld [vmem:[%s8236_s9 + $0x84] sm:$0xf0]  ;;  %v8547_v61 = vor.u32 %v6910_v10, %v6127_v17 }
 0x25d   : >> { %v8528_v46 = vpop.f32.mrf.mxu2  ;;  %v2372_v20 = vpop.f32.mrf.mxu0  ;;  %10164 = vst [vmem:[#allocation96_spill] sm:$0xff] %v8547_v61 }
 0x25e   : >> { %10160 = vst [vmem:[#allocation92_spill] sm:$0xff] %v8528_v46  ;;  %v2952_v2 = vpop.f32.mrf.mxu3  ;;  %v2501_v12 = vpop.f32.mrf.mxu1  ;;  %v8545_v46 = vor.u32 %v6833_v43, %v5962_v48  ;;  %v6958_v48 = vld [vmem:[%s9891_s1 + $0x1b0] sm:$0xff] }
 0x25f   : >> { %v8543_v2 = vor.u32 %v6911_v11, %v6125_v14  ;;  %v6847_v14 = vld [vmem:[%s7951_s8 + $0x4] sm:$0xf]  ;;  %3651 = vmatpush.bf16.msra.mxu0 %v6958_v48 }
 0x260   : >> { %10163 = vst [vmem:[#allocation95_spill] sm:$0xff] %v8545_v46 }
 0x261   : >> { %10162 = vst [vmem:[#allocation94_spill] sm:$0xff] %v8543_v2 }
 0x265   : >> { %v2824_v6 = vpop.f32.mrf.mxu2  ;;  %v2374_v20 = vpop.f32.mrf.mxu0 }
 0x266   : >> { %v2953_v27 = vpop.f32.mrf.mxu3  ;;  %v3305_v12 = vpop.f32.mrf.mxu1  ;;  %v2463_v11 = vadd.f32 %v8216_v5, %v2374_v20  ;;  %v5635_v6 = vld [vmem:[%s7951_s8 + $0x8] sm:$0xf0]  ;;  %v6912_v20 = vld [vmem:[%s8236_s9 + $0x94] sm:$0xf] }
 0x267   : >> { %v6800_v27 = vld [vmem:[%s7962_s15 + $0x4] sm:$0xf]  ;;  %v5836_v5 = vld [vmem:[%s7962_s15 + $0x8] sm:$0xf0] }
 0x268   : >> { %2411 = vmatmul.bf16.gmra.mxu0 %v8541_v3  ;;  %v8579_v33 = vor.u32 %v6800_v27, %v5836_v5  ;;  %v6957_v5 = vld [vmem:[%s9891_s1 + $0x1a8] sm:$0xff] }
 0x269   : >> { %3342 = vmatmul.bf16.gmra.mxu1 %v8543_v2  ;;  %v6913_v2 = vld [vmem:[%s8236_s9 + $0x94] sm:$0xf0]  ;;  %3652 = vmatpush.bf16.msra.mxu0 %v6957_v5 }
 0x26a   : >> { %2863 = vmatmul.bf16.gmra.mxu2 %v8545_v46  ;;  %v6135_v46 = vld [vmem:[%s8236_s9 + $0x98] sm:$0xf0]  ;;  %10166 = vst [vmem:[#allocation98_spill] sm:$0xff] %v8579_v33 }
 0x26b   : >> { %6251 = vmatmul.msk.bf16.gmra.mxu3 %vm2275_vm3, %v8547_v61  ;;  %v6133_v61 = vld [vmem:[%s8236_s9 + $0x90] sm:$0xf]  ;;  %v8581_v48 = vor.u32 %v6912_v20, %v6135_v46  ;;  %v6849_v20 = vld [vmem:[%s7951_s8 + $0x14] sm:$0xf] }
 0x26c   : >> { %v8573_v3 = vor.u32 %v6913_v2, %v6133_v61  ;;  %v6962_v61 = vld [vmem:[%s9891_s1 + $0x1d0] sm:$0xff] }
 0x26d   : >> { %v2826_v43 = vpop.f32.mrf.mxu2  ;;  %v2376_v26 = vpop.f32.mrf.mxu0  ;;  %10167 = vst [vmem:[#allocation99_spill] sm:$0xff] %v8581_v48  ;;  %3747 = vmatpush.bf16.msra.mxu2 %v6962_v61  ;;  %v6914_v61 = vld [vmem:[%s8236_s9 + $0xa4] sm:$0xf] }
 0x26e   : >> { %v3393_v40 = vpop.f32.mrf.mxu3  ;;  %v8555_v10 = vadd.f32 %v2826_v43, %v2463_v11  ;;  %v3307_v49 = vpop.f32.mrf.mxu1  ;;  %v2465_v11 = vadd.f32 %v8231_v13, %v2376_v26  ;;  %10165 = vst [vmem:[#allocation97_spill] sm:$0xff] %v8573_v3  ;;  %v6942_v13 = vld [vmem:[%s9891_s1 + $0x70] sm:$0xff] }
 0x26f   : >> { %v8557_v17 = vadd.f32 %v3393_v40, %v3305_v12  ;;  %v8571_v40 = vor.u32 %v6847_v14, %v5635_v6  ;;  %3911 = vmatpush.bf16.msra.mxu1 %v6942_v13  ;;  %v6143_v13 = vld [vmem:[%s8236_s9 + $0xa8] sm:$0xf0] }
 0x270   : >> { %v8623_v35 = vor.u32 %v6914_v61, %v6143_v13  ;;  %v5651_v61 = vld [vmem:[%s7951_s8 + $0x28] sm:$0xf0]  ;;  %v6804_v13 = vld [vmem:[%s7962_s15 + $0x24] sm:$0xf] }
 0x272   : >> { %10170 = vst [vmem:[#allocation102_spill] sm:$0xff] %v8623_v35 }
 0x275   : >> { %v2828_v43 = vpop.f32.mrf.mxu2  ;;  %v2379_v53 = vpop.f32.mrf.mxu0 }
 0x276   : >> { %v3395_v12 = vpop.f32.mrf.mxu3  ;;  %v8575_v9 = vadd.f32 %v2828_v43, %v2465_v11  ;;  %v3310_v60 = vpop.f32.mrf.mxu1  ;;  %v2468_v46 = vadd.f32 %v8251_v39, %v2379_v53  ;;  %v5643_v11 = vld [vmem:[%s7951_s8 + $0x18] sm:$0xf0]  ;;  %v6802_v39 = vld [vmem:[%s7962_s15 + $0x14] sm:$0xf]  ;;  %v6141_v53 = vld [vmem:[%s8236_s9 + $0xa0] sm:$0xf] }
 0x277   : >> { %v8577_v44 = vadd.f32 %v3395_v12, %v3307_v49  ;;  %v6915_v43 = vld [vmem:[%s8236_s9 + $0xa4] sm:$0xf0]  ;;  %v5844_v12 = vld [vmem:[%s7962_s15 + $0x18] sm:$0xf0] }
 0x278   : >> { %5815 = vmatmul.msk.bf16.vlgmr.msrb.gmra.mxu0 %vm2275_vm3, %v8571_v40  ;;  %v8621_v5 = vor.u32 %v6802_v39, %v5844_v12  ;;  %v6851_v12 = vld [vmem:[%s7951_s8 + $0x24] sm:$0xf] }
 0x279   : >> { %3347 = vmatmul.bf16.gmra.mxu1 %v8573_v3 }
 0x27a   : >> { %6016 = vmatmul.msk.bf16.vlgmr.msrb.gmra.mxu2 %vm2275_vm3, %v8579_v33  ;;  %10169 = vst [vmem:[#allocation101_spill] sm:$0xff] %v8621_v5 }
 0x27b   : >> { %6252 = vmatmul.msk.bf16.gmra.mxu3 %vm2275_vm3, %v8581_v48  ;;  %v8615_v48 = vor.u32 %v6915_v43, %v6141_v53  ;;  %v6956_v43 = vld [vmem:[%s9891_s1 + $0x1a0] sm:$0xff] }
 0x27c   : >> { %3653 = vmatpush.bf16.msra.mxu0 %v6956_v43 }
 0x27d   : >> { %v2831_v2 = vpop.f32.mrf.mxu2  ;;  %v2381_v6 = vpop.f32.mrf.mxu0  ;;  %10168 = vst [vmem:[#allocation100_spill] sm:$0xff] %v8615_v48 }
 0x27e   : >> { %v3398_v26 = vpop.f32.mrf.mxu3  ;;  %v8597_v49 = vadd.f32 %v2831_v2, %v2468_v46  ;;  %v3312_v27 = vpop.f32.mrf.mxu1  ;;  %v2470_v46 = vadd.f32 %v8268_v52, %v2381_v6 }
 0x27f   : >> { %v8599_v14 = vadd.f32 %v3398_v26, %v3310_v60  ;;  %v8613_v26 = vor.u32 %v6849_v20, %v5643_v11 }
 0x285   : >> { %v2833_v2 = vpop.f32.mrf.mxu2  ;;  %v2384_v57 = vpop.f32.mrf.mxu0 }
 0x286   : >> { %v3400_v60 = vpop.f32.mrf.mxu3  ;;  %v8617_v3 = vadd.f32 %v2833_v2, %v2470_v46  ;;  %v3315_v7 = vpop.f32.mrf.mxu1  ;;  %v2473_v52 = vadd.f32 %v8291_v25, %v2384_v57  ;;  %v6149_v46 = vld [vmem:[%s8236_s9 + $0xb0] sm:$0xf]  ;;  %v6917_v2 = vld [vmem:[%s8236_s9 + $0xb4] sm:$0xf0]  ;;  %v5852_v57 = vld [vmem:[%s7962_s15 + $0x28] sm:$0xf0] }
 0x287   : >> { %v8619_v59 = vadd.f32 %v3400_v60, %v3312_v27  ;;  %v6916_v25 = vld [vmem:[%s8236_s9 + $0xb4] sm:$0xf]  ;;  %v6151_v60 = vld [vmem:[%s8236_s9 + $0xb8] sm:$0xf0]  ;;  %v8657_v41 = vor.u32 %v6804_v13, %v5852_v57 }
 0x288   : >> { %5816 = vmatmul.msk.bf16.gmra.mxu0 %vm2275_vm3, %v8613_v26  ;;  %v8659_v43 = vor.u32 %v6916_v25, %v6151_v60  ;;  %v6955_v60 = vld [vmem:[%s9891_s1 + $0x198] sm:$0xff] }
 0x289   : >> { %3352 = vmatmul.bf16.gmra.mxu1 %v8615_v48  ;;  %10174 = vst [vmem:[#allocation106_spill] sm:$0xff] %v8657_v41  ;;  %3654 = vmatpush.bf16.msra.mxu0 %v6955_v60 }
 0x28a   : >> { %6017 = vmatmul.msk.bf16.gmra.mxu2 %vm2275_vm3, %v8621_v5  ;;  %10175 = vst [vmem:[#allocation107_spill] sm:$0xff] %v8659_v43 }
 0x28b   : >> { %6253 = vmatmul.msk.bf16.gmra.mxu3 %vm2275_vm3, %v8623_v35  ;;  %v8651_v35 = vor.u32 %v6917_v2, %v6149_v46 }
 0x28d   : >> { %v2836_v6 = vpop.f32.mrf.mxu2  ;;  %v2386_v39 = vpop.f32.mrf.mxu0  ;;  %10172 = vst [vmem:[#allocation104_spill] sm:$0xff] %v8651_v35 }
 0x28e   : >> { %v3403_v27 = vpop.f32.mrf.mxu3  ;;  %v8633_v20 = vadd.f32 %v2836_v6, %v2473_v52  ;;  %v3317_v53 = vpop.f32.mrf.mxu1  ;;  %v2475_v52 = vadd.f32 %v8308_v56, %v2386_v39  ;;  %v6948_v56 = vld [vmem:[%s9891_s1 + $0xa0] sm:$0xff]  ;;  %v6961_v39 = vld [vmem:[%s9891_s1 + $0x1c8] sm:$0xff] }
 0x28f   : >> { %v8635_v11 = vadd.f32 %v3403_v27, %v3315_v7  ;;  %v8649_v27 = vor.u32 %v6851_v12, %v5651_v61  ;;  %4005 = vmatpush.bf16.msra.mxu3 %v6948_v56  ;;  %3748 = vmatpush.bf16.msra.mxu2 %v6961_v39  ;;  %v5860_v56 = vld [vmem:[%s7962_s15 + $0x38] sm:$0xf0]  ;;  %v6918_v39 = vld [vmem:[%s8236_s9 + $0xc4] sm:$0xf] }
 0x291   : >> { %10171 = vst [vmem:[#allocation103_spill] sm:$0xff] %v8635_v11 }
 0x295   : >> { %v2838_v6 = vpop.f32.mrf.mxu2  ;;  %v2389_v11 = vpop.f32.mrf.mxu0 }
 0x296   : >> { %v3405_v7 = vpop.f32.mrf.mxu3  ;;  %v8653_v48 = vadd.f32 %v2838_v6, %v2475_v52  ;;  %v3320_v37 = vpop.f32.mrf.mxu1  ;;  %v2478_v12 = vadd.f32 %v8328_v28, %v2389_v11  ;;  %v6853_v52 = vld [vmem:[%s7951_s8 + $0x34] sm:$0xf]  ;;  %v5659_v6 = vld [vmem:[%s7951_s8 + $0x38] sm:$0xf0]  ;;  %v6157_v11 = vld [vmem:[%s8236_s9 + $0xc0] sm:$0xf] }
 0x297   : >> { %v8655_v23 = vadd.f32 %v3405_v7, %v3317_v53  ;;  %v6941_v53 = vld [vmem:[%s9891_s1 + $0x68] sm:$0xff]  ;;  %v6806_v28 = vld [vmem:[%s7962_s15 + $0x34] sm:$0xf] }
 0x298   : >> { %5817 = vmatmul.msk.bf16.gmra.mxu0 %vm2275_vm3, %v8649_v27  ;;  %3912 = vmatpush.bf16.msra.mxu1 %v6941_v53  ;;  %v6919_v7 = vld [vmem:[%s8236_s9 + $0xc4] sm:$0xf0]  ;;  %v6159_v53 = vld [vmem:[%s8236_s9 + $0xc8] sm:$0xf0] }
 0x299   : >> { %10173 = vst [vmem:[#allocation105_spill] sm:$0xff] %v8655_v23  ;;  %3357 = vmatmul.bf16.gmra.mxu1 %v8651_v35  ;;  %v8699_v35 = vor.u32 %v6918_v39, %v6159_v53  ;;  %v6855_v39 = vld [vmem:[%s7951_s8 + $0x44] sm:$0xf]  ;;  %v5667_v53 = vld [vmem:[%s7951_s8 + $0x48] sm:$0xf0] }
 0x29a   : >> { %6018 = vmatmul.msk.bf16.gmra.mxu2 %vm2275_vm3, %v8657_v41 }
 0x29b   : >> { %6254 = vmatmul.msk.bf16.gmra.mxu3 %vm2275_vm3, %v8659_v43  ;;  %10181 = vst [vmem:[#allocation113_spill] sm:$0xff] %v8699_v35 }
 0x29d   : >> { %v2841_v61 = vpop.f32.mrf.mxu2  ;;  %v2391_v57 = vpop.f32.mrf.mxu0 }
 0x29e   : >> { %v3408_v13 = vpop.f32.mrf.mxu3  ;;  %v8678_v46 = vadd.f32 %v2841_v61, %v2478_v12  ;;  %v3322_v25 = vpop.f32.mrf.mxu1  ;;  %v8693_v61 = vor.u32 %v6853_v52, %v5659_v6 }
 0x29f   : >> { %v8680_v2 = vadd.f32 %v3408_v13, %v3320_v37  ;;  %v8695_v37 = vor.u32 %v6919_v7, %v6157_v11  ;;  %v8697_v25 = vor.u32 %v6806_v28, %v5860_v56  ;;  %v6954_v56 = vld [vmem:[%s9891_s1 + $0x190] sm:$0xff] }
 0x2a0   : >> { %10176 = vst [vmem:[#allocation108_spill] sm:$0xff] %v8678_v46  ;;  %3655 = vmatpush.bf16.msra.mxu0 %v6954_v56 }
 0x2a1   : >> { %10177 = vst [vmem:[#allocation109_spill] sm:$0xff] %v8680_v2  ;;  %v6167_v2 = vld [vmem:[%s8236_s9 + $0xd8] sm:$0xf0] }
 0x2a2   : >> { %10178 = vst [vmem:[#allocation110_spill] sm:$0xff] %v8693_v61 }
 0x2a3   : >> { %10179 = vst [vmem:[#allocation111_spill] sm:$0xff] %v8695_v37 }
 0x2a4   : >> { %10180 = vst [vmem:[#allocation112_spill] sm:$0xff] %v8697_v25 }
 0x2a5   : >> { %v2843_v43 = vpop.f32.mrf.mxu2  ;;  %v2393_v13 = vpop.f32.mrf.mxu0 }
 0x2a6   : >> { %v3410_v12 = vpop.f32.mrf.mxu3  ;;  %v3324_v57 = vpop.f32.mrf.mxu1  ;;  %v2482_v43 = vadd.f32 %v8367_v1, %v2393_v13  ;;  %v5868_v1 = vld [vmem:[%s7962_s15 + $0x48] sm:$0xf0]  ;;  %v6920_v13 = vld [vmem:[%s8236_s9 + $0xd4] sm:$0xf] }
 0x2a7   : >> { %v6808_v12 = vld [vmem:[%s7962_s15 + $0x44] sm:$0xf]  ;;  %v8735_v56 = vor.u32 %v6920_v13, %v6167_v2  ;;  %v6810_v13 = vld [vmem:[%s7962_s15 + $0x54] sm:$0xf] }
 0x2a8   : >> { %5818 = vmatmul.msk.bf16.gmra.mxu0 %vm2275_vm3, %v8693_v61  ;;  %v8733_v46 = vor.u32 %v6808_v12, %v5868_v1  ;;  %v6940_v12 = vld [vmem:[%s9891_s1 + $0x60] sm:$0xff]  ;;  %v5675_v1 = vld [vmem:[%s7951_s8 + $0x58] sm:$0xf0] }
 0x2a9   : >> { %3361 = vmatmul.bf16.gmra.mxu1 %v8695_v37  ;;  %v6921_v37 = vld [vmem:[%s8236_s9 + $0xd4] sm:$0xf0]  ;;  %10187 = vst [vmem:[#allocation119_spill] sm:$0xff] %v8735_v56 }
 0x2aa   : >> { %6019 = vmatmul.msk.bf16.gmra.mxu2 %vm2275_vm3, %v8697_v25  ;;  %10186 = vst [vmem:[#allocation118_spill] sm:$0xff] %v8733_v46  ;;  %3913 = vmatpush.bf16.msra.mxu1 %v6940_v12 }
 0x2ab   : >> { %6255 = vmatmul.msk.bf16.gmra.mxu3 %vm2275_vm3, %v8699_v35  ;;  %v6165_v35 = vld [vmem:[%s8236_s9 + $0xd0] sm:$0xf] }
 0x2ad   : >> { %v2845_v60 = vpop.f32.mrf.mxu2  ;;  %v2395_v11 = vpop.f32.mrf.mxu0 }
 0x2ae   : >> { %v3412_v52 = vpop.f32.mrf.mxu3  ;;  %v8709_v6 = vadd.f32 %v2845_v60, %v2482_v43  ;;  %v3326_v7 = vpop.f32.mrf.mxu1  ;;  %v2484_v43 = vadd.f32 %v8382_v58, %v2395_v11 }
 0x2af   : >> { %v8711_v28 = vadd.f32 %v3412_v52, %v3324_v57  ;;  %v8725_v52 = vor.u32 %v6855_v39, %v5667_v53 }
 0x2b0   : >> { %10182 = vst [vmem:[#allocation114_spill] sm:$0xff] %v8709_v6 }
 0x2b1   : >> { %10183 = vst [vmem:[#allocation115_spill] sm:$0xff] %v8711_v28  ;;  %v8727_v28 = vor.u32 %v6921_v37, %v6165_v35  ;;  %v6960_v35 = vld [vmem:[%s9891_s1 + $0x1c0] sm:$0xff] }
 0x2b2   : >> { %3749 = vmatpush.bf16.msra.mxu2 %v6960_v35  ;;  %v6175_v35 = vld [vmem:[%s8236_s9 + $0xe8] sm:$0xf0] }
 0x2b3   : >> { %10184 = vst [vmem:[#allocation116_spill] sm:$0xff] %v8727_v28 }
 0x2b5   : >> { %v2847_v60 = vpop.f32.mrf.mxu2  ;;  %v2398_v61 = vpop.f32.mrf.mxu0 }
 0x2b6   : >> { %v3414_v57 = vpop.f32.mrf.mxu3  ;;  %v8729_v6 = vadd.f32 %v2847_v60, %v2484_v43  ;;  %v3329_v23 = vpop.f32.mrf.mxu1  ;;  %v2487_v58 = vadd.f32 %v8400_v62, %v2398_v61  ;;  %v6953_v62 = vld [vmem:[%s9891_s1 + $0x188] sm:$0xff]  ;;  %v6857_v61 = vld [vmem:[%s7951_s8 + $0x54] sm:$0xf]  ;;  %v6173_v43 = vld [vmem:[%s8236_s9 + $0xe0] sm:$0xf] }
 0x2b7   : >> { %v8731_v25 = vadd.f32 %v3414_v57, %v3326_v7  ;;  %v6923_v60 = vld [vmem:[%s8236_s9 + $0xe4] sm:$0xf0]  ;;  %3656 = vmatpush.bf16.msra.mxu0 %v6953_v62  ;;  %v5876_v57 = vld [vmem:[%s7962_s15 + $0x58] sm:$0xf0] }
 0x2b8   : >> { %5819 = vmatmul.msk.bf16.gmra.mxu0 %vm2275_vm3, %v8725_v52  ;;  %v8775_v12 = vor.u32 %v6810_v13, %v5876_v57  ;;  %v6859_v57 = vld [vmem:[%s7951_s8 + $0x64] sm:$0xf] }
 0x2b9   : >> { %10185 = vst [vmem:[#allocation117_spill] sm:$0xff] %v8731_v25  ;;  %3366 = vmatmul.bf16.gmra.mxu1 %v8727_v28  ;;  %v8769_v28 = vor.u32 %v6923_v60, %v6173_v43  ;;  %v6952_v60 = vld [vmem:[%s9891_s1 + $0x180] sm:$0xff] }
 0x2ba   : >> { %6020 = vmatmul.msk.bf16.gmra.mxu2 %vm2275_vm3, %v8733_v46  ;;  %10192 = vst [vmem:[#allocation124_spill] sm:$0xff] %v8775_v12 }
 0x2bb   : >> { %6256 = vmatmul.msk.bf16.gmra.mxu3 %vm2275_vm3, %v8735_v56  ;;  %v8767_v56 = vor.u32 %v6857_v61, %v5675_v1  ;;  %10190 = vst [vmem:[#allocation122_spill] sm:$0xff] %v8769_v28  ;;  %3657 = vmatpush.bf16.msra.mxu0 %v6952_v60 }
 0x2bd   : >> { %v2850_v2 = vpop.f32.mrf.mxu2  ;;  %v2400_v39 = vpop.f32.mrf.mxu0 }
 0x2be   : >> { %v3417_v37 = vpop.f32.mrf.mxu3  ;;  %v8748_v11 = vadd.f32 %v2850_v2, %v2487_v58  ;;  %v3331_v53 = vpop.f32.mrf.mxu1  ;;  %v2489_v58 = vadd.f32 %v8417_v0, %v2400_v39 }
 0x2bf   : >> { %v8750_v7 = vadd.f32 %v3417_v37, %v3329_v23  ;;  %v6922_v23 = vld [vmem:[%s8236_s9 + $0xe4] sm:$0xf] }
 0x2c0   : >> { %10188 = vst [vmem:[#allocation120_spill] sm:$0xff] %v8748_v11  ;;  %v8777_v62 = vor.u32 %v6922_v23, %v6175_v35  ;;  %v5683_v23 = vld [vmem:[%s7951_s8 + $0x68] sm:$0xf0]  ;;  %v6812_v35 = vld [vmem:[%s7962_s15 + $0x64] sm:$0xf] }
 0x2c1   : >> { %10189 = vst [vmem:[#allocation121_spill] sm:$0xff] %v8750_v7 }
 0x2c2   : >> { %10193 = vst [vmem:[#allocation125_spill] sm:$0xff] %v8777_v62 }
 0x2c5   : >> { %v2852_v2 = vpop.f32.mrf.mxu2  ;;  %v2403_v11 = vpop.f32.mrf.mxu0 }
 0x2c6   : >> { %v3419_v37 = vpop.f32.mrf.mxu3  ;;  %v8771_v7 = vadd.f32 %v2852_v2, %v2489_v58  ;;  %v3334_v46 = vpop.f32.mrf.mxu1  ;;  %v2492_v0 = vadd.f32 %v8440_v29, %v2403_v11  ;;  %v6181_v58 = vld [vmem:[%s8236_s9 + $0xf0] sm:$0xf]  ;;  %v6925_v2 = vld [vmem:[%s8236_s9 + $0xf4] sm:$0xf0]  ;;  %v5884_v29 = vld [vmem:[%s7962_s15 + $0x68] sm:$0xf0] }
 0x2c7   : >> { %v8773_v25 = vadd.f32 %v3419_v37, %v3331_v53  ;;  %v6924_v11 = vld [vmem:[%s8236_s9 + $0xf4] sm:$0xf]  ;;  %v6183_v37 = vld [vmem:[%s8236_s9 + $0xf8] sm:$0xf0] }
 0x2c8   : >> { %5820 = vmatmul.msk.bf16.gmra.mxu0 %vm2275_vm3, %v8767_v56  ;;  %v8813_v60 = vor.u32 %v6924_v11, %v6183_v37  ;;  %v6971_v11 = vld [vmem:[%s9891_s1 + $0x2d8] sm:$0xff] }
 0x2c9   : >> { %10191 = vst [vmem:[#allocation123_spill] sm:$0xff] %v8773_v25  ;;  %3371 = vmatmul.bf16.gmra.mxu1 %v8769_v28  ;;  %v5691_v37 = vld [vmem:[%s7951_s8 + $0x78] sm:$0xf0]  ;;  %4187 = vmatpush.bf16.msrb.mxu0 %v6971_v11 }
 0x2ca   : >> { %6021 = vmatmul.msk.bf16.gmra.mxu2 %vm2275_vm3, %v8775_v12  ;;  %v8811_v12 = vor.u32 %v6812_v35, %v5884_v29  ;;  %10198 = vst [vmem:[#allocation130_spill] sm:$0xff] %v8813_v60 }
 0x2cb   : >> { %6257 = vmatmul.msk.bf16.gmra.mxu3 %vm2275_vm3, %v8777_v62  ;;  %v8805_v62 = vor.u32 %v6925_v2, %v6181_v58 }
 0x2cc   : >> { %10197 = vst [vmem:[#allocation129_spill] sm:$0xff] %v8811_v12 }
 0x2cd   : >> { %v2855_v39 = vpop.f32.mrf.mxu2  ;;  %v2405_v13 = vpop.f32.mrf.mxu0  ;;  %10196 = vst [vmem:[#allocation128_spill] sm:$0xff] %v8805_v62 }
 0x2ce   : >> { %v3422_v53 = vpop.f32.mrf.mxu3  ;;  %v8787_v61 = vadd.f32 %v2855_v39, %v2492_v0  ;;  %v3336_v43 = vpop.f32.mrf.mxu1  ;;  %v2494_v0 = vadd.f32 %v8457_v36, %v2405_v13  ;;  %v6975_v36 = vld [vmem:[%s9891_s1 + $0x2f8] sm:$0xff] }
 0x2cf   : >> { %v8789_v1 = vadd.f32 %v3422_v53, %v3334_v46  ;;  %v8803_v53 = vor.u32 %v6859_v57, %v5683_v23  ;;  %v6999_v13 = vld [vmem:[%s9891_s1 + $0x238] sm:$0xff]  ;;  %4283 = vmatpush.bf16.msrb.mxu2 %v6975_v36 }
 0x2d0   : >> { %10194 = vst [vmem:[#allocation126_spill] sm:$0xff] %v8787_v61  ;;  %4712 = vmatpush.bf16.msrb.mxu3 %v6999_v13  ;;  %v5892_v36 = vld [vmem:[%s7962_s15 + $0x78] sm:$0xf0]  ;;  %v6191_v13 = vld [vmem:[%s8236_s9 + $0x108] sm:$0xf0] }
 0x2d1   : >> { %10195 = vst [vmem:[#allocation127_spill] sm:$0xff] %v8789_v1 }
 0x2d5   : >> { %v2857_v39 = vpop.f32.mrf.mxu2  ;;  %v2408_v25 = vpop.f32.mrf.mxu0 }
 0x2d6   : >> { %v3424_v46 = vpop.f32.mrf.mxu3  ;;  %v8807_v28 = vadd.f32 %v2857_v39, %v2494_v0  ;;  %v3339_v61 = vpop.f32.mrf.mxu1  ;;  %v6814_v0 = vld [vmem:[%s7962_s15 + $0x74] sm:$0xf]  ;;  %v6189_v39 = vld [vmem:[%s8236_s9 + $0x100] sm:$0xf] }
 0x2d7   : >> { %v8809_v1 = vadd.f32 %v3424_v46, %v3336_v43  ;;  %v2497_v43 = vadd.f32 %v8477_v22, %v2408_v25  ;;  %v6995_v22 = vld [vmem:[%s9891_s1 + $0x218] sm:$0xff]  ;;  %v6861_v25 = vld [vmem:[%s7951_s8 + $0x74] sm:$0xf]  ;;  %v6927_v46 = vld [vmem:[%s8236_s9 + $0x104] sm:$0xf0] }
 0x2d8   : >> { %5821 = vmatmul.msk.bf16.gmra.mxu0 %vm2275_vm3, %v8803_v53  ;;  %4616 = vmatpush.bf16.msrb.mxu1 %v6995_v22 }
 0x2d9   : >> { %3376 = vmatmul.bf16.gmra.mxu1 %v8805_v62  ;;  %v8851_v62 = vor.u32 %v6814_v0, %v5892_v36 }
 0x2da   : >> { %6022 = vmatmul.msk.bf16.gmra.mxu2 %vm2275_vm3, %v8811_v12 }
 0x2db   : >> { %6258 = vmatmul.msk.bf16.gmra.mxu3 %vm2275_vm3, %v8813_v60  ;;  %10201 = vst [vmem:[#allocation133_spill] sm:$0xff] %v8851_v62 }
 0x2dd   : >> { %v2860_v57 = vpop.f32.mrf.mxu2  ;;  %v2410_v2 = vpop.f32.mrf.mxu0 }
 0x2de   : >> { %v3427_v23 = vpop.f32.mrf.mxu3  ;;  %v8829_v35 = vadd.f32 %v2860_v57, %v2497_v43  ;;  %v3341_v29 = vpop.f32.mrf.mxu1  ;;  %v8849_v2 = vor.u32 %v6927_v46, %v6189_v39 }
 0x2df   : >> { %v8831_v58 = vadd.f32 %v3427_v23, %v3339_v61  ;;  %v6926_v61 = vld [vmem:[%s8236_s9 + $0x104] sm:$0xf]  ;;  %v8847_v23 = vor.u32 %v6861_v25, %v5691_v37  ;;  %v2915_v25 = vadd.f32 %v8229_v8, %v8555_v10  ;;  %v2920_v10 = vadd.f32 %v8264_v42, %v8597_v49 }
 0x2e0   : >> { %10200 = vst [vmem:[#allocation132_spill] sm:$0xff] %v8849_v2 }
 0x2e1   : >> { %10199 = vst [vmem:[#allocation131_spill] sm:$0xff] %v8831_v58  ;;  %v8853_v58 = vor.u32 %v6926_v61, %v6191_v13  ;;  %v2917_v13 = vadd.f32 %v8243_v31, %v8575_v9 }
 0x2e3   : >> { %10202 = vst [vmem:[#allocation134_spill] sm:$0xff] %v8853_v58 }
 0x2e5   : >> { %v2862_v43 = vpop.f32.mrf.mxu2  ;;  %v2412_v29 = vpop.f32.mrf.mxu0 }
 0x2e6   : >> { %v3429_v57 = vpop.f32.mrf.mxu3  ;;  %v3343_v60 = vpop.f32.mrf.mxu1 }
 0x2e8   : >> { %5822 = vmatmul.msk.bf16.gmra.mxu0 %vm2275_vm3, %v8847_v23 }
 0x2e9   : >> { %3380 = vmatmul.bf16.gmra.mxu1 %v8849_v2 }
 0x2ea   : >> { %6023 = vmatmul.msk.bf16.gmra.mxu2 %vm2275_vm3, %v8851_v62 }
 0x2eb   : >> { %6259 = vmatmul.msk.bf16.gmra.mxu3 %vm2275_vm3, %v8853_v58  ;;  %v10298_v58 = vld [vmem:[#allocation68_spill] sm:$0xff] }
 0x2ed   : >> { %v2864_v11 = vpop.f32.mrf.mxu2  ;;  %v2413_v0 = vpop.f32.mrf.mxu0 }
 0x2ee   : >> { %v3431_v22 = vpop.f32.mrf.mxu3  ;;  %v3345_v39 = vpop.f32.mrf.mxu1 }
 0x2ef   : >> { %v3432_v37 = vadd.f32 %v3431_v22, %v3343_v60 }
 0x2f1   : >> { %v8864_v46 = vadd.f32 %v3432_v37, %v2915_v25 }
 0x2f3   : >> { %10203 = vst [vmem:[#allocation135_spill] sm:$0xff] %v8864_v46 }
 0x2f5   : >> { %v2865_v36 = vpop.f32.mrf.mxu2  ;;  %v2424_v57 = vpop.f32.mrf.mxu0 }
 0x2f6   : >> { %v3433_v61 = vpop.f32.mrf.mxu3  ;;  %v3348_v29 = vpop.f32.mrf.mxu1  ;;  %v2425_v11 = vadd.f32 %v2424_v57, %v8249_v38  ;;  %v6994_v36 = vld [vmem:[%s9891_s1 + $0x210] sm:$0xff] }
 0x2f7   : >> { %v3434_v43 = vadd.f32 %v3433_v61, %v3345_v39  ;;  %4617 = vmatpush.bf16.msrb.mxu1 %v6994_v36 }
 0x2f8   : >> { %3658 = vmatmul.bf16.vlgmr.msra.gmra.mxu0 %v8023_v19  ;;  %v2789_v8 = vadd.f32 %v8262_v18, %v2425_v11  ;;  %v6970_v18 = vld [vmem:[%s9891_s1 + $0x2d0] sm:$0xff] }
 0x2f9   : >> { %v8868_v2 = vadd.f32 %v3434_v43, %v2917_v13  ;;  %3914 = vmatmul.bf16.vlgmr.msra.gmra.mxu1 %v8027_v21  ;;  %4188 = vmatpush.bf16.msrb.mxu0 %v6970_v18  ;;  %v2927_v18 = vadd.f32 %v8320_v50, %v8653_v48  ;;  %v10209_v50 = vld [vmem:[#allocation46_spill] sm:$0xff] }
 0x2fa   : >> { %6356 = vmatmul.msk.bf16.vlgmr.msra.gmra.mxu2 %vm2275_vm3, %v8571_v40 }
 0x2fb   : >> { %10204 = vst [vmem:[#allocation136_spill] sm:$0xff] %v8868_v2  ;;  %6421 = vmatmul.msk.bf16.vlgmr.msra.gmra.mxu3 %vm2275_vm3, %v8579_v33 }
 0x2fd   : >> { %v2876_v9 = vpop.f32.mrf.mxu2  ;;  %v2426_v38 = vpop.f32.mrf.mxu0 }
 0x2fe   : >> { %v3436_v31 = vpop.f32.mrf.mxu3  ;;  %v2877_v60 = vadd.f32 %v2876_v9, %v2789_v8  ;;  %v3350_v25 = vpop.f32.mrf.mxu1  ;;  %v2427_v39 = vadd.f32 %v2426_v38, %v8266_v51 }
 0x2ff   : >> { %v3437_v22 = vadd.f32 %v3436_v31, %v3348_v29 }
 0x300   : >> { %v8881_v37 = vadd.f32 %v8557_v17, %v2877_v60  ;;  %v2791_v42 = vadd.f32 %v8281_v15, %v2427_v39  ;;  %v2922_v17 = vadd.f32 %v8283_v16, %v8617_v3 }
 0x301   : >> { %v8883_v0 = vadd.f32 %v3437_v22, %v2920_v10 }
 0x303   : >> { %10205 = vst [vmem:[#allocation137_spill] sm:$0xff] %v8883_v0  ;;  %v10290_v0 = vld [vmem:[#allocation50_spill] sm:$0xff] }
 0x305   : >> { %v2878_v49 = vpop.f32.mrf.mxu2  ;;  %v2429_v51 = vpop.f32.mrf.mxu0 }
 0x306   : >> { %v3438_v61 = vpop.f32.mrf.mxu3  ;;  %v2879_v13 = vadd.f32 %v2878_v49, %v2791_v42  ;;  %v3353_v57 = vpop.f32.mrf.mxu1  ;;  %v2430_v8 = vadd.f32 %v2429_v51, %v8289_v24 }
 0x307   : >> { %v3439_v43 = vadd.f32 %v3438_v61, %v3350_v25 }
 0x308   : >> { %v8896_v29 = vadd.f32 %v8577_v44, %v2879_v13  ;;  %3663 = vmatmul.bf16.gmra.mxu0 %v8056_v32  ;;  %v2794_v15 = vadd.f32 %v8302_v54, %v2430_v8  ;;  %v2925_v44 = vadd.f32 %v8304_v55, %v8633_v20  ;;  %v10212_v8 = vld [vmem:[#allocation103_spill] sm:$0xff] }
 0x309   : >> { %v8898_v11 = vadd.f32 %v3439_v43, %v2922_v17  ;;  %3919 = vmatmul.bf16.gmra.mxu1 %v8060_v34  ;;  %v10211_v17 = vld [vmem:[#allocation47_spill] sm:$0xff] }
 0x30a   : >> { %6357 = vmatmul.msk.bf16.gmra.mxu2 %vm2275_vm3, %v8613_v26 }
 0x30b   : >> { %10206 = vst [vmem:[#allocation138_spill] sm:$0xff] %v8898_v11  ;;  %6422 = vmatmul.msk.bf16.gmra.mxu3 %vm2275_vm3, %v8621_v5  ;;  %v10291_v5 = vld [vmem:[#allocation53_spill] sm:$0xff] }
 0x30d   : >> { %v2881_v16 = vpop.f32.mrf.mxu2  ;;  %v2431_v24 = vpop.f32.mrf.mxu0 }
 0x30e   : >> { %v3441_v3 = vpop.f32.mrf.mxu3  ;;  %v2882_v9 = vadd.f32 %v2881_v16, %v2794_v15  ;;  %v3355_v10 = vpop.f32.mrf.mxu1  ;;  %v2432_v38 = vadd.f32 %v2431_v24, %v8306_v63  ;;  %v6969_v24 = vld [vmem:[%s9891_s1 + $0x2c8] sm:$0xff] }
 0x30f   : >> { %v3442_v31 = vadd.f32 %v3441_v3, %v3353_v57  ;;  %v10214_v3 = vld [vmem:[#allocation48_spill] sm:$0xff]  ;;  %4189 = vmatpush.bf16.msrb.mxu0 %v6969_v24  ;;  %v10225_v24 = vld [vmem:[#allocation109_spill] sm:$0xff] }
 0x310   : >> { %v8911_v60 = vadd.f32 %v8599_v14, %v2882_v9  ;;  %v2796_v25 = vadd.f32 %v8318_v4, %v2432_v38  ;;  %v6974_v9 = vld [vmem:[%s9891_s1 + $0x2f0] sm:$0xff] }
 0x311   : >> { %v8913_v22 = vadd.f32 %v3442_v31, %v2925_v44  ;;  %v6998_v31 = vld [vmem:[%s9891_s1 + $0x230] sm:$0xff]  ;;  %4284 = vmatpush.bf16.msrb.mxu2 %v6974_v9 }
 0x312   : >> { %4713 = vmatpush.bf16.msrb.mxu3 %v6998_v31  ;;  %v10215_v38 = vld [vmem:[#allocation49_spill] sm:$0xff] }
 0x313   : >> { %10207 = vst [vmem:[#allocation139_spill] sm:$0xff] %v8913_v22 }
 0x315   : >> { %v2883_v39 = vpop.f32.mrf.mxu2  ;;  %v2434_v20 = vpop.f32.mrf.mxu0 }
 0x316   : >> { %v3443_v54 = vpop.f32.mrf.mxu3  ;;  %v2884_v36 = vadd.f32 %v2883_v39, %v2796_v25  ;;  %v3358_v42 = vpop.f32.mrf.mxu1  ;;  %v2435_v61 = vadd.f32 %v2434_v20, %v8326_v30  ;;  %v10216_v20 = vld [vmem:[#allocation105_spill] sm:$0xff] }
 0x317   : >> { %v3444_v55 = vadd.f32 %v3443_v54, %v3355_v10  ;;  %v6993_v10 = vld [vmem:[%s9891_s1 + $0x208] sm:$0xff] }
 0x318   : >> { %v8920_v49 = vadd.f32 %v8619_v59, %v2884_v36  ;;  %3668 = vmatmul.bf16.gmra.mxu0 %v8084_v45  ;;  %v2799_v4 = vadd.f32 %v10209_v50, %v2435_v61  ;;  %v10210_v59 = vld [vmem:[#allocation108_spill] sm:$0xff]  ;;  %4618 = vmatpush.bf16.msrb.mxu1 %v6993_v10 }
 0x319   : >> { %v8922_v14 = vadd.f32 %v3444_v55, %v2927_v18  ;;  %3924 = vmatmul.bf16.gmra.mxu1 %v8088_v47  ;;  %v2930_v13 = vadd.f32 %v10211_v17, %v10210_v59  ;;  %v10217_v61 = vld [vmem:[#allocation52_spill] sm:$0xff]  ;;  %v10222_v17 = vld [vmem:[#allocation55_spill] sm:$0xff] }
 0x31a   : >> { %6358 = vmatmul.msk.bf16.gmra.mxu2 %vm2275_vm3, %v8649_v27  ;;  %v10221_v59 = vld [vmem:[#allocation112_spill] sm:$0xff] }
 0x31b   : >> { %10208 = vst [vmem:[#allocation140_spill] sm:$0xff] %v8922_v14  ;;  %6423 = vmatmul.msk.bf16.gmra.mxu3 %vm2275_vm3, %v8657_v41  ;;  %v10286_v41 = vld [vmem:[#allocation42_spill] sm:$0xff]  ;;  %v10287_v47 = vld [vmem:[#allocation44_spill] sm:$0xff] }
 0x31d   : >> { %v2886_v63 = vpop.f32.mrf.mxu2  ;;  %v2436_v30 = vpop.f32.mrf.mxu0 }
 0x31e   : >> { %v3446_v48 = vpop.f32.mrf.mxu3  ;;  %v2887_v43 = vadd.f32 %v2886_v63, %v2799_v4  ;;  %v3360_v57 = vpop.f32.mrf.mxu1  ;;  %v2437_v44 = vadd.f32 %v2436_v30, %v10214_v3  ;;  %v10218_v4 = vld [vmem:[#allocation14_spill] sm:$0xff]  ;;  %v10219_v63 = vld [vmem:[#allocation16_spill] sm:$0xff] }
 0x31f   : >> { %v3447_v51 = vadd.f32 %v3446_v48, %v3358_v42  ;;  %v10220_v48 = vld [vmem:[#allocation110_spill] sm:$0xff]  ;;  %v10224_v57 = vld [vmem:[#allocation56_spill] sm:$0xff] }
 0x320   : >> { %v8935_v15 = vadd.f32 %v10212_v8, %v2887_v43  ;;  %v2801_v25 = vadd.f32 %v10215_v38, %v2437_v44  ;;  %v10223_v30 = vld [vmem:[#allocation114_spill] sm:$0xff] }
 0x321   : >> { %v8937_v16 = vadd.f32 %v3447_v51, %v2930_v13  ;;  %v2934_v8 = vadd.f32 %v10224_v57, %v10223_v30  ;;  %v10233_v30 = vld [vmem:[#allocation63_spill] sm:$0xff] }
 0x323   : >> { %10213 = vst [vmem:[#allocation46_spill] sm:$0xff] %v8937_v16 }
 0x325   : >> { %v2888_v39 = vpop.f32.mrf.mxu2  ;;  %v2439_v36 = vpop.f32.mrf.mxu0 }
 0x326   : >> { %v3448_v54 = vpop.f32.mrf.mxu3  ;;  %v2889_v18 = vadd.f32 %v2888_v39, %v2801_v25  ;;  %v3362_v55 = vpop.f32.mrf.mxu1  ;;  %v2440_v50 = vadd.f32 %v2439_v36, %v10217_v61 }
 0x327   : >> { %v10227_v54 = vld [vmem:[#allocation57_spill] sm:$0xff] }
 0x328   : >> { %v8954_v42 = vadd.f32 %v10216_v20, %v2889_v18  ;;  %3673 = vmatmul.bf16.gmra.mxu0 %v10218_v4  ;;  %v2804_v13 = vadd.f32 %v10222_v17, %v2440_v50  ;;  %v2936_v18 = vadd.f32 %v10227_v54, %v8729_v6  ;;  %v10229_v17 = vld [vmem:[#allocation60_spill] sm:$0xff]  ;;  %v10236_v54 = vld [vmem:[#allocation115_spill] sm:$0xff] }
 0x329   : >> { %3929 = vmatmul.bf16.gmra.mxu1 %v10219_v63 }
 0x32a   : >> { %6359 = vmatmul.msk.bf16.gmra.mxu2 %vm2275_vm3, %v10220_v48 }
 0x32b   : >> { %6424 = vmatmul.msk.bf16.gmra.mxu3 %vm2275_vm3, %v10221_v59 }
 0x32d   : >> { %v2891_v43 = vpop.f32.mrf.mxu2  ;;  %v2441_v9 = vpop.f32.mrf.mxu0 }
 0x32e   : >> { %v3450_v51 = vpop.f32.mrf.mxu3  ;;  %v2892_v3 = vadd.f32 %v2891_v43, %v2804_v13  ;;  %v3364_v31 = vpop.f32.mrf.mxu1  ;;  %v10231_v43 = vld [vmem:[#allocation20_spill] sm:$0xff] }
 0x32f   : >> { %v3451_v44 = vadd.f32 %v3450_v51, %v3362_v55  ;;  %v10230_v55 = vld [vmem:[#allocation18_spill] sm:$0xff] }
 0x330   : >> { %v8967_v10 = vadd.f32 %v10225_v24, %v2892_v3  ;;  %v10232_v51 = vld [vmem:[#allocation118_spill] sm:$0xff]  ;;  %v10234_v3 = vld [vmem:[#allocation120_spill] sm:$0xff] }
 0x331   : >> { %v8969_v38 = vadd.f32 %v3451_v44, %v2934_v8  ;;  %v10235_v44 = vld [vmem:[#allocation64_spill] sm:$0xff] }
 0x332   : >> { %v2939_v9 = vadd.f32 %v10235_v44, %v10234_v3 }
 0x333   : >> { %10226 = vst [vmem:[#allocation108_spill] sm:$0xff] %v8969_v38 }
 0x335   : >> { %v2893_v25 = vpop.f32.mrf.mxu2  ;;  %v2443_v20 = vpop.f32.mrf.mxu0 }
 0x336   : >> { %v3452_v39 = vpop.f32.mrf.mxu3  ;;  %v3367_v61 = vpop.f32.mrf.mxu1  ;;  %v2444_v13 = vadd.f32 %v2443_v20, %v10229_v17  ;;  %v10239_v20 = vld [vmem:[#allocation65_spill] sm:$0xff] }
 0x337   : >> { %v3453_v36 = vadd.f32 %v3452_v39, %v3364_v31 }
 0x338   : >> { %3678 = vmatmul.bf16.gmra.mxu0 %v10230_v55  ;;  %v2808_v57 = vadd.f32 %v10233_v30, %v2444_v13  ;;  %v10241_v30 = vld [vmem:[#allocation67_spill] sm:$0xff] }
 0x339   : >> { %v8973_v50 = vadd.f32 %v3453_v36, %v2936_v18  ;;  %3934 = vmatmul.bf16.gmra.mxu1 %v10231_v43  ;;  %v2941_v43 = vadd.f32 %v10241_v30, %v8771_v7  ;;  %v10246_v7 = vld [vmem:[#allocation22_spill] sm:$0xff] }
 0x33a   : >> { %6360 = vmatmul.msk.bf16.gmra.mxu2 %vm2275_vm3, %v8725_v52 }
 0x33b   : >> { %10228 = vst [vmem:[#allocation47_spill] sm:$0xff] %v8973_v50  ;;  %6425 = vmatmul.msk.bf16.gmra.mxu3 %vm2275_vm3, %v10232_v51  ;;  %v10240_v50 = vld [vmem:[#allocation66_spill] sm:$0xff] }
 0x33d   : >> { %v2895_v6 = vpop.f32.mrf.mxu2  ;;  %v2445_v25 = vpop.f32.mrf.mxu0 }
 0x33e   : >> { %v3455_v8 = vpop.f32.mrf.mxu3  ;;  %v2896_v31 = vadd.f32 %v2895_v6, %v2808_v57  ;;  %v3369_v39 = vpop.f32.mrf.mxu1  ;;  %v2446_v17 = vadd.f32 %v2445_v25, %v10239_v20  ;;  %v10242_v6 = vld [vmem:[#allocation117_spill] sm:$0xff]  ;;  %v10251_v20 = vld [vmem:[#allocation74_spill] sm:$0xff] }
 0x33f   : >> { %v3456_v24 = vadd.f32 %v3455_v8, %v3367_v61 }
 0x340   : >> { %v8986_v18 = vadd.f32 %v10236_v54, %v2896_v31  ;;  %v2810_v38 = vadd.f32 %v10240_v50, %v2446_v17  ;;  %v6968_v50 = vld [vmem:[%s9891_s1 + $0x2c0] sm:$0xff]  ;;  %v10250_v54 = vld [vmem:[#allocation126_spill] sm:$0xff] }
 0x341   : >> { %v8988_v36 = vadd.f32 %v3456_v24, %v2939_v9  ;;  %v10245_v9 = vld [vmem:[#allocation70_spill] sm:$0xff]  ;;  %v6992_v24 = vld [vmem:[%s9891_s1 + $0x200] sm:$0xff]  ;;  %4190 = vmatpush.bf16.msrb.mxu0 %v6968_v50  ;;  %v2944_v17 = vadd.f32 %v10251_v20, %v10250_v54  ;;  %v10256_v50 = vld [vmem:[#allocation76_spill] sm:$0xff] }
 0x342   : >> { %10237 = vst [vmem:[#allocation103_spill] sm:$0xff] %v8986_v18  ;;  %4619 = vmatpush.bf16.msrb.mxu1 %v6992_v24 }
 0x343   : >> { %10238 = vst [vmem:[#allocation48_spill] sm:$0xff] %v8988_v36  ;;  %v10255_v36 = vld [vmem:[#allocation75_spill] sm:$0xff] }
 0x345   : >> { %v2897_v51 = vpop.f32.mrf.mxu2  ;;  %v2448_v57 = vpop.f32.mrf.mxu0 }
 0x346   : >> { %v3457_v13 = vpop.f32.mrf.mxu3  ;;  %v2898_v16 = vadd.f32 %v2897_v51, %v2810_v38  ;;  %v3372_v61 = vpop.f32.mrf.mxu1  ;;  %v2449_v31 = vadd.f32 %v2448_v57, %v10245_v9  ;;  %v10247_v38 = vld [vmem:[#allocation24_spill] sm:$0xff] }
 0x347   : >> { %v3458_v3 = vadd.f32 %v3457_v13, %v3369_v39 }
 0x348   : >> { %v8995_v8 = vadd.f32 %v10242_v6, %v2898_v16  ;;  %3683 = vmatmul.bf16.gmra.mxu0 %v10246_v7  ;;  %v10248_v16 = vld [vmem:[#allocation124_spill] sm:$0xff]  ;;  %v10252_v6 = vld [vmem:[#allocation121_spill] sm:$0xff] }
 0x349   : >> { %v8997_v44 = vadd.f32 %v3458_v3, %v2941_v43  ;;  %3939 = vmatmul.bf16.gmra.mxu1 %v10247_v38  ;;  %v10249_v43 = vld [vmem:[#allocation73_spill] sm:$0xff] }
 0x34a   : >> { %10243 = vst [vmem:[#allocation49_spill] sm:$0xff] %v8995_v8  ;;  %6361 = vmatmul.msk.bf16.gmra.mxu2 %vm2275_vm3, %v8767_v56  ;;  %v2813_v51 = vadd.f32 %v10249_v43, %v2449_v31  ;;  %v10257_v43 = vld [vmem:[#allocation77_spill] sm:$0xff] }
 0x34b   : >> { %10244 = vst [vmem:[#allocation105_spill] sm:$0xff] %v8997_v44  ;;  %6426 = vmatmul.msk.bf16.gmra.mxu3 %vm2275_vm3, %v10248_v16  ;;  %v2946_v59 = vadd.f32 %v10257_v43, %v8807_v28  ;;  %v10264_v28 = vld [vmem:[#allocation83_spill] sm:$0xff] }
 0x34d   : >> { %v2900_v25 = vpop.f32.mrf.mxu2  ;;  %v2450_v3 = vpop.f32.mrf.mxu0 }
 0x34e   : >> { %v3460_v39 = vpop.f32.mrf.mxu3  ;;  %v2901_v13 = vadd.f32 %v2900_v25, %v2813_v51  ;;  %v3374_v57 = vpop.f32.mrf.mxu1  ;;  %v2451_v16 = vadd.f32 %v2450_v3, %v10255_v36  ;;  %v10258_v25 = vld [vmem:[#allocation123_spill] sm:$0xff]  ;;  %v10263_v36 = vld [vmem:[#allocation28_spill] sm:$0xff] }
 0x34f   : >> { %v3461_v30 = vadd.f32 %v3460_v39, %v3372_v61 }
 0x350   : >> { %v9016_v9 = vadd.f32 %v10252_v6, %v2901_v13  ;;  %v2815_v24 = vadd.f32 %v10256_v50, %v2451_v16 }
 0x351   : >> { %v9018_v44 = vadd.f32 %v3461_v30, %v2944_v17  ;;  %v10261_v17 = vld [vmem:[#allocation80_spill] sm:$0xff]  ;;  %v10262_v30 = vld [vmem:[#allocation26_spill] sm:$0xff] }
 0x352   : >> { %10253 = vst [vmem:[#allocation52_spill] sm:$0xff] %v9016_v9 }
 0x353   : >> { %10254 = vst [vmem:[#allocation14_spill] sm:$0xff] %v9018_v44  ;;  %v10282_v44 = vld [vmem:[#allocation38_spill] sm:$0xff] }
 0x355   : >> { %v2902_v38 = vpop.f32.mrf.mxu2  ;;  %v2453_v51 = vpop.f32.mrf.mxu0 }
 0x356   : >> { %v3462_v31 = vpop.f32.mrf.mxu3  ;;  %v2903_v63 = vadd.f32 %v2902_v38, %v2815_v24  ;;  %v3377_v61 = vpop.f32.mrf.mxu1  ;;  %v2454_v13 = vadd.f32 %v2453_v51, %v10261_v17  ;;  %v10269_v51 = vld [vmem:[#allocation85_spill] sm:$0xff]  ;;  %v6973_v17 = vld [vmem:[%s9891_s1 + $0x2e8] sm:$0xff] }
 0x357   : >> { %v3463_v54 = vadd.f32 %v3462_v31, %v3374_v57  ;;  %v10266_v31 = vld [vmem:[#allocation127_spill] sm:$0xff]  ;;  %4285 = vmatpush.bf16.msrb.mxu2 %v6973_v17 }
 0x358   : >> { %v9025_v39 = vadd.f32 %v10258_v25, %v2903_v63  ;;  %3688 = vmatmul.bf16.gmra.mxu0 %v10262_v30  ;;  %v2818_v38 = vadd.f32 %v10264_v28, %v2454_v13  ;;  %v10265_v63 = vld [vmem:[#allocation84_spill] sm:$0xff] }
 0x359   : >> { %v9027_v20 = vadd.f32 %v3463_v54, %v2946_v59  ;;  %3944 = vmatmul.bf16.gmra.mxu1 %v10263_v36  ;;  %v2949_v59 = vadd.f32 %v10265_v63, %v8829_v35  ;;  %v6997_v13 = vld [vmem:[%s9891_s1 + $0x228] sm:$0xff]  ;;  %v10270_v35 = vld [vmem:[#allocation86_spill] sm:$0xff] }
 0x35a   : >> { %10259 = vst [vmem:[#allocation110_spill] sm:$0xff] %v9025_v39  ;;  %6362 = vmatmul.msk.bf16.gmra.mxu2 %vm2275_vm3, %v8803_v53  ;;  %4714 = vmatpush.bf16.msrb.mxu3 %v6997_v13  ;;  %v10303_v39 = vld [vmem:[#allocation78_spill] sm:$0xff] }
 0x35b   : >> { %10260 = vst [vmem:[#allocation55_spill] sm:$0xff] %v9027_v20  ;;  %6427 = vmatmul.msk.bf16.gmra.mxu3 %vm2275_vm3, %v8811_v12  ;;  %v10280_v20 = vld [vmem:[#allocation3_spill] sm:$0xff]  ;;  %v10283_v12 = vld [vmem:[#allocation40_spill] sm:$0xff] }
 0x35d   : >> { %v2905_v16 = vpop.f32.mrf.mxu2  ;;  %v2455_v50 = vpop.f32.mrf.mxu0 }
 0x35e   : >> { %v3465_v3 = vpop.f32.mrf.mxu3  ;;  %v2906_v57 = vadd.f32 %v2905_v16, %v2818_v38  ;;  %v3379_v24 = vpop.f32.mrf.mxu1  ;;  %v2456_v25 = vadd.f32 %v2455_v50, %v10269_v51  ;;  %v10273_v50 = vld [vmem:[#allocation30_spill] sm:$0xff]  ;;  %v10275_v51 = vld [vmem:[#allocation92_spill] sm:$0xff] }
 0x35f   : >> { %v3466_v6 = vadd.f32 %v3465_v3, %v3377_v61  ;;  %v10274_v24 = vld [vmem:[#allocation32_spill] sm:$0xff] }
 0x360   : >> { %v9040_v43 = vadd.f32 %v10266_v31, %v2906_v57  ;;  %v2820_v28 = vadd.f32 %v10270_v35, %v2456_v25  ;;  %v10272_v57 = vld [vmem:[#allocation89_spill] sm:$0xff]  ;;  %v6967_v31 = vld [vmem:[%s9891_s1 + $0x2b8] sm:$0xff] }
 0x361   : >> { %v9042_v54 = vadd.f32 %v3466_v6, %v2949_v59  ;;  %4191 = vmatpush.bf16.msrb.mxu0 %v6967_v31 }
 0x362   : >> { %10267 = vst [vmem:[#allocation114_spill] sm:$0xff] %v9040_v43 }
 0x363   : >> { %10268 = vst [vmem:[#allocation56_spill] sm:$0xff] %v9042_v54 }
 0x365   : >> { %v2907_v61 = vpop.f32.mrf.mxu2  ;;  %v2458_v3 = vpop.f32.mrf.mxu0 }
 0x366   : >> { %v3467_v38 = vpop.f32.mrf.mxu3  ;;  %v2908_v16 = vadd.f32 %v2907_v61, %v2820_v28  ;;  %v3381_v63 = vpop.f32.mrf.mxu1  ;;  %v2459_v6 = vadd.f32 %v2458_v3, %v10272_v57 }
 0x367   : >> { %v10276_v38 = vld [vmem:[#allocation131_spill] sm:$0xff] }
 0x368   : >> { %v9053_v59 = vadd.f32 %v8809_v1, %v2908_v16  ;;  %3693 = vmatmul.bf16.gmra.mxu0 %v10273_v50  ;;  %v6991_v1 = vld [vmem:[%s9891_s1 + $0x1f8] sm:$0xff]  ;;  %v2823_v25 = vadd.f32 %v10275_v51, %v2459_v6  ;;  %v10281_v6 = vld [vmem:[#allocation4_spill] sm:$0xff] }
 0x369   : >> { %3949 = vmatmul.bf16.gmra.mxu1 %v10274_v24  ;;  %v10279_v24 = vld [vmem:[#allocation36_spill] sm:$0xff] }
 0x36a   : >> { %10271 = vst [vmem:[#allocation109_spill] sm:$0xff] %v9053_v59  ;;  %6363 = vmatmul.msk.bf16.gmra.mxu2 %vm2275_vm3, %v8847_v23  ;;  %4620 = vmatpush.bf16.msrb.mxu1 %v6991_v1  ;;  %v10299_v59 = vld [vmem:[#allocation71_spill] sm:$0xff] }
 0x36b   : >> { %6428 = vmatmul.msk.bf16.gmra.mxu3 %vm2275_vm3, %v8851_v62  ;;  %v10278_v62 = vld [vmem:[#allocation34_spill] sm:$0xff] }
 0x36d   : >> { %v2910_v17 = vpop.f32.mrf.mxu2  ;;  %v2460_v28 = vpop.f32.mrf.mxu0 }
 0x36e   : >> { %v3469_v13 = vpop.f32.mrf.mxu3  ;;  %v2911_v35 = vadd.f32 %v2910_v17, %v2823_v25  ;;  %v3382_v61 = vpop.f32.mrf.mxu1 }
 0x370   : >> { %v9070_v16 = vadd.f32 %v10276_v38, %v2911_v35 }
 0x372   : >> { %10277 = vst [vmem:[#allocation57_spill] sm:$0xff] %v9070_v16  ;;  %v10294_v16 = vld [vmem:[#allocation58_spill] sm:$0xff] }
 0x375   : >> { %v2912_v3 = vpop.f32.mrf.mxu2  ;;  %v3659_v57 = vpop.f32.mrf.mxu0 }
 0x376   : >> { %v3470_v63 = vpop.f32.mrf.mxu3  ;;  %v3915_v54 = vpop.f32.mrf.mxu1 }
 0x378   : >> { %3698 = vmatmul.bf16.gmra.mxu0 %v10278_v62 }
 0x379   : >> { %3954 = vmatmul.bf16.gmra.mxu1 %v10279_v24 }
 0x37a   : >> { %6364 = vmatmul.msk.bf16.gmra.mxu2 %vm2275_vm3, %v10280_v20 }
 0x37b   : >> { %6429 = vmatmul.msk.bf16.gmra.mxu3 %vm2275_vm3, %v10281_v6  ;;  %v10284_v6 = vld [vmem:[#allocation5_spill] sm:$0xff] }
 0x37d   : >> { %v3751_v31 = vpop.f32.mrf.mxu2  ;;  %v3661_v25 = vpop.f32.mrf.mxu0 }
 0x37e   : >> { %v4007_v1 = vpop.f32.mrf.mxu3  ;;  %v3752_v51 = vadd.f32 %v3751_v31, %v3659_v57  ;;  %v3917_v17 = vpop.f32.mrf.mxu1  ;;  %v10285_v57 = vld [vmem:[#allocation7_spill] sm:$0xff]  ;;  %v6990_v31 = vld [vmem:[%s9891_s1 + $0x1f0] sm:$0xff] }
 0x37f   : >> { %4621 = vmatpush.bf16.msrb.mxu1 %v6990_v31  ;;  %v10288_v31 = vld [vmem:[#allocation8_spill] sm:$0xff] }
 0x380   : >> { %v3916_v13 = vadd.f32 %v3915_v54, %v3752_v51  ;;  %v6966_v54 = vld [vmem:[%s9891_s1 + $0x2b0] sm:$0xff] }
 0x381   : >> { %4192 = vmatpush.bf16.msrb.mxu0 %v6966_v54 }
 0x382   : >> { %v9078_v35 = vadd.f32 %v4007_v1, %v3916_v13 }
 0x385   : >> { %v3753_v28 = vpop.f32.mrf.mxu2  ;;  %v3664_v3 = vpop.f32.mrf.mxu0 }
 0x386   : >> { %v4009_v61 = vpop.f32.mrf.mxu3  ;;  %v3754_v38 = vadd.f32 %v3753_v28, %v3661_v25  ;;  %v3920_v63 = vpop.f32.mrf.mxu1 }
 0x388   : >> { %v3918_v24 = vadd.f32 %v3917_v17, %v3754_v38  ;;  %3703 = vmatmul.bf16.gmra.mxu0 %v10282_v44 }
 0x389   : >> { %3959 = vmatmul.bf16.gmra.mxu1 %v10283_v12 }
 0x38a   : >> { %v9082_v36 = vadd.f32 %v4009_v61, %v3918_v24  ;;  %6365 = vmatmul.msk.bf16.gmra.mxu2 %vm2275_vm3, %v10284_v6 }
 0x38b   : >> { %6430 = vmatmul.msk.bf16.gmra.mxu3 %vm2275_vm3, %v10285_v57 }
 0x38d   : >> { %v3756_v1 = vpop.f32.mrf.mxu2  ;;  %v3666_v25 = vpop.f32.mrf.mxu0 }
 0x38e   : >> { %v4012_v51 = vpop.f32.mrf.mxu3  ;;  %v3757_v24 = vadd.f32 %v3756_v1, %v3664_v3  ;;  %v3922_v17 = vpop.f32.mrf.mxu1  ;;  %v10289_v3 = vld [vmem:[#allocation10_spill] sm:$0xff] }
 0x390   : >> { %v3921_v13 = vadd.f32 %v3920_v63, %v3757_v24 }
 0x392   : >> { %v9094_v28 = vadd.f32 %v4012_v51, %v3921_v13 }
 0x395   : >> { %v3758_v61 = vpop.f32.mrf.mxu2  ;;  %v3669_v12 = vpop.f32.mrf.mxu0 }
 0x396   : >> { %v4014_v38 = vpop.f32.mrf.mxu3  ;;  %v3759_v57 = vadd.f32 %v3758_v61, %v3666_v25  ;;  %v3925_v14 = vpop.f32.mrf.mxu1 }
 0x398   : >> { %v3923_v22 = vadd.f32 %v3922_v17, %v3759_v57  ;;  %3708 = vmatmul.bf16.gmra.mxu0 %v10286_v41 }
 0x399   : >> { %3964 = vmatmul.bf16.gmra.mxu1 %v10287_v47 }
 0x39a   : >> { %v9098_v54 = vadd.f32 %v4014_v38, %v3923_v22  ;;  %6366 = vmatmul.msk.bf16.gmra.mxu2 %vm2275_vm3, %v10288_v31 }
 0x39b   : >> { %6431 = vmatmul.msk.bf16.gmra.mxu3 %vm2275_vm3, %v10289_v3  ;;  %v10292_v3 = vld [vmem:[#allocation11_spill] sm:$0xff] }
 0x39d   : >> { %v3761_v63 = vpop.f32.mrf.mxu2  ;;  %v3671_v24 = vpop.f32.mrf.mxu0 }
 0x39e   : >> { %v4017_v1 = vpop.f32.mrf.mxu3  ;;  %v3762_v51 = vadd.f32 %v3761_v63, %v3669_v12  ;;  %v3927_v25 = vpop.f32.mrf.mxu1  ;;  %v10293_v12 = vld [vmem:[#allocation13_spill] sm:$0xff]  ;;  %v6965_v63 = vld [vmem:[%s9891_s1 + $0x2a8] sm:$0xff] }
 0x39f   : >> { %4193 = vmatpush.bf16.msrb.mxu0 %v6965_v63  ;;  %v10296_v63 = vld [vmem:[#allocation15_spill] sm:$0xff] }
 0x3a0   : >> { %v3926_v13 = vadd.f32 %v3925_v14, %v3762_v51  ;;  %v6972_v14 = vld [vmem:[%s9891_s1 + $0x2e0] sm:$0xff] }
 0x3a1   : >> { %4286 = vmatpush.bf16.msrb.mxu2 %v6972_v14  ;;  %v10295_v14 = vld [vmem:[#allocation61_spill] sm:$0xff] }
 0x3a2   : >> { %v9104_v61 = vadd.f32 %v4017_v1, %v3926_v13  ;;  %v6989_v1 = vld [vmem:[%s9891_s1 + $0x1e8] sm:$0xff] }
 0x3a3   : >> { %4622 = vmatpush.bf16.msrb.mxu1 %v6989_v1 }
 0x3a5   : >> { %v3763_v57 = vpop.f32.mrf.mxu2  ;;  %v3674_v47 = vpop.f32.mrf.mxu0 }
 0x3a6   : >> { %v4019_v17 = vpop.f32.mrf.mxu3  ;;  %v3764_v11 = vadd.f32 %v3763_v57, %v3671_v24  ;;  %v3930_v22 = vpop.f32.mrf.mxu1 }
 0x3a8   : >> { %v3928_v38 = vadd.f32 %v3927_v25, %v3764_v11  ;;  %3713 = vmatmul.bf16.gmra.mxu0 %v10290_v0  ;;  %v6996_v11 = vld [vmem:[%s9891_s1 + $0x220] sm:$0xff] }
 0x3a9   : >> { %3969 = vmatmul.bf16.gmra.mxu1 %v10291_v5  ;;  %4715 = vmatpush.bf16.msrb.mxu3 %v6996_v11 }
 0x3aa   : >> { %v9108_v34 = vadd.f32 %v4019_v17, %v3928_v38  ;;  %6367 = vmatmul.msk.bf16.gmra.mxu2 %vm2275_vm3, %v10292_v3 }
 0x3ab   : >> { %6432 = vmatmul.msk.bf16.gmra.mxu3 %vm2275_vm3, %v10293_v12 }
 0x3ad   : >> { %v3766_v51 = vpop.f32.mrf.mxu2  ;;  %v3676_v13 = vpop.f32.mrf.mxu0 }
 0x3ae   : >> { %v4022_v24 = vpop.f32.mrf.mxu3  ;;  %v3767_v25 = vadd.f32 %v3766_v51, %v3674_v47  ;;  %v3932_v57 = vpop.f32.mrf.mxu1  ;;  %v10297_v47 = vld [vmem:[#allocation17_spill] sm:$0xff] }
 0x3b0   : >> { %v3931_v17 = vadd.f32 %v3930_v22, %v3767_v25 }
 0x3b2   : >> { %v9126_v38 = vadd.f32 %v4022_v24, %v3931_v17 }
 0x3b5   : >> { %v3768_v12 = vpop.f32.mrf.mxu2  ;;  %v3679_v46 = vpop.f32.mrf.mxu0 }
 0x3b6   : >> { %v4024_v5 = vpop.f32.mrf.mxu3  ;;  %v3769_v2 = vadd.f32 %v3768_v12, %v3676_v13  ;;  %v3935_v33 = vpop.f32.mrf.mxu1 }
 0x3b8   : >> { %v3933_v21 = vadd.f32 %v3932_v57, %v3769_v2  ;;  %3718 = vmatmul.bf16.gmra.mxu0 %v10294_v16 }
 0x3b9   : >> { %3974 = vmatmul.bf16.gmra.mxu1 %v10295_v14 }
 0x3ba   : >> { %v9130_v11 = vadd.f32 %v4024_v5, %v3933_v21  ;;  %6368 = vmatmul.msk.bf16.gmra.mxu2 %vm2275_vm3, %v10296_v63 }
 0x3bb   : >> { %6433 = vmatmul.msk.bf16.gmra.mxu3 %vm2275_vm3, %v10297_v47  ;;  %v10300_v47 = vld [vmem:[#allocation19_spill] sm:$0xff] }
 0x3bd   : >> { %v3771_v22 = vpop.f32.mrf.mxu2  ;;  %v3681_v24 = vpop.f32.mrf.mxu0 }
 0x3be   : >> { %v4027_v1 = vpop.f32.mrf.mxu3  ;;  %v3772_v51 = vadd.f32 %v3771_v22, %v3679_v46  ;;  %v3937_v12 = vpop.f32.mrf.mxu1  ;;  %v10301_v46 = vld [vmem:[#allocation21_spill] sm:$0xff] }
 0x3c0   : >> { %v3936_v25 = vadd.f32 %v3935_v33, %v3772_v51 }
 0x3c2   : >> { %v9136_v13 = vadd.f32 %v4027_v1, %v3936_v25 }
 0x3c5   : >> { %v3773_v2 = vpop.f32.mrf.mxu2  ;;  %v3684_v14 = vpop.f32.mrf.mxu0 }
 0x3c6   : >> { %v4029_v57 = vpop.f32.mrf.mxu3  ;;  %v3774_v17 = vadd.f32 %v3773_v2, %v3681_v24  ;;  %v3940_v21 = vpop.f32.mrf.mxu1 }
 0x3c8   : >> { %v3938_v5 = vadd.f32 %v3937_v12, %v3774_v17  ;;  %3723 = vmatmul.bf16.gmra.mxu0 %v10298_v58  ;;  %v6964_v12 = vld [vmem:[%s9891_s1 + $0x2a0] sm:$0xff] }
 0x3c9   : >> { %3979 = vmatmul.bf16.gmra.mxu1 %v10299_v59  ;;  %4194 = vmatpush.bf16.msrb.mxu0 %v6964_v12 }
 0x3ca   : >> { %v9140_v43 = vadd.f32 %v4029_v57, %v3938_v5  ;;  %6369 = vmatmul.msk.bf16.gmra.mxu2 %vm2275_vm3, %v10300_v47  ;;  %v6988_v57 = vld [vmem:[%s9891_s1 + $0x1e0] sm:$0xff] }
 0x3cb   : >> { %6434 = vmatmul.msk.bf16.gmra.mxu3 %vm2275_vm3, %v10301_v46  ;;  %4623 = vmatpush.bf16.msrb.mxu1 %v6988_v57 }
 0x3cd   : >> { %v3776_v33 = vpop.f32.mrf.mxu2  ;;  %v3686_v51 = vpop.f32.mrf.mxu0 }
 0x3ce   : >> { %v4032_v22 = vpop.f32.mrf.mxu3  ;;  %v3777_v1 = vadd.f32 %v3776_v33, %v3684_v14  ;;  %v3942_v24 = vpop.f32.mrf.mxu1 }
 0x3d0   : >> { %v3941_v25 = vadd.f32 %v3940_v21, %v3777_v1  ;;  %v10304_v21 = vld [vmem:[#allocation81_spill] sm:$0xff]  ;;  %v10306_v1 = vld [vmem:[#allocation23_spill] sm:$0xff] }
 0x3d2   : >> { %v9146_v2 = vadd.f32 %v4032_v22, %v3941_v25  ;;  %v10307_v25 = vld [vmem:[#allocation25_spill] sm:$0xff] }
 0x3d4   : >> { %10302 = vst [vmem:[#allocation60_spill] sm:$0xff] %v9146_v2 }
 0x3d5   : >> { %v3778_v17 = vpop.f32.mrf.mxu2  ;;  %v3689_v59 = vpop.f32.mrf.mxu0 }
 0x3d6   : >> { %v4034_v5 = vpop.f32.mrf.mxu3  ;;  %v3779_v46 = vadd.f32 %v3778_v17, %v3686_v51  ;;  %v3945_v14 = vpop.f32.mrf.mxu1 }
 0x3d8   : >> { %v3943_v33 = vadd.f32 %v3942_v24, %v3779_v46  ;;  %3728 = vmatmul.bf16.gmra.mxu0 %v10303_v39 }
 0x3d9   : >> { %3984 = vmatmul.bf16.gmra.mxu1 %v10304_v21 }
 0x3da   : >> { %v9156_v22 = vadd.f32 %v4034_v5, %v3943_v33  ;;  %6370 = vmatmul.msk.bf16.gmra.mxu2 %vm2275_vm3, %v10306_v1  ;;  %v10309_v1 = vld [vmem:[#allocation90_spill] sm:$0xff] }
 0x3db   : >> { %6435 = vmatmul.msk.bf16.gmra.mxu3 %vm2275_vm3, %v10307_v25  ;;  %v10311_v25 = vld [vmem:[#allocation27_spill] sm:$0xff] }
 0x3dc   : >> { %10305 = vst [vmem:[#allocation18_spill] sm:$0xff] %v9156_v22  ;;  %v10308_v22 = vld [vmem:[#allocation87_spill] sm:$0xff] }
 0x3dd   : >> { %v3781_v12 = vpop.f32.mrf.mxu2  ;;  %v3691_v8 = vpop.f32.mrf.mxu0 }
 0x3de   : >> { %v4037_v57 = vpop.f32.mrf.mxu3  ;;  %v3782_v9 = vadd.f32 %v3781_v12, %v3689_v59  ;;  %v3947_v51 = vpop.f32.mrf.mxu1  ;;  %v10312_v59 = vld [vmem:[#allocation29_spill] sm:$0xff] }
 0x3e0   : >> { %v3946_v17 = vadd.f32 %v3945_v14, %v3782_v9  ;;  %v6987_v9 = vld [vmem:[%s9891_s1 + $0x118] sm:$0xff] }
 0x3e1   : >> { %4968 = vmatpush.bf16.msra.mxu2 %v6987_v9 }
 0x3e2   : >> { %v9162_v2 = vadd.f32 %v4037_v57, %v3946_v17 }
 0x3e5   : >> { %v3783_v46 = vpop.f32.mrf.mxu2  ;;  %v3694_v21 = vpop.f32.mrf.mxu0 }
 0x3e6   : >> { %v4039_v24 = vpop.f32.mrf.mxu3  ;;  %v3784_v39 = vadd.f32 %v3783_v46, %v3691_v8  ;;  %v3950_v5 = vpop.f32.mrf.mxu1  ;;  %v7011_v8 = vld [vmem:[%s9891_s1 + $0x358] sm:$0xff] }
 0x3e7   : >> { %5249 = vmatpush.bf16.msra.mxu3 %v7011_v8 }
 0x3e8   : >> { %v3948_v33 = vadd.f32 %v3947_v51, %v3784_v39  ;;  %3733 = vmatmul.bf16.gmra.mxu0 %v10308_v22 }
 0x3e9   : >> { %3989 = vmatmul.bf16.gmra.mxu1 %v10309_v1 }
 0x3ea   : >> { %v9166_v18 = vadd.f32 %v4039_v24, %v3948_v33  ;;  %6371 = vmatmul.msk.bf16.gmra.mxu2 %vm2275_vm3, %v10311_v25  ;;  %v6983_v24 = vld [vmem:[%s9891_s1 + $0xf8] sm:$0xff]  ;;  %v10314_v25 = vld [vmem:[#allocation93_spill] sm:$0xff] }
 0x3eb   : >> { %6436 = vmatmul.msk.bf16.gmra.mxu3 %vm2275_vm3, %v10312_v59  ;;  %v7007_v33 = vld [vmem:[%s9891_s1 + $0x338] sm:$0xff]  ;;  %4872 = vmatpush.bf16.msra.mxu0 %v6983_v24 }
 0x3ec   : >> { %10310 = vst [vmem:[#allocation63_spill] sm:$0xff] %v9166_v18  ;;  %5153 = vmatpush.bf16.msra.mxu1 %v7007_v33 }
 0x3ed   : >> { %v3786_v39 = vpop.f32.mrf.mxu2  ;;  %v3696_v57 = vpop.f32.mrf.mxu0 }
 0x3ee   : >> { %v4042_v14 = vpop.f32.mrf.mxu3  ;;  %v3787_v12 = vadd.f32 %v3786_v39, %v3694_v21  ;;  %v3952_v51 = vpop.f32.mrf.mxu1 }
 0x3f0   : >> { %v3951_v17 = vadd.f32 %v3950_v5, %v3787_v12  ;;  %v10315_v5 = vld [vmem:[#allocation95_spill] sm:$0xff] }
 0x3f1   : >> { %v10317_v12 = vld [vmem:[#allocation31_spill] sm:$0xff] }
 0x3f2   : >> { %v9178_v46 = vadd.f32 %v4042_v14, %v3951_v17  ;;  %v10318_v17 = vld [vmem:[#allocation33_spill] sm:$0xff] }
 0x3f4   : >> { %10313 = vst [vmem:[#allocation120_spill] sm:$0xff] %v9178_v46 }
 0x3f5   : >> { %v3788_v9 = vpop.f32.mrf.mxu2  ;;  %v3699_v1 = vpop.f32.mrf.mxu0 }
 0x3f6   : >> { %v4044_v8 = vpop.f32.mrf.mxu3  ;;  %v3789_v59 = vadd.f32 %v3788_v9, %v3696_v57  ;;  %v3955_v21 = vpop.f32.mrf.mxu1 }
 0x3f8   : >> { %v3953_v39 = vadd.f32 %v3952_v51, %v3789_v59  ;;  %3738 = vmatmul.bf16.gmra.mxu0 %v10314_v25 }
 0x3f9   : >> { %3994 = vmatmul.bf16.gmra.mxu1 %v10315_v5 }
 0x3fa   : >> { %v9188_v14 = vadd.f32 %v4044_v8, %v3953_v39  ;;  %6372 = vmatmul.msk.bf16.gmra.mxu2 %vm2275_vm3, %v10317_v12 }
 0x3fb   : >> { %6437 = vmatmul.msk.bf16.gmra.mxu3 %vm2275_vm3, %v10318_v17  ;;  %v10320_v17 = vld [vmem:[#allocation37_spill] sm:$0xff] }
 0x3fc   : >> { %10316 = vst [vmem:[#allocation64_spill] sm:$0xff] %v9188_v14  ;;  %v10319_v14 = vld [vmem:[#allocation35_spill] sm:$0xff] }
 0x3fd   : >> { %v3791_v24 = vpop.f32.mrf.mxu2  ;;  %v3701_v22 = vpop.f32.mrf.mxu0 }
 0x3fe   : >> { %v4047_v33 = vpop.f32.mrf.mxu3  ;;  %v3792_v46 = vadd.f32 %v3791_v24, %v3699_v1  ;;  %v3957_v57 = vpop.f32.mrf.mxu1 }
 0x400   : >> { %v3956_v9 = vadd.f32 %v3955_v21, %v3792_v46 }
 0x402   : >> { %v9194_v18 = vadd.f32 %v4047_v33, %v3956_v9 }
 0x405   : >> { %v3793_v59 = vpop.f32.mrf.mxu2  ;;  %v3704_v5 = vpop.f32.mrf.mxu0 }
 0x406   : >> { %v4049_v51 = vpop.f32.mrf.mxu3  ;;  %v3794_v25 = vadd.f32 %v3793_v59, %v3701_v22  ;;  %v3960_v8 = vpop.f32.mrf.mxu1 }
 0x408   : >> { %v3958_v39 = vadd.f32 %v3957_v57, %v3794_v25  ;;  %4195 = vmatmul.bf16.vlgmr.msrb.gmra.mxu0 %v10319_v14  ;;  %v7006_v25 = vld [vmem:[%s9891_s1 + $0x330] sm:$0xff] }
 0x409   : >> { %4624 = vmatmul.bf16.vlgmr.msrb.gmra.mxu1 %v8023_v19  ;;  %v6982_v19 = vld [vmem:[%s9891_s1 + $0xf0] sm:$0xff] }
 0x40a   : >> { %v9198_v12 = vadd.f32 %v4049_v51, %v3958_v39  ;;  %6510 = vmatmul.msk.bf16.vlgmr.msrb.gmra.mxu2 %vm2275_vm3, %v10320_v17  ;;  %4873 = vmatpush.bf16.msra.mxu0 %v6982_v19 }
 0x40b   : >> { %6623 = vmatmul.msk.bf16.vlgmr.msrb.gmra.mxu3 %vm2275_vm3, %v8571_v40  ;;  %5154 = vmatpush.bf16.msra.mxu1 %v7006_v25 }
 0x40d   : >> { %v3796_v1 = vpop.f32.mrf.mxu2  ;;  %v3706_v24 = vpop.f32.mrf.mxu0 }
 0x40e   : >> { %v4052_v46 = vpop.f32.mrf.mxu3  ;;  %v3797_v21 = vadd.f32 %v3796_v1, %v3704_v5  ;;  %v3962_v22 = vpop.f32.mrf.mxu1  ;;  %v10322_v1 = vld [vmem:[#allocation39_spill] sm:$0xff] }
 0x410   : >> { %v3961_v33 = vadd.f32 %v3960_v8, %v3797_v21 }
 0x412   : >> { %v9204_v9 = vadd.f32 %v4052_v46, %v3961_v33  ;;  %v10324_v46 = vld [vmem:[#allocation41_spill] sm:$0xff] }
 0x414   : >> { %10321 = vst [vmem:[#allocation115_spill] sm:$0xff] %v9204_v9 }
 0x415   : >> { %v3798_v57 = vpop.f32.mrf.mxu2  ;;  %v3709_v51 = vpop.f32.mrf.mxu0 }
 0x416   : >> { %v4054_v40 = vpop.f32.mrf.mxu3  ;;  %v3799_v59 = vadd.f32 %v3798_v57, %v3706_v24  ;;  %v3965_v5 = vpop.f32.mrf.mxu1 }
 0x418   : >> { %v3963_v39 = vadd.f32 %v3962_v22, %v3799_v59  ;;  %4200 = vmatmul.bf16.gmra.mxu0 %v10322_v1 }
 0x419   : >> { %4629 = vmatmul.bf16.gmra.mxu1 %v8056_v32 }
 0x41a   : >> { %v9214_v8 = vadd.f32 %v4054_v40, %v3963_v39  ;;  %6511 = vmatmul.msk.bf16.gmra.mxu2 %vm2275_vm3, %v10324_v46 }
 0x41b   : >> { %6624 = vmatmul.msk.bf16.gmra.mxu3 %vm2275_vm3, %v8613_v26  ;;  %v10326_v26 = vld [vmem:[#allocation45_spill] sm:$0xff] }
 0x41c   : >> { %10323 = vst [vmem:[#allocation65_spill] sm:$0xff] %v9214_v8  ;;  %v10325_v8 = vld [vmem:[#allocation43_spill] sm:$0xff] }
 0x41d   : >> { %v3801_v21 = vpop.f32.mrf.mxu2  ;;  %v3711_v25 = vpop.f32.mrf.mxu0 }
 0x41e   : >> { %v4057_v33 = vpop.f32.mrf.mxu3  ;;  %v3802_v19 = vadd.f32 %v3801_v21, %v3709_v51  ;;  %v3967_v24 = vpop.f32.mrf.mxu1 }
 0x420   : >> { %v3966_v57 = vadd.f32 %v3965_v5, %v3802_v19 }
 0x422   : >> { %v9220_v9 = vadd.f32 %v4057_v33, %v3966_v57 }
 0x425   : >> { %v3803_v22 = vpop.f32.mrf.mxu2  ;;  %v3714_v32 = vpop.f32.mrf.mxu0 }
 0x426   : >> { %v4059_v59 = vpop.f32.mrf.mxu3  ;;  %v3804_v1 = vadd.f32 %v3803_v22, %v3711_v25  ;;  %v3970_v40 = vpop.f32.mrf.mxu1 }
 0x428   : >> { %v3968_v39 = vadd.f32 %v3967_v24, %v3804_v1  ;;  %4205 = vmatmul.bf16.gmra.mxu0 %v10325_v8  ;;  %v7010_v1 = vld [vmem:[%s9891_s1 + $0x350] sm:$0xff]  ;;  %v7005_v24 = vld [vmem:[%s9891_s1 + $0x328] sm:$0xff] }
 0x429   : >> { %4634 = vmatmul.bf16.gmra.mxu1 %v8084_v45  ;;  %v6986_v45 = vld [vmem:[%s9891_s1 + $0x110] sm:$0xff]  ;;  %5250 = vmatpush.bf16.msra.mxu3 %v7010_v1 }
 0x42a   : >> { %v9224_v46 = vadd.f32 %v4059_v59, %v3968_v39  ;;  %6512 = vmatmul.msk.bf16.gmra.mxu2 %vm2275_vm3, %v10326_v26  ;;  %5155 = vmatpush.bf16.msra.mxu1 %v7005_v24 }
 0x42b   : >> { %6625 = vmatmul.msk.bf16.gmra.mxu3 %vm2275_vm3, %v8649_v27  ;;  %v6981_v27 = vld [vmem:[%s9891_s1 + $0xe8] sm:$0xff]  ;;  %4969 = vmatpush.bf16.msra.mxu2 %v6986_v45 }
 0x42c   : >> { %4874 = vmatpush.bf16.msra.mxu0 %v6981_v27 }
 0x42d   : >> { %v3806_v51 = vpop.f32.mrf.mxu2  ;;  %v3716_v33 = vpop.f32.mrf.mxu0 }
 0x42e   : >> { %v4062_v5 = vpop.f32.mrf.mxu3  ;;  %v3807_v21 = vadd.f32 %v3806_v51, %v3714_v32  ;;  %v3972_v19 = vpop.f32.mrf.mxu1 }
 0x430   : >> { %v3971_v25 = vadd.f32 %v3970_v40, %v3807_v21 }
 0x432   : >> { %v9230_v57 = vadd.f32 %v4062_v5, %v3971_v25  ;;  %v10328_v5 = vld [vmem:[#allocation51_spill] sm:$0xff]  ;;  %v10330_v25 = vld [vmem:[#allocation54_spill] sm:$0xff] }
 0x434   : >> { %10327 = vst [vmem:[#allocation66_spill] sm:$0xff] %v9230_v57 }
 0x435   : >> { %v3808_v22 = vpop.f32.mrf.mxu2  ;;  %v3719_v40 = vpop.f32.mrf.mxu0 }
 0x436   : >> { %v4064_v59 = vpop.f32.mrf.mxu3  ;;  %v3809_v32 = vadd.f32 %v3808_v22, %v3716_v33  ;;  %v3975_v39 = vpop.f32.mrf.mxu1 }
 0x438   : >> { %v3973_v51 = vadd.f32 %v3972_v19, %v3809_v32  ;;  %4210 = vmatmul.bf16.gmra.mxu0 %v10328_v5 }
 0x439   : >> { %4639 = vmatmul.bf16.gmra.mxu1 %v10218_v4 }
 0x43a   : >> { %v9246_v21 = vadd.f32 %v4064_v59, %v3973_v51  ;;  %6513 = vmatmul.msk.bf16.gmra.mxu2 %vm2275_vm3, %v10330_v25 }
 0x43b   : >> { %6626 = vmatmul.msk.bf16.gmra.mxu3 %vm2275_vm3, %v10220_v48  ;;  %v10332_v48 = vld [vmem:[#allocation62_spill] sm:$0xff] }
 0x43c   : >> { %10329 = vst [vmem:[#allocation67_spill] sm:$0xff] %v9246_v21  ;;  %v10331_v21 = vld [vmem:[#allocation59_spill] sm:$0xff] }
 0x43d   : >> { %v3811_v45 = vpop.f32.mrf.mxu2  ;;  %v3721_v24 = vpop.f32.mrf.mxu0 }
 0x43e   : >> { %v4067_v1 = vpop.f32.mrf.mxu3  ;;  %v3812_v27 = vadd.f32 %v3811_v45, %v3719_v40  ;;  %v3977_v33 = vpop.f32.mrf.mxu1 }
 0x440   : >> { %v3976_v22 = vadd.f32 %v3975_v39, %v3812_v27 }
 0x442   : >> { %v9252_v57 = vadd.f32 %v4067_v1, %v3976_v22 }
 0x445   : >> { %v3813_v19 = vpop.f32.mrf.mxu2  ;;  %v3724_v4 = vpop.f32.mrf.mxu0 }
 0x446   : >> { %v4069_v32 = vpop.f32.mrf.mxu3  ;;  %v3814_v5 = vadd.f32 %v3813_v19, %v3721_v24  ;;  %v3980_v59 = vpop.f32.mrf.mxu1 }
 0x448   : >> { %v3978_v51 = vadd.f32 %v3977_v33, %v3814_v5  ;;  %4215 = vmatmul.bf16.gmra.mxu0 %v10331_v21  ;;  %v10333_v21 = vld [vmem:[#allocation69_spill] sm:$0xff] }
 0x449   : >> { %4644 = vmatmul.bf16.gmra.mxu1 %v10230_v55 }
 0x44a   : >> { %v9256_v25 = vadd.f32 %v4069_v32, %v3978_v51  ;;  %6514 = vmatmul.msk.bf16.gmra.mxu2 %vm2275_vm3, %v10332_v48 }
 0x44b   : >> { %6627 = vmatmul.msk.bf16.gmra.mxu3 %vm2275_vm3, %v8725_v52  ;;  %v10334_v52 = vld [vmem:[#allocation72_spill] sm:$0xff] }
 0x44d   : >> { %v3816_v40 = vpop.f32.mrf.mxu2  ;;  %v3726_v1 = vpop.f32.mrf.mxu0 }
 0x44e   : >> { %v4072_v39 = vpop.f32.mrf.mxu3  ;;  %v3817_v45 = vadd.f32 %v3816_v40, %v3724_v4  ;;  %v3982_v27 = vpop.f32.mrf.mxu1  ;;  %v6980_v4 = vld [vmem:[%s9891_s1 + $0xe0] sm:$0xff] }
 0x44f   : >> { %4875 = vmatpush.bf16.msra.mxu0 %v6980_v4 }
 0x450   : >> { %v3981_v24 = vadd.f32 %v3980_v59, %v3817_v45  ;;  %v7004_v59 = vld [vmem:[%s9891_s1 + $0x320] sm:$0xff] }
 0x451   : >> { %5156 = vmatpush.bf16.msra.mxu1 %v7004_v59  ;;  %v10336_v59 = vld [vmem:[#allocation82_spill] sm:$0xff] }
 0x452   : >> { %v9262_v22 = vadd.f32 %v4072_v39, %v3981_v24 }
 0x455   : >> { %v3818_v5 = vpop.f32.mrf.mxu2  ;;  %v3729_v55 = vpop.f32.mrf.mxu0 }
 0x456   : >> { %v4074_v33 = vpop.f32.mrf.mxu3  ;;  %v3819_v19 = vadd.f32 %v3818_v5, %v3726_v1  ;;  %v3985_v32 = vpop.f32.mrf.mxu1 }
 0x458   : >> { %v3983_v51 = vadd.f32 %v3982_v27, %v3819_v19  ;;  %4220 = vmatmul.bf16.gmra.mxu0 %v10333_v21  ;;  %v10335_v21 = vld [vmem:[#allocation79_spill] sm:$0xff] }
 0x459   : >> { %4649 = vmatmul.bf16.gmra.mxu1 %v10246_v7 }
 0x45a   : >> { %v9266_v48 = vadd.f32 %v4074_v33, %v3983_v51  ;;  %6515 = vmatmul.msk.bf16.gmra.mxu2 %vm2275_vm3, %v10334_v52 }
 0x45b   : >> { %6628 = vmatmul.msk.bf16.gmra.mxu3 %vm2275_vm3, %v8767_v56 }
 0x45d   : >> { %v3821_v40 = vpop.f32.mrf.mxu2  ;;  %v3731_v45 = vpop.f32.mrf.mxu0 }
 0x45e   : >> { %v4077_v7 = vpop.f32.mrf.mxu3  ;;  %v3822_v39 = vadd.f32 %v3821_v40, %v3729_v55  ;;  %v3987_v1 = vpop.f32.mrf.mxu1 }
 0x460   : >> { %v3986_v27 = vadd.f32 %v3985_v32, %v3822_v39 }
 0x462   : >> { %v9278_v24 = vadd.f32 %v4077_v7, %v3986_v27 }
 0x465   : >> { %v3823_v5 = vpop.f32.mrf.mxu2  ;;  %v3734_v19 = vpop.f32.mrf.mxu0 }
 0x466   : >> { %v4079_v56 = vpop.f32.mrf.mxu3  ;;  %v3824_v33 = vadd.f32 %v3823_v5, %v3731_v45  ;;  %v3990_v51 = vpop.f32.mrf.mxu1 }
 0x468   : >> { %v3988_v52 = vadd.f32 %v3987_v1, %v3824_v33  ;;  %4225 = vmatmul.bf16.gmra.mxu0 %v10335_v21 }
 0x469   : >> { %4654 = vmatmul.bf16.gmra.mxu1 %v10262_v30  ;;  %v6985_v30 = vld [vmem:[%s9891_s1 + $0x108] sm:$0xff] }
 0x46a   : >> { %v9282_v4 = vadd.f32 %v4079_v56, %v3988_v52  ;;  %6516 = vmatmul.msk.bf16.gmra.mxu2 %vm2275_vm3, %v10336_v59  ;;  %v7009_v52 = vld [vmem:[%s9891_s1 + $0x348] sm:$0xff] }
 0x46b   : >> { %6629 = vmatmul.msk.bf16.gmra.mxu3 %vm2275_vm3, %v8803_v53  ;;  %4970 = vmatpush.bf16.msra.mxu2 %v6985_v30 }
 0x46c   : >> { %5251 = vmatpush.bf16.msra.mxu3 %v7009_v52 }
 0x46d   : >> { %v3826_v55 = vpop.f32.mrf.mxu2  ;;  %v3736_v7 = vpop.f32.mrf.mxu0 }
 0x46e   : >> { %v4082_v32 = vpop.f32.mrf.mxu3  ;;  %v3827_v40 = vadd.f32 %v3826_v55, %v3734_v19  ;;  %v3992_v39 = vpop.f32.mrf.mxu1  ;;  %v10337_v55 = vld [vmem:[#allocation88_spill] sm:$0xff] }
 0x470   : >> { %v3991_v45 = vadd.f32 %v3990_v51, %v3827_v40 }
 0x472   : >> { %v9288_v27 = vadd.f32 %v4082_v32, %v3991_v45  ;;  %v10338_v32 = vld [vmem:[#allocation91_spill] sm:$0xff] }
 0x475   : >> { %v3828_v1 = vpop.f32.mrf.mxu2  ;;  %v3739_v56 = vpop.f32.mrf.mxu0 }
 0x476   : >> { %v4084_v53 = vpop.f32.mrf.mxu3  ;;  %v3829_v5 = vadd.f32 %v3828_v1, %v3736_v7  ;;  %v3995_v33 = vpop.f32.mrf.mxu1  ;;  %v6979_v7 = vld [vmem:[%s9891_s1 + $0xd8] sm:$0xff] }
 0x477   : >> { %4876 = vmatpush.bf16.msra.mxu0 %v6979_v7  ;;  %v10339_v56 = vld [vmem:[#allocation94_spill] sm:$0xff] }
 0x478   : >> { %v3993_v19 = vadd.f32 %v3992_v39, %v3829_v5  ;;  %4230 = vmatmul.bf16.gmra.mxu0 %v10337_v55  ;;  %v7003_v39 = vld [vmem:[%s9891_s1 + $0x318] sm:$0xff] }
 0x479   : >> { %4659 = vmatmul.bf16.gmra.mxu1 %v10273_v50 }
 0x47a   : >> { %v9298_v51 = vadd.f32 %v4084_v53, %v3993_v19  ;;  %6517 = vmatmul.msk.bf16.gmra.mxu2 %vm2275_vm3, %v10338_v32  ;;  %5157 = vmatpush.bf16.msra.mxu1 %v7003_v39 }
 0x47b   : >> { %6630 = vmatmul.msk.bf16.gmra.mxu3 %vm2275_vm3, %v8847_v23  ;;  %v10340_v23 = vld [vmem:[#allocation96_spill] sm:$0xff] }
 0x47d   : >> { %v3831_v40 = vpop.f32.mrf.mxu2  ;;  %v3740_v30 = vpop.f32.mrf.mxu0 }
 0x47e   : >> { %v4087_v45 = vpop.f32.mrf.mxu3  ;;  %v3996_v50 = vpop.f32.mrf.mxu1 }
 0x47f   : >> { %v4435_v50 = vlaneseq }
 0x485   : >> { %v3832_v52 = vpop.f32.mrf.mxu2  ;;  %v4196_v53 = vpop.f32.mrf.mxu0 }
 0x486   : >> { %v4088_v1 = vpop.f32.mrf.mxu3  ;;  %v4625_v5 = vpop.f32.mrf.mxu1 }
 0x487   : >> { %v9319_v1 = vshrl.u32 %v4435_v50, 7 }
 0x488   : >> { %4235 = vmatmul.bf16.gmra.mxu0 %v10339_v56 }
 0x489   : >> { %4664 = vmatmul.bf16.gmra.mxu1 %v10278_v62  ;;  %vm4437_vm4 = vcmp.lt.s32.totalorder %v9319_v1, 7  ;;  %vm5401_vm5 = vcmp.lt.s32.totalorder %v9319_v1, 6 }
 0x48a   : >> { %6518 = vmatmul.msk.bf16.gmra.mxu2 %vm2275_vm3, %v10340_v23 }
 0x48b   : >> { %6631 = vmatmul.msk.bf16.gmra.mxu3 %vm2275_vm3, %v10280_v20 }
 0x48d   : >> { %v4288_v33 = vpop.f32.mrf.mxu2  ;;  %v4198_v7 = vpop.f32.mrf.mxu0 }
 0x48e   : >> { %v4717_v19 = vpop.f32.mrf.mxu3  ;;  %v4289_v40 = vadd.f32 %v4288_v33, %v4196_v53  ;;  %v4627_v39 = vpop.f32.mrf.mxu1  ;;  %v10341_v53 = vld [vmem:[#allocation97_spill] sm:$0xff]  ;;  %v10342_v33 = vld [vmem:[#allocation99_spill] sm:$0xff] }
 0x48f   : >> { %v9316_v45 = vadd.f32 %v4717_v19, %v4625_v5 }
 0x490   : >> { %v4371_v30 = vadd.f32 %v4289_v40, %v9078_v35 }
 0x492   : >> { %v4403_v5 = vrot.slane %v4371_v30, 1 }
 0x495   : >> { %v4290_v52 = vpop.f32.mrf.mxu2  ;;  %v4201_v23 = vpop.f32.mrf.mxu0 }
 0x496   : >> { %v4719_v62 = vpop.f32.mrf.mxu3  ;;  %v4291_v56 = vadd.f32 %v4290_v52, %v4198_v7  ;;  %v4630_v55 = vpop.f32.mrf.mxu1  ;;  %v7002_v7 = vld [vmem:[%s9891_s1 + $0x310] sm:$0xff] }
 0x497   : >> { %v9321_v32 = vadd.f32 %v4719_v62, %v4627_v39  ;;  %5158 = vmatpush.bf16.msra.mxu1 %v7002_v7 }
 0x498   : >> { %v4372_v20 = vadd.f32 %v4291_v56, %v9082_v36  ;;  %4240 = vmatmul.bf16.gmra.mxu0 %v10341_v53 }
 0x499   : >> { %4669 = vmatmul.bf16.gmra.mxu1 %v10282_v44  ;;  %v6978_v44 = vld [vmem:[%s9891_s1 + $0xd0] sm:$0xff] }
 0x49a   : >> { %v4404_v35 = vrot.slane %v4372_v20, 1  ;;  %6519 = vmatmul.msk.bf16.gmra.mxu2 %vm2275_vm3, %v10342_v33  ;;  %4877 = vmatpush.bf16.msra.mxu0 %v6978_v44  ;;  %v10345_v44 = vld [vmem:[#allocation102_spill] sm:$0xff] }
 0x49b   : >> { %6632 = vmatmul.msk.bf16.gmra.mxu3 %vm2275_vm3, %v10284_v6 }
 0x49c   : >> { %v4465_v19 = vsel %vm4437_vm4, %v4403_v5, %v4404_v35 }
 0x49d   : >> { %v9334_v40 = vadd.f32 %v4465_v19, %v8881_v37  ;;  %v4293_v36 = vpop.f32.mrf.mxu2  ;;  %v4203_v6 = vpop.f32.mrf.mxu0 }
 0x49e   : >> { %v4722_v56 = vpop.f32.mrf.mxu3  ;;  %v4294_v39 = vadd.f32 %v4293_v36, %v4201_v23  ;;  %v4632_v50 = vpop.f32.mrf.mxu1 }
 0x49f   : >> { %10343 = vst [vmem:[#allocation117_spill] sm:$0xff] %v9334_v40  ;;  %v9342_v30 = vadd.f32 %v4722_v56, %v4630_v55  ;;  %v10344_v56 = vld [vmem:[#allocation100_spill] sm:$0xff] }
 0x4a0   : >> { %v4373_v37 = vadd.f32 %v4294_v39, %v9094_v28 }
 0x4a2   : >> { %v4405_v52 = vrot.slane %v4373_v37, 1 }
 0x4a4   : >> { %v4464_v62 = vsel %vm4437_vm4, %v4404_v35, %v4405_v52 }
 0x4a5   : >> { %v9348_v20 = vadd.f32 %v4464_v62, %v8896_v29  ;;  %v4295_v5 = vpop.f32.mrf.mxu2  ;;  %v4206_v55 = vpop.f32.mrf.mxu0 }
 0x4a6   : >> { %v4724_v19 = vpop.f32.mrf.mxu3  ;;  %v4296_v40 = vadd.f32 %v4295_v5, %v4203_v6  ;;  %v4635_v23 = vpop.f32.mrf.mxu1 }
 0x4a7   : >> { %v9350_v33 = vadd.f32 %v4724_v19, %v4632_v50 }
 0x4a8   : >> { %v4374_v36 = vadd.f32 %v4296_v40, %v9098_v54  ;;  %4245 = vmatmul.bf16.gmra.mxu0 %v10344_v56 }
 0x4a9   : >> { %4674 = vmatmul.bf16.gmra.mxu1 %v10286_v41 }
 0x4aa   : >> { %v4406_v28 = vrot.slane %v4374_v36, 1  ;;  %6520 = vmatmul.msk.bf16.gmra.mxu2 %vm2275_vm3, %v10345_v44 }
 0x4ab   : >> { %6633 = vmatmul.msk.bf16.gmra.mxu3 %vm2275_vm3, %v10288_v31 }
 0x4ac   : >> { %v4463_v29 = vsel %vm4437_vm4, %v4405_v52, %v4406_v28 }
 0x4ad   : >> { %v9362_v35 = vadd.f32 %v4463_v29, %v8911_v60  ;;  %v4298_v7 = vpop.f32.mrf.mxu2  ;;  %v4208_v6 = vpop.f32.mrf.mxu0  ;;  %v10346_v29 = vld [vmem:[#allocation104_spill] sm:$0xff] }
 0x4ae   : >> { %v4727_v39 = vpop.f32.mrf.mxu3  ;;  %v4299_v54 = vadd.f32 %v4298_v7, %v4206_v55  ;;  %v4637_v41 = vpop.f32.mrf.mxu1  ;;  %v10347_v7 = vld [vmem:[#allocation107_spill] sm:$0xff] }
 0x4af   : >> { %v9364_v40 = vadd.f32 %v4727_v39, %v4635_v23 }
 0x4b0   : >> { %v4375_v50 = vadd.f32 %v4299_v54, %v9104_v61 }
 0x4b2   : >> { %v4407_v37 = vrot.slane %v4375_v50, 1 }
 0x4b4   : >> { %v4462_v62 = vsel %vm4437_vm4, %v4406_v28, %v4407_v37 }
 0x4b5   : >> { %v9370_v31 = vadd.f32 %v4462_v62, %v8920_v49  ;;  %v4300_v52 = vpop.f32.mrf.mxu2  ;;  %v4211_v36 = vpop.f32.mrf.mxu0 }
 0x4b6   : >> { %v4729_v5 = vpop.f32.mrf.mxu3  ;;  %v4301_v60 = vadd.f32 %v4300_v52, %v4208_v6  ;;  %v4640_v55 = vpop.f32.mrf.mxu1 }
 0x4b7   : >> { %v9372_v19 = vadd.f32 %v4729_v5, %v4637_v41 }
 0x4b8   : >> { %v4376_v23 = vadd.f32 %v4301_v60, %v9108_v34  ;;  %4250 = vmatmul.bf16.gmra.mxu0 %v10346_v29  ;;  %v6984_v34 = vld [vmem:[%s9891_s1 + $0x100] sm:$0xff] }
 0x4b9   : >> { %4679 = vmatmul.bf16.gmra.mxu1 %v10290_v0  ;;  %v7008_v0 = vld [vmem:[%s9891_s1 + $0x340] sm:$0xff]  ;;  %4971 = vmatpush.bf16.msra.mxu2 %v6984_v34 }
 0x4ba   : >> { %v4408_v61 = vrot.slane %v4376_v23, 1  ;;  %6521 = vmatmul.msk.bf16.gmra.mxu2 %vm2275_vm3, %v10347_v7  ;;  %5252 = vmatpush.bf16.msra.mxu3 %v7008_v0  ;;  %v10348_v0 = vld [vmem:[#allocation111_spill] sm:$0xff] }
 0x4bb   : >> { %6634 = vmatmul.msk.bf16.gmra.mxu3 %vm2275_vm3, %v10292_v3  ;;  %v6977_v3 = vld [vmem:[%s9891_s1 + $0xc8] sm:$0xff] }
 0x4bc   : >> { %v4461_v49 = vsel %vm4437_vm4, %v4407_v37, %v4408_v61  ;;  %v7001_v37 = vld [vmem:[%s9891_s1 + $0x308] sm:$0xff]  ;;  %4878 = vmatpush.bf16.msra.mxu0 %v6977_v3  ;;  %v10349_v3 = vld [vmem:[#allocation113_spill] sm:$0xff] }
 0x4bd   : >> { %v9384_v28 = vadd.f32 %v4461_v49, %v8935_v15  ;;  %v4303_v39 = vpop.f32.mrf.mxu2  ;;  %v4213_v50 = vpop.f32.mrf.mxu0  ;;  %5159 = vmatpush.bf16.msra.mxu1 %v7001_v37 }
 0x4be   : >> { %v4732_v54 = vpop.f32.mrf.mxu3  ;;  %v4304_v6 = vadd.f32 %v4303_v39, %v4211_v36  ;;  %v4642_v15 = vpop.f32.mrf.mxu1 }
 0x4bf   : >> { %v9395_v41 = vadd.f32 %v4732_v54, %v4640_v55 }
 0x4c0   : >> { %v4377_v62 = vadd.f32 %v4304_v6, %v9126_v38 }
 0x4c2   : >> { %v4409_v52 = vrot.slane %v4377_v62, 1 }
 0x4c4   : >> { %v4460_v5 = vsel %vm4437_vm4, %v4408_v61, %v4409_v52 }
 0x4c5   : >> { %v9404_v60 = vadd.f32 %v4460_v5, %v8954_v42  ;;  %v4305_v36 = vpop.f32.mrf.mxu2  ;;  %v4216_v39 = vpop.f32.mrf.mxu0 }
 0x4c6   : >> { %v4734_v55 = vpop.f32.mrf.mxu3  ;;  %v4306_v23 = vadd.f32 %v4305_v36, %v4213_v50  ;;  %v4645_v54 = vpop.f32.mrf.mxu1 }
 0x4c7   : >> { %v9406_v49 = vadd.f32 %v4734_v55, %v4642_v15 }
 0x4c8   : >> { %v4378_v34 = vadd.f32 %v4306_v23, %v9130_v11  ;;  %4255 = vmatmul.bf16.gmra.mxu0 %v10348_v0 }
 0x4c9   : >> { %4684 = vmatmul.bf16.gmra.mxu1 %v10294_v16 }
 0x4ca   : >> { %v4410_v38 = vrot.slane %v4378_v34, 1  ;;  %6522 = vmatmul.msk.bf16.gmra.mxu2 %vm2275_vm3, %v10349_v3 }
 0x4cb   : >> { %6635 = vmatmul.msk.bf16.gmra.mxu3 %vm2275_vm3, %v10296_v63 }
 0x4cc   : >> { %v4459_v42 = vsel %vm4437_vm4, %v4409_v52, %v4410_v38  ;;  %v10351_v38 = vld [vmem:[#allocation119_spill] sm:$0xff] }
 0x4cd   : >> { %v9418_v61 = vadd.f32 %v4459_v42, %v8967_v10  ;;  %v4308_v6 = vpop.f32.mrf.mxu2  ;;  %v4218_v37 = vpop.f32.mrf.mxu0  ;;  %v10350_v10 = vld [vmem:[#allocation116_spill] sm:$0xff]  ;;  %v10352_v42 = vld [vmem:[#allocation103_spill] sm:$0xff] }
 0x4ce   : >> { %v4737_v50 = vpop.f32.mrf.mxu3  ;;  %v4309_v11 = vadd.f32 %v4308_v6, %v4216_v39  ;;  %v4647_v16 = vpop.f32.mrf.mxu1 }
 0x4cf   : >> { %v9420_v15 = vadd.f32 %v4737_v50, %v4645_v54 }
 0x4d0   : >> { %v4379_v62 = vadd.f32 %v4309_v11, %v9136_v13 }
 0x4d2   : >> { %v4411_v39 = vrot.slane %v4379_v62, 1  ;;  %v10354_v62 = vld [vmem:[#allocation60_spill] sm:$0xff] }
 0x4d5   : >> { %v4310_v5 = vpop.f32.mrf.mxu2  ;;  %v4221_v63 = vpop.f32.mrf.mxu0 }
 0x4d6   : >> { %v4739_v36 = vpop.f32.mrf.mxu3  ;;  %v4311_v55 = vadd.f32 %v4310_v5, %v4218_v37  ;;  %v4650_v34 = vpop.f32.mrf.mxu1 }
 0x4d7   : >> { %v9423_v23 = vadd.f32 %v4739_v36, %v4647_v16 }
 0x4d8   : >> { %v4380_v52 = vadd.f32 %v4311_v55, %v9140_v43  ;;  %4260 = vmatmul.bf16.gmra.mxu0 %v10350_v10 }
 0x4d9   : >> { %4689 = vmatmul.bf16.gmra.mxu1 %v10298_v58 }
 0x4da   : >> { %v4412_v54 = vrot.slane %v4380_v52, 1  ;;  %6523 = vmatmul.msk.bf16.gmra.mxu2 %vm2275_vm3, %v10351_v38 }
 0x4db   : >> { %6636 = vmatmul.msk.bf16.gmra.mxu3 %vm2275_vm3, %v10300_v47  ;;  %v10355_v47 = vld [vmem:[#allocation49_spill] sm:$0xff] }
 0x4dc   : >> { %v4458_v13 = vsel %vm4437_vm4, %v4411_v39, %v4412_v54 }
 0x4dd   : >> { %v9435_v6 = vadd.f32 %v4458_v13, %v10352_v42  ;;  %v4313_v50 = vpop.f32.mrf.mxu2  ;;  %v4223_v58 = vpop.f32.mrf.mxu0  ;;  %v6976_v13 = vld [vmem:[%s9891_s1 + $0xc0] sm:$0xff] }
 0x4de   : >> { %v4742_v43 = vpop.f32.mrf.mxu3  ;;  %v4314_v11 = vadd.f32 %v4313_v50, %v4221_v63  ;;  %v4652_v16 = vpop.f32.mrf.mxu1  ;;  %v7000_v63 = vld [vmem:[%s9891_s1 + $0x300] sm:$0xff]  ;;  %4879 = vmatpush.bf16.msra.mxu0 %v6976_v13 }
 0x4df   : >> { %10353 = vst [vmem:[#allocation70_spill] sm:$0xff] %v9435_v6  ;;  %v9437_v37 = vadd.f32 %v4742_v43, %v4650_v34  ;;  %5160 = vmatpush.bf16.msra.mxu1 %v7000_v63 }
 0x4e0   : >> { %v4381_v5 = vadd.f32 %v4314_v11, %v10354_v62  ;;  %v10359_v62 = vld [vmem:[#allocation122_spill] sm:$0xff] }
 0x4e2   : >> { %v4413_v36 = vrot.slane %v4381_v5, 1  ;;  %v10360_v5 = vld [vmem:[#allocation78_spill] sm:$0xff] }
 0x4e4   : >> { %v4457_v55 = vsel %vm4437_vm4, %v4412_v54, %v4413_v36  ;;  %v10358_v54 = vld [vmem:[#allocation18_spill] sm:$0xff] }
 0x4e5   : >> { %v9443_v52 = vadd.f32 %v4457_v55, %v10355_v47  ;;  %v4315_v39 = vpop.f32.mrf.mxu2  ;;  %v4226_v50 = vpop.f32.mrf.mxu0  ;;  %v10361_v47 = vld [vmem:[#allocation125_spill] sm:$0xff] }
 0x4e6   : >> { %v4744_v38 = vpop.f32.mrf.mxu3  ;;  %v4316_v34 = vadd.f32 %v4315_v39, %v4223_v58  ;;  %v4655_v43 = vpop.f32.mrf.mxu1  ;;  %v10363_v58 = vld [vmem:[#allocation52_spill] sm:$0xff] }
 0x4e7   : >> { %10356 = vst [vmem:[#allocation22_spill] sm:$0xff] %v9443_v52  ;;  %v9451_v42 = vadd.f32 %v4744_v38, %v4652_v16  ;;  %v10362_v52 = vld [vmem:[#allocation23_spill] sm:$0xff] }
 0x4e8   : >> { %v4382_v11 = vadd.f32 %v4316_v34, %v10358_v54  ;;  %4265 = vmatmul.bf16.gmra.mxu0 %v10359_v62 }
 0x4e9   : >> { %10357 = vst [vmem:[#allocation73_spill] sm:$0xff] %v9451_v42  ;;  %4694 = vmatmul.bf16.gmra.mxu1 %v10360_v5 }
 0x4ea   : >> { %v4414_v55 = vrot.slane %v4382_v11, 1  ;;  %6524 = vmatmul.msk.bf16.gmra.mxu2 %vm2275_vm3, %v10361_v47 }
 0x4eb   : >> { %6637 = vmatmul.msk.bf16.gmra.mxu3 %vm2275_vm3, %v10362_v52  ;;  %v10366_v52 = vld [vmem:[#allocation110_spill] sm:$0xff] }
 0x4ec   : >> { %v4456_v38 = vsel %vm4437_vm4, %v4413_v36, %v4414_v55 }
 0x4ed   : >> { %v9463_v16 = vadd.f32 %v4456_v38, %v10363_v58  ;;  %v4318_v39 = vpop.f32.mrf.mxu2  ;;  %v4228_v54 = vpop.f32.mrf.mxu0 }
 0x4ee   : >> { %v4747_v13 = vpop.f32.mrf.mxu3  ;;  %v4319_v63 = vadd.f32 %v4318_v39, %v4226_v50  ;;  %v4657_v5 = vpop.f32.mrf.mxu1 }
 0x4ef   : >> { %10364 = vst [vmem:[#allocation126_spill] sm:$0xff] %v9463_v16  ;;  %v9465_v34 = vadd.f32 %v4747_v13, %v4655_v43  ;;  %v10369_v43 = vld [vmem:[#allocation63_spill] sm:$0xff]  ;;  %v10370_v13 = vld [vmem:[#allocation128_spill] sm:$0xff] }
 0x4f0   : >> { %v4383_v11 = vadd.f32 %v4319_v63, %v9162_v2  ;;  %v10372_v63 = vld [vmem:[#allocation130_spill] sm:$0xff] }
 0x4f1   : >> { %10365 = vst [vmem:[#allocation74_spill] sm:$0xff] %v9465_v34  ;;  %v10371_v34 = vld [vmem:[#allocation87_spill] sm:$0xff] }
 0x4f2   : >> { %v4415_v62 = vrot.slane %v4383_v11, 1 }
 0x4f4   : >> { %v4455_v47 = vsel %vm4437_vm4, %v4414_v55, %v4415_v62  ;;  %v10373_v55 = vld [vmem:[#allocation27_spill] sm:$0xff] }
 0x4f5   : >> { %v9471_v42 = vadd.f32 %v4455_v47, %v10366_v52  ;;  %v4320_v36 = vpop.f32.mrf.mxu2  ;;  %v4231_v16 = vpop.f32.mrf.mxu0 }
 0x4f6   : >> { %v4749_v6 = vpop.f32.mrf.mxu3  ;;  %v4321_v38 = vadd.f32 %v4320_v36, %v4228_v54  ;;  %v4660_v50 = vpop.f32.mrf.mxu1 }
 0x4f7   : >> { %10367 = vst [vmem:[#allocation121_spill] sm:$0xff] %v9471_v42  ;;  %v9473_v58 = vadd.f32 %v4749_v6, %v4657_v5  ;;  %v10374_v6 = vld [vmem:[#allocation114_spill] sm:$0xff] }
 0x4f8   : >> { %v4384_v39 = vadd.f32 %v4321_v38, %v10369_v43  ;;  %4270 = vmatmul.bf16.gmra.mxu0 %v10370_v13  ;;  %v10377_v43 = vld [vmem:[#allocation120_spill] sm:$0xff] }
 0x4f9   : >> { %10368 = vst [vmem:[#allocation75_spill] sm:$0xff] %v9473_v58  ;;  %4699 = vmatmul.bf16.gmra.mxu1 %v10371_v34 }
 0x4fa   : >> { %v4416_v2 = vrot.slane %v4384_v39, 1  ;;  %6525 = vmatmul.msk.bf16.gmra.mxu2 %vm2275_vm3, %v10372_v63 }
 0x4fb   : >> { %6638 = vmatmul.msk.bf16.gmra.mxu3 %vm2275_vm3, %v10373_v55  ;;  %v10378_v55 = vld [vmem:[#allocation109_spill] sm:$0xff] }
 0x4fc   : >> { %v4454_v47 = vsel %vm4437_vm4, %v4415_v62, %v4416_v2 }
 0x4fd   : >> { %v9485_v54 = vadd.f32 %v4454_v47, %v10374_v6  ;;  %v4323_v5 = vpop.f32.mrf.mxu2  ;;  %v4233_v38 = vpop.f32.mrf.mxu0 }
 0x4fe   : >> { %v4752_v11 = vpop.f32.mrf.mxu3  ;;  %v4324_v52 = vadd.f32 %v4323_v5, %v4231_v16  ;;  %v4662_v34 = vpop.f32.mrf.mxu1 }
 0x4ff   : >> { %10375 = vst [vmem:[#allocation76_spill] sm:$0xff] %v9485_v54  ;;  %v9487_v36 = vadd.f32 %v4752_v11, %v4660_v50  ;;  %v10381_v50 = vld [vmem:[#allocation64_spill] sm:$0xff] }
 0x500   : >> { %v4385_v39 = vadd.f32 %v4324_v52, %v10377_v43  ;;  %v10382_v11 = vld [vmem:[#allocation132_spill] sm:$0xff]  ;;  %v10384_v43 = vld [vmem:[#allocation134_spill] sm:$0xff] }
 0x501   : >> { %10376 = vst [vmem:[#allocation77_spill] sm:$0xff] %v9487_v36  ;;  %v10383_v36 = vld [vmem:[#allocation93_spill] sm:$0xff] }
 0x502   : >> { %v4417_v13 = vrot.slane %v4385_v39, 1 }
 0x504   : >> { %v4453_v63 = vsel %vm4437_vm4, %v4416_v2, %v4417_v13  ;;  %v10385_v2 = vld [vmem:[#allocation31_spill] sm:$0xff] }
 0x505   : >> { %v9493_v42 = vadd.f32 %v4453_v63, %v10378_v55  ;;  %v4325_v62 = vpop.f32.mrf.mxu2  ;;  %v4236_v54 = vpop.f32.mrf.mxu0 }
 0x506   : >> { %v4754_v58 = vpop.f32.mrf.mxu3  ;;  %v4326_v47 = vadd.f32 %v4325_v62, %v4233_v38  ;;  %v4665_v16 = vpop.f32.mrf.mxu1 }
 0x507   : >> { %10379 = vst [vmem:[#allocation123_spill] sm:$0xff] %v9493_v42  ;;  %v9495_v6 = vadd.f32 %v4754_v58, %v4662_v34  ;;  %v10386_v58 = vld [vmem:[#allocation57_spill] sm:$0xff] }
 0x508   : >> { %v4386_v5 = vadd.f32 %v4326_v47, %v10381_v50  ;;  %4275 = vmatmul.bf16.gmra.mxu0 %v10382_v11 }
 0x509   : >> { %10380 = vst [vmem:[#allocation80_spill] sm:$0xff] %v9495_v6  ;;  %4704 = vmatmul.bf16.gmra.mxu1 %v10383_v36 }
 0x50a   : >> { %v4418_v52 = vrot.slane %v4386_v5, 1  ;;  %6526 = vmatmul.msk.bf16.gmra.mxu2 %vm2275_vm3, %v10384_v43 }
 0x50b   : >> { %6639 = vmatmul.msk.bf16.gmra.mxu3 %vm2275_vm3, %v10385_v2 }
 0x50c   : >> { %v4452_v63 = vsel %vm4437_vm4, %v4417_v13, %v4418_v52  ;;  %v10387_v52 = vld [vmem:[#allocation6_spill] sm:$0xff] }
 0x50d   : >> { %v9507_v38 = vadd.f32 %v4452_v63, %v10386_v58  ;;  %v4328_v34 = vpop.f32.mrf.mxu2  ;;  %v4238_v47 = vpop.f32.mrf.mxu0  ;;  %v10388_v63 = vld [vmem:[#allocation98_spill] sm:$0xff] }
 0x50e   : >> { %v4757_v39 = vpop.f32.mrf.mxu3  ;;  %v4329_v55 = vadd.f32 %v4328_v34, %v4236_v54  ;;  %v4667_v36 = vpop.f32.mrf.mxu1 }
 0x50f   : >> { %v9509_v62 = vadd.f32 %v4757_v39, %v4665_v16 }
 0x510   : >> { %v4387_v50 = vadd.f32 %v4329_v55, %v9194_v18 }
 0x512   : >> { %v4419_v54 = vrot.slane %v4387_v50, 1 }
 0x515   : >> { %v4330_v5 = vpop.f32.mrf.mxu2  ;;  %v4241_v2 = vpop.f32.mrf.mxu0 }
 0x516   : >> { %v4759_v43 = vpop.f32.mrf.mxu3  ;;  %v4331_v11 = vadd.f32 %v4330_v5, %v4238_v47  ;;  %v4670_v6 = vpop.f32.mrf.mxu1  ;;  %v10391_v47 = vld [vmem:[#allocation115_spill] sm:$0xff] }
 0x517   : >> { %v9512_v42 = vadd.f32 %v4759_v43, %v4667_v36  ;;  %v10389_v43 = vld [vmem:[#allocation135_spill] sm:$0xff] }
 0x518   : >> { %v4388_v13 = vadd.f32 %v4331_v11, %v9198_v12  ;;  %4880 = vmatmul.bf16.vlgmr.msra.gmra.mxu0 %v10387_v52 }
 0x519   : >> { %5161 = vmatmul.bf16.vlgmr.msra.gmra.mxu1 %v10319_v14 }
 0x51a   : >> { %v4420_v16 = vrot.slane %v4388_v13, 1  ;;  %6688 = vmatmul.msk.bf16.vlgmr.msra.gmra.mxu2 %vm2275_vm3, %v10388_v63 }
 0x51b   : >> { %6777 = vmatmul.msk.bf16.vlgmr.msra.gmra.mxu3 %vm2275_vm3, %v10320_v17  ;;  %v10392_v17 = vld [vmem:[#allocation136_spill] sm:$0xff] }
 0x51c   : >> { %v4451_v18 = vsel %vm4437_vm4, %v4419_v54, %v4420_v16 }
 0x51d   : >> { %v9524_v58 = vadd.f32 %v4451_v18, %v10389_v43  ;;  %v4333_v34 = vpop.f32.mrf.mxu2  ;;  %v4243_v14 = vpop.f32.mrf.mxu0 }
 0x51e   : >> { %v4762_v12 = vpop.f32.mrf.mxu3  ;;  %v4334_v11 = vadd.f32 %v4333_v34, %v4241_v2  ;;  %v4672_v55 = vpop.f32.mrf.mxu1 }
 0x51f   : >> { %10390 = vst [vmem:[#allocation26_spill] sm:$0xff] %v9524_v58  ;;  %v9526_v39 = vadd.f32 %v4762_v12, %v4670_v6  ;;  %v10394_v6 = vld [vmem:[#allocation65_spill] sm:$0xff]  ;;  %v10396_v58 = vld [vmem:[#allocation39_spill] sm:$0xff] }
 0x520   : >> { %v4389_v36 = vadd.f32 %v4334_v11, %v10391_v47  ;;  %v10395_v12 = vld [vmem:[#allocation9_spill] sm:$0xff] }
 0x521   : >> { %v10397_v47 = vld [vmem:[#allocation101_spill] sm:$0xff] }
 0x522   : >> { %v4421_v50 = vrot.slane %v4389_v36, 1 }
 0x524   : >> { %v4450_v5 = vsel %vm4437_vm4, %v4420_v16, %v4421_v50  ;;  %v10398_v16 = vld [vmem:[#allocation41_spill] sm:$0xff] }
 0x525   : >> { %v9532_v13 = vadd.f32 %v4450_v5, %v10392_v17  ;;  %v4335_v52 = vpop.f32.mrf.mxu2  ;;  %v4246_v43 = vpop.f32.mrf.mxu0 }
 0x526   : >> { %v4764_v54 = vpop.f32.mrf.mxu3  ;;  %v4336_v63 = vadd.f32 %v4335_v52, %v4243_v14  ;;  %v4675_v2 = vpop.f32.mrf.mxu1 }
 0x527   : >> { %10393 = vst [vmem:[#allocation83_spill] sm:$0xff] %v9532_v13  ;;  %v9534_v18 = vadd.f32 %v4764_v54, %v4672_v55  ;;  %v10399_v55 = vld [vmem:[#allocation137_spill] sm:$0xff] }
 0x528   : >> { %v4390_v34 = vadd.f32 %v4336_v63, %v10394_v6  ;;  %4885 = vmatmul.bf16.gmra.mxu0 %v10395_v12 }
 0x529   : >> { %5166 = vmatmul.bf16.gmra.mxu1 %v10396_v58 }
 0x52a   : >> { %v4422_v11 = vrot.slane %v4390_v34, 1  ;;  %6689 = vmatmul.msk.bf16.gmra.mxu2 %vm2275_vm3, %v10397_v47  ;;  %v10401_v47 = vld [vmem:[#allocation138_spill] sm:$0xff] }
 0x52b   : >> { %6778 = vmatmul.msk.bf16.gmra.mxu3 %vm2275_vm3, %v10398_v16 }
 0x52c   : >> { %v4449_v14 = vsel %vm4437_vm4, %v4421_v50, %v4422_v11 }
 0x52d   : >> { %v9546_v36 = vadd.f32 %v4449_v14, %v10399_v55  ;;  %v4338_v5 = vpop.f32.mrf.mxu2  ;;  %v4248_v63 = vpop.f32.mrf.mxu0 }
 0x52e   : >> { %v4767_v17 = vpop.f32.mrf.mxu3  ;;  %v4339_v52 = vadd.f32 %v4338_v5, %v4246_v43  ;;  %v4677_v58 = vpop.f32.mrf.mxu1  ;;  %v10402_v5 = vld [vmem:[#allocation12_spill] sm:$0xff] }
 0x52f   : >> { %10400 = vst [vmem:[#allocation84_spill] sm:$0xff] %v9546_v36  ;;  %v9548_v54 = vadd.f32 %v4767_v17, %v4675_v2  ;;  %v10403_v17 = vld [vmem:[#allocation106_spill] sm:$0xff] }
 0x530   : >> { %v4391_v6 = vadd.f32 %v4339_v52, %v9220_v9 }
 0x532   : >> { %v4423_v34 = vrot.slane %v4391_v6, 1 }
 0x534   : >> { %v4448_v12 = vsel %vm4437_vm4, %v4422_v11, %v4423_v34 }
 0x535   : >> { %v9554_v16 = vadd.f32 %v4448_v12, %v10401_v47  ;;  %v4340_v50 = vpop.f32.mrf.mxu2  ;;  %v4251_v36 = vpop.f32.mrf.mxu0  ;;  %v10407_v47 = vld [vmem:[#allocation66_spill] sm:$0xff] }
 0x536   : >> { %v4769_v13 = vpop.f32.mrf.mxu3  ;;  %v4341_v14 = vadd.f32 %v4340_v50, %v4248_v63  ;;  %v4680_v43 = vpop.f32.mrf.mxu1 }
 0x537   : >> { %v9556_v55 = vadd.f32 %v4769_v13, %v4677_v58  ;;  %v10404_v13 = vld [vmem:[#allocation139_spill] sm:$0xff] }
 0x538   : >> { %v4392_v2 = vadd.f32 %v4341_v14, %v9224_v46  ;;  %4890 = vmatmul.bf16.gmra.mxu0 %v10402_v5 }
 0x539   : >> { %5171 = vmatmul.bf16.gmra.mxu1 %v10325_v8 }
 0x53a   : >> { %v4424_v9 = vrot.slane %v4392_v2, 1  ;;  %6690 = vmatmul.msk.bf16.gmra.mxu2 %vm2275_vm3, %v10403_v17 }
 0x53b   : >> { %6779 = vmatmul.msk.bf16.gmra.mxu3 %vm2275_vm3, %v10326_v26  ;;  %v10408_v26 = vld [vmem:[#allocation140_spill] sm:$0xff] }
 0x53c   : >> { %v4447_v11 = vsel %vm4437_vm4, %v4423_v34, %v4424_v9 }
 0x53d   : >> { %v9568_v52 = vadd.f32 %v4447_v11, %v10404_v13  ;;  %v4343_v63 = vpop.f32.mrf.mxu2  ;;  %v4253_v12 = vpop.f32.mrf.mxu0 }
 0x53e   : >> { %v4772_v58 = vpop.f32.mrf.mxu3  ;;  %v4344_v46 = vadd.f32 %v4343_v63, %v4251_v36  ;;  %v4682_v8 = vpop.f32.mrf.mxu1 }
 0x53f   : >> { %10405 = vst [vmem:[#allocation127_spill] sm:$0xff] %v9568_v52  ;;  %v9570_v6 = vadd.f32 %v4772_v58, %v4680_v43  ;;  %v10411_v43 = vld [vmem:[#allocation67_spill] sm:$0xff]  ;;  %v10412_v58 = vld [vmem:[#allocation16_spill] sm:$0xff] }
 0x540   : >> { %v4393_v50 = vadd.f32 %v4344_v46, %v10407_v47  ;;  %v10414_v47 = vld [vmem:[#allocation112_spill] sm:$0xff] }
 0x541   : >> { %10406 = vst [vmem:[#allocation85_spill] sm:$0xff] %v9570_v6  ;;  %v10413_v6 = vld [vmem:[#allocation51_spill] sm:$0xff] }
 0x542   : >> { %v4425_v14 = vrot.slane %v4393_v50, 1 }
 0x544   : >> { %v4446_v2 = vsel %vm4437_vm4, %v4424_v9, %v4425_v14  ;;  %v10415_v9 = vld [vmem:[#allocation54_spill] sm:$0xff] }
 0x545   : >> { %v9576_v5 = vadd.f32 %v4446_v2, %v10408_v26  ;;  %v4345_v34 = vpop.f32.mrf.mxu2  ;;  %v4256_v52 = vpop.f32.mrf.mxu0 }
 0x546   : >> { %v4774_v17 = vpop.f32.mrf.mxu3  ;;  %v4346_v11 = vadd.f32 %v4345_v34, %v4253_v12  ;;  %v4685_v36 = vpop.f32.mrf.mxu1 }
 0x547   : >> { %10409 = vst [vmem:[#allocation86_spill] sm:$0xff] %v9576_v5  ;;  %v9578_v13 = vadd.f32 %v4774_v17, %v4682_v8  ;;  %v10416_v8 = vld [vmem:[#allocation46_spill] sm:$0xff] }
 0x548   : >> { %v4394_v63 = vadd.f32 %v4346_v11, %v10411_v43  ;;  %4895 = vmatmul.bf16.gmra.mxu0 %v10412_v58 }
 0x549   : >> { %10410 = vst [vmem:[#allocation89_spill] sm:$0xff] %v9578_v13  ;;  %5176 = vmatmul.bf16.gmra.mxu1 %v10413_v6 }
 0x54a   : >> { %v4426_v46 = vrot.slane %v4394_v63, 1  ;;  %6691 = vmatmul.msk.bf16.gmra.mxu2 %vm2275_vm3, %v10414_v47 }
 0x54b   : >> { %6780 = vmatmul.msk.bf16.gmra.mxu3 %vm2275_vm3, %v10415_v9 }
 0x54c   : >> { %v4445_v12 = vsel %vm4437_vm4, %v4425_v14, %v4426_v46  ;;  %v10417_v46 = vld [vmem:[#allocation20_spill] sm:$0xff] }
 0x54d   : >> { %v9590_v50 = vadd.f32 %v4445_v12, %v10416_v8  ;;  %v4348_v2 = vpop.f32.mrf.mxu2  ;;  %v4258_v11 = vpop.f32.mrf.mxu0  ;;  %v10418_v12 = vld [vmem:[#allocation59_spill] sm:$0xff]  ;;  %v10419_v8 = vld [vmem:[#allocation118_spill] sm:$0xff] }
 0x54e   : >> { %v4777_v26 = vpop.f32.mrf.mxu3  ;;  %v4349_v34 = vadd.f32 %v4348_v2, %v4256_v52  ;;  %v4687_v6 = vpop.f32.mrf.mxu1  ;;  %v10420_v2 = vld [vmem:[#allocation62_spill] sm:$0xff] }
 0x54f   : >> { %v9592_v17 = vadd.f32 %v4777_v26, %v4685_v36  ;;  %v10421_v26 = vld [vmem:[#allocation108_spill] sm:$0xff] }
 0x550   : >> { %v4395_v43 = vadd.f32 %v4349_v34, %v9252_v57 }
 0x552   : >> { %v4427_v52 = vrot.slane %v4395_v43, 1 }
 0x555   : >> { %v4350_v63 = vpop.f32.mrf.mxu2  ;;  %v4261_v9 = vpop.f32.mrf.mxu0 }
 0x556   : >> { %v4779_v58 = vpop.f32.mrf.mxu3  ;;  %v4351_v47 = vadd.f32 %v4350_v63, %v4258_v11  ;;  %v4690_v13 = vpop.f32.mrf.mxu1 }
 0x557   : >> { %v9595_v5 = vadd.f32 %v4779_v58, %v4687_v6 }
 0x558   : >> { %v4396_v14 = vadd.f32 %v4351_v47, %v9256_v25  ;;  %4900 = vmatmul.bf16.gmra.mxu0 %v10417_v46 }
 0x559   : >> { %5181 = vmatmul.bf16.gmra.mxu1 %v10418_v12  ;;  %v10423_v12 = vld [vmem:[#allocation47_spill] sm:$0xff] }
 0x55a   : >> { %v4428_v36 = vrot.slane %v4396_v14, 1  ;;  %6692 = vmatmul.msk.bf16.gmra.mxu2 %vm2275_vm3, %v10419_v8 }
 0x55b   : >> { %6781 = vmatmul.msk.bf16.gmra.mxu3 %vm2275_vm3, %v10420_v2 }
 0x55c   : >> { %v4444_v57 = vsel %vm4437_vm4, %v4427_v52, %v4428_v36 }
 0x55d   : >> { %v9607_v34 = vadd.f32 %v4444_v57, %v10421_v26  ;;  %v4353_v11 = vpop.f32.mrf.mxu2  ;;  %v4263_v58 = vpop.f32.mrf.mxu0 }
 0x55e   : >> { %v4782_v25 = vpop.f32.mrf.mxu3  ;;  %v4354_v6 = vadd.f32 %v4353_v11, %v4261_v9  ;;  %v4692_v43 = vpop.f32.mrf.mxu1  ;;  %v10425_v11 = vld [vmem:[#allocation24_spill] sm:$0xff] }
 0x55f   : >> { %10422 = vst [vmem:[#allocation30_spill] sm:$0xff] %v9607_v34  ;;  %v9609_v63 = vadd.f32 %v4782_v25, %v4690_v13  ;;  %v10426_v25 = vld [vmem:[#allocation69_spill] sm:$0xff] }
 0x560   : >> { %v4397_v47 = vadd.f32 %v4354_v6, %v9262_v22  ;;  %v10427_v6 = vld [vmem:[#allocation124_spill] sm:$0xff] }
 0x562   : >> { %v4429_v14 = vrot.slane %v4397_v47, 1 }
 0x564   : >> { %v4443_v46 = vsel %vm4437_vm4, %v4428_v36, %v4429_v14  ;;  %v10428_v36 = vld [vmem:[#allocation72_spill] sm:$0xff] }
 0x565   : >> { %v9615_v8 = vadd.f32 %v4443_v46, %v10423_v12  ;;  %v4355_v52 = vpop.f32.mrf.mxu2  ;;  %v4266_v34 = vpop.f32.mrf.mxu0 }
 0x566   : >> { %v4784_v2 = vpop.f32.mrf.mxu3  ;;  %v4356_v57 = vadd.f32 %v4355_v52, %v4263_v58  ;;  %v4695_v9 = vpop.f32.mrf.mxu1 }
 0x567   : >> { %10424 = vst [vmem:[#allocation92_spill] sm:$0xff] %v9615_v8  ;;  %v9617_v26 = vadd.f32 %v4784_v2, %v4692_v43  ;;  %v10429_v43 = vld [vmem:[#allocation48_spill] sm:$0xff] }
 0x568   : >> { %v4398_v13 = vadd.f32 %v4356_v57, %v9266_v48  ;;  %4905 = vmatmul.bf16.gmra.mxu0 %v10425_v11 }
 0x569   : >> { %5186 = vmatmul.bf16.gmra.mxu1 %v10426_v25 }
 0x56a   : >> { %v4430_v22 = vrot.slane %v4398_v13, 1  ;;  %6693 = vmatmul.msk.bf16.gmra.mxu2 %vm2275_vm3, %v10427_v6  ;;  %v10431_v6 = vld [vmem:[#allocation105_spill] sm:$0xff] }
 0x56b   : >> { %6782 = vmatmul.msk.bf16.gmra.mxu3 %vm2275_vm3, %v10428_v36 }
 0x56c   : >> { %v4442_v58 = vsel %vm4437_vm4, %v4429_v14, %v4430_v22 }
 0x56d   : >> { %v9629_v47 = vadd.f32 %v4442_v58, %v10429_v43  ;;  %v4358_v46 = vpop.f32.mrf.mxu2  ;;  %v4268_v2 = vpop.f32.mrf.mxu0 }
 0x56e   : >> { %v4787_v12 = vpop.f32.mrf.mxu3  ;;  %v4359_v48 = vadd.f32 %v4358_v46, %v4266_v34  ;;  %v4697_v57 = vpop.f32.mrf.mxu1  ;;  %v10432_v46 = vld [vmem:[#allocation28_spill] sm:$0xff] }
 0x56f   : >> { %10430 = vst [vmem:[#allocation131_spill] sm:$0xff] %v9629_v47  ;;  %v9631_v52 = vadd.f32 %v4787_v12, %v4695_v9  ;;  %v10433_v12 = vld [vmem:[#allocation129_spill] sm:$0xff] }
 0x570   : >> { %v4399_v13 = vadd.f32 %v4359_v48, %v9278_v24 }
 0x572   : >> { %v4431_v11 = vrot.slane %v4399_v13, 1 }
 0x574   : >> { %v4441_v25 = vsel %vm4437_vm4, %v4430_v22, %v4431_v11 }
 0x575   : >> { %v9637_v36 = vadd.f32 %v4441_v25, %v10431_v6  ;;  %v4360_v14 = vpop.f32.mrf.mxu2  ;;  %v4271_v47 = vpop.f32.mrf.mxu0 }
 0x576   : >> { %v4789_v8 = vpop.f32.mrf.mxu3  ;;  %v4361_v58 = vadd.f32 %v4360_v14, %v4268_v2  ;;  %v4700_v34 = vpop.f32.mrf.mxu1 }
 0x577   : >> { %v9639_v43 = vadd.f32 %v4789_v8, %v4697_v57  ;;  %v10434_v8 = vld [vmem:[#allocation14_spill] sm:$0xff] }
 0x578   : >> { %v4400_v9 = vadd.f32 %v4361_v58, %v9282_v4  ;;  %4910 = vmatmul.bf16.gmra.mxu0 %v10432_v46 }
 0x579   : >> { %5191 = vmatmul.bf16.gmra.mxu1 %v10335_v21 }
 0x57a   : >> { %v4432_v24 = vrot.slane %v4400_v9, 1  ;;  %6694 = vmatmul.msk.bf16.gmra.mxu2 %vm2275_vm3, %v10433_v12 }
 0x57b   : >> { %6783 = vmatmul.msk.bf16.gmra.mxu3 %vm2275_vm3, %v10336_v59  ;;  %v10435_v59 = vld [vmem:[#allocation55_spill] sm:$0xff] }
 0x57c   : >> { %v4440_v22 = vsel %vm4437_vm4, %v4431_v11, %v4432_v24 }
 0x57d   : >> { %v9651_v48 = vadd.f32 %v4440_v22, %v10434_v8  ;;  %v4363_v2 = vpop.f32.mrf.mxu2  ;;  %v4273_v25 = vpop.f32.mrf.mxu0 }
 0x57e   : >> { %v4792_v57 = vpop.f32.mrf.mxu3  ;;  %v4364_v4 = vadd.f32 %v4363_v2, %v4271_v47  ;;  %v4702_v21 = vpop.f32.mrf.mxu1  ;;  %v10437_v2 = vld [vmem:[#allocation32_spill] sm:$0xff] }
 0x57f   : >> { %v9653_v13 = vadd.f32 %v4792_v57, %v4700_v34  ;;  %v10438_v57 = vld [vmem:[#allocation88_spill] sm:$0xff] }
 0x580   : >> { %v4401_v6 = vadd.f32 %v4364_v4, %v9288_v27  ;;  %v10439_v4 = vld [vmem:[#allocation133_spill] sm:$0xff] }
 0x582   : >> { %v4433_v14 = vrot.slane %v4401_v6, 1 }
 0x584   : >> { %v4439_v58 = vsel %vm4437_vm4, %v4432_v24, %v4433_v14  ;;  %v10440_v24 = vld [vmem:[#allocation91_spill] sm:$0xff] }
 0x585   : >> { %v9659_v9 = vadd.f32 %v4439_v58, %v10435_v59  ;;  %v4365_v11 = vpop.f32.mrf.mxu2  ;;  %v4276_v8 = vpop.f32.mrf.mxu0 }
 0x586   : >> { %v4794_v46 = vpop.f32.mrf.mxu3  ;;  %v4366_v12 = vadd.f32 %v4365_v11, %v4273_v25  ;;  %v4705_v47 = vpop.f32.mrf.mxu1 }
 0x587   : >> { %10436 = vst [vmem:[#allocation34_spill] sm:$0xff] %v9659_v9  ;;  %v9661_v22 = vadd.f32 %v4794_v46, %v4702_v21  ;;  %v10441_v21 = vld [vmem:[#allocation56_spill] sm:$0xff] }
 0x588   : >> { %v4402_v34 = vadd.f32 %v4366_v12, %v9298_v51  ;;  %4915 = vmatmul.bf16.gmra.mxu0 %v10437_v2  ;;  %v10444_v2 = vld [vmem:[#allocation94_spill] sm:$0xff]  ;;  %v10447_v9 = vld [vmem:[#allocation40_spill] sm:$0xff] }
 0x589   : >> { %5196 = vmatmul.bf16.gmra.mxu1 %v10438_v57  ;;  %v10445_v57 = vld [vmem:[#allocation4_spill] sm:$0xff] }
 0x58a   : >> { %v4434_v27 = vrot.slane %v4402_v34, 1  ;;  %6695 = vmatmul.msk.bf16.gmra.mxu2 %vm2275_vm3, %v10439_v4  ;;  %v10443_v34 = vld [vmem:[#allocation36_spill] sm:$0xff] }
 0x58b   : >> { %6784 = vmatmul.msk.bf16.gmra.mxu3 %vm2275_vm3, %v10440_v24  ;;  %v10446_v4 = vld [vmem:[#allocation96_spill] sm:$0xff] }
 0x58c   : >> { %v4438_v25 = vsel %vm4437_vm4, %v4433_v14, %v4434_v27 }
 0x58d   : >> { %v9673_v6 = vadd.f32 %v4438_v25, %v10441_v21  ;;  %v4368_v58 = vpop.f32.mrf.mxu2  ;;  %v4277_v51 = vpop.f32.mrf.mxu0 }
 0x58e   : >> { %v4797_v59 = vpop.f32.mrf.mxu3  ;;  %v4706_v11 = vpop.f32.mrf.mxu1 }
 0x58f   : >> { %10442 = vst [vmem:[#allocation3_spill] sm:$0xff] %v9673_v6 }
 0x595   : >> { %v4369_v46 = vpop.f32.mrf.mxu2  ;;  %v4881_v8 = vpop.f32.mrf.mxu0 }
 0x596   : >> { %v4798_v12 = vpop.f32.mrf.mxu3  ;;  %v5162_v47 = vpop.f32.mrf.mxu1  ;;  %v4882_v21 = vadd.f32 %v4881_v8, %v9316_v45 }
 0x598   : >> { %4920 = vmatmul.bf16.gmra.mxu0 %v10443_v34 }
 0x599   : >> { %5201 = vmatmul.bf16.gmra.mxu1 %v10444_v2 }
 0x59a   : >> { %6696 = vmatmul.msk.bf16.gmra.mxu2 %vm2275_vm3, %v10445_v57 }
 0x59b   : >> { %6785 = vmatmul.msk.bf16.gmra.mxu3 %vm2275_vm3, %v10446_v4 }
 0x59d   : >> { %v4973_v14 = vpop.f32.mrf.mxu2  ;;  %v4883_v24 = vpop.f32.mrf.mxu0 }
 0x59e   : >> { %v5254_v27 = vpop.f32.mrf.mxu3  ;;  %v5164_v25 = vpop.f32.mrf.mxu1  ;;  %v4974_v58 = vadd.f32 %v4973_v14, %v4882_v21  ;;  %v4884_v51 = vadd.f32 %v4883_v24, %v9321_v32  ;;  %v10449_v32 = vld [vmem:[#allocation99_spill] sm:$0xff]  ;;  %v10450_v24 = vld [vmem:[#allocation117_spill] sm:$0xff] }
 0x59f   : >> { %v5255_v59 = vadd.f32 %v5254_v27, %v5162_v47  ;;  %v10448_v47 = vld [vmem:[#allocation7_spill] sm:$0xff] }
 0x5a1   : >> { %v5337_v12 = vadd.f32 %v5255_v59, %v4974_v58 }
 0x5a3   : >> { %v5369_v45 = vrot.slane %v5337_v12, 2 }
 0x5a5   : >> { %v4975_v11 = vpop.f32.mrf.mxu2  ;;  %v4886_v57 = vpop.f32.mrf.mxu0 }
 0x5a6   : >> { %v5256_v46 = vpop.f32.mrf.mxu3  ;;  %v4976_v34 = vadd.f32 %v4975_v11, %v4884_v51  ;;  %v5167_v6 = vpop.f32.mrf.mxu1  ;;  %v4887_v27 = vadd.f32 %v4886_v57, %v9342_v30 }
 0x5a7   : >> { %v5257_v2 = vadd.f32 %v5256_v46, %v5164_v25 }
 0x5a8   : >> { %4925 = vmatmul.bf16.gmra.mxu0 %v10447_v9 }
 0x5a9   : >> { %v5338_v4 = vadd.f32 %v5257_v2, %v4976_v34  ;;  %5206 = vmatmul.bf16.gmra.mxu1 %v10341_v53 }
 0x5aa   : >> { %6697 = vmatmul.msk.bf16.gmra.mxu2 %vm2275_vm3, %v10448_v47 }
 0x5ab   : >> { %v5370_v8 = vrot.slane %v5338_v4, 2  ;;  %6786 = vmatmul.msk.bf16.gmra.mxu3 %vm2275_vm3, %v10449_v32 }
 0x5ad   : >> { %v5429_v14 = vsel %vm5401_vm5, %v5369_v45, %v5370_v8  ;;  %v4978_v25 = vpop.f32.mrf.mxu2  ;;  %v4888_v59 = vpop.f32.mrf.mxu0 }
 0x5ae   : >> { %v5430_v9 = vadd.f32 %v5429_v14, %v10450_v24  ;;  %v5259_v53 = vpop.f32.mrf.mxu3  ;;  %v4979_v21 = vadd.f32 %v4978_v25, %v4887_v27  ;;  %v5169_v51 = vpop.f32.mrf.mxu1  ;;  %v4889_v34 = vadd.f32 %v4888_v59, %v9350_v33  ;;  %v10451_v14 = vld [vmem:[#allocation44_spill] sm:$0xff]  ;;  %v10452_v24 = vld [vmem:[#allocation10_spill] sm:$0xff] }
 0x5af   : >> { %v5260_v58 = vadd.f32 %v5259_v53, %v5167_v6 }
 0x5b0   : >> { %5461 = vst [vmem:[%s9694_s6] sm:$0xff] %v5430_v9 }
 0x5b1   : >> { %v5339_v11 = vadd.f32 %v5260_v58, %v4979_v21 }
 0x5b3   : >> { %v5371_v46 = vrot.slane %v5339_v11, 2 }
 0x5b5   : >> { %v5428_v12 = vsel %vm5401_vm5, %v5370_v8, %v5371_v46  ;;  %v4980_v30 = vpop.f32.mrf.mxu2  ;;  %v4891_v47 = vpop.f32.mrf.mxu0 }
 0x5b6   : >> { %v5431_v2 = vadd.f32 %v5428_v12, %v9348_v20  ;;  %v5261_v57 = vpop.f32.mrf.mxu3  ;;  %v4981_v4 = vadd.f32 %v4980_v30, %v4889_v34  ;;  %v5172_v32 = vpop.f32.mrf.mxu1  ;;  %v4892_v20 = vadd.f32 %v4891_v47, %v9364_v40  ;;  %v10454_v47 = vld [vmem:[#allocation13_spill] sm:$0xff] }
 0x5b7   : >> { %v5262_v45 = vadd.f32 %v5261_v57, %v5169_v51 }
 0x5b8   : >> { %5462 = vst [vmem:[%s9694_s6 + $0x8] sm:$0xff] %v5431_v2  ;;  %4930 = vmatmul.bf16.gmra.mxu0 %v10451_v14 }
 0x5b9   : >> { %v5340_v6 = vadd.f32 %v5262_v45, %v4981_v4  ;;  %5211 = vmatmul.bf16.gmra.mxu1 %v10344_v56  ;;  %v10453_v4 = vld [vmem:[#allocation53_spill] sm:$0xff] }
 0x5ba   : >> { %6698 = vmatmul.msk.bf16.gmra.mxu2 %vm2275_vm3, %v10452_v24 }
 0x5bb   : >> { %v5372_v27 = vrot.slane %v5340_v6, 2  ;;  %6787 = vmatmul.msk.bf16.gmra.mxu3 %vm2275_vm3, %v10345_v44 }
 0x5bd   : >> { %v5427_v33 = vsel %vm5401_vm5, %v5371_v46, %v5372_v27  ;;  %v4983_v9 = vpop.f32.mrf.mxu2  ;;  %v4893_v56 = vpop.f32.mrf.mxu0 }
 0x5be   : >> { %v5432_v8 = vadd.f32 %v5427_v33, %v9362_v35  ;;  %v5264_v25 = vpop.f32.mrf.mxu3  ;;  %v4984_v53 = vadd.f32 %v4983_v9, %v4892_v20  ;;  %v5174_v58 = vpop.f32.mrf.mxu1  ;;  %v4894_v11 = vadd.f32 %v4893_v56, %v9372_v19 }
 0x5bf   : >> { %v5265_v21 = vadd.f32 %v5264_v25, %v5172_v32 }
 0x5c0   : >> { %5463 = vst [vmem:[%s9694_s6 + $0x10] sm:$0xff] %v5432_v8 }
 0x5c1   : >> { %v5341_v59 = vadd.f32 %v5265_v21, %v4984_v53 }
 0x5c3   : >> { %v5373_v51 = vrot.slane %v5341_v59, 2 }
 0x5c5   : >> { %v5426_v44 = vsel %vm5401_vm5, %v5372_v27, %v5373_v51  ;;  %v4985_v40 = vpop.f32.mrf.mxu2  ;;  %v4896_v2 = vpop.f32.mrf.mxu0 }
 0x5c6   : >> { %v5433_v46 = vadd.f32 %v5426_v44, %v9370_v31  ;;  %v5266_v12 = vpop.f32.mrf.mxu3  ;;  %v4986_v35 = vadd.f32 %v4985_v40, %v4894_v11  ;;  %v5177_v30 = vpop.f32.mrf.mxu1  ;;  %v4897_v19 = vadd.f32 %v4896_v2, %v9395_v41  ;;  %v10456_v11 = vld [vmem:[#allocation17_spill] sm:$0xff] }
 0x5c7   : >> { %v5267_v34 = vadd.f32 %v5266_v12, %v5174_v58 }
 0x5c8   : >> { %5464 = vst [vmem:[%s9694_s6 + $0x18] sm:$0xff] %v5433_v46  ;;  %4935 = vmatmul.bf16.gmra.mxu0 %v10453_v4 }
 0x5c9   : >> { %v5342_v57 = vadd.f32 %v5267_v34, %v4986_v35  ;;  %5216 = vmatmul.bf16.gmra.mxu1 %v10346_v29 }
 0x5ca   : >> { %6699 = vmatmul.msk.bf16.gmra.mxu2 %vm2275_vm3, %v10454_v47 }
 0x5cb   : >> { %v5374_v45 = vrot.slane %v5342_v57, 2  ;;  %6788 = vmatmul.msk.bf16.gmra.mxu3 %vm2275_vm3, %v10347_v7 }
 0x5cd   : >> { %v5425_v31 = vsel %vm5401_vm5, %v5373_v51, %v5374_v45  ;;  %v4988_v6 = vpop.f32.mrf.mxu2  ;;  %v4898_v29 = vpop.f32.mrf.mxu0  ;;  %v10455_v51 = vld [vmem:[#allocation61_spill] sm:$0xff] }
 0x5ce   : >> { %v5434_v32 = vadd.f32 %v5425_v31, %v9384_v28  ;;  %v5269_v14 = vpop.f32.mrf.mxu3  ;;  %v4989_v27 = vadd.f32 %v4988_v6, %v4897_v19  ;;  %v5179_v33 = vpop.f32.mrf.mxu1  ;;  %v4899_v9 = vadd.f32 %v4898_v29, %v9406_v49  ;;  %v10460_v29 = vld [vmem:[#allocation70_spill] sm:$0xff] }
 0x5cf   : >> { %v5270_v24 = vadd.f32 %v5269_v14, %v5177_v30 }
 0x5d0   : >> { %5465 = vst [vmem:[%s9694_s6 + $0x20] sm:$0xff] %v5434_v32 }
 0x5d1   : >> { %v5343_v20 = vadd.f32 %v5270_v24, %v4989_v27  ;;  %v10459_v27 = vld [vmem:[#allocation119_spill] sm:$0xff] }
 0x5d3   : >> { %v5375_v8 = vrot.slane %v5343_v20, 2 }
 0x5d5   : >> { %v5424_v7 = vsel %vm5401_vm5, %v5374_v45, %v5375_v8  ;;  %v4990_v41 = vpop.f32.mrf.mxu2  ;;  %v4901_v56 = vpop.f32.mrf.mxu0 }
 0x5d6   : >> { %v5435_v25 = vadd.f32 %v5424_v7, %v9404_v60  ;;  %v5271_v53 = vpop.f32.mrf.mxu3  ;;  %v4991_v28 = vadd.f32 %v4990_v41, %v4899_v9  ;;  %v5182_v58 = vpop.f32.mrf.mxu1  ;;  %v4902_v34 = vadd.f32 %v4901_v56, %v9420_v15  ;;  %v10458_v15 = vld [vmem:[#allocation21_spill] sm:$0xff] }
 0x5d7   : >> { %v5272_v21 = vadd.f32 %v5271_v53, %v5179_v33 }
 0x5d8   : >> { %5466 = vst [vmem:[%s9694_s6 + $0x28] sm:$0xff] %v5435_v25  ;;  %4940 = vmatmul.bf16.gmra.mxu0 %v10455_v51 }
 0x5d9   : >> { %v5344_v59 = vadd.f32 %v5272_v21, %v4991_v28  ;;  %5221 = vmatmul.bf16.gmra.mxu1 %v10348_v0  ;;  %v10461_v21 = vld [vmem:[#allocation73_spill] sm:$0xff] }
 0x5da   : >> { %6700 = vmatmul.msk.bf16.gmra.mxu2 %vm2275_vm3, %v10456_v11 }
 0x5db   : >> { %v5376_v44 = vrot.slane %v5344_v59, 2  ;;  %6789 = vmatmul.msk.bf16.gmra.mxu3 %vm2275_vm3, %v10349_v3 }
 0x5dd   : >> { %v5423_v60 = vsel %vm5401_vm5, %v5375_v8, %v5376_v44  ;;  %v4993_v46 = vpop.f32.mrf.mxu2  ;;  %v4903_v12 = vpop.f32.mrf.mxu0 }
 0x5de   : >> { %v5436_v49 = vadd.f32 %v5423_v60, %v9418_v61  ;;  %v5274_v40 = vpop.f32.mrf.mxu3  ;;  %v5184_v35 = vpop.f32.mrf.mxu1  ;;  %v4994_v0 = vadd.f32 %v4993_v46, %v4902_v34  ;;  %v4904_v30 = vadd.f32 %v4903_v12, %v9423_v23  ;;  %v10457_v61 = vld [vmem:[#allocation71_spill] sm:$0xff]  ;;  %v10464_v12 = vld [vmem:[#allocation122_spill] sm:$0xff]  ;;  %v10465_v34 = vld [vmem:[#allocation25_spill] sm:$0xff] }
 0x5df   : >> { %v5275_v2 = vadd.f32 %v5274_v40, %v5182_v58  ;;  %v10462_v58 = vld [vmem:[#allocation22_spill] sm:$0xff]  ;;  %v10463_v40 = vld [vmem:[#allocation81_spill] sm:$0xff] }
 0x5e0   : >> { %5467 = vst [vmem:[%s9694_s6 + $0x30] sm:$0xff] %v5436_v49 }
 0x5e1   : >> { %v5345_v45 = vadd.f32 %v5275_v2, %v4994_v0  ;;  %v10466_v0 = vld [vmem:[#allocation125_spill] sm:$0xff] }
 0x5e3   : >> { %v5377_v6 = vrot.slane %v5345_v45, 2 }
 0x5e5   : >> { %v4995_v57 = vpop.f32.mrf.mxu2  ;;  %v4906_v31 = vpop.f32.mrf.mxu0 }
 0x5e6   : >> { %v5276_v4 = vpop.f32.mrf.mxu3  ;;  %v4996_v3 = vadd.f32 %v4995_v57, %v4904_v30  ;;  %v5187_v19 = vpop.f32.mrf.mxu1  ;;  %v4907_v24 = vadd.f32 %v4906_v31, %v9437_v37  ;;  %v10467_v30 = vld [vmem:[#allocation74_spill] sm:$0xff] }
 0x5e7   : >> { %v5277_v47 = vadd.f32 %v5276_v4, %v5184_v35  ;;  %v10468_v4 = vld [vmem:[#allocation126_spill] sm:$0xff] }
 0x5e8   : >> { %4945 = vmatmul.bf16.gmra.mxu0 %v10457_v61 }
 0x5e9   : >> { %v5346_v32 = vadd.f32 %v5277_v47, %v4996_v3  ;;  %5226 = vmatmul.bf16.gmra.mxu1 %v10350_v10 }
 0x5ea   : >> { %6701 = vmatmul.msk.bf16.gmra.mxu2 %vm2275_vm3, %v10458_v15 }
 0x5eb   : >> { %v5378_v14 = vrot.slane %v5346_v32, 2  ;;  %6790 = vmatmul.msk.bf16.gmra.mxu3 %vm2275_vm3, %v10459_v27  ;;  %v10469_v27 = vld [vmem:[#allocation75_spill] sm:$0xff] }
 0x5ed   : >> { %v5422_v23 = vsel %vm5401_vm5, %v5377_v6, %v5378_v14  ;;  %v4998_v20 = vpop.f32.mrf.mxu2  ;;  %v4908_v9 = vpop.f32.mrf.mxu0 }
 0x5ee   : >> { %v5437_v33 = vadd.f32 %v5422_v23, %v10460_v29  ;;  %v5279_v8 = vpop.f32.mrf.mxu3  ;;  %v4999_v7 = vadd.f32 %v4998_v20, %v4907_v24  ;;  %v5189_v25 = vpop.f32.mrf.mxu1  ;;  %v4909_v56 = vadd.f32 %v4908_v9, %v10461_v21  ;;  %v10470_v24 = vld [vmem:[#allocation121_spill] sm:$0xff] }
 0x5ef   : >> { %v5280_v10 = vadd.f32 %v5279_v8, %v5187_v19  ;;  %v10473_v21 = vld [vmem:[#allocation29_spill] sm:$0xff] }
 0x5f0   : >> { %5468 = vst [vmem:[%s9694_s6 + $0x38] sm:$0xff] %v5437_v33 }
 0x5f1   : >> { %v5347_v41 = vadd.f32 %v5280_v10, %v4999_v7 }
 0x5f3   : >> { %v5379_v53 = vrot.slane %v5347_v41, 2  ;;  %v10471_v41 = vld [vmem:[#allocation90_spill] sm:$0xff] }
 0x5f5   : >> { %v5421_v28 = vsel %vm5401_vm5, %v5378_v14, %v5379_v53  ;;  %v5000_v37 = vpop.f32.mrf.mxu2  ;;  %v4911_v60 = vpop.f32.mrf.mxu0 }
 0x5f6   : >> { %v5438_v59 = vadd.f32 %v5421_v28, %v10462_v58  ;;  %v5281_v51 = vpop.f32.mrf.mxu3  ;;  %v5001_v44 = vadd.f32 %v5000_v37, %v4909_v56  ;;  %v5192_v49 = vpop.f32.mrf.mxu1  ;;  %v4912_v57 = vadd.f32 %v4911_v60, %v10467_v30  ;;  %v10474_v56 = vld [vmem:[#allocation130_spill] sm:$0xff] }
 0x5f7   : >> { %v5282_v11 = vadd.f32 %v5281_v51, %v5189_v25  ;;  %v10476_v51 = vld [vmem:[#allocation76_spill] sm:$0xff] }
 0x5f8   : >> { %5469 = vst [vmem:[%s9694_s6 + $0x40] sm:$0xff] %v5438_v59  ;;  %4950 = vmatmul.bf16.gmra.mxu0 %v10463_v40  ;;  %v10475_v59 = vld [vmem:[#allocation77_spill] sm:$0xff] }
 0x5f9   : >> { %v5348_v46 = vadd.f32 %v5282_v11, %v5001_v44  ;;  %5231 = vmatmul.bf16.gmra.mxu1 %v10464_v12 }
 0x5fa   : >> { %6702 = vmatmul.msk.bf16.gmra.mxu2 %vm2275_vm3, %v10465_v34 }
 0x5fb   : >> { %v5380_v35 = vrot.slane %v5348_v46, 2  ;;  %6791 = vmatmul.msk.bf16.gmra.mxu3 %vm2275_vm3, %v10466_v0 }
 0x5fd   : >> { %v5420_v2 = vsel %vm5401_vm5, %v5379_v53, %v5380_v35  ;;  %v5003_v3 = vpop.f32.mrf.mxu2  ;;  %v4913_v32 = vpop.f32.mrf.mxu0  ;;  %v10472_v53 = vld [vmem:[#allocation128_spill] sm:$0xff] }
 0x5fe   : >> { %v5439_v45 = vadd.f32 %v5420_v2, %v10468_v4  ;;  %v5284_v47 = vpop.f32.mrf.mxu3  ;;  %v5004_v31 = vadd.f32 %v5003_v3, %v4912_v57  ;;  %v5194_v61 = vpop.f32.mrf.mxu1  ;;  %v4914_v23 = vadd.f32 %v4913_v32, %v10469_v27  ;;  %v10477_v2 = vld [vmem:[#allocation80_spill] sm:$0xff]  ;;  %v10478_v57 = vld [vmem:[#allocation123_spill] sm:$0xff]  ;;  %v10481_v27 = vld [vmem:[#allocation33_spill] sm:$0xff] }
 0x5ff   : >> { %v5285_v19 = vadd.f32 %v5284_v47, %v5192_v49 }
 0x600   : >> { %5470 = vst [vmem:[%s9694_s6 + $0x48] sm:$0xff] %v5439_v45 }
 0x601   : >> { %v5349_v6 = vadd.f32 %v5285_v19, %v5004_v31 }
 0x603   : >> { %v5381_v14 = vrot.slane %v5349_v6, 2  ;;  %v10479_v6 = vld [vmem:[#allocation95_spill] sm:$0xff] }
 0x605   : >> { %v5419_v15 = vsel %vm5401_vm5, %v5380_v35, %v5381_v14  ;;  %v5005_v33 = vpop.f32.mrf.mxu2  ;;  %v4916_v10 = vpop.f32.mrf.mxu0 }
 0x606   : >> { %v5440_v29 = vadd.f32 %v5419_v15, %v10470_v24  ;;  %v5286_v20 = vpop.f32.mrf.mxu3  ;;  %v5006_v8 = vadd.f32 %v5005_v33, %v4914_v23  ;;  %v5197_v9 = vpop.f32.mrf.mxu1  ;;  %v4917_v37 = vadd.f32 %v4916_v10, %v10475_v59  ;;  %v10482_v23 = vld [vmem:[#allocation134_spill] sm:$0xff] }
 0x607   : >> { %v5287_v7 = vadd.f32 %v5286_v20, %v5194_v61 }
 0x608   : >> { %5471 = vst [vmem:[%s9694_s6 + $0x50] sm:$0xff] %v5440_v29  ;;  %4955 = vmatmul.bf16.gmra.mxu0 %v10471_v41 }
 0x609   : >> { %v5350_v25 = vadd.f32 %v5287_v7, %v5006_v8  ;;  %5236 = vmatmul.bf16.gmra.mxu1 %v10472_v53 }
 0x60a   : >> { %6703 = vmatmul.msk.bf16.gmra.mxu2 %vm2275_vm3, %v10473_v21 }
 0x60b   : >> { %v5382_v28 = vrot.slane %v5350_v25, 2  ;;  %6792 = vmatmul.msk.bf16.gmra.mxu3 %vm2275_vm3, %v10474_v56 }
 0x60d   : >> { %v5418_v58 = vsel %vm5401_vm5, %v5381_v14, %v5382_v28  ;;  %v5008_v11 = vpop.f32.mrf.mxu2  ;;  %v4918_v40 = vpop.f32.mrf.mxu0  ;;  %v10480_v14 = vld [vmem:[#allocation132_spill] sm:$0xff] }
 0x60e   : >> { %v5441_v44 = vadd.f32 %v5418_v58, %v10476_v51  ;;  %v5289_v60 = vpop.f32.mrf.mxu3  ;;  %v5009_v49 = vadd.f32 %v5008_v11, %v4917_v37  ;;  %v5199_v12 = vpop.f32.mrf.mxu1  ;;  %v4919_v30 = vadd.f32 %v4918_v40, %v10477_v2 }
 0x60f   : >> { %v5290_v46 = vadd.f32 %v5289_v60, %v5197_v9  ;;  %v10483_v60 = vld [vmem:[#allocation26_spill] sm:$0xff] }
 0x610   : >> { %5472 = vst [vmem:[%s9694_s6 + $0x58] sm:$0xff] %v5441_v44 }
 0x611   : >> { %v5351_v35 = vadd.f32 %v5290_v46, %v5009_v49 }
 0x613   : >> { %v5383_v34 = vrot.slane %v5351_v35, 2 }
 0x615   : >> { %v5417_v0 = vsel %vm5401_vm5, %v5382_v28, %v5383_v34  ;;  %v5010_v45 = vpop.f32.mrf.mxu2  ;;  %v4921_v19 = vpop.f32.mrf.mxu0 }
 0x616   : >> { %v5442_v4 = vadd.f32 %v5417_v0, %v10478_v57  ;;  %v5291_v3 = vpop.f32.mrf.mxu3  ;;  %v5011_v47 = vadd.f32 %v5010_v45, %v4919_v30  ;;  %v5202_v32 = vpop.f32.mrf.mxu1  ;;  %v4922_v10 = vadd.f32 %v4921_v19, %v9509_v62 }
 0x617   : >> { %v5292_v31 = vadd.f32 %v5291_v3, %v5199_v12 }
 0x618   : >> { %5473 = vst [vmem:[%s9694_s6 + $0x60] sm:$0xff] %v5442_v4  ;;  %4960 = vmatmul.bf16.gmra.mxu0 %v10479_v6  ;;  %v10484_v4 = vld [vmem:[#allocation83_spill] sm:$0xff] }
 0x619   : >> { %v5352_v61 = vadd.f32 %v5292_v31, %v5011_v47  ;;  %5241 = vmatmul.bf16.gmra.mxu1 %v10480_v14 }
 0x61a   : >> { %6704 = vmatmul.msk.bf16.gmra.mxu2 %vm2275_vm3, %v10481_v27  ;;  %v10485_v27 = vld [vmem:[#allocation84_spill] sm:$0xff] }
 0x61b   : >> { %v5384_v15 = vrot.slane %v5352_v61, 2  ;;  %6793 = vmatmul.msk.bf16.gmra.mxu3 %vm2275_vm3, %v10482_v23 }
 0x61d   : >> { %v5416_v24 = vsel %vm5401_vm5, %v5383_v34, %v5384_v15  ;;  %v5013_v33 = vpop.f32.mrf.mxu2  ;;  %v4923_v8 = vpop.f32.mrf.mxu0 }
 0x61e   : >> { %v5443_v29 = vadd.f32 %v5416_v24, %v9507_v38  ;;  %v5294_v20 = vpop.f32.mrf.mxu3  ;;  %v5204_v7 = vpop.f32.mrf.mxu1  ;;  %v5014_v9 = vadd.f32 %v5013_v33, %v4922_v10  ;;  %v4924_v41 = vadd.f32 %v4923_v8, %v9512_v42 }
 0x61f   : >> { %v5295_v25 = vadd.f32 %v5294_v20, %v5202_v32 }
 0x620   : >> { %5474 = vst [vmem:[%s9694_s6 + $0x68] sm:$0xff] %v5443_v29 }
 0x621   : >> { %v5353_v21 = vadd.f32 %v5295_v25, %v5014_v9 }
 0x623   : >> { %v5385_v51 = vrot.slane %v5353_v21, 2 }
 0x625   : >> { %v5015_v53 = vpop.f32.mrf.mxu2  ;;  %v4926_v59 = vpop.f32.mrf.mxu0 }
 0x626   : >> { %v5296_v28 = vpop.f32.mrf.mxu3  ;;  %v5016_v56 = vadd.f32 %v5015_v53, %v4924_v41  ;;  %v5207_v37 = vpop.f32.mrf.mxu1  ;;  %v4927_v62 = vadd.f32 %v4926_v59, %v9526_v39 }
 0x627   : >> { %v5297_v58 = vadd.f32 %v5296_v28, %v5204_v7 }
 0x629   : >> { %v5354_v38 = vadd.f32 %v5297_v58, %v5016_v56 }
 0x62b   : >> { %v5386_v44 = vrot.slane %v5354_v38, 2 }
 0x62d   : >> { %v5415_v11 = vsel %vm5401_vm5, %v5385_v51, %v5386_v44  ;;  %v5018_v46 = vpop.f32.mrf.mxu2  ;;  %v4928_v35 = vpop.f32.mrf.mxu0  ;;  %v10486_v51 = vld [vmem:[#allocation85_spill] sm:$0xff] }
 0x62e   : >> { %v5444_v49 = vadd.f32 %v5415_v11, %v10483_v60  ;;  %v5299_v42 = vpop.f32.mrf.mxu3  ;;  %v5019_v40 = vadd.f32 %v5018_v46, %v4927_v62  ;;  %v5209_v34 = vpop.f32.mrf.mxu1  ;;  %v4929_v57 = vadd.f32 %v4928_v35, %v9534_v18  ;;  %v10487_v11 = vld [vmem:[#allocation127_spill] sm:$0xff] }
 0x62f   : >> { %v5300_v12 = vadd.f32 %v5299_v42, %v5207_v37 }
 0x630   : >> { %5475 = vst [vmem:[%s9694_s6 + $0x70] sm:$0xff] %v5444_v49 }
 0x631   : >> { %v5355_v0 = vadd.f32 %v5300_v12, %v5019_v40 }
 0x633   : >> { %v5387_v2 = vrot.slane %v5355_v0, 2 }
 0x635   : >> { %v5414_v30 = vsel %vm5401_vm5, %v5386_v44, %v5387_v2  ;;  %v5020_v39 = vpop.f32.mrf.mxu2  ;;  %v4931_v19 = vpop.f32.mrf.mxu0 }
 0x636   : >> { %v5445_v45 = vadd.f32 %v5414_v30, %v10484_v4  ;;  %v5301_v3 = vpop.f32.mrf.mxu3  ;;  %v5021_v47 = vadd.f32 %v5020_v39, %v4929_v57  ;;  %v5212_v32 = vpop.f32.mrf.mxu1  ;;  %v4932_v15 = vadd.f32 %v4931_v19, %v9548_v54 }
 0x637   : >> { %v5302_v31 = vadd.f32 %v5301_v3, %v5209_v34  ;;  %v10488_v34 = vld [vmem:[#allocation89_spill] sm:$0xff] }
 0x638   : >> { %5476 = vst [vmem:[%s9694_s6 + $0x78] sm:$0xff] %v5445_v45 }
 0x639   : >> { %v5356_v61 = vadd.f32 %v5302_v31, %v5021_v47 }
 0x63b   : >> { %v5388_v6 = vrot.slane %v5356_v61, 2 }
 0x63d   : >> { %v5413_v14 = vsel %vm5401_vm5, %v5387_v2, %v5388_v6  ;;  %v5023_v18 = vpop.f32.mrf.mxu2  ;;  %v4933_v20 = vpop.f32.mrf.mxu0  ;;  %v10489_v2 = vld [vmem:[#allocation86_spill] sm:$0xff] }
 0x63e   : >> { %v5446_v23 = vadd.f32 %v5413_v14, %v10485_v27  ;;  %v5304_v24 = vpop.f32.mrf.mxu3  ;;  %v5024_v29 = vadd.f32 %v5023_v18, %v4932_v15  ;;  %v5214_v8 = vpop.f32.mrf.mxu1  ;;  %v4934_v25 = vadd.f32 %v4933_v20, %v9556_v55 }
 0x63f   : >> { %v5305_v33 = vadd.f32 %v5304_v24, %v5212_v32 }
 0x640   : >> { %5477 = vst [vmem:[%s9694_s6 + $0x80] sm:$0xff] %v5446_v23 }
 0x641   : >> { %v5357_v7 = vadd.f32 %v5305_v33, %v5024_v29 }
 0x643   : >> { %v5389_v10 = vrot.slane %v5357_v7, 2 }
 0x645   : >> { %v5412_v9 = vsel %vm5401_vm5, %v5388_v6, %v5389_v10  ;;  %v5025_v54 = vpop.f32.mrf.mxu2  ;;  %v4936_v56 = vpop.f32.mrf.mxu0 }
 0x646   : >> { %v5447_v41 = vadd.f32 %v5412_v9, %v9554_v16  ;;  %v5306_v53 = vpop.f32.mrf.mxu3  ;;  %v5026_v28 = vadd.f32 %v5025_v54, %v4934_v25  ;;  %v5217_v58 = vpop.f32.mrf.mxu1  ;;  %v4937_v44 = vadd.f32 %v4936_v56, %v10486_v51 }
 0x647   : >> { %v5307_v21 = vadd.f32 %v5306_v53, %v5214_v8 }
 0x648   : >> { %5478 = vst [vmem:[%s9694_s6 + $0x88] sm:$0xff] %v5447_v41 }
 0x649   : >> { %v5358_v59 = vadd.f32 %v5307_v21, %v5026_v28  ;;  %v10490_v28 = vld [vmem:[#allocation30_spill] sm:$0xff] }
 0x64b   : >> { %v5390_v37 = vrot.slane %v5358_v59, 2 }
 0x64d   : >> { %v5411_v38 = vsel %vm5401_vm5, %v5389_v10, %v5390_v37  ;;  %v5028_v55 = vpop.f32.mrf.mxu2  ;;  %v4938_v46 = vpop.f32.mrf.mxu0 }
 0x64e   : >> { %v5448_v62 = vadd.f32 %v5411_v38, %v10487_v11  ;;  %v5309_v60 = vpop.f32.mrf.mxu3  ;;  %v5029_v16 = vadd.f32 %v5028_v55, %v4937_v44  ;;  %v5219_v42 = vpop.f32.mrf.mxu1  ;;  %v4939_v0 = vadd.f32 %v4938_v46, %v10488_v34  ;;  %v10491_v55 = vld [vmem:[#allocation92_spill] sm:$0xff] }
 0x64f   : >> { %v5310_v49 = vadd.f32 %v5309_v60, %v5217_v58 }
 0x650   : >> { %5479 = vst [vmem:[%s9694_s6 + $0x90] sm:$0xff] %v5448_v62 }
 0x651   : >> { %v5359_v40 = vadd.f32 %v5310_v49, %v5029_v16 }
 0x653   : >> { %v5391_v12 = vrot.slane %v5359_v40, 2 }
 0x655   : >> { %v5410_v35 = vsel %vm5401_vm5, %v5390_v37, %v5391_v12  ;;  %v5030_v57 = vpop.f32.mrf.mxu2  ;;  %v4941_v3 = vpop.f32.mrf.mxu0 }
 0x656   : >> { %v5449_v30 = vadd.f32 %v5410_v35, %v10489_v2  ;;  %v5311_v4 = vpop.f32.mrf.mxu3  ;;  %v5031_v45 = vadd.f32 %v5030_v57, %v4939_v0  ;;  %v5222_v47 = vpop.f32.mrf.mxu1  ;;  %v4942_v23 = vadd.f32 %v4941_v3, %v9592_v17  ;;  %v10492_v2 = vld [vmem:[#allocation131_spill] sm:$0xff] }
 0x657   : >> { %v5312_v39 = vadd.f32 %v5311_v4, %v5219_v42 }
 0x658   : >> { %5480 = vst [vmem:[%s9694_s6 + $0x98] sm:$0xff] %v5449_v30 }
 0x659   : >> { %v5360_v31 = vadd.f32 %v5312_v39, %v5031_v45 }
 0x65b   : >> { %v5392_v19 = vrot.slane %v5360_v31, 2 }
 0x65d   : >> { %v5409_v32 = vsel %vm5401_vm5, %v5391_v12, %v5392_v19  ;;  %v5033_v6 = vpop.f32.mrf.mxu2  ;;  %v4943_v15 = vpop.f32.mrf.mxu0 }
 0x65e   : >> { %v5450_v61 = vadd.f32 %v5409_v32, %v9590_v50  ;;  %v5314_v14 = vpop.f32.mrf.mxu3  ;;  %v5224_v27 = vpop.f32.mrf.mxu1  ;;  %v5034_v18 = vadd.f32 %v5033_v6, %v4942_v23  ;;  %v4944_v29 = vadd.f32 %v4943_v15, %v9595_v5 }
 0x65f   : >> { %v5315_v24 = vadd.f32 %v5314_v14, %v5222_v47 }
 0x660   : >> { %5481 = vst [vmem:[%s9694_s6 + $0xa0] sm:$0xff] %v5450_v61 }
 0x661   : >> { %v5361_v8 = vadd.f32 %v5315_v24, %v5034_v18 }
 0x663   : >> { %v5393_v41 = vrot.slane %v5361_v8, 2 }
 0x665   : >> { %v5035_v33 = vpop.f32.mrf.mxu2  ;;  %v4946_v9 = vpop.f32.mrf.mxu0 }
 0x666   : >> { %v5316_v20 = vpop.f32.mrf.mxu3  ;;  %v5036_v7 = vadd.f32 %v5035_v33, %v4944_v29  ;;  %v5227_v25 = vpop.f32.mrf.mxu1  ;;  %v4947_v17 = vadd.f32 %v4946_v9, %v9609_v63 }
 0x667   : >> { %v5317_v10 = vadd.f32 %v5316_v20, %v5224_v27 }
 0x669   : >> { %v5362_v50 = vadd.f32 %v5317_v10, %v5036_v7 }
 0x66b   : >> { %v5394_v54 = vrot.slane %v5362_v50, 2 }
 0x66d   : >> { %v5408_v53 = vsel %vm5401_vm5, %v5393_v41, %v5394_v54  ;;  %v5038_v56 = vpop.f32.mrf.mxu2  ;;  %v4948_v37 = vpop.f32.mrf.mxu0 }
 0x66e   : >> { %v5451_v21 = vadd.f32 %v5408_v53, %v10490_v28  ;;  %v5319_v5 = vpop.f32.mrf.mxu3  ;;  %v5039_v58 = vadd.f32 %v5038_v56, %v4947_v17  ;;  %v5229_v38 = vpop.f32.mrf.mxu1  ;;  %v4949_v62 = vadd.f32 %v4948_v37, %v9617_v26  ;;  %v10493_v53 = vld [vmem:[#allocation34_spill] sm:$0xff] }
 0x66f   : >> { %v5320_v59 = vadd.f32 %v5319_v5, %v5227_v25 }
 0x670   : >> { %5482 = vst [vmem:[%s9694_s6 + $0xa8] sm:$0xff] %v5451_v21 }
 0x671   : >> { %v5363_v51 = vadd.f32 %v5320_v59, %v5039_v58 }
 0x673   : >> { %v5395_v44 = vrot.slane %v5363_v51, 2 }
 0x675   : >> { %v5407_v11 = vsel %vm5401_vm5, %v5394_v54, %v5395_v44  ;;  %v5040_v63 = vpop.f32.mrf.mxu2  ;;  %v4951_v42 = vpop.f32.mrf.mxu0 }
 0x676   : >> { %v5452_v60 = vadd.f32 %v5407_v11, %v10491_v55  ;;  %v5321_v16 = vpop.f32.mrf.mxu3  ;;  %v5041_v49 = vadd.f32 %v5040_v63, %v4949_v62  ;;  %v5232_v40 = vpop.f32.mrf.mxu1  ;;  %v4952_v0 = vadd.f32 %v4951_v42, %v9631_v52 }
 0x677   : >> { %v5322_v46 = vadd.f32 %v5321_v16, %v5229_v38  ;;  %v10494_v38 = vld [vmem:[#allocation3_spill] sm:$0xff] }
 0x678   : >> { %5483 = vst [vmem:[%s9694_s6 + $0xb0] sm:$0xff] %v5452_v60 }
 0x679   : >> { %v5364_v12 = vadd.f32 %v5322_v46, %v5041_v49 }
 0x67b   : >> { %v5396_v35 = vrot.slane %v5364_v12, 2 }
 0x67d   : >> { %v5406_v34 = vsel %vm5401_vm5, %v5395_v44, %v5396_v35  ;;  %v5043_v26 = vpop.f32.mrf.mxu2  ;;  %v4953_v39 = vpop.f32.mrf.mxu0 }
 0x67e   : >> { %v5453_v30 = vadd.f32 %v5406_v34, %v10492_v2  ;;  %v5324_v57 = vpop.f32.mrf.mxu3  ;;  %v5044_v4 = vadd.f32 %v5043_v26, %v4952_v0  ;;  %v5234_v3 = vpop.f32.mrf.mxu1  ;;  %v4954_v32 = vadd.f32 %v4953_v39, %v9639_v43 }
 0x67f   : >> { %v5325_v45 = vadd.f32 %v5324_v57, %v5232_v40 }
 0x680   : >> { %5484 = vst [vmem:[%s9694_s6 + $0xb8] sm:$0xff] %v5453_v30 }
 0x681   : >> { %v5365_v47 = vadd.f32 %v5325_v45, %v5044_v4 }
 0x683   : >> { %v5397_v31 = vrot.slane %v5365_v47, 2 }
 0x685   : >> { %v5405_v19 = vsel %vm5401_vm5, %v5396_v35, %v5397_v31  ;;  %v5045_v52 = vpop.f32.mrf.mxu2  ;;  %v4956_v27 = vpop.f32.mrf.mxu0 }
 0x686   : >> { %v5454_v61 = vadd.f32 %v5405_v19, %v9637_v36  ;;  %v5326_v6 = vpop.f32.mrf.mxu3  ;;  %v5046_v14 = vadd.f32 %v5045_v52, %v4954_v32  ;;  %v5237_v23 = vpop.f32.mrf.mxu1  ;;  %v4957_v33 = vadd.f32 %v4956_v27, %v9653_v13 }
 0x687   : >> { %v5327_v15 = vadd.f32 %v5326_v6, %v5234_v3 }
 0x688   : >> { %5485 = vst [vmem:[%s9694_s6 + $0xc0] sm:$0xff] %v5454_v61 }
 0x689   : >> { %v5366_v18 = vadd.f32 %v5327_v15, %v5046_v14 }
 0x68b   : >> { %v5398_v24 = vrot.slane %v5366_v18, 2 }
 0x68d   : >> { %v5404_v29 = vsel %vm5401_vm5, %v5397_v31, %v5398_v24  ;;  %v5048_v43 = vpop.f32.mrf.mxu2  ;;  %v4958_v10 = vpop.f32.mrf.mxu0 }
 0x68e   : >> { %v5455_v20 = vadd.f32 %v5404_v29, %v9651_v48  ;;  %v5329_v8 = vpop.f32.mrf.mxu3  ;;  %v5049_v36 = vadd.f32 %v5048_v43, %v4957_v33  ;;  %v5239_v9 = vpop.f32.mrf.mxu1  ;;  %v4959_v54 = vadd.f32 %v4958_v10, %v9661_v22 }
 0x68f   : >> { %v5330_v7 = vadd.f32 %v5329_v8, %v5237_v23 }
 0x690   : >> { %5486 = vst [vmem:[%s9694_s6 + $0xc8] sm:$0xff] %v5455_v20 }
 0x691   : >> { %v5367_v25 = vadd.f32 %v5330_v7, %v5049_v36 }
 0x693   : >> { %v5399_v50 = vrot.slane %v5367_v25, 2 }
 0x695   : >> { %v5403_v41 = vsel %vm5401_vm5, %v5398_v24, %v5399_v50  ;;  %v5050_v13 = vpop.f32.mrf.mxu2  ;;  %v4961_v56 = vpop.f32.mrf.mxu0 }
 0x696   : >> { %v5456_v17 = vadd.f32 %v5403_v41, %v10493_v53  ;;  %v5331_v48 = vpop.f32.mrf.mxu3  ;;  %v5051_v28 = vadd.f32 %v5050_v13, %v4959_v54  ;;  %v5242_v5 = vpop.f32.mrf.mxu1 }
 0x697   : >> { %v5332_v21 = vadd.f32 %v5331_v48, %v5239_v9 }
 0x698   : >> { %5487 = vst [vmem:[%s9694_s6 + $0xd0] sm:$0xff] %v5456_v17 }
 0x699   : >> { %v5368_v58 = vadd.f32 %v5332_v21, %v5051_v28 }
 0x69b   : >> { %v5400_v59 = vrot.slane %v5368_v58, 2 }
 0x69d   : >> { %v5402_v37 = vsel %vm5401_vm5, %v5399_v50, %v5400_v59  ;;  %v5053_v44 = vpop.f32.mrf.mxu2  ;;  %v4962_v22 = vpop.f32.mrf.mxu0 }
 0x69e   : >> { %v5457_v51 = vadd.f32 %v5402_v37, %v10494_v38  ;;  %v5334_v11 = vpop.f32.mrf.mxu3  ;;  %v5243_v62 = vpop.f32.mrf.mxu1 }
 0x6a0   : >> { %5488 = vst [vmem:[%s9694_s6 + $0xd8] sm:$0xff] %v5457_v51 }
 0x6a2   : > { %1919 = sbr.rel (!%p1917_p5) target bundleno = 328 (0x148), region = 78 }
 0x6a5   : >> { %v5054_v55 = vpop.f32.mrf.mxu2 }
 0x6a6   : >> { %v5335_v60 = vpop.f32.mrf.mxu3 }
 0x6a7 PF: > { %s12_s11 = sadd.s32 1, %s7079_s11   ;;  %s10495_s9 = smov %s7075_s10 }
 0x6a8   : > { %p9_p6 = scmp.ge.s32.totalorder %s12_s11, 4   ;;  %s10496_s10 = smov %s10498_s12 }
 0x6aa   :  { %11 = sbr.rel (!%p9_p6) target bundleno = 2 (0x2), region = 89 }

</bundles_post_ra>
